<compile_context>
chip_gen: v7x
topology: tpu7x:2x2x1
jax: 0.10.0
libtpu: 0.0.40
codegen_flags: <defaults>
</compile_context>

<pallas_src>
import functools

import jax
import jax.numpy as jnp
from jax.experimental import pallas as pl
from jax.experimental.pallas import tpu as pltpu


# ----------------------------- in-kernel helpers -----------------------------

def _vmem_specs(n):
    return [pl.BlockSpec(memory_space=pltpu.MemorySpace.VMEM) for _ in range(n)]


def _lrn(x, *, size, alpha, beta, k, boundary_mask):
    """PyTorch LocalResponseNorm over the channel (lane) dim of a (rows, C) f32 array.

    boundary_mask=False is valid when the channels that would wrap around the lane
    roll are exactly zero (true for the 96->128 zero-padded conv1 output).
    """
    rows, c = x.shape
    sq = x * x
    s = sq
    lane = (jax.lax.broadcasted_iota(jnp.int32, (rows, c), 1)
            if boundary_mask else None)
    for sh in range(1, size // 2 + 1):
        up = pltpu.roll(sq, sh, axis=1)        # lane c receives channel c - sh
        dn = pltpu.roll(sq, c - sh, axis=1)    # lane c receives channel c + sh
        if boundary_mask:
            up = jnp.where(lane >= sh, up, 0.0)
            dn = jnp.where(lane < c - sh, dn, 0.0)
        s = s + up + dn
    base = k + (alpha / size) * s
    if beta == 0.75:
        # base**-0.75 = rsqrt(base) * rsqrt(sqrt(base)): EUP only, no exp/log chain
        inv = jax.lax.rsqrt(base) * jax.lax.rsqrt(jax.lax.sqrt(base))
    else:
        inv = jnp.exp(-beta * jnp.log(base))
    return x * inv


# ----------------------------- Pallas kernels -----------------------------

def _conv1_pool_lrn_kernel(a_ref, w_ref, b_ref, o_ref, h_sc, wrow_sc, pool_sc,
                           *, n_batch, oh, ow, ph, pw, size, alpha, beta, k):
    # conv1 as an MXU matmul, computed in M-chunks so the f32 result never occupies
    # ~49 live vregs at once (avoids spills).
    m = a_ref.shape[0]
    cm = 56 if m % 56 == 0 else m
    for i in range(m // cm):
        acc = jnp.dot(a_ref[pl.ds(i * cm, cm), :], w_ref[...],
                      preferred_element_type=jnp.float32)
        h_sc[pl.ds(i * cm, cm), :] = jnp.maximum(acc + b_ref[...], 0.0)

    # MaxPool2d(3, stride=2): h_sc rows are ordered (n, y, x); pooled rows (n, py, px).
    # Only contiguous ref slices + elementwise maxima (no strided/exotic ops).
    for ni in range(n_batch):
        for py in range(ph):
            base = ni * oh * ow + (2 * py) * ow
            wrow_sc[...] = jnp.maximum(
                jnp.maximum(h_sc[pl.ds(base, ow), :],
                            h_sc[pl.ds(base + ow, ow), :]),
                h_sc[pl.ds(base + 2 * ow, ow), :])
            for px in range(pw):
                out_row = ni * ph * pw + py * pw + px
                pool_sc[pl.ds(out_row, 1), :] = jnp.maximum(
                    jnp.maximum(wrow_sc[pl.ds(2 * px, 1), :],
                                wrow_sc[pl.ds(2 * px + 1, 1), :]),
                    wrow_sc[pl.ds(2 * px + 2, 1), :])

    # LocalResponseNorm: channels 96..127 are exactly zero (zero-padded weights+bias,
    # ReLU(0)=0), so boundary clipping needs no lane masks here.
    o_ref[...] = _lrn(pool_sc[...], size=size, alpha=alpha, beta=beta, k=k,
                      boundary_mask=False).astype(o_ref.dtype)


def _conv2_pool_conv34_kernel(a2_ref, w2_ref, b2_ref, w3_ref, b3_ref, w4_ref, b4_ref,
                              o_ref, h2_sc, wrow_sc, p2_sc, a3_sc,
                              *, n_batch, s2, size, alpha, beta, k):
    c2 = h2_sc.shape[1]                       # 256
    p2 = (s2 - 3) // 2 + 1                    # pooled spatial (2)

    # conv2: (M2, K2) @ (K2, 256) + bias + ReLU, kept in a VMEM scratch.
    h2 = jnp.dot(a2_ref[...], w2_ref[...], preferred_element_type=jnp.float32)
    h2_sc[...] = jnp.maximum(h2 + b2_ref[...], 0.0)

    # MaxPool2d(3, stride=2) over the s2 x s2 map -> p2 x p2, rows ordered (n, py, px).
    for ni in range(n_batch):
        for py in range(p2):
            base = ni * s2 * s2 + (2 * py) * s2
            wrow_sc[...] = jnp.maximum(
                jnp.maximum(h2_sc[pl.ds(base, s2), :],
                            h2_sc[pl.ds(base + s2, s2), :]),
                h2_sc[pl.ds(base + 2 * s2, s2), :])
            for px in range(p2):
                p2_sc[pl.ds(ni * p2 * p2 + py * p2 + px, 1), :] = jnp.maximum(
                    jnp.maximum(wrow_sc[pl.ds(2 * px, 1), :],
                                wrow_sc[pl.ds(2 * px + 1, 1), :]),
                    wrow_sc[pl.ds(2 * px + 2, 1), :])

    # LRN over all 256 real channels -> boundary masks required.
    p2_sc[...] = _lrn(p2_sc[...], size=size, alpha=alpha, beta=beta, k=k,
                      boundary_mask=True)

    # conv3's 3x3/pad-1 im2col, assembled directly in VMEM (tap-major, channel-minor).
    a3_sc[...] = jnp.zeros(a3_sc.shape, a3_sc.dtype)
    for ni in range(n_batch):
        for py in range(p2):
            for px in range(p2):
                dst = ni * p2 * p2 + py * p2 + px
                for ky in range(3):
                    for kx in range(3):
                        sy, sx = py - 1 + ky, px - 1 + kx
                        if 0 <= sy < p2 and 0 <= sx < p2:
                            src = ni * p2 * p2 + sy * p2 + sx
                            a3_sc[pl.ds(dst, 1), pl.ds((ky * 3 + kx) * c2, c2)] = (
                                p2_sc[pl.ds(src, 1), :])

    # conv3 matmul + ReLU chained with conv4 (1x1) matmul + ReLU; the (M,384)
    # intermediate never leaves VMEM/vregs.
    a3 = a3_sc[...].astype(jnp.bfloat16)
    h3 = jnp.dot(a3, w3_ref[...], preferred_element_type=jnp.float32)
    h3 = jnp.maximum(h3 + b3_ref[...], 0.0).astype(jnp.bfloat16)
    h4 = jnp.dot(h3, w4_ref[...], preferred_element_type=jnp.float32)
    o_ref[...] = jnp.maximum(h4 + b4_ref[...], 0.0).astype(o_ref.dtype)


# ----------------------------- plain-JAX glue -----------------------------

def _round_up(v, mult):
    return (v + mult - 1) // mult * mult


def _im2col(x, kh, kw, stride, pad):
    # x: NHWC -> (N*OH*OW, KH*KW*C); column index = (ki*KW + kj)*C + c
    if pad:
        x = jnp.pad(x, ((0, 0), (pad, pad), (pad, pad), (0, 0)))
    n, h, w, c = x.shape
    oh = (h - kh) // stride + 1
    ow = (w - kw) // stride + 1
    cols = []
    for ki in range(kh):
        for kj in range(kw):
            cols.append(x[:, ki:ki + stride * (oh - 1) + 1:stride,
                             kj:kj + stride * (ow - 1) + 1:stride, :])
    patches = jnp.stack(cols, axis=3)                       # (N, OH, OW, KH*KW, C)
    return patches.reshape(n * oh * ow, kh * kw * c), oh, ow


def _pack_conv_weights(w, b, *, pad_oc_to=None, pad_k_to=None):
    # w: (OC, IC, KH, KW) PyTorch layout -> (K, N) bf16 matrix matching im2col order,
    # with optional zero padding of the K rows and OC columns.
    oc, ic, kh, kw = w.shape
    wm = jnp.transpose(w, (2, 3, 1, 0)).reshape(kh * kw * ic, oc)
    if pad_k_to is not None and pad_k_to > wm.shape[0]:
        wm = jnp.pad(wm, ((0, pad_k_to - wm.shape[0]), (0, 0)))
    if pad_oc_to is not None and pad_oc_to > oc:
        wm = jnp.pad(wm, ((0, 0), (0, pad_oc_to - oc)))
        b = jnp.pad(b, (0, pad_oc_to - oc))
    return wm.astype(jnp.bfloat16), b.astype(jnp.float32)


def eyenet_forward(x_nchw, params):
    (w1, b1), (w2, b2), (w3, b3), (w4, b4) = params
    n = x_nchw.shape[0]
    x = jnp.transpose(x_nchw, (0, 2, 3, 1)).astype(jnp.bfloat16)     # NCHW -> NHWC bf16

    # --- stage 1: Conv2d(3,96,11,s4)+ReLU -> MaxPool(3,s2) -> LRN(5), ONE kernel ---
    a1, oh1, ow1 = _im2col(x, 11, 11, 4, 0)                          # (392, 363) bf16
    k1 = _round_up(a1.shape[1], 128)                                 # 384
    a1 = jnp.pad(a1, ((0, 0), (0, k1 - a1.shape[1])))
    w1m, b1v = _pack_conv_weights(w1, b1, pad_oc_to=128, pad_k_to=k1)
    m1 = a1.shape[0]
    ph1, pw1 = (oh1 - 3) // 2 + 1, (ow1 - 3) // 2 + 1                # 6, 6
    mp1 = n * ph1 * pw1                                              # 72
    kern1 = functools.partial(_conv1_pool_lrn_kernel, n_batch=n, oh=oh1, ow=ow1,
                              ph=ph1, pw=pw1, size=5, alpha=1e-4, beta=0.75, k=1.0)
    y1 = pl.pallas_call(
        kern1,
        out_shape=jax.ShapeDtypeStruct((mp1, 128), jnp.bfloat16),
        in_specs=_vmem_specs(3),
        out_specs=pl.BlockSpec(memory_space=pltpu.MemorySpace.VMEM),
        scratch_shapes=[pltpu.VMEM((m1, 128), jnp.float32),
                        pltpu.VMEM((ow1, 128), jnp.float32),
                        pltpu.VMEM((mp1, 128), jnp.float32)],
        cost_estimate=pl.CostEstimate(
            flops=2 * m1 * k1 * 128,
            transcendentals=3 * mp1 * 128,
            bytes_accessed=a1.size * 2 + w1m.size * 2 + 128 * 4 + mp1 * 128 * 2),
    )(a1, w1m, b1v.reshape(1, -1))

    # --- stage 2: Conv2d(96,256,5,p2)+ReLU -> MaxPool(3,s2) -> LRN(5)
    #              -> Conv2d(256,384,3,p1)+ReLU -> Conv2d(384,64,1)+ReLU, ONE kernel ---
    y1 = y1.reshape(n, ph1, pw1, 128)[..., :96]      # drop the 32 zero channels (K 3200->2432)
    a2, oh2, ow2 = _im2col(y1, 5, 5, 1, 2)                           # (72, 2400) bf16
    k2 = _round_up(a2.shape[1], 128)                                 # 2432
    a2 = jnp.pad(a2, ((0, 0), (0, k2 - a2.shape[1])))
    w2m, b2v = _pack_conv_weights(w2, b2, pad_k_to=k2)               # (2432, 256)
    w3m, b3v = _pack_conv_weights(w3, b3)                            # (2304, 384)
    w4m, b4v = _pack_conv_weights(w4, b4, pad_oc_to=128)             # (384, 128)
    p2h, p2w = (oh2 - 3) // 2 + 1, (ow2 - 3) // 2 + 1                # 2, 2
    m3 = n * p2h * p2w                                               # 8
    kern2 = functools.partial(_conv2_pool_conv34_kernel, n_batch=n, s2=oh2,
                              size=5, alpha=1e-4, beta=0.75, k=1.0)
    y = pl.pallas_call(
        kern2,
        out_shape=jax.ShapeDtypeStruct((m3, 128), jnp.float32),
        in_specs=_vmem_specs(7),
        out_specs=pl.BlockSpec(memory_space=pltpu.MemorySpace.VMEM),
        scratch_shapes=[pltpu.VMEM((a2.shape[0], 256), jnp.float32),
                        pltpu.VMEM((ow2, 256), jnp.float32),
                        pltpu.VMEM((m3, 256), jnp.float32),
                        pltpu.VMEM((m3, 9 * 256), jnp.float32)],
        cost_estimate=pl.CostEstimate(
            flops=2 * (a2.shape[0] * k2 * 256 + m3 * 9 * 256 * 384 + m3 * 384 * 128),
            transcendentals=3 * m3 * 256,
            bytes_accessed=a2.size * 2 + w2m.size * 2 + w3m.size * 2 + w4m.size * 2
                           + (256 + 384 + 128) * 4 + m3 * 128 * 4),
    )(a2, w2m, b2v.reshape(1, -1), w3m, b3v.reshape(1, -1), w4m, b4v.reshape(1, -1))

    # match PyTorch .flatten(start_dim=1) applied to the NCHW output
    y = y[:, :64].reshape(n, p2h, p2w, 64)                           # (n, h, w, c)
    y = jnp.transpose(y, (0, 3, 1, 2))                               # NHWC -> NCHW
    return y.reshape(n, -1)


# ----------------------------- parameters -----------------------------

def _conv_params(key, oc, ic, k):
    kw_, kb_ = jax.random.split(key)
    w = jax.random.normal(kw_, (oc, ic, k, k), jnp.float32) * 0.05
    b = jax.random.normal(kb_, (oc,), jnp.float32) * 0.05
    return w, b


def init_eyenet_params(key):
    k1, k2, k3, k4 = jax.random.split(key, 4)
    return (
        _conv_params(k1, 96, 3, 11),
        _conv_params(k2, 256, 96, 5),
        _conv_params(k3, 384, 256, 3),
        _conv_params(k4, 64, 384, 1),
    )


# ----------------------------- main -----------------------------

if __name__ == "__main__":
    key = jax.random.PRNGKey(0)
    k_params, k_x = jax.random.split(key)
    params = init_eyenet_params(k_params)

    # small eye-crop-like input: NCHW (batch=2, 3 channels, 63x63 spatial)
    # 63 -> conv11/s4 -> 14 -> pool -> 6 -> conv5/p2 -> 6 -> pool -> 2 -> conv3/p1 -> 2 -> conv1x1 -> 2
    x = jax.random.normal(k_x, (2, 3, 63, 63), jnp.float32)

    out = jax.jit(eyenet_forward)(x, params)
    out = jax.block_until_ready(out)

    assert out.shape == (2, 64 * 2 * 2), out.shape
    assert bool(jnp.all(jnp.isfinite(out)))
    print("KERNEL_OK")
</pallas_src>

<mosaic_0001>
module attributes {stable_mosaic.version = 11 : i64} {
  func.func @_conv1_pool_lrn_kernel(%arg0: memref<392x384xbf16, #tpu.memory_space<vmem>>, %arg1: memref<384x128xbf16, #tpu.memory_space<vmem>>, %arg2: memref<1x128xf32, #tpu.memory_space<vmem>>, %arg3: memref<72x128xbf16, #tpu.memory_space<vmem>>, %arg4: memref<392x128xf32, #tpu.memory_space<vmem>>, %arg5: memref<14x128xf32, #tpu.memory_space<vmem>>, %arg6: memref<72x128xf32, #tpu.memory_space<vmem>>) attributes {dimension_semantics = [], scalar_prefetch = 0 : i64, scratch_operands = 3 : i64, tpu.core_type = #tpu.core_type<tc>} {
    %c0 = arith.constant 0 : index
    %c0_0 = arith.constant 0 : index
    %0 = vector.load %arg0[%c0, %c0_0] : memref<392x384xbf16, #tpu.memory_space<vmem>>, vector<56x384xbf16>
    %c0_1 = arith.constant 0 : index
    %c0_2 = arith.constant 0 : index
    %1 = vector.load %arg1[%c0_1, %c0_2] : memref<384x128xbf16, #tpu.memory_space<vmem>>, vector<384x128xbf16>
    %cst = arith.constant dense<0.000000e+00> : vector<56x128xf32>
    %2 = tpu.matmul %0, %1, %cst {dimension_numbers = #tpu.dot_dimension_numbers<[1], [0], [0], [1], [0, 0, 1, 1], [], []>} : vector<56x384xbf16>, vector<384x128xbf16>, vector<56x128xf32> -> vector<56x128xf32>
    %c0_3 = arith.constant 0 : index
    %c0_4 = arith.constant 0 : index
    %3 = vector.load %arg2[%c0_3, %c0_4] : memref<1x128xf32, #tpu.memory_space<vmem>>, vector<1x128xf32>
    %4 = vector.broadcast %3 : vector<1x128xf32> to vector<56x128xf32>
    %5 = arith.addf %2, %4 : vector<56x128xf32>
    %cst_5 = arith.constant 0.000000e+00 : f32
    %6 = vector.broadcast %cst_5 : f32 to vector<56x128xf32>
    %7 = arith.maximumf %5, %6 : vector<56x128xf32>
    %c0_6 = arith.constant 0 : index
    %c0_7 = arith.constant 0 : index
    %8 = vector.load %arg4[%c0_6, %c0_7] : memref<392x128xf32, #tpu.memory_space<vmem>>, vector<56x128xf32>
    tpu.vector_store %arg4[%c0_6, %c0_7], %7 {strides = array<i32>} : memref<392x128xf32, #tpu.memory_space<vmem>>, vector<56x128xf32>,
    %c56 = arith.constant 56 : index
    %c0_8 = arith.constant 0 : index
    %9 = vector.load %arg0[%c56, %c0_8] : memref<392x384xbf16, #tpu.memory_space<vmem>>, vector<56x384xbf16>
    %c0_9 = arith.constant 0 : index
    %c0_10 = arith.constant 0 : index
    %10 = vector.load %arg1[%c0_9, %c0_10] : memref<384x128xbf16, #tpu.memory_space<vmem>>, vector<384x128xbf16>
    %cst_11 = arith.constant dense<0.000000e+00> : vector<56x128xf32>
    %11 = tpu.matmul %9, %10, %cst_11 {dimension_numbers = #tpu.dot_dimension_numbers<[1], [0], [0], [1], [0, 0, 1, 1], [], []>} : vector<56x384xbf16>, vector<384x128xbf16>, vector<56x128xf32> -> vector<56x128xf32>
    %c0_12 = arith.constant 0 : index
    %c0_13 = arith.constant 0 : index
    %12 = vector.load %arg2[%c0_12, %c0_13] : memref<1x128xf32, #tpu.memory_space<vmem>>, vector<1x128xf32>
    %13 = vector.broadcast %12 : vector<1x128xf32> to vector<56x128xf32>
    %14 = arith.addf %11, %13 : vector<56x128xf32>
    %cst_14 = arith.constant 0.000000e+00 : f32
    %15 = vector.broadcast %cst_14 : f32 to vector<56x128xf32>
    %16 = arith.maximumf %14, %15 : vector<56x128xf32>
    %c56_15 = arith.constant 56 : index
    %c0_16 = arith.constant 0 : index
    %17 = vector.load %arg4[%c56_15, %c0_16] : memref<392x128xf32, #tpu.memory_space<vmem>>, vector<56x128xf32>
    tpu.vector_store %arg4[%c56_15, %c0_16], %16 {strides = array<i32>} : memref<392x128xf32, #tpu.memory_space<vmem>>, vector<56x128xf32>,
    %c112 = arith.constant 112 : index
    %c0_17 = arith.constant 0 : index
    %18 = vector.load %arg0[%c112, %c0_17] : memref<392x384xbf16, #tpu.memory_space<vmem>>, vector<56x384xbf16>
    %c0_18 = arith.constant 0 : index
    %c0_19 = arith.constant 0 : index
    %19 = vector.load %arg1[%c0_18, %c0_19] : memref<384x128xbf16, #tpu.memory_space<vmem>>, vector<384x128xbf16>
    %cst_20 = arith.constant dense<0.000000e+00> : vector<56x128xf32>
    %20 = tpu.matmul %18, %19, %cst_20 {dimension_numbers = #tpu.dot_dimension_numbers<[1], [0], [0], [1], [0, 0, 1, 1], [], []>} : vector<56x384xbf16>, vector<384x128xbf16>, vector<56x128xf32> -> vector<56x128xf32>
    %c0_21 = arith.constant 0 : index
    %c0_22 = arith.constant 0 : index
    %21 = vector.load %arg2[%c0_21, %c0_22] : memref<1x128xf32, #tpu.memory_space<vmem>>, vector<1x128xf32>
    %22 = vector.broadcast %21 : vector<1x128xf32> to vector<56x128xf32>
    %23 = arith.addf %20, %22 : vector<56x128xf32>
    %cst_23 = arith.constant 0.000000e+00 : f32
    %24 = vector.broadcast %cst_23 : f32 to vector<56x128xf32>
    %25 = arith.maximumf %23, %24 : vector<56x128xf32>
    %c112_24 = arith.constant 112 : index
    %c0_25 = arith.constant 0 : index
    %26 = vector.load %arg4[%c112_24, %c0_25] : memref<392x128xf32, #tpu.memory_space<vmem>>, vector<56x128xf32>
    tpu.vector_store %arg4[%c112_24, %c0_25], %25 {strides = array<i32>} : memref<392x128xf32, #tpu.memory_space<vmem>>, vector<56x128xf32>,
    %c168 = arith.constant 168 : index
    %c0_26 = arith.constant 0 : index
    %27 = vector.load %arg0[%c168, %c0_26] : memref<392x384xbf16, #tpu.memory_space<vmem>>, vector<56x384xbf16>
    %c0_27 = arith.constant 0 : index
    %c0_28 = arith.constant 0 : index
    %28 = vector.load %arg1[%c0_27, %c0_28] : memref<384x128xbf16, #tpu.memory_space<vmem>>, vector<384x128xbf16>
    %cst_29 = arith.constant dense<0.000000e+00> : vector<56x128xf32>
    %29 = tpu.matmul %27, %28, %cst_29 {dimension_numbers = #tpu.dot_dimension_numbers<[1], [0], [0], [1], [0, 0, 1, 1], [], []>} : vector<56x384xbf16>, vector<384x128xbf16>, vector<56x128xf32> -> vector<56x128xf32>
    %c0_30 = arith.constant 0 : index
    %c0_31 = arith.constant 0 : index
    %30 = vector.load %arg2[%c0_30, %c0_31] : memref<1x128xf32, #tpu.memory_space<vmem>>, vector<1x128xf32>
    %31 = vector.broadcast %30 : vector<1x128xf32> to vector<56x128xf32>
    %32 = arith.addf %29, %31 : vector<56x128xf32>
    %cst_32 = arith.constant 0.000000e+00 : f32
    %33 = vector.broadcast %cst_32 : f32 to vector<56x128xf32>
    %34 = arith.maximumf %32, %33 : vector<56x128xf32>
    %c168_33 = arith.constant 168 : index
    %c0_34 = arith.constant 0 : index
    %35 = vector.load %arg4[%c168_33, %c0_34] : memref<392x128xf32, #tpu.memory_space<vmem>>, vector<56x128xf32>
    tpu.vector_store %arg4[%c168_33, %c0_34], %34 {strides = array<i32>} : memref<392x128xf32, #tpu.memory_space<vmem>>, vector<56x128xf32>,
    %c224 = arith.constant 224 : index
    %c0_35 = arith.constant 0 : index
    %36 = vector.load %arg0[%c224, %c0_35] : memref<392x384xbf16, #tpu.memory_space<vmem>>, vector<56x384xbf16>
    %c0_36 = arith.constant 0 : index
    %c0_37 = arith.constant 0 : index
    %37 = vector.load %arg1[%c0_36, %c0_37] : memref<384x128xbf16, #tpu.memory_space<vmem>>, vector<384x128xbf16>
    %cst_38 = arith.constant dense<0.000000e+00> : vector<56x128xf32>
    %38 = tpu.matmul %36, %37, %cst_38 {dimension_numbers = #tpu.dot_dimension_numbers<[1], [0], [0], [1], [0, 0, 1, 1], [], []>} : vector<56x384xbf16>, vector<384x128xbf16>, vector<56x128xf32> -> vector<56x128xf32>
    %c0_39 = arith.constant 0 : index
    %c0_40 = arith.constant 0 : index
    %39 = vector.load %arg2[%c0_39, %c0_40] : memref<1x128xf32, #tpu.memory_space<vmem>>, vector<1x128xf32>
    %40 = vector.broadcast %39 : vector<1x128xf32> to vector<56x128xf32>
    %41 = arith.addf %38, %40 : vector<56x128xf32>
    %cst_41 = arith.constant 0.000000e+00 : f32
    %42 = vector.broadcast %cst_41 : f32 to vector<56x128xf32>
    %43 = arith.maximumf %41, %42 : vector<56x128xf32>
    %c224_42 = arith.constant 224 : index
    %c0_43 = arith.constant 0 : index
    %44 = vector.load %arg4[%c224_42, %c0_43] : memref<392x128xf32, #tpu.memory_space<vmem>>, vector<56x128xf32>
    tpu.vector_store %arg4[%c224_42, %c0_43], %43 {strides = array<i32>} : memref<392x128xf32, #tpu.memory_space<vmem>>, vector<56x128xf32>,
    %c280 = arith.constant 280 : index
    %c0_44 = arith.constant 0 : index
    %45 = vector.load %arg0[%c280, %c0_44] : memref<392x384xbf16, #tpu.memory_space<vmem>>, vector<56x384xbf16>
    %c0_45 = arith.constant 0 : index
    %c0_46 = arith.constant 0 : index
    %46 = vector.load %arg1[%c0_45, %c0_46] : memref<384x128xbf16, #tpu.memory_space<vmem>>, vector<384x128xbf16>
    %cst_47 = arith.constant dense<0.000000e+00> : vector<56x128xf32>
    %47 = tpu.matmul %45, %46, %cst_47 {dimension_numbers = #tpu.dot_dimension_numbers<[1], [0], [0], [1], [0, 0, 1, 1], [], []>} : vector<56x384xbf16>, vector<384x128xbf16>, vector<56x128xf32> -> vector<56x128xf32>
    %c0_48 = arith.constant 0 : index
    %c0_49 = arith.constant 0 : index
    %48 = vector.load %arg2[%c0_48, %c0_49] : memref<1x128xf32, #tpu.memory_space<vmem>>, vector<1x128xf32>
    %49 = vector.broadcast %48 : vector<1x128xf32> to vector<56x128xf32>
    %50 = arith.addf %47, %49 : vector<56x128xf32>
    %cst_50 = arith.constant 0.000000e+00 : f32
    %51 = vector.broadcast %cst_50 : f32 to vector<56x128xf32>
    %52 = arith.maximumf %50, %51 : vector<56x128xf32>
    %c280_51 = arith.constant 280 : index
    %c0_52 = arith.constant 0 : index
    %53 = vector.load %arg4[%c280_51, %c0_52] : memref<392x128xf32, #tpu.memory_space<vmem>>, vector<56x128xf32>
    tpu.vector_store %arg4[%c280_51, %c0_52], %52 {strides = array<i32>} : memref<392x128xf32, #tpu.memory_space<vmem>>, vector<56x128xf32>,
    %c336 = arith.constant 336 : index
    %c0_53 = arith.constant 0 : index
    %54 = vector.load %arg0[%c336, %c0_53] : memref<392x384xbf16, #tpu.memory_space<vmem>>, vector<56x384xbf16>
    %c0_54 = arith.constant 0 : index
    %c0_55 = arith.constant 0 : index
    %55 = vector.load %arg1[%c0_54, %c0_55] : memref<384x128xbf16, #tpu.memory_space<vmem>>, vector<384x128xbf16>
    %cst_56 = arith.constant dense<0.000000e+00> : vector<56x128xf32>
    %56 = tpu.matmul %54, %55, %cst_56 {dimension_numbers = #tpu.dot_dimension_numbers<[1], [0], [0], [1], [0, 0, 1, 1], [], []>} : vector<56x384xbf16>, vector<384x128xbf16>, vector<56x128xf32> -> vector<56x128xf32>
    %c0_57 = arith.constant 0 : index
    %c0_58 = arith.constant 0 : index
    %57 = vector.load %arg2[%c0_57, %c0_58] : memref<1x128xf32, #tpu.memory_space<vmem>>, vector<1x128xf32>
    %58 = vector.broadcast %57 : vector<1x128xf32> to vector<56x128xf32>
    %59 = arith.addf %56, %58 : vector<56x128xf32>
    %cst_59 = arith.constant 0.000000e+00 : f32
    %60 = vector.broadcast %cst_59 : f32 to vector<56x128xf32>
    %61 = arith.maximumf %59, %60 : vector<56x128xf32>
    %c336_60 = arith.constant 336 : index
    %c0_61 = arith.constant 0 : index
    %62 = vector.load %arg4[%c336_60, %c0_61] : memref<392x128xf32, #tpu.memory_space<vmem>>, vector<56x128xf32>
    tpu.vector_store %arg4[%c336_60, %c0_61], %61 {strides = array<i32>} : memref<392x128xf32, #tpu.memory_space<vmem>>, vector<56x128xf32>,
    %c0_62 = arith.constant 0 : index
    %c0_63 = arith.constant 0 : index
    %63 = vector.load %arg4[%c0_62, %c0_63] : memref<392x128xf32, #tpu.memory_space<vmem>>, vector<14x128xf32>
    %c14 = arith.constant 14 : index
    %c0_64 = arith.constant 0 : index
    %64 = vector.load %arg4[%c14, %c0_64] : memref<392x128xf32, #tpu.memory_space<vmem>>, vector<14x128xf32>
    %65 = arith.maximumf %63, %64 : vector<14x128xf32>
    %c28 = arith.constant 28 : index
    %c0_65 = arith.constant 0 : index
    %66 = vector.load %arg4[%c28, %c0_65] : memref<392x128xf32, #tpu.memory_space<vmem>>, vector<14x128xf32>
    %67 = arith.maximumf %65, %66 : vector<14x128xf32>
    %c0_66 = arith.constant 0 : index
    %c0_67 = arith.constant 0 : index
    %68 = vector.load %arg5[%c0_66, %c0_67] : memref<14x128xf32, #tpu.memory_space<vmem>>, vector<14x128xf32>
    tpu.vector_store %arg5[%c0_66, %c0_67], %67 {strides = array<i32>} : memref<14x128xf32, #tpu.memory_space<vmem>>, vector<14x128xf32>,
    %c0_68 = arith.constant 0 : index
    %c0_69 = arith.constant 0 : index
    %69 = vector.load %arg5[%c0_68, %c0_69] : memref<14x128xf32, #tpu.memory_space<vmem>>, vector<1x128xf32>
    %c1 = arith.constant 1 : index
    %c0_70 = arith.constant 0 : index
    %70 = vector.load %arg5[%c1, %c0_70] : memref<14x128xf32, #tpu.memory_space<vmem>>, vector<1x128xf32>
    %71 = arith.maximumf %69, %70 : vector<1x128xf32>
    %c2 = arith.constant 2 : index
    %c0_71 = arith.constant 0 : index
    %72 = vector.load %arg5[%c2, %c0_71] : memref<14x128xf32, #tpu.memory_space<vmem>>, vector<1x128xf32>
    %73 = arith.maximumf %71, %72 : vector<1x128xf32>
    %c0_72 = arith.constant 0 : index
    %c0_73 = arith.constant 0 : index
    %74 = vector.load %arg6[%c0_72, %c0_73] : memref<72x128xf32, #tpu.memory_space<vmem>>, vector<1x128xf32>
    tpu.vector_store %arg6[%c0_72, %c0_73], %73 {strides = array<i32>} : memref<72x128xf32, #tpu.memory_space<vmem>>, vector<1x128xf32>,
    %c2_74 = arith.constant 2 : index
    %c0_75 = arith.constant 0 : index
    %75 = vector.load %arg5[%c2_74, %c0_75] : memref<14x128xf32, #tpu.memory_space<vmem>>, vector<1x128xf32>
    %c3 = arith.constant 3 : index
    %c0_76 = arith.constant 0 : index
    %76 = vector.load %arg5[%c3, %c0_76] : memref<14x128xf32, #tpu.memory_space<vmem>>, vector<1x128xf32>
    %77 = arith.maximumf %75, %76 : vector<1x128xf32>
    %c4 = arith.constant 4 : index
    %c0_77 = arith.constant 0 : index
    %78 = vector.load %arg5[%c4, %c0_77] : memref<14x128xf32, #tpu.memory_space<vmem>>, vector<1x128xf32>
    %79 = arith.maximumf %77, %78 : vector<1x128xf32>
    %c1_78 = arith.constant 1 : index
    %c0_79 = arith.constant 0 : index
    %80 = vector.load %arg6[%c1_78, %c0_79] : memref<72x128xf32, #tpu.memory_space<vmem>>, vector<1x128xf32>
    tpu.vector_store %arg6[%c1_78, %c0_79], %79 {strides = array<i32>} : memref<72x128xf32, #tpu.memory_space<vmem>>, vector<1x128xf32>,
    %c4_80 = arith.constant 4 : index
    %c0_81 = arith.constant 0 : index
    %81 = vector.load %arg5[%c4_80, %c0_81] : memref<14x128xf32, #tpu.memory_space<vmem>>, vector<1x128xf32>
    %c5 = arith.constant 5 : index
    %c0_82 = arith.constant 0 : index
    %82 = vector.load %arg5[%c5, %c0_82] : memref<14x128xf32, #tpu.memory_space<vmem>>, vector<1x128xf32>
    %83 = arith.maximumf %81, %82 : vector<1x128xf32>
    %c6 = arith.constant 6 : index
    %c0_83 = arith.constant 0 : index
    %84 = vector.load %arg5[%c6, %c0_83] : memref<14x128xf32, #tpu.memory_space<vmem>>, vector<1x128xf32>
    %85 = arith.maximumf %83, %84 : vector<1x128xf32>
    %c2_84 = arith.constant 2 : index
    %c0_85 = arith.constant 0 : index
    %86 = vector.load %arg6[%c2_84, %c0_85] : memref<72x128xf32, #tpu.memory_space<vmem>>, vector<1x128xf32>
    tpu.vector_store %arg6[%c2_84, %c0_85], %85 {strides = array<i32>} : memref<72x128xf32, #tpu.memory_space<vmem>>, vector<1x128xf32>,
    %c6_86 = arith.constant 6 : index
    %c0_87 = arith.constant 0 : index
    %87 = vector.load %arg5[%c6_86, %c0_87] : memref<14x128xf32, #tpu.memory_space<vmem>>, vector<1x128xf32>
    %c7 = arith.constant 7 : index
    %c0_88 = arith.constant 0 : index
    %88 = vector.load %arg5[%c7, %c0_88] : memref<14x128xf32, #tpu.memory_space<vmem>>, vector<1x128xf32>
    %89 = arith.maximumf %87, %88 : vector<1x128xf32>
    %c8 = arith.constant 8 : index
    %c0_89 = arith.constant 0 : index
    %90 = vector.load %arg5[%c8, %c0_89] : memref<14x128xf32, #tpu.memory_space<vmem>>, vector<1x128xf32>
    %91 = arith.maximumf %89, %90 : vector<1x128xf32>
    %c3_90 = arith.constant 3 : index
    %c0_91 = arith.constant 0 : index
    %92 = vector.load %arg6[%c3_90, %c0_91] : memref<72x128xf32, #tpu.memory_space<vmem>>, vector<1x128xf32>
    tpu.vector_store %arg6[%c3_90, %c0_91], %91 {strides = array<i32>} : memref<72x128xf32, #tpu.memory_space<vmem>>, vector<1x128xf32>,
    %c8_92 = arith.constant 8 : index
    %c0_93 = arith.constant 0 : index
    %93 = vector.load %arg5[%c8_92, %c0_93] : memref<14x128xf32, #tpu.memory_space<vmem>>, vector<1x128xf32>
    %c9 = arith.constant 9 : index
    %c0_94 = arith.constant 0 : index
    %94 = vector.load %arg5[%c9, %c0_94] : memref<14x128xf32, #tpu.memory_space<vmem>>, vector<1x128xf32>
    %95 = arith.maximumf %93, %94 : vector<1x128xf32>
    %c10 = arith.constant 10 : index
    %c0_95 = arith.constant 0 : index
    %96 = vector.load %arg5[%c10, %c0_95] : memref<14x128xf32, #tpu.memory_space<vmem>>, vector<1x128xf32>
    %97 = arith.maximumf %95, %96 : vector<1x128xf32>
    %c4_96 = arith.constant 4 : index
    %c0_97 = arith.constant 0 : index
    %98 = vector.load %arg6[%c4_96, %c0_97] : memref<72x128xf32, #tpu.memory_space<vmem>>, vector<1x128xf32>
    tpu.vector_store %arg6[%c4_96, %c0_97], %97 {strides = array<i32>} : memref<72x128xf32, #tpu.memory_space<vmem>>, vector<1x128xf32>,
    %c10_98 = arith.constant 10 : index
    %c0_99 = arith.constant 0 : index
    %99 = vector.load %arg5[%c10_98, %c0_99] : memref<14x128xf32, #tpu.memory_space<vmem>>, vector<1x128xf32>
    %c11 = arith.constant 11 : index
    %c0_100 = arith.constant 0 : index
    %100 = vector.load %arg5[%c11, %c0_100] : memref<14x128xf32, #tpu.memory_space<vmem>>, vector<1x128xf32>
    %101 = arith.maximumf %99, %100 : vector<1x128xf32>
    %c12 = arith.constant 12 : index
    %c0_101 = arith.constant 0 : index
    %102 = vector.load %arg5[%c12, %c0_101] : memref<14x128xf32, #tpu.memory_space<vmem>>, vector<1x128xf32>
    %103 = arith.maximumf %101, %102 : vector<1x128xf32>
    %c5_102 = arith.constant 5 : index
    %c0_103 = arith.constant 0 : index
    %104 = vector.load %arg6[%c5_102, %c0_103] : memref<72x128xf32, #tpu.memory_space<vmem>>, vector<1x128xf32>
    tpu.vector_store %arg6[%c5_102, %c0_103], %103 {strides = array<i32>} : memref<72x128xf32, #tpu.memory_space<vmem>>, vector<1x128xf32>,
    %c28_104 = arith.constant 28 : index
    %c0_105 = arith.constant 0 : index
    %105 = vector.load %arg4[%c28_104, %c0_105] : memref<392x128xf32, #tpu.memory_space<vmem>>, vector<14x128xf32>
    %c42 = arith.constant 42 : index
    %c0_106 = arith.constant 0 : index
    %106 = vector.load %arg4[%c42, %c0_106] : memref<392x128xf32, #tpu.memory_space<vmem>>, vector<14x128xf32>
    %107 = arith.maximumf %105, %106 : vector<14x128xf32>
    %c56_107 = arith.constant 56 : index
    %c0_108 = arith.constant 0 : index
    %108 = vector.load %arg4[%c56_107, %c0_108] : memref<392x128xf32, #tpu.memory_space<vmem>>, vector<14x128xf32>
    %109 = arith.maximumf %107, %108 : vector<14x128xf32>
    %c0_109 = arith.constant 0 : index
    %c0_110 = arith.constant 0 : index
    %110 = vector.load %arg5[%c0_109, %c0_110] : memref<14x128xf32, #tpu.memory_space<vmem>>, vector<14x128xf32>
    tpu.vector_store %arg5[%c0_109, %c0_110], %109 {strides = array<i32>} : memref<14x128xf32, #tpu.memory_space<vmem>>, vector<14x128xf32>,
    %c0_111 = arith.constant 0 : index
    %c0_112 = arith.constant 0 : index
    %111 = vector.load %arg5[%c0_111, %c0_112] : memref<14x128xf32, #tpu.memory_space<vmem>>, vector<1x128xf32>
    %c1_113 = arith.constant 1 : index
    %c0_114 = arith.constant 0 : index
    %112 = vector.load %arg5[%c1_113, %c0_114] : memref<14x128xf32, #tpu.memory_space<vmem>>, vector<1x128xf32>
    %113 = arith.maximumf %111, %112 : vector<1x128xf32>
    %c2_115 = arith.constant 2 : index
    %c0_116 = arith.constant 0 : index
    %114 = vector.load %arg5[%c2_115, %c0_116] : memref<14x128xf32, #tpu.memory_space<vmem>>, vector<1x128xf32>
    %115 = arith.maximumf %113, %114 : vector<1x128xf32>
    %c6_117 = arith.constant 6 : index
    %c0_118 = arith.constant 0 : index
    %116 = vector.load %arg6[%c6_117, %c0_118] : memref<72x128xf32, #tpu.memory_space<vmem>>, vector<1x128xf32>
    tpu.vector_store %arg6[%c6_117, %c0_118], %115 {strides = array<i32>} : memref<72x128xf32, #tpu.memory_space<vmem>>, vector<1x128xf32>,
    %c2_119 = arith.constant 2 : index
    %c0_120 = arith.constant 0 : index
    %117 = vector.load %arg5[%c2_119, %c0_120] : memref<14x128xf32, #tpu.memory_space<vmem>>, vector<1x128xf32>
    %c3_121 = arith.constant 3 : index
    %c0_122 = arith.constant 0 : index
    %118 = vector.load %arg5[%c3_121, %c0_122] : memref<14x128xf32, #tpu.memory_space<vmem>>, vector<1x128xf32>
    %119 = arith.maximumf %117, %118 : vector<1x128xf32>
    %c4_123 = arith.constant 4 : index
    %c0_124 = arith.constant 0 : index
    %120 = vector.load %arg5[%c4_123, %c0_124] : memref<14x128xf32, #tpu.memory_space<vmem>>, vector<1x128xf32>
    %121 = arith.maximumf %119, %120 : vector<1x128xf32>
    %c7_125 = arith.constant 7 : index
    %c0_126 = arith.constant 0 : index
    %122 = vector.load %arg6[%c7_125, %c0_126] : memref<72x128xf32, #tpu.memory_space<vmem>>, vector<1x128xf32>
    tpu.vector_store %arg6[%c7_125, %c0_126], %121 {strides = array<i32>} : memref<72x128xf32, #tpu.memory_space<vmem>>, vector<1x128xf32>,
    %c4_127 = arith.constant 4 : index
    %c0_128 = arith.constant 0 : index
    %123 = vector.load %arg5[%c4_127, %c0_128] : memref<14x128xf32, #tpu.memory_space<vmem>>, vector<1x128xf32>
    %c5_129 = arith.constant 5 : index
    %c0_130 = arith.constant 0 : index
    %124 = vector.load %arg5[%c5_129, %c0_130] : memref<14x128xf32, #tpu.memory_space<vmem>>, vector<1x128xf32>
    %125 = arith.maximumf %123, %124 : vector<1x128xf32>
    %c6_131 = arith.constant 6 : index
    %c0_132 = arith.constant 0 : index
    %126 = vector.load %arg5[%c6_131, %c0_132] : memref<14x128xf32, #tpu.memory_space<vmem>>, vector<1x128xf32>
    %127 = arith.maximumf %125, %126 : vector<1x128xf32>
    %c8_133 = arith.constant 8 : index
    %c0_134 = arith.constant 0 : index
    %128 = vector.load %arg6[%c8_133, %c0_134] : memref<72x128xf32, #tpu.memory_space<vmem>>, vector<1x128xf32>
    tpu.vector_store %arg6[%c8_133, %c0_134], %127 {strides = array<i32>} : memref<72x128xf32, #tpu.memory_space<vmem>>, vector<1x128xf32>,
    %c6_135 = arith.constant 6 : index
    %c0_136 = arith.constant 0 : index
    %129 = vector.load %arg5[%c6_135, %c0_136] : memref<14x128xf32, #tpu.memory_space<vmem>>, vector<1x128xf32>
    %c7_137 = arith.constant 7 : index
    %c0_138 = arith.constant 0 : index
    %130 = vector.load %arg5[%c7_137, %c0_138] : memref<14x128xf32, #tpu.memory_space<vmem>>, vector<1x128xf32>
    %131 = arith.maximumf %129, %130 : vector<1x128xf32>
    %c8_139 = arith.constant 8 : index
    %c0_140 = arith.constant 0 : index
    %132 = vector.load %arg5[%c8_139, %c0_140] : memref<14x128xf32, #tpu.memory_space<vmem>>, vector<1x128xf32>
    %133 = arith.maximumf %131, %132 : vector<1x128xf32>
    %c9_141 = arith.constant 9 : index
    %c0_142 = arith.constant 0 : index
    %134 = vector.load %arg6[%c9_141, %c0_142] : memref<72x128xf32, #tpu.memory_space<vmem>>, vector<1x128xf32>
    tpu.vector_store %arg6[%c9_141, %c0_142], %133 {strides = array<i32>} : memref<72x128xf32, #tpu.memory_space<vmem>>, vector<1x128xf32>,
    %c8_143 = arith.constant 8 : index
    %c0_144 = arith.constant 0 : index
    %135 = vector.load %arg5[%c8_143, %c0_144] : memref<14x128xf32, #tpu.memory_space<vmem>>, vector<1x128xf32>
    %c9_145 = arith.constant 9 : index
    %c0_146 = arith.constant 0 : index
    %136 = vector.load %arg5[%c9_145, %c0_146] : memref<14x128xf32, #tpu.memory_space<vmem>>, vector<1x128xf32>
    %137 = arith.maximumf %135, %136 : vector<1x128xf32>
    %c10_147 = arith.constant 10 : index
    %c0_148 = arith.constant 0 : index
    %138 = vector.load %arg5[%c10_147, %c0_148] : memref<14x128xf32, #tpu.memory_space<vmem>>, vector<1x128xf32>
    %139 = arith.maximumf %137, %138 : vector<1x128xf32>
    %c10_149 = arith.constant 10 : index
    %c0_150 = arith.constant 0 : index
    %140 = vector.load %arg6[%c10_149, %c0_150] : memref<72x128xf32, #tpu.memory_space<vmem>>, vector<1x128xf32>
    tpu.vector_store %arg6[%c10_149, %c0_150], %139 {strides = array<i32>} : memref<72x128xf32, #tpu.memory_space<vmem>>, vector<1x128xf32>,
    %c10_151 = arith.constant 10 : index
    %c0_152 = arith.constant 0 : index
    %141 = vector.load %arg5[%c10_151, %c0_152] : memref<14x128xf32, #tpu.memory_space<vmem>>, vector<1x128xf32>
    %c11_153 = arith.constant 11 : index
    %c0_154 = arith.constant 0 : index
    %142 = vector.load %arg5[%c11_153, %c0_154] : memref<14x128xf32, #tpu.memory_space<vmem>>, vector<1x128xf32>
    %143 = arith.maximumf %141, %142 : vector<1x128xf32>
    %c12_155 = arith.constant 12 : index
    %c0_156 = arith.constant 0 : index
    %144 = vector.load %arg5[%c12_155, %c0_156] : memref<14x128xf32, #tpu.memory_space<vmem>>, vector<1x128xf32>
    %145 = arith.maximumf %143, %144 : vector<1x128xf32>
    %c11_157 = arith.constant 11 : index
    %c0_158 = arith.constant 0 : index
    %146 = vector.load %arg6[%c11_157, %c0_158] : memref<72x128xf32, #tpu.memory_space<vmem>>, vector<1x128xf32>
    tpu.vector_store %arg6[%c11_157, %c0_158], %145 {strides = array<i32>} : memref<72x128xf32, #tpu.memory_space<vmem>>, vector<1x128xf32>,
    %c56_159 = arith.constant 56 : index
    %c0_160 = arith.constant 0 : index
    %147 = vector.load %arg4[%c56_159, %c0_160] : memref<392x128xf32, #tpu.memory_space<vmem>>, vector<14x128xf32>
    %c70 = arith.constant 70 : index
    %c0_161 = arith.constant 0 : index
    %148 = vector.load %arg4[%c70, %c0_161] : memref<392x128xf32, #tpu.memory_space<vmem>>, vector<14x128xf32>
    %149 = arith.maximumf %147, %148 : vector<14x128xf32>
    %c84 = arith.constant 84 : index
    %c0_162 = arith.constant 0 : index
    %150 = vector.load %arg4[%c84, %c0_162] : memref<392x128xf32, #tpu.memory_space<vmem>>, vector<14x128xf32>
    %151 = arith.maximumf %149, %150 : vector<14x128xf32>
    %c0_163 = arith.constant 0 : index
    %c0_164 = arith.constant 0 : index
    %152 = vector.load %arg5[%c0_163, %c0_164] : memref<14x128xf32, #tpu.memory_space<vmem>>, vector<14x128xf32>
    tpu.vector_store %arg5[%c0_163, %c0_164], %151 {strides = array<i32>} : memref<14x128xf32, #tpu.memory_space<vmem>>, vector<14x128xf32>,
    %c0_165 = arith.constant 0 : index
    %c0_166 = arith.constant 0 : index
    %153 = vector.load %arg5[%c0_165, %c0_166] : memref<14x128xf32, #tpu.memory_space<vmem>>, vector<1x128xf32>
    %c1_167 = arith.constant 1 : index
    %c0_168 = arith.constant 0 : index
    %154 = vector.load %arg5[%c1_167, %c0_168] : memref<14x128xf32, #tpu.memory_space<vmem>>, vector<1x128xf32>
    %155 = arith.maximumf %153, %154 : vector<1x128xf32>
    %c2_169 = arith.constant 2 : index
    %c0_170 = arith.constant 0 : index
    %156 = vector.load %arg5[%c2_169, %c0_170] : memref<14x128xf32, #tpu.memory_space<vmem>>, vector<1x128xf32>
    %157 = arith.maximumf %155, %156 : vector<1x128xf32>
    %c12_171 = arith.constant 12 : index
    %c0_172 = arith.constant 0 : index
    %158 = vector.load %arg6[%c12_171, %c0_172] : memref<72x128xf32, #tpu.memory_space<vmem>>, vector<1x128xf32>
    tpu.vector_store %arg6[%c12_171, %c0_172], %157 {strides = array<i32>} : memref<72x128xf32, #tpu.memory_space<vmem>>, vector<1x128xf32>,
    %c2_173 = arith.constant 2 : index
    %c0_174 = arith.constant 0 : index
    %159 = vector.load %arg5[%c2_173, %c0_174] : memref<14x128xf32, #tpu.memory_space<vmem>>, vector<1x128xf32>
    %c3_175 = arith.constant 3 : index
    %c0_176 = arith.constant 0 : index
    %160 = vector.load %arg5[%c3_175, %c0_176] : memref<14x128xf32, #tpu.memory_space<vmem>>, vector<1x128xf32>
    %161 = arith.maximumf %159, %160 : vector<1x128xf32>
    %c4_177 = arith.constant 4 : index
    %c0_178 = arith.constant 0 : index
    %162 = vector.load %arg5[%c4_177, %c0_178] : memref<14x128xf32, #tpu.memory_space<vmem>>, vector<1x128xf32>
    %163 = arith.maximumf %161, %162 : vector<1x128xf32>
    %c13 = arith.constant 13 : index
    %c0_179 = arith.constant 0 : index
    %164 = vector.load %arg6[%c13, %c0_179] : memref<72x128xf32, #tpu.memory_space<vmem>>, vector<1x128xf32>
    tpu.vector_store %arg6[%c13, %c0_179], %163 {strides = array<i32>} : memref<72x128xf32, #tpu.memory_space<vmem>>, vector<1x128xf32>,
    %c4_180 = arith.constant 4 : index
    %c0_181 = arith.constant 0 : index
    %165 = vector.load %arg5[%c4_180, %c0_181] : memref<14x128xf32, #tpu.memory_space<vmem>>, vector<1x128xf32>
    %c5_182 = arith.constant 5 : index
    %c0_183 = arith.constant 0 : index
    %166 = vector.load %arg5[%c5_182, %c0_183] : memref<14x128xf32, #tpu.memory_space<vmem>>, vector<1x128xf32>
    %167 = arith.maximumf %165, %166 : vector<1x128xf32>
    %c6_184 = arith.constant 6 : index
    %c0_185 = arith.constant 0 : index
    %168 = vector.load %arg5[%c6_184, %c0_185] : memref<14x128xf32, #tpu.memory_space<vmem>>, vector<1x128xf32>
    %169 = arith.maximumf %167, %168 : vector<1x128xf32>
    %c14_186 = arith.constant 14 : index
    %c0_187 = arith.constant 0 : index
    %170 = vector.load %arg6[%c14_186, %c0_187] : memref<72x128xf32, #tpu.memory_space<vmem>>, vector<1x128xf32>
    tpu.vector_store %arg6[%c14_186, %c0_187], %169 {strides = array<i32>} : memref<72x128xf32, #tpu.memory_space<vmem>>, vector<1x128xf32>,
    %c6_188 = arith.constant 6 : index
    %c0_189 = arith.constant 0 : index
    %171 = vector.load %arg5[%c6_188, %c0_189] : memref<14x128xf32, #tpu.memory_space<vmem>>, vector<1x128xf32>
    %c7_190 = arith.constant 7 : index
    %c0_191 = arith.constant 0 : index
    %172 = vector.load %arg5[%c7_190, %c0_191] : memref<14x128xf32, #tpu.memory_space<vmem>>, vector<1x128xf32>
    %173 = arith.maximumf %171, %172 : vector<1x128xf32>
    %c8_192 = arith.constant 8 : index
    %c0_193 = arith.constant 0 : index
    %174 = vector.load %arg5[%c8_192, %c0_193] : memref<14x128xf32, #tpu.memory_space<vmem>>, vector<1x128xf32>
    %175 = arith.maximumf %173, %174 : vector<1x128xf32>
    %c15 = arith.constant 15 : index
    %c0_194 = arith.constant 0 : index
    %176 = vector.load %arg6[%c15, %c0_194] : memref<72x128xf32, #tpu.memory_space<vmem>>, vector<1x128xf32>
    tpu.vector_store %arg6[%c15, %c0_194], %175 {strides = array<i32>} : memref<72x128xf32, #tpu.memory_space<vmem>>, vector<1x128xf32>,
    %c8_195 = arith.constant 8 : index
    %c0_196 = arith.constant 0 : index
    %177 = vector.load %arg5[%c8_195, %c0_196] : memref<14x128xf32, #tpu.memory_space<vmem>>, vector<1x128xf32>
    %c9_197 = arith.constant 9 : index
    %c0_198 = arith.constant 0 : index
    %178 = vector.load %arg5[%c9_197, %c0_198] : memref<14x128xf32, #tpu.memory_space<vmem>>, vector<1x128xf32>
    %179 = arith.maximumf %177, %178 : vector<1x128xf32>
    %c10_199 = arith.constant 10 : index
    %c0_200 = arith.constant 0 : index
    %180 = vector.load %arg5[%c10_199, %c0_200] : memref<14x128xf32, #tpu.memory_space<vmem>>, vector<1x128xf32>
    %181 = arith.maximumf %179, %180 : vector<1x128xf32>
    %c16 = arith.constant 16 : index
    %c0_201 = arith.constant 0 : index
    %182 = vector.load %arg6[%c16, %c0_201] : memref<72x128xf32, #tpu.memory_space<vmem>>, vector<1x128xf32>
    tpu.vector_store %arg6[%c16, %c0_201], %181 {strides = array<i32>} : memref<72x128xf32, #tpu.memory_space<vmem>>, vector<1x128xf32>,
    %c10_202 = arith.constant 10 : index
    %c0_203 = arith.constant 0 : index
    %183 = vector.load %arg5[%c10_202, %c0_203] : memref<14x128xf32, #tpu.memory_space<vmem>>, vector<1x128xf32>
    %c11_204 = arith.constant 11 : index
    %c0_205 = arith.constant 0 : index
    %184 = vector.load %arg5[%c11_204, %c0_205] : memref<14x128xf32, #tpu.memory_space<vmem>>, vector<1x128xf32>
    %185 = arith.maximumf %183, %184 : vector<1x128xf32>
    %c12_206 = arith.constant 12 : index
    %c0_207 = arith.constant 0 : index
    %186 = vector.load %arg5[%c12_206, %c0_207] : memref<14x128xf32, #tpu.memory_space<vmem>>, vector<1x128xf32>
    %187 = arith.maximumf %185, %186 : vector<1x128xf32>
    %c17 = arith.constant 17 : index
    %c0_208 = arith.constant 0 : index
    %188 = vector.load %arg6[%c17, %c0_208] : memref<72x128xf32, #tpu.memory_space<vmem>>, vector<1x128xf32>
    tpu.vector_store %arg6[%c17, %c0_208], %187 {strides = array<i32>} : memref<72x128xf32, #tpu.memory_space<vmem>>, vector<1x128xf32>,
    %c84_209 = arith.constant 84 : index
    %c0_210 = arith.constant 0 : index
    %189 = vector.load %arg4[%c84_209, %c0_210] : memref<392x128xf32, #tpu.memory_space<vmem>>, vector<14x128xf32>
    %c98 = arith.constant 98 : index
    %c0_211 = arith.constant 0 : index
    %190 = vector.load %arg4[%c98, %c0_211] : memref<392x128xf32, #tpu.memory_space<vmem>>, vector<14x128xf32>
    %191 = arith.maximumf %189, %190 : vector<14x128xf32>
    %c112_212 = arith.constant 112 : index
    %c0_213 = arith.constant 0 : index
    %192 = vector.load %arg4[%c112_212, %c0_213] : memref<392x128xf32, #tpu.memory_space<vmem>>, vector<14x128xf32>
    %193 = arith.maximumf %191, %192 : vector<14x128xf32>
    %c0_214 = arith.constant 0 : index
    %c0_215 = arith.constant 0 : index
    %194 = vector.load %arg5[%c0_214, %c0_215] : memref<14x128xf32, #tpu.memory_space<vmem>>, vector<14x128xf32>
    tpu.vector_store %arg5[%c0_214, %c0_215], %193 {strides = array<i32>} : memref<14x128xf32, #tpu.memory_space<vmem>>, vector<14x128xf32>,
    %c0_216 = arith.constant 0 : index
    %c0_217 = arith.constant 0 : index
    %195 = vector.load %arg5[%c0_216, %c0_217] : memref<14x128xf32, #tpu.memory_space<vmem>>, vector<1x128xf32>
    %c1_218 = arith.constant 1 : index
    %c0_219 = arith.constant 0 : index
    %196 = vector.load %arg5[%c1_218, %c0_219] : memref<14x128xf32, #tpu.memory_space<vmem>>, vector<1x128xf32>
    %197 = arith.maximumf %195, %196 : vector<1x128xf32>
    %c2_220 = arith.constant 2 : index
    %c0_221 = arith.constant 0 : index
    %198 = vector.load %arg5[%c2_220, %c0_221] : memref<14x128xf32, #tpu.memory_space<vmem>>, vector<1x128xf32>
    %199 = arith.maximumf %197, %198 : vector<1x128xf32>
    %c18 = arith.constant 18 : index
    %c0_222 = arith.constant 0 : index
    %200 = vector.load %arg6[%c18, %c0_222] : memref<72x128xf32, #tpu.memory_space<vmem>>, vector<1x128xf32>
    tpu.vector_store %arg6[%c18, %c0_222], %199 {strides = array<i32>} : memref<72x128xf32, #tpu.memory_space<vmem>>, vector<1x128xf32>,
    %c2_223 = arith.constant 2 : index
    %c0_224 = arith.constant 0 : index
    %201 = vector.load %arg5[%c2_223, %c0_224] : memref<14x128xf32, #tpu.memory_space<vmem>>, vector<1x128xf32>
    %c3_225 = arith.constant 3 : index
    %c0_226 = arith.constant 0 : index
    %202 = vector.load %arg5[%c3_225, %c0_226] : memref<14x128xf32, #tpu.memory_space<vmem>>, vector<1x128xf32>
    %203 = arith.maximumf %201, %202 : vector<1x128xf32>
    %c4_227 = arith.constant 4 : index
    %c0_228 = arith.constant 0 : index
    %204 = vector.load %arg5[%c4_227, %c0_228] : memref<14x128xf32, #tpu.memory_space<vmem>>, vector<1x128xf32>
    %205 = arith.maximumf %203, %204 : vector<1x128xf32>
    %c19 = arith.constant 19 : index
    %c0_229 = arith.constant 0 : index
    %206 = vector.load %arg6[%c19, %c0_229] : memref<72x128xf32, #tpu.memory_space<vmem>>, vector<1x128xf32>
    tpu.vector_store %arg6[%c19, %c0_229], %205 {strides = array<i32>} : memref<72x128xf32, #tpu.memory_space<vmem>>, vector<1x128xf32>,
    %c4_230 = arith.constant 4 : index
    %c0_231 = arith.constant 0 : index
    %207 = vector.load %arg5[%c4_230, %c0_231] : memref<14x128xf32, #tpu.memory_space<vmem>>, vector<1x128xf32>
    %c5_232 = arith.constant 5 : index
    %c0_233 = arith.constant 0 : index
    %208 = vector.load %arg5[%c5_232, %c0_233] : memref<14x128xf32, #tpu.memory_space<vmem>>, vector<1x128xf32>
    %209 = arith.maximumf %207, %208 : vector<1x128xf32>
    %c6_234 = arith.constant 6 : index
    %c0_235 = arith.constant 0 : index
    %210 = vector.load %arg5[%c6_234, %c0_235] : memref<14x128xf32, #tpu.memory_space<vmem>>, vector<1x128xf32>
    %211 = arith.maximumf %209, %210 : vector<1x128xf32>
    %c20 = arith.constant 20 : index
    %c0_236 = arith.constant 0 : index
    %212 = vector.load %arg6[%c20, %c0_236] : memref<72x128xf32, #tpu.memory_space<vmem>>, vector<1x128xf32>
    tpu.vector_store %arg6[%c20, %c0_236], %211 {strides = array<i32>} : memref<72x128xf32, #tpu.memory_space<vmem>>, vector<1x128xf32>,
    %c6_237 = arith.constant 6 : index
    %c0_238 = arith.constant 0 : index
    %213 = vector.load %arg5[%c6_237, %c0_238] : memref<14x128xf32, #tpu.memory_space<vmem>>, vector<1x128xf32>
    %c7_239 = arith.constant 7 : index
    %c0_240 = arith.constant 0 : index
    %214 = vector.load %arg5[%c7_239, %c0_240] : memref<14x128xf32, #tpu.memory_space<vmem>>, vector<1x128xf32>
    %215 = arith.maximumf %213, %214 : vector<1x128xf32>
    %c8_241 = arith.constant 8 : index
    %c0_242 = arith.constant 0 : index
    %216 = vector.load %arg5[%c8_241, %c0_242] : memref<14x128xf32, #tpu.memory_space<vmem>>, vector<1x128xf32>
    %217 = arith.maximumf %215, %216 : vector<1x128xf32>
    %c21 = arith.constant 21 : index
    %c0_243 = arith.constant 0 : index
    %218 = vector.load %arg6[%c21, %c0_243] : memref<72x128xf32, #tpu.memory_space<vmem>>, vector<1x128xf32>
    tpu.vector_store %arg6[%c21, %c0_243], %217 {strides = array<i32>} : memref<72x128xf32, #tpu.memory_space<vmem>>, vector<1x128xf32>,
    %c8_244 = arith.constant 8 : index
    %c0_245 = arith.constant 0 : index
    %219 = vector.load %arg5[%c8_244, %c0_245] : memref<14x128xf32, #tpu.memory_space<vmem>>, vector<1x128xf32>
    %c9_246 = arith.constant 9 : index
    %c0_247 = arith.constant 0 : index
    %220 = vector.load %arg5[%c9_246, %c0_247] : memref<14x128xf32, #tpu.memory_space<vmem>>, vector<1x128xf32>
    %221 = arith.maximumf %219, %220 : vector<1x128xf32>
    %c10_248 = arith.constant 10 : index
    %c0_249 = arith.constant 0 : index
    %222 = vector.load %arg5[%c10_248, %c0_249] : memref<14x128xf32, #tpu.memory_space<vmem>>, vector<1x128xf32>
    %223 = arith.maximumf %221, %222 : vector<1x128xf32>
    %c22 = arith.constant 22 : index
    %c0_250 = arith.constant 0 : index
    %224 = vector.load %arg6[%c22, %c0_250] : memref<72x128xf32, #tpu.memory_space<vmem>>, vector<1x128xf32>
    tpu.vector_store %arg6[%c22, %c0_250], %223 {strides = array<i32>} : memref<72x128xf32, #tpu.memory_space<vmem>>, vector<1x128xf32>,
    %c10_251 = arith.constant 10 : index
    %c0_252 = arith.constant 0 : index
    %225 = vector.load %arg5[%c10_251, %c0_252] : memref<14x128xf32, #tpu.memory_space<vmem>>, vector<1x128xf32>
    %c11_253 = arith.constant 11 : index
    %c0_254 = arith.constant 0 : index
    %226 = vector.load %arg5[%c11_253, %c0_254] : memref<14x128xf32, #tpu.memory_space<vmem>>, vector<1x128xf32>
    %227 = arith.maximumf %225, %226 : vector<1x128xf32>
    %c12_255 = arith.constant 12 : index
    %c0_256 = arith.constant 0 : index
    %228 = vector.load %arg5[%c12_255, %c0_256] : memref<14x128xf32, #tpu.memory_space<vmem>>, vector<1x128xf32>
    %229 = arith.maximumf %227, %228 : vector<1x128xf32>
    %c23 = arith.constant 23 : index
    %c0_257 = arith.constant 0 : index
    %230 = vector.load %arg6[%c23, %c0_257] : memref<72x128xf32, #tpu.memory_space<vmem>>, vector<1x128xf32>
    tpu.vector_store %arg6[%c23, %c0_257], %229 {strides = array<i32>} : memref<72x128xf32, #tpu.memory_space<vmem>>, vector<1x128xf32>,
    %c112_258 = arith.constant 112 : index
    %c0_259 = arith.constant 0 : index
    %231 = vector.load %arg4[%c112_258, %c0_259] : memref<392x128xf32, #tpu.memory_space<vmem>>, vector<14x128xf32>
    %c126 = arith.constant 126 : index
    %c0_260 = arith.constant 0 : index
    %232 = vector.load %arg4[%c126, %c0_260] : memref<392x128xf32, #tpu.memory_space<vmem>>, vector<14x128xf32>
    %233 = arith.maximumf %231, %232 : vector<14x128xf32>
    %c140 = arith.constant 140 : index
    %c0_261 = arith.constant 0 : index
    %234 = vector.load %arg4[%c140, %c0_261] : memref<392x128xf32, #tpu.memory_space<vmem>>, vector<14x128xf32>
    %235 = arith.maximumf %233, %234 : vector<14x128xf32>
    %c0_262 = arith.constant 0 : index
    %c0_263 = arith.constant 0 : index
    %236 = vector.load %arg5[%c0_262, %c0_263] : memref<14x128xf32, #tpu.memory_space<vmem>>, vector<14x128xf32>
    tpu.vector_store %arg5[%c0_262, %c0_263], %235 {strides = array<i32>} : memref<14x128xf32, #tpu.memory_space<vmem>>, vector<14x128xf32>,
    %c0_264 = arith.constant 0 : index
    %c0_265 = arith.constant 0 : index
    %237 = vector.load %arg5[%c0_264, %c0_265] : memref<14x128xf32, #tpu.memory_space<vmem>>, vector<1x128xf32>
    %c1_266 = arith.constant 1 : index
    %c0_267 = arith.constant 0 : index
    %238 = vector.load %arg5[%c1_266, %c0_267] : memref<14x128xf32, #tpu.memory_space<vmem>>, vector<1x128xf32>
    %239 = arith.maximumf %237, %238 : vector<1x128xf32>
    %c2_268 = arith.constant 2 : index
    %c0_269 = arith.constant 0 : index
    %240 = vector.load %arg5[%c2_268, %c0_269] : memref<14x128xf32, #tpu.memory_space<vmem>>, vector<1x128xf32>
    %241 = arith.maximumf %239, %240 : vector<1x128xf32>
    %c24 = arith.constant 24 : index
    %c0_270 = arith.constant 0 : index
    %242 = vector.load %arg6[%c24, %c0_270] : memref<72x128xf32, #tpu.memory_space<vmem>>, vector<1x128xf32>
    tpu.vector_store %arg6[%c24, %c0_270], %241 {strides = array<i32>} : memref<72x128xf32, #tpu.memory_space<vmem>>, vector<1x128xf32>,
    %c2_271 = arith.constant 2 : index
    %c0_272 = arith.constant 0 : index
    %243 = vector.load %arg5[%c2_271, %c0_272] : memref<14x128xf32, #tpu.memory_space<vmem>>, vector<1x128xf32>
    %c3_273 = arith.constant 3 : index
    %c0_274 = arith.constant 0 : index
    %244 = vector.load %arg5[%c3_273, %c0_274] : memref<14x128xf32, #tpu.memory_space<vmem>>, vector<1x128xf32>
    %245 = arith.maximumf %243, %244 : vector<1x128xf32>
    %c4_275 = arith.constant 4 : index
    %c0_276 = arith.constant 0 : index
    %246 = vector.load %arg5[%c4_275, %c0_276] : memref<14x128xf32, #tpu.memory_space<vmem>>, vector<1x128xf32>
    %247 = arith.maximumf %245, %246 : vector<1x128xf32>
    %c25 = arith.constant 25 : index
    %c0_277 = arith.constant 0 : index
    %248 = vector.load %arg6[%c25, %c0_277] : memref<72x128xf32, #tpu.memory_space<vmem>>, vector<1x128xf32>
    tpu.vector_store %arg6[%c25, %c0_277], %247 {strides = array<i32>} : memref<72x128xf32, #tpu.memory_space<vmem>>, vector<1x128xf32>,
    %c4_278 = arith.constant 4 : index
    %c0_279 = arith.constant 0 : index
    %249 = vector.load %arg5[%c4_278, %c0_279] : memref<14x128xf32, #tpu.memory_space<vmem>>, vector<1x128xf32>
    %c5_280 = arith.constant 5 : index
    %c0_281 = arith.constant 0 : index
    %250 = vector.load %arg5[%c5_280, %c0_281] : memref<14x128xf32, #tpu.memory_space<vmem>>, vector<1x128xf32>
    %251 = arith.maximumf %249, %250 : vector<1x128xf32>
    %c6_282 = arith.constant 6 : index
    %c0_283 = arith.constant 0 : index
    %252 = vector.load %arg5[%c6_282, %c0_283] : memref<14x128xf32, #tpu.memory_space<vmem>>, vector<1x128xf32>
    %253 = arith.maximumf %251, %252 : vector<1x128xf32>
    %c26 = arith.constant 26 : index
    %c0_284 = arith.constant 0 : index
    %254 = vector.load %arg6[%c26, %c0_284] : memref<72x128xf32, #tpu.memory_space<vmem>>, vector<1x128xf32>
    tpu.vector_store %arg6[%c26, %c0_284], %253 {strides = array<i32>} : memref<72x128xf32, #tpu.memory_space<vmem>>, vector<1x128xf32>,
    %c6_285 = arith.constant 6 : index
    %c0_286 = arith.constant 0 : index
    %255 = vector.load %arg5[%c6_285, %c0_286] : memref<14x128xf32, #tpu.memory_space<vmem>>, vector<1x128xf32>
    %c7_287 = arith.constant 7 : index
    %c0_288 = arith.constant 0 : index
    %256 = vector.load %arg5[%c7_287, %c0_288] : memref<14x128xf32, #tpu.memory_space<vmem>>, vector<1x128xf32>
    %257 = arith.maximumf %255, %256 : vector<1x128xf32>
    %c8_289 = arith.constant 8 : index
    %c0_290 = arith.constant 0 : index
    %258 = vector.load %arg5[%c8_289, %c0_290] : memref<14x128xf32, #tpu.memory_space<vmem>>, vector<1x128xf32>
    %259 = arith.maximumf %257, %258 : vector<1x128xf32>
    %c27 = arith.constant 27 : index
    %c0_291 = arith.constant 0 : index
    %260 = vector.load %arg6[%c27, %c0_291] : memref<72x128xf32, #tpu.memory_space<vmem>>, vector<1x128xf32>
    tpu.vector_store %arg6[%c27, %c0_291], %259 {strides = array<i32>} : memref<72x128xf32, #tpu.memory_space<vmem>>, vector<1x128xf32>,
    %c8_292 = arith.constant 8 : index
    %c0_293 = arith.constant 0 : index
    %261 = vector.load %arg5[%c8_292, %c0_293] : memref<14x128xf32, #tpu.memory_space<vmem>>, vector<1x128xf32>
    %c9_294 = arith.constant 9 : index
    %c0_295 = arith.constant 0 : index
    %262 = vector.load %arg5[%c9_294, %c0_295] : memref<14x128xf32, #tpu.memory_space<vmem>>, vector<1x128xf32>
    %263 = arith.maximumf %261, %262 : vector<1x128xf32>
    %c10_296 = arith.constant 10 : index
    %c0_297 = arith.constant 0 : index
    %264 = vector.load %arg5[%c10_296, %c0_297] : memref<14x128xf32, #tpu.memory_space<vmem>>, vector<1x128xf32>
    %265 = arith.maximumf %263, %264 : vector<1x128xf32>
    %c28_298 = arith.constant 28 : index
    %c0_299 = arith.constant 0 : index
    %266 = vector.load %arg6[%c28_298, %c0_299] : memref<72x128xf32, #tpu.memory_space<vmem>>, vector<1x128xf32>
    tpu.vector_store %arg6[%c28_298, %c0_299], %265 {strides = array<i32>} : memref<72x128xf32, #tpu.memory_space<vmem>>, vector<1x128xf32>,
    %c10_300 = arith.constant 10 : index
    %c0_301 = arith.constant 0 : index
    %267 = vector.load %arg5[%c10_300, %c0_301] : memref<14x128xf32, #tpu.memory_space<vmem>>, vector<1x128xf32>
    %c11_302 = arith.constant 11 : index
    %c0_303 = arith.constant 0 : index
    %268 = vector.load %arg5[%c11_302, %c0_303] : memref<14x128xf32, #tpu.memory_space<vmem>>, vector<1x128xf32>
    %269 = arith.maximumf %267, %268 : vector<1x128xf32>
    %c12_304 = arith.constant 12 : index
    %c0_305 = arith.constant 0 : index
    %270 = vector.load %arg5[%c12_304, %c0_305] : memref<14x128xf32, #tpu.memory_space<vmem>>, vector<1x128xf32>
    %271 = arith.maximumf %269, %270 : vector<1x128xf32>
    %c29 = arith.constant 29 : index
    %c0_306 = arith.constant 0 : index
    %272 = vector.load %arg6[%c29, %c0_306] : memref<72x128xf32, #tpu.memory_space<vmem>>, vector<1x128xf32>
    tpu.vector_store %arg6[%c29, %c0_306], %271 {strides = array<i32>} : memref<72x128xf32, #tpu.memory_space<vmem>>, vector<1x128xf32>,
    %c140_307 = arith.constant 140 : index
    %c0_308 = arith.constant 0 : index
    %273 = vector.load %arg4[%c140_307, %c0_308] : memref<392x128xf32, #tpu.memory_space<vmem>>, vector<14x128xf32>
    %c154 = arith.constant 154 : index
    %c0_309 = arith.constant 0 : index
    %274 = vector.load %arg4[%c154, %c0_309] : memref<392x128xf32, #tpu.memory_space<vmem>>, vector<14x128xf32>
    %275 = arith.maximumf %273, %274 : vector<14x128xf32>
    %c168_310 = arith.constant 168 : index
    %c0_311 = arith.constant 0 : index
    %276 = vector.load %arg4[%c168_310, %c0_311] : memref<392x128xf32, #tpu.memory_space<vmem>>, vector<14x128xf32>
    %277 = arith.maximumf %275, %276 : vector<14x128xf32>
    %c0_312 = arith.constant 0 : index
    %c0_313 = arith.constant 0 : index
    %278 = vector.load %arg5[%c0_312, %c0_313] : memref<14x128xf32, #tpu.memory_space<vmem>>, vector<14x128xf32>
    tpu.vector_store %arg5[%c0_312, %c0_313], %277 {strides = array<i32>} : memref<14x128xf32, #tpu.memory_space<vmem>>, vector<14x128xf32>,
    %c0_314 = arith.constant 0 : index
    %c0_315 = arith.constant 0 : index
    %279 = vector.load %arg5[%c0_314, %c0_315] : memref<14x128xf32, #tpu.memory_space<vmem>>, vector<1x128xf32>
    %c1_316 = arith.constant 1 : index
    %c0_317 = arith.constant 0 : index
    %280 = vector.load %arg5[%c1_316, %c0_317] : memref<14x128xf32, #tpu.memory_space<vmem>>, vector<1x128xf32>
    %281 = arith.maximumf %279, %280 : vector<1x128xf32>
    %c2_318 = arith.constant 2 : index
    %c0_319 = arith.constant 0 : index
    %282 = vector.load %arg5[%c2_318, %c0_319] : memref<14x128xf32, #tpu.memory_space<vmem>>, vector<1x128xf32>
    %283 = arith.maximumf %281, %282 : vector<1x128xf32>
    %c30 = arith.constant 30 : index
    %c0_320 = arith.constant 0 : index
    %284 = vector.load %arg6[%c30, %c0_320] : memref<72x128xf32, #tpu.memory_space<vmem>>, vector<1x128xf32>
    tpu.vector_store %arg6[%c30, %c0_320], %283 {strides = array<i32>} : memref<72x128xf32, #tpu.memory_space<vmem>>, vector<1x128xf32>,
    %c2_321 = arith.constant 2 : index
    %c0_322 = arith.constant 0 : index
    %285 = vector.load %arg5[%c2_321, %c0_322] : memref<14x128xf32, #tpu.memory_space<vmem>>, vector<1x128xf32>
    %c3_323 = arith.constant 3 : index
    %c0_324 = arith.constant 0 : index
    %286 = vector.load %arg5[%c3_323, %c0_324] : memref<14x128xf32, #tpu.memory_space<vmem>>, vector<1x128xf32>
    %287 = arith.maximumf %285, %286 : vector<1x128xf32>
    %c4_325 = arith.constant 4 : index
    %c0_326 = arith.constant 0 : index
    %288 = vector.load %arg5[%c4_325, %c0_326] : memref<14x128xf32, #tpu.memory_space<vmem>>, vector<1x128xf32>
    %289 = arith.maximumf %287, %288 : vector<1x128xf32>
    %c31 = arith.constant 31 : index
    %c0_327 = arith.constant 0 : index
    %290 = vector.load %arg6[%c31, %c0_327] : memref<72x128xf32, #tpu.memory_space<vmem>>, vector<1x128xf32>
    tpu.vector_store %arg6[%c31, %c0_327], %289 {strides = array<i32>} : memref<72x128xf32, #tpu.memory_space<vmem>>, vector<1x128xf32>,
    %c4_328 = arith.constant 4 : index
    %c0_329 = arith.constant 0 : index
    %291 = vector.load %arg5[%c4_328, %c0_329] : memref<14x128xf32, #tpu.memory_space<vmem>>, vector<1x128xf32>
    %c5_330 = arith.constant 5 : index
    %c0_331 = arith.constant 0 : index
    %292 = vector.load %arg5[%c5_330, %c0_331] : memref<14x128xf32, #tpu.memory_space<vmem>>, vector<1x128xf32>
    %293 = arith.maximumf %291, %292 : vector<1x128xf32>
    %c6_332 = arith.constant 6 : index
    %c0_333 = arith.constant 0 : index
    %294 = vector.load %arg5[%c6_332, %c0_333] : memref<14x128xf32, #tpu.memory_space<vmem>>, vector<1x128xf32>
    %295 = arith.maximumf %293, %294 : vector<1x128xf32>
    %c32 = arith.constant 32 : index
    %c0_334 = arith.constant 0 : index
    %296 = vector.load %arg6[%c32, %c0_334] : memref<72x128xf32, #tpu.memory_space<vmem>>, vector<1x128xf32>
    tpu.vector_store %arg6[%c32, %c0_334], %295 {strides = array<i32>} : memref<72x128xf32, #tpu.memory_space<vmem>>, vector<1x128xf32>,
    %c6_335 = arith.constant 6 : index
    %c0_336 = arith.constant 0 : index
    %297 = vector.load %arg5[%c6_335, %c0_336] : memref<14x128xf32, #tpu.memory_space<vmem>>, vector<1x128xf32>
    %c7_337 = arith.constant 7 : index
    %c0_338 = arith.constant 0 : index
    %298 = vector.load %arg5[%c7_337, %c0_338] : memref<14x128xf32, #tpu.memory_space<vmem>>, vector<1x128xf32>
    %299 = arith.maximumf %297, %298 : vector<1x128xf32>
    %c8_339 = arith.constant 8 : index
    %c0_340 = arith.constant 0 : index
    %300 = vector.load %arg5[%c8_339, %c0_340] : memref<14x128xf32, #tpu.memory_space<vmem>>, vector<1x128xf32>
    %301 = arith.maximumf %299, %300 : vector<1x128xf32>
    %c33 = arith.constant 33 : index
    %c0_341 = arith.constant 0 : index
    %302 = vector.load %arg6[%c33, %c0_341] : memref<72x128xf32, #tpu.memory_space<vmem>>, vector<1x128xf32>
    tpu.vector_store %arg6[%c33, %c0_341], %301 {strides = array<i32>} : memref<72x128xf32, #tpu.memory_space<vmem>>, vector<1x128xf32>,
    %c8_342 = arith.constant 8 : index
    %c0_343 = arith.constant 0 : index
    %303 = vector.load %arg5[%c8_342, %c0_343] : memref<14x128xf32, #tpu.memory_space<vmem>>, vector<1x128xf32>
    %c9_344 = arith.constant 9 : index
    %c0_345 = arith.constant 0 : index
    %304 = vector.load %arg5[%c9_344, %c0_345] : memref<14x128xf32, #tpu.memory_space<vmem>>, vector<1x128xf32>
    %305 = arith.maximumf %303, %304 : vector<1x128xf32>
    %c10_346 = arith.constant 10 : index
    %c0_347 = arith.constant 0 : index
    %306 = vector.load %arg5[%c10_346, %c0_347] : memref<14x128xf32, #tpu.memory_space<vmem>>, vector<1x128xf32>
    %307 = arith.maximumf %305, %306 : vector<1x128xf32>
    %c34 = arith.constant 34 : index
    %c0_348 = arith.constant 0 : index
    %308 = vector.load %arg6[%c34, %c0_348] : memref<72x128xf32, #tpu.memory_space<vmem>>, vector<1x128xf32>
    tpu.vector_store %arg6[%c34, %c0_348], %307 {strides = array<i32>} : memref<72x128xf32, #tpu.memory_space<vmem>>, vector<1x128xf32>,
    %c10_349 = arith.constant 10 : index
    %c0_350 = arith.constant 0 : index
    %309 = vector.load %arg5[%c10_349, %c0_350] : memref<14x128xf32, #tpu.memory_space<vmem>>, vector<1x128xf32>
    %c11_351 = arith.constant 11 : index
    %c0_352 = arith.constant 0 : index
    %310 = vector.load %arg5[%c11_351, %c0_352] : memref<14x128xf32, #tpu.memory_space<vmem>>, vector<1x128xf32>
    %311 = arith.maximumf %309, %310 : vector<1x128xf32>
    %c12_353 = arith.constant 12 : index
    %c0_354 = arith.constant 0 : index
    %312 = vector.load %arg5[%c12_353, %c0_354] : memref<14x128xf32, #tpu.memory_space<vmem>>, vector<1x128xf32>
    %313 = arith.maximumf %311, %312 : vector<1x128xf32>
    %c35 = arith.constant 35 : index
    %c0_355 = arith.constant 0 : index
    %314 = vector.load %arg6[%c35, %c0_355] : memref<72x128xf32, #tpu.memory_space<vmem>>, vector<1x128xf32>
    tpu.vector_store %arg6[%c35, %c0_355], %313 {strides = array<i32>} : memref<72x128xf32, #tpu.memory_space<vmem>>, vector<1x128xf32>,
    %c196 = arith.constant 196 : index
    %c0_356 = arith.constant 0 : index
    %315 = vector.load %arg4[%c196, %c0_356] : memref<392x128xf32, #tpu.memory_space<vmem>>, vector<14x128xf32>
    %c210 = arith.constant 210 : index
    %c0_357 = arith.constant 0 : index
    %316 = vector.load %arg4[%c210, %c0_357] : memref<392x128xf32, #tpu.memory_space<vmem>>, vector<14x128xf32>
    %317 = arith.maximumf %315, %316 : vector<14x128xf32>
    %c224_358 = arith.constant 224 : index
    %c0_359 = arith.constant 0 : index
    %318 = vector.load %arg4[%c224_358, %c0_359] : memref<392x128xf32, #tpu.memory_space<vmem>>, vector<14x128xf32>
    %319 = arith.maximumf %317, %318 : vector<14x128xf32>
    %c0_360 = arith.constant 0 : index
    %c0_361 = arith.constant 0 : index
    %320 = vector.load %arg5[%c0_360, %c0_361] : memref<14x128xf32, #tpu.memory_space<vmem>>, vector<14x128xf32>
    tpu.vector_store %arg5[%c0_360, %c0_361], %319 {strides = array<i32>} : memref<14x128xf32, #tpu.memory_space<vmem>>, vector<14x128xf32>,
    %c0_362 = arith.constant 0 : index
    %c0_363 = arith.constant 0 : index
    %321 = vector.load %arg5[%c0_362, %c0_363] : memref<14x128xf32, #tpu.memory_space<vmem>>, vector<1x128xf32>
    %c1_364 = arith.constant 1 : index
    %c0_365 = arith.constant 0 : index
    %322 = vector.load %arg5[%c1_364, %c0_365] : memref<14x128xf32, #tpu.memory_space<vmem>>, vector<1x128xf32>
    %323 = arith.maximumf %321, %322 : vector<1x128xf32>
    %c2_366 = arith.constant 2 : index
    %c0_367 = arith.constant 0 : index
    %324 = vector.load %arg5[%c2_366, %c0_367] : memref<14x128xf32, #tpu.memory_space<vmem>>, vector<1x128xf32>
    %325 = arith.maximumf %323, %324 : vector<1x128xf32>
    %c36 = arith.constant 36 : index
    %c0_368 = arith.constant 0 : index
    %326 = vector.load %arg6[%c36, %c0_368] : memref<72x128xf32, #tpu.memory_space<vmem>>, vector<1x128xf32>
    tpu.vector_store %arg6[%c36, %c0_368], %325 {strides = array<i32>} : memref<72x128xf32, #tpu.memory_space<vmem>>, vector<1x128xf32>,
    %c2_369 = arith.constant 2 : index
    %c0_370 = arith.constant 0 : index
    %327 = vector.load %arg5[%c2_369, %c0_370] : memref<14x128xf32, #tpu.memory_space<vmem>>, vector<1x128xf32>
    %c3_371 = arith.constant 3 : index
    %c0_372 = arith.constant 0 : index
    %328 = vector.load %arg5[%c3_371, %c0_372] : memref<14x128xf32, #tpu.memory_space<vmem>>, vector<1x128xf32>
    %329 = arith.maximumf %327, %328 : vector<1x128xf32>
    %c4_373 = arith.constant 4 : index
    %c0_374 = arith.constant 0 : index
    %330 = vector.load %arg5[%c4_373, %c0_374] : memref<14x128xf32, #tpu.memory_space<vmem>>, vector<1x128xf32>
    %331 = arith.maximumf %329, %330 : vector<1x128xf32>
    %c37 = arith.constant 37 : index
    %c0_375 = arith.constant 0 : index
    %332 = vector.load %arg6[%c37, %c0_375] : memref<72x128xf32, #tpu.memory_space<vmem>>, vector<1x128xf32>
    tpu.vector_store %arg6[%c37, %c0_375], %331 {strides = array<i32>} : memref<72x128xf32, #tpu.memory_space<vmem>>, vector<1x128xf32>,
    %c4_376 = arith.constant 4 : index
    %c0_377 = arith.constant 0 : index
    %333 = vector.load %arg5[%c4_376, %c0_377] : memref<14x128xf32, #tpu.memory_space<vmem>>, vector<1x128xf32>
    %c5_378 = arith.constant 5 : index
    %c0_379 = arith.constant 0 : index
    %334 = vector.load %arg5[%c5_378, %c0_379] : memref<14x128xf32, #tpu.memory_space<vmem>>, vector<1x128xf32>
    %335 = arith.maximumf %333, %334 : vector<1x128xf32>
    %c6_380 = arith.constant 6 : index
    %c0_381 = arith.constant 0 : index
    %336 = vector.load %arg5[%c6_380, %c0_381] : memref<14x128xf32, #tpu.memory_space<vmem>>, vector<1x128xf32>
    %337 = arith.maximumf %335, %336 : vector<1x128xf32>
    %c38 = arith.constant 38 : index
    %c0_382 = arith.constant 0 : index
    %338 = vector.load %arg6[%c38, %c0_382] : memref<72x128xf32, #tpu.memory_space<vmem>>, vector<1x128xf32>
    tpu.vector_store %arg6[%c38, %c0_382], %337 {strides = array<i32>} : memref<72x128xf32, #tpu.memory_space<vmem>>, vector<1x128xf32>,
    %c6_383 = arith.constant 6 : index
    %c0_384 = arith.constant 0 : index
    %339 = vector.load %arg5[%c6_383, %c0_384] : memref<14x128xf32, #tpu.memory_space<vmem>>, vector<1x128xf32>
    %c7_385 = arith.constant 7 : index
    %c0_386 = arith.constant 0 : index
    %340 = vector.load %arg5[%c7_385, %c0_386] : memref<14x128xf32, #tpu.memory_space<vmem>>, vector<1x128xf32>
    %341 = arith.maximumf %339, %340 : vector<1x128xf32>
    %c8_387 = arith.constant 8 : index
    %c0_388 = arith.constant 0 : index
    %342 = vector.load %arg5[%c8_387, %c0_388] : memref<14x128xf32, #tpu.memory_space<vmem>>, vector<1x128xf32>
    %343 = arith.maximumf %341, %342 : vector<1x128xf32>
    %c39 = arith.constant 39 : index
    %c0_389 = arith.constant 0 : index
    %344 = vector.load %arg6[%c39, %c0_389] : memref<72x128xf32, #tpu.memory_space<vmem>>, vector<1x128xf32>
    tpu.vector_store %arg6[%c39, %c0_389], %343 {strides = array<i32>} : memref<72x128xf32, #tpu.memory_space<vmem>>, vector<1x128xf32>,
    %c8_390 = arith.constant 8 : index
    %c0_391 = arith.constant 0 : index
    %345 = vector.load %arg5[%c8_390, %c0_391] : memref<14x128xf32, #tpu.memory_space<vmem>>, vector<1x128xf32>
    %c9_392 = arith.constant 9 : index
    %c0_393 = arith.constant 0 : index
    %346 = vector.load %arg5[%c9_392, %c0_393] : memref<14x128xf32, #tpu.memory_space<vmem>>, vector<1x128xf32>
    %347 = arith.maximumf %345, %346 : vector<1x128xf32>
    %c10_394 = arith.constant 10 : index
    %c0_395 = arith.constant 0 : index
    %348 = vector.load %arg5[%c10_394, %c0_395] : memref<14x128xf32, #tpu.memory_space<vmem>>, vector<1x128xf32>
    %349 = arith.maximumf %347, %348 : vector<1x128xf32>
    %c40 = arith.constant 40 : index
    %c0_396 = arith.constant 0 : index
    %350 = vector.load %arg6[%c40, %c0_396] : memref<72x128xf32, #tpu.memory_space<vmem>>, vector<1x128xf32>
    tpu.vector_store %arg6[%c40, %c0_396], %349 {strides = array<i32>} : memref<72x128xf32, #tpu.memory_space<vmem>>, vector<1x128xf32>,
    %c10_397 = arith.constant 10 : index
    %c0_398 = arith.constant 0 : index
    %351 = vector.load %arg5[%c10_397, %c0_398] : memref<14x128xf32, #tpu.memory_space<vmem>>, vector<1x128xf32>
    %c11_399 = arith.constant 11 : index
    %c0_400 = arith.constant 0 : index
    %352 = vector.load %arg5[%c11_399, %c0_400] : memref<14x128xf32, #tpu.memory_space<vmem>>, vector<1x128xf32>
    %353 = arith.maximumf %351, %352 : vector<1x128xf32>
    %c12_401 = arith.constant 12 : index
    %c0_402 = arith.constant 0 : index
    %354 = vector.load %arg5[%c12_401, %c0_402] : memref<14x128xf32, #tpu.memory_space<vmem>>, vector<1x128xf32>
    %355 = arith.maximumf %353, %354 : vector<1x128xf32>
    %c41 = arith.constant 41 : index
    %c0_403 = arith.constant 0 : index
    %356 = vector.load %arg6[%c41, %c0_403] : memref<72x128xf32, #tpu.memory_space<vmem>>, vector<1x128xf32>
    tpu.vector_store %arg6[%c41, %c0_403], %355 {strides = array<i32>} : memref<72x128xf32, #tpu.memory_space<vmem>>, vector<1x128xf32>,
    %c224_404 = arith.constant 224 : index
    %c0_405 = arith.constant 0 : index
    %357 = vector.load %arg4[%c224_404, %c0_405] : memref<392x128xf32, #tpu.memory_space<vmem>>, vector<14x128xf32>
    %c238 = arith.constant 238 : index
    %c0_406 = arith.constant 0 : index
    %358 = vector.load %arg4[%c238, %c0_406] : memref<392x128xf32, #tpu.memory_space<vmem>>, vector<14x128xf32>
    %359 = arith.maximumf %357, %358 : vector<14x128xf32>
    %c252 = arith.constant 252 : index
    %c0_407 = arith.constant 0 : index
    %360 = vector.load %arg4[%c252, %c0_407] : memref<392x128xf32, #tpu.memory_space<vmem>>, vector<14x128xf32>
    %361 = arith.maximumf %359, %360 : vector<14x128xf32>
    %c0_408 = arith.constant 0 : index
    %c0_409 = arith.constant 0 : index
    %362 = vector.load %arg5[%c0_408, %c0_409] : memref<14x128xf32, #tpu.memory_space<vmem>>, vector<14x128xf32>
    tpu.vector_store %arg5[%c0_408, %c0_409], %361 {strides = array<i32>} : memref<14x128xf32, #tpu.memory_space<vmem>>, vector<14x128xf32>,
    %c0_410 = arith.constant 0 : index
    %c0_411 = arith.constant 0 : index
    %363 = vector.load %arg5[%c0_410, %c0_411] : memref<14x128xf32, #tpu.memory_space<vmem>>, vector<1x128xf32>
    %c1_412 = arith.constant 1 : index
    %c0_413 = arith.constant 0 : index
    %364 = vector.load %arg5[%c1_412, %c0_413] : memref<14x128xf32, #tpu.memory_space<vmem>>, vector<1x128xf32>
    %365 = arith.maximumf %363, %364 : vector<1x128xf32>
    %c2_414 = arith.constant 2 : index
    %c0_415 = arith.constant 0 : index
    %366 = vector.load %arg5[%c2_414, %c0_415] : memref<14x128xf32, #tpu.memory_space<vmem>>, vector<1x128xf32>
    %367 = arith.maximumf %365, %366 : vector<1x128xf32>
    %c42_416 = arith.constant 42 : index
    %c0_417 = arith.constant 0 : index
    %368 = vector.load %arg6[%c42_416, %c0_417] : memref<72x128xf32, #tpu.memory_space<vmem>>, vector<1x128xf32>
    tpu.vector_store %arg6[%c42_416, %c0_417], %367 {strides = array<i32>} : memref<72x128xf32, #tpu.memory_space<vmem>>, vector<1x128xf32>,
    %c2_418 = arith.constant 2 : index
    %c0_419 = arith.constant 0 : index
    %369 = vector.load %arg5[%c2_418, %c0_419] : memref<14x128xf32, #tpu.memory_space<vmem>>, vector<1x128xf32>
    %c3_420 = arith.constant 3 : index
    %c0_421 = arith.constant 0 : index
    %370 = vector.load %arg5[%c3_420, %c0_421] : memref<14x128xf32, #tpu.memory_space<vmem>>, vector<1x128xf32>
    %371 = arith.maximumf %369, %370 : vector<1x128xf32>
    %c4_422 = arith.constant 4 : index
    %c0_423 = arith.constant 0 : index
    %372 = vector.load %arg5[%c4_422, %c0_423] : memref<14x128xf32, #tpu.memory_space<vmem>>, vector<1x128xf32>
    %373 = arith.maximumf %371, %372 : vector<1x128xf32>
    %c43 = arith.constant 43 : index
    %c0_424 = arith.constant 0 : index
    %374 = vector.load %arg6[%c43, %c0_424] : memref<72x128xf32, #tpu.memory_space<vmem>>, vector<1x128xf32>
    tpu.vector_store %arg6[%c43, %c0_424], %373 {strides = array<i32>} : memref<72x128xf32, #tpu.memory_space<vmem>>, vector<1x128xf32>,
    %c4_425 = arith.constant 4 : index
    %c0_426 = arith.constant 0 : index
    %375 = vector.load %arg5[%c4_425, %c0_426] : memref<14x128xf32, #tpu.memory_space<vmem>>, vector<1x128xf32>
    %c5_427 = arith.constant 5 : index
    %c0_428 = arith.constant 0 : index
    %376 = vector.load %arg5[%c5_427, %c0_428] : memref<14x128xf32, #tpu.memory_space<vmem>>, vector<1x128xf32>
    %377 = arith.maximumf %375, %376 : vector<1x128xf32>
    %c6_429 = arith.constant 6 : index
    %c0_430 = arith.constant 0 : index
    %378 = vector.load %arg5[%c6_429, %c0_430] : memref<14x128xf32, #tpu.memory_space<vmem>>, vector<1x128xf32>
    %379 = arith.maximumf %377, %378 : vector<1x128xf32>
    %c44 = arith.constant 44 : index
    %c0_431 = arith.constant 0 : index
    %380 = vector.load %arg6[%c44, %c0_431] : memref<72x128xf32, #tpu.memory_space<vmem>>, vector<1x128xf32>
    tpu.vector_store %arg6[%c44, %c0_431], %379 {strides = array<i32>} : memref<72x128xf32, #tpu.memory_space<vmem>>, vector<1x128xf32>,
    %c6_432 = arith.constant 6 : index
    %c0_433 = arith.constant 0 : index
    %381 = vector.load %arg5[%c6_432, %c0_433] : memref<14x128xf32, #tpu.memory_space<vmem>>, vector<1x128xf32>
    %c7_434 = arith.constant 7 : index
    %c0_435 = arith.constant 0 : index
    %382 = vector.load %arg5[%c7_434, %c0_435] : memref<14x128xf32, #tpu.memory_space<vmem>>, vector<1x128xf32>
    %383 = arith.maximumf %381, %382 : vector<1x128xf32>
    %c8_436 = arith.constant 8 : index
    %c0_437 = arith.constant 0 : index
    %384 = vector.load %arg5[%c8_436, %c0_437] : memref<14x128xf32, #tpu.memory_space<vmem>>, vector<1x128xf32>
    %385 = arith.maximumf %383, %384 : vector<1x128xf32>
    %c45 = arith.constant 45 : index
    %c0_438 = arith.constant 0 : index
    %386 = vector.load %arg6[%c45, %c0_438] : memref<72x128xf32, #tpu.memory_space<vmem>>, vector<1x128xf32>
    tpu.vector_store %arg6[%c45, %c0_438], %385 {strides = array<i32>} : memref<72x128xf32, #tpu.memory_space<vmem>>, vector<1x128xf32>,
    %c8_439 = arith.constant 8 : index
    %c0_440 = arith.constant 0 : index
    %387 = vector.load %arg5[%c8_439, %c0_440] : memref<14x128xf32, #tpu.memory_space<vmem>>, vector<1x128xf32>
    %c9_441 = arith.constant 9 : index
    %c0_442 = arith.constant 0 : index
    %388 = vector.load %arg5[%c9_441, %c0_442] : memref<14x128xf32, #tpu.memory_space<vmem>>, vector<1x128xf32>
    %389 = arith.maximumf %387, %388 : vector<1x128xf32>
    %c10_443 = arith.constant 10 : index
    %c0_444 = arith.constant 0 : index
    %390 = vector.load %arg5[%c10_443, %c0_444] : memref<14x128xf32, #tpu.memory_space<vmem>>, vector<1x128xf32>
    %391 = arith.maximumf %389, %390 : vector<1x128xf32>
    %c46 = arith.constant 46 : index
    %c0_445 = arith.constant 0 : index
    %392 = vector.load %arg6[%c46, %c0_445] : memref<72x128xf32, #tpu.memory_space<vmem>>, vector<1x128xf32>
    tpu.vector_store %arg6[%c46, %c0_445], %391 {strides = array<i32>} : memref<72x128xf32, #tpu.memory_space<vmem>>, vector<1x128xf32>,
    %c10_446 = arith.constant 10 : index
    %c0_447 = arith.constant 0 : index
    %393 = vector.load %arg5[%c10_446, %c0_447] : memref<14x128xf32, #tpu.memory_space<vmem>>, vector<1x128xf32>
    %c11_448 = arith.constant 11 : index
    %c0_449 = arith.constant 0 : index
    %394 = vector.load %arg5[%c11_448, %c0_449] : memref<14x128xf32, #tpu.memory_space<vmem>>, vector<1x128xf32>
    %395 = arith.maximumf %393, %394 : vector<1x128xf32>
    %c12_450 = arith.constant 12 : index
    %c0_451 = arith.constant 0 : index
    %396 = vector.load %arg5[%c12_450, %c0_451] : memref<14x128xf32, #tpu.memory_space<vmem>>, vector<1x128xf32>
    %397 = arith.maximumf %395, %396 : vector<1x128xf32>
    %c47 = arith.constant 47 : index
    %c0_452 = arith.constant 0 : index
    %398 = vector.load %arg6[%c47, %c0_452] : memref<72x128xf32, #tpu.memory_space<vmem>>, vector<1x128xf32>
    tpu.vector_store %arg6[%c47, %c0_452], %397 {strides = array<i32>} : memref<72x128xf32, #tpu.memory_space<vmem>>, vector<1x128xf32>,
    %c252_453 = arith.constant 252 : index
    %c0_454 = arith.constant 0 : index
    %399 = vector.load %arg4[%c252_453, %c0_454] : memref<392x128xf32, #tpu.memory_space<vmem>>, vector<14x128xf32>
    %c266 = arith.constant 266 : index
    %c0_455 = arith.constant 0 : index
    %400 = vector.load %arg4[%c266, %c0_455] : memref<392x128xf32, #tpu.memory_space<vmem>>, vector<14x128xf32>
    %401 = arith.maximumf %399, %400 : vector<14x128xf32>
    %c280_456 = arith.constant 280 : index
    %c0_457 = arith.constant 0 : index
    %402 = vector.load %arg4[%c280_456, %c0_457] : memref<392x128xf32, #tpu.memory_space<vmem>>, vector<14x128xf32>
    %403 = arith.maximumf %401, %402 : vector<14x128xf32>
    %c0_458 = arith.constant 0 : index
    %c0_459 = arith.constant 0 : index
    %404 = vector.load %arg5[%c0_458, %c0_459] : memref<14x128xf32, #tpu.memory_space<vmem>>, vector<14x128xf32>
    tpu.vector_store %arg5[%c0_458, %c0_459], %403 {strides = array<i32>} : memref<14x128xf32, #tpu.memory_space<vmem>>, vector<14x128xf32>,
    %c0_460 = arith.constant 0 : index
    %c0_461 = arith.constant 0 : index
    %405 = vector.load %arg5[%c0_460, %c0_461] : memref<14x128xf32, #tpu.memory_space<vmem>>, vector<1x128xf32>
    %c1_462 = arith.constant 1 : index
    %c0_463 = arith.constant 0 : index
    %406 = vector.load %arg5[%c1_462, %c0_463] : memref<14x128xf32, #tpu.memory_space<vmem>>, vector<1x128xf32>
    %407 = arith.maximumf %405, %406 : vector<1x128xf32>
    %c2_464 = arith.constant 2 : index
    %c0_465 = arith.constant 0 : index
    %408 = vector.load %arg5[%c2_464, %c0_465] : memref<14x128xf32, #tpu.memory_space<vmem>>, vector<1x128xf32>
    %409 = arith.maximumf %407, %408 : vector<1x128xf32>
    %c48 = arith.constant 48 : index
    %c0_466 = arith.constant 0 : index
    %410 = vector.load %arg6[%c48, %c0_466] : memref<72x128xf32, #tpu.memory_space<vmem>>, vector<1x128xf32>
    tpu.vector_store %arg6[%c48, %c0_466], %409 {strides = array<i32>} : memref<72x128xf32, #tpu.memory_space<vmem>>, vector<1x128xf32>,
    %c2_467 = arith.constant 2 : index
    %c0_468 = arith.constant 0 : index
    %411 = vector.load %arg5[%c2_467, %c0_468] : memref<14x128xf32, #tpu.memory_space<vmem>>, vector<1x128xf32>
    %c3_469 = arith.constant 3 : index
    %c0_470 = arith.constant 0 : index
    %412 = vector.load %arg5[%c3_469, %c0_470] : memref<14x128xf32, #tpu.memory_space<vmem>>, vector<1x128xf32>
    %413 = arith.maximumf %411, %412 : vector<1x128xf32>
    %c4_471 = arith.constant 4 : index
    %c0_472 = arith.constant 0 : index
    %414 = vector.load %arg5[%c4_471, %c0_472] : memref<14x128xf32, #tpu.memory_space<vmem>>, vector<1x128xf32>
    %415 = arith.maximumf %413, %414 : vector<1x128xf32>
    %c49 = arith.constant 49 : index
    %c0_473 = arith.constant 0 : index
    %416 = vector.load %arg6[%c49, %c0_473] : memref<72x128xf32, #tpu.memory_space<vmem>>, vector<1x128xf32>
    tpu.vector_store %arg6[%c49, %c0_473], %415 {strides = array<i32>} : memref<72x128xf32, #tpu.memory_space<vmem>>, vector<1x128xf32>,
    %c4_474 = arith.constant 4 : index
    %c0_475 = arith.constant 0 : index
    %417 = vector.load %arg5[%c4_474, %c0_475] : memref<14x128xf32, #tpu.memory_space<vmem>>, vector<1x128xf32>
    %c5_476 = arith.constant 5 : index
    %c0_477 = arith.constant 0 : index
    %418 = vector.load %arg5[%c5_476, %c0_477] : memref<14x128xf32, #tpu.memory_space<vmem>>, vector<1x128xf32>
    %419 = arith.maximumf %417, %418 : vector<1x128xf32>
    %c6_478 = arith.constant 6 : index
    %c0_479 = arith.constant 0 : index
    %420 = vector.load %arg5[%c6_478, %c0_479] : memref<14x128xf32, #tpu.memory_space<vmem>>, vector<1x128xf32>
    %421 = arith.maximumf %419, %420 : vector<1x128xf32>
    %c50 = arith.constant 50 : index
    %c0_480 = arith.constant 0 : index
    %422 = vector.load %arg6[%c50, %c0_480] : memref<72x128xf32, #tpu.memory_space<vmem>>, vector<1x128xf32>
    tpu.vector_store %arg6[%c50, %c0_480], %421 {strides = array<i32>} : memref<72x128xf32, #tpu.memory_space<vmem>>, vector<1x128xf32>,
    %c6_481 = arith.constant 6 : index
    %c0_482 = arith.constant 0 : index
    %423 = vector.load %arg5[%c6_481, %c0_482] : memref<14x128xf32, #tpu.memory_space<vmem>>, vector<1x128xf32>
    %c7_483 = arith.constant 7 : index
    %c0_484 = arith.constant 0 : index
    %424 = vector.load %arg5[%c7_483, %c0_484] : memref<14x128xf32, #tpu.memory_space<vmem>>, vector<1x128xf32>
    %425 = arith.maximumf %423, %424 : vector<1x128xf32>
    %c8_485 = arith.constant 8 : index
    %c0_486 = arith.constant 0 : index
    %426 = vector.load %arg5[%c8_485, %c0_486] : memref<14x128xf32, #tpu.memory_space<vmem>>, vector<1x128xf32>
    %427 = arith.maximumf %425, %426 : vector<1x128xf32>
    %c51 = arith.constant 51 : index
    %c0_487 = arith.constant 0 : index
    %428 = vector.load %arg6[%c51, %c0_487] : memref<72x128xf32, #tpu.memory_space<vmem>>, vector<1x128xf32>
    tpu.vector_store %arg6[%c51, %c0_487], %427 {strides = array<i32>} : memref<72x128xf32, #tpu.memory_space<vmem>>, vector<1x128xf32>,
    %c8_488 = arith.constant 8 : index
    %c0_489 = arith.constant 0 : index
    %429 = vector.load %arg5[%c8_488, %c0_489] : memref<14x128xf32, #tpu.memory_space<vmem>>, vector<1x128xf32>
    %c9_490 = arith.constant 9 : index
    %c0_491 = arith.constant 0 : index
    %430 = vector.load %arg5[%c9_490, %c0_491] : memref<14x128xf32, #tpu.memory_space<vmem>>, vector<1x128xf32>
    %431 = arith.maximumf %429, %430 : vector<1x128xf32>
    %c10_492 = arith.constant 10 : index
    %c0_493 = arith.constant 0 : index
    %432 = vector.load %arg5[%c10_492, %c0_493] : memref<14x128xf32, #tpu.memory_space<vmem>>, vector<1x128xf32>
    %433 = arith.maximumf %431, %432 : vector<1x128xf32>
    %c52 = arith.constant 52 : index
    %c0_494 = arith.constant 0 : index
    %434 = vector.load %arg6[%c52, %c0_494] : memref<72x128xf32, #tpu.memory_space<vmem>>, vector<1x128xf32>
    tpu.vector_store %arg6[%c52, %c0_494], %433 {strides = array<i32>} : memref<72x128xf32, #tpu.memory_space<vmem>>, vector<1x128xf32>,
    %c10_495 = arith.constant 10 : index
    %c0_496 = arith.constant 0 : index
    %435 = vector.load %arg5[%c10_495, %c0_496] : memref<14x128xf32, #tpu.memory_space<vmem>>, vector<1x128xf32>
    %c11_497 = arith.constant 11 : index
    %c0_498 = arith.constant 0 : index
    %436 = vector.load %arg5[%c11_497, %c0_498] : memref<14x128xf32, #tpu.memory_space<vmem>>, vector<1x128xf32>
    %437 = arith.maximumf %435, %436 : vector<1x128xf32>
    %c12_499 = arith.constant 12 : index
    %c0_500 = arith.constant 0 : index
    %438 = vector.load %arg5[%c12_499, %c0_500] : memref<14x128xf32, #tpu.memory_space<vmem>>, vector<1x128xf32>
    %439 = arith.maximumf %437, %438 : vector<1x128xf32>
    %c53 = arith.constant 53 : index
    %c0_501 = arith.constant 0 : index
    %440 = vector.load %arg6[%c53, %c0_501] : memref<72x128xf32, #tpu.memory_space<vmem>>, vector<1x128xf32>
    tpu.vector_store %arg6[%c53, %c0_501], %439 {strides = array<i32>} : memref<72x128xf32, #tpu.memory_space<vmem>>, vector<1x128xf32>,
    %c280_502 = arith.constant 280 : index
    %c0_503 = arith.constant 0 : index
    %441 = vector.load %arg4[%c280_502, %c0_503] : memref<392x128xf32, #tpu.memory_space<vmem>>, vector<14x128xf32>
    %c294 = arith.constant 294 : index
    %c0_504 = arith.constant 0 : index
    %442 = vector.load %arg4[%c294, %c0_504] : memref<392x128xf32, #tpu.memory_space<vmem>>, vector<14x128xf32>
    %443 = arith.maximumf %441, %442 : vector<14x128xf32>
    %c308 = arith.constant 308 : index
    %c0_505 = arith.constant 0 : index
    %444 = vector.load %arg4[%c308, %c0_505] : memref<392x128xf32, #tpu.memory_space<vmem>>, vector<14x128xf32>
    %445 = arith.maximumf %443, %444 : vector<14x128xf32>
    %c0_506 = arith.constant 0 : index
    %c0_507 = arith.constant 0 : index
    %446 = vector.load %arg5[%c0_506, %c0_507] : memref<14x128xf32, #tpu.memory_space<vmem>>, vector<14x128xf32>
    tpu.vector_store %arg5[%c0_506, %c0_507], %445 {strides = array<i32>} : memref<14x128xf32, #tpu.memory_space<vmem>>, vector<14x128xf32>,
    %c0_508 = arith.constant 0 : index
    %c0_509 = arith.constant 0 : index
    %447 = vector.load %arg5[%c0_508, %c0_509] : memref<14x128xf32, #tpu.memory_space<vmem>>, vector<1x128xf32>
    %c1_510 = arith.constant 1 : index
    %c0_511 = arith.constant 0 : index
    %448 = vector.load %arg5[%c1_510, %c0_511] : memref<14x128xf32, #tpu.memory_space<vmem>>, vector<1x128xf32>
    %449 = arith.maximumf %447, %448 : vector<1x128xf32>
    %c2_512 = arith.constant 2 : index
    %c0_513 = arith.constant 0 : index
    %450 = vector.load %arg5[%c2_512, %c0_513] : memref<14x128xf32, #tpu.memory_space<vmem>>, vector<1x128xf32>
    %451 = arith.maximumf %449, %450 : vector<1x128xf32>
    %c54 = arith.constant 54 : index
    %c0_514 = arith.constant 0 : index
    %452 = vector.load %arg6[%c54, %c0_514] : memref<72x128xf32, #tpu.memory_space<vmem>>, vector<1x128xf32>
    tpu.vector_store %arg6[%c54, %c0_514], %451 {strides = array<i32>} : memref<72x128xf32, #tpu.memory_space<vmem>>, vector<1x128xf32>,
    %c2_515 = arith.constant 2 : index
    %c0_516 = arith.constant 0 : index
    %453 = vector.load %arg5[%c2_515, %c0_516] : memref<14x128xf32, #tpu.memory_space<vmem>>, vector<1x128xf32>
    %c3_517 = arith.constant 3 : index
    %c0_518 = arith.constant 0 : index
    %454 = vector.load %arg5[%c3_517, %c0_518] : memref<14x128xf32, #tpu.memory_space<vmem>>, vector<1x128xf32>
    %455 = arith.maximumf %453, %454 : vector<1x128xf32>
    %c4_519 = arith.constant 4 : index
    %c0_520 = arith.constant 0 : index
    %456 = vector.load %arg5[%c4_519, %c0_520] : memref<14x128xf32, #tpu.memory_space<vmem>>, vector<1x128xf32>
    %457 = arith.maximumf %455, %456 : vector<1x128xf32>
    %c55 = arith.constant 55 : index
    %c0_521 = arith.constant 0 : index
    %458 = vector.load %arg6[%c55, %c0_521] : memref<72x128xf32, #tpu.memory_space<vmem>>, vector<1x128xf32>
    tpu.vector_store %arg6[%c55, %c0_521], %457 {strides = array<i32>} : memref<72x128xf32, #tpu.memory_space<vmem>>, vector<1x128xf32>,
    %c4_522 = arith.constant 4 : index
    %c0_523 = arith.constant 0 : index
    %459 = vector.load %arg5[%c4_522, %c0_523] : memref<14x128xf32, #tpu.memory_space<vmem>>, vector<1x128xf32>
    %c5_524 = arith.constant 5 : index
    %c0_525 = arith.constant 0 : index
    %460 = vector.load %arg5[%c5_524, %c0_525] : memref<14x128xf32, #tpu.memory_space<vmem>>, vector<1x128xf32>
    %461 = arith.maximumf %459, %460 : vector<1x128xf32>
    %c6_526 = arith.constant 6 : index
    %c0_527 = arith.constant 0 : index
    %462 = vector.load %arg5[%c6_526, %c0_527] : memref<14x128xf32, #tpu.memory_space<vmem>>, vector<1x128xf32>
    %463 = arith.maximumf %461, %462 : vector<1x128xf32>
    %c56_528 = arith.constant 56 : index
    %c0_529 = arith.constant 0 : index
    %464 = vector.load %arg6[%c56_528, %c0_529] : memref<72x128xf32, #tpu.memory_space<vmem>>, vector<1x128xf32>
    tpu.vector_store %arg6[%c56_528, %c0_529], %463 {strides = array<i32>} : memref<72x128xf32, #tpu.memory_space<vmem>>, vector<1x128xf32>,
    %c6_530 = arith.constant 6 : index
    %c0_531 = arith.constant 0 : index
    %465 = vector.load %arg5[%c6_530, %c0_531] : memref<14x128xf32, #tpu.memory_space<vmem>>, vector<1x128xf32>
    %c7_532 = arith.constant 7 : index
    %c0_533 = arith.constant 0 : index
    %466 = vector.load %arg5[%c7_532, %c0_533] : memref<14x128xf32, #tpu.memory_space<vmem>>, vector<1x128xf32>
    %467 = arith.maximumf %465, %466 : vector<1x128xf32>
    %c8_534 = arith.constant 8 : index
    %c0_535 = arith.constant 0 : index
    %468 = vector.load %arg5[%c8_534, %c0_535] : memref<14x128xf32, #tpu.memory_space<vmem>>, vector<1x128xf32>
    %469 = arith.maximumf %467, %468 : vector<1x128xf32>
    %c57 = arith.constant 57 : index
    %c0_536 = arith.constant 0 : index
    %470 = vector.load %arg6[%c57, %c0_536] : memref<72x128xf32, #tpu.memory_space<vmem>>, vector<1x128xf32>
    tpu.vector_store %arg6[%c57, %c0_536], %469 {strides = array<i32>} : memref<72x128xf32, #tpu.memory_space<vmem>>, vector<1x128xf32>,
    %c8_537 = arith.constant 8 : index
    %c0_538 = arith.constant 0 : index
    %471 = vector.load %arg5[%c8_537, %c0_538] : memref<14x128xf32, #tpu.memory_space<vmem>>, vector<1x128xf32>
    %c9_539 = arith.constant 9 : index
    %c0_540 = arith.constant 0 : index
    %472 = vector.load %arg5[%c9_539, %c0_540] : memref<14x128xf32, #tpu.memory_space<vmem>>, vector<1x128xf32>
    %473 = arith.maximumf %471, %472 : vector<1x128xf32>
    %c10_541 = arith.constant 10 : index
    %c0_542 = arith.constant 0 : index
    %474 = vector.load %arg5[%c10_541, %c0_542] : memref<14x128xf32, #tpu.memory_space<vmem>>, vector<1x128xf32>
    %475 = arith.maximumf %473, %474 : vector<1x128xf32>
    %c58 = arith.constant 58 : index
    %c0_543 = arith.constant 0 : index
    %476 = vector.load %arg6[%c58, %c0_543] : memref<72x128xf32, #tpu.memory_space<vmem>>, vector<1x128xf32>
    tpu.vector_store %arg6[%c58, %c0_543], %475 {strides = array<i32>} : memref<72x128xf32, #tpu.memory_space<vmem>>, vector<1x128xf32>,
    %c10_544 = arith.constant 10 : index
    %c0_545 = arith.constant 0 : index
    %477 = vector.load %arg5[%c10_544, %c0_545] : memref<14x128xf32, #tpu.memory_space<vmem>>, vector<1x128xf32>
    %c11_546 = arith.constant 11 : index
    %c0_547 = arith.constant 0 : index
    %478 = vector.load %arg5[%c11_546, %c0_547] : memref<14x128xf32, #tpu.memory_space<vmem>>, vector<1x128xf32>
    %479 = arith.maximumf %477, %478 : vector<1x128xf32>
    %c12_548 = arith.constant 12 : index
    %c0_549 = arith.constant 0 : index
    %480 = vector.load %arg5[%c12_548, %c0_549] : memref<14x128xf32, #tpu.memory_space<vmem>>, vector<1x128xf32>
    %481 = arith.maximumf %479, %480 : vector<1x128xf32>
    %c59 = arith.constant 59 : index
    %c0_550 = arith.constant 0 : index
    %482 = vector.load %arg6[%c59, %c0_550] : memref<72x128xf32, #tpu.memory_space<vmem>>, vector<1x128xf32>
    tpu.vector_store %arg6[%c59, %c0_550], %481 {strides = array<i32>} : memref<72x128xf32, #tpu.memory_space<vmem>>, vector<1x128xf32>,
    %c308_551 = arith.constant 308 : index
    %c0_552 = arith.constant 0 : index
    %483 = vector.load %arg4[%c308_551, %c0_552] : memref<392x128xf32, #tpu.memory_space<vmem>>, vector<14x128xf32>
    %c322 = arith.constant 322 : index
    %c0_553 = arith.constant 0 : index
    %484 = vector.load %arg4[%c322, %c0_553] : memref<392x128xf32, #tpu.memory_space<vmem>>, vector<14x128xf32>
    %485 = arith.maximumf %483, %484 : vector<14x128xf32>
    %c336_554 = arith.constant 336 : index
    %c0_555 = arith.constant 0 : index
    %486 = vector.load %arg4[%c336_554, %c0_555] : memref<392x128xf32, #tpu.memory_space<vmem>>, vector<14x128xf32>
    %487 = arith.maximumf %485, %486 : vector<14x128xf32>
    %c0_556 = arith.constant 0 : index
    %c0_557 = arith.constant 0 : index
    %488 = vector.load %arg5[%c0_556, %c0_557] : memref<14x128xf32, #tpu.memory_space<vmem>>, vector<14x128xf32>
    tpu.vector_store %arg5[%c0_556, %c0_557], %487 {strides = array<i32>} : memref<14x128xf32, #tpu.memory_space<vmem>>, vector<14x128xf32>,
    %c0_558 = arith.constant 0 : index
    %c0_559 = arith.constant 0 : index
    %489 = vector.load %arg5[%c0_558, %c0_559] : memref<14x128xf32, #tpu.memory_space<vmem>>, vector<1x128xf32>
    %c1_560 = arith.constant 1 : index
    %c0_561 = arith.constant 0 : index
    %490 = vector.load %arg5[%c1_560, %c0_561] : memref<14x128xf32, #tpu.memory_space<vmem>>, vector<1x128xf32>
    %491 = arith.maximumf %489, %490 : vector<1x128xf32>
    %c2_562 = arith.constant 2 : index
    %c0_563 = arith.constant 0 : index
    %492 = vector.load %arg5[%c2_562, %c0_563] : memref<14x128xf32, #tpu.memory_space<vmem>>, vector<1x128xf32>
    %493 = arith.maximumf %491, %492 : vector<1x128xf32>
    %c60 = arith.constant 60 : index
    %c0_564 = arith.constant 0 : index
    %494 = vector.load %arg6[%c60, %c0_564] : memref<72x128xf32, #tpu.memory_space<vmem>>, vector<1x128xf32>
    tpu.vector_store %arg6[%c60, %c0_564], %493 {strides = array<i32>} : memref<72x128xf32, #tpu.memory_space<vmem>>, vector<1x128xf32>,
    %c2_565 = arith.constant 2 : index
    %c0_566 = arith.constant 0 : index
    %495 = vector.load %arg5[%c2_565, %c0_566] : memref<14x128xf32, #tpu.memory_space<vmem>>, vector<1x128xf32>
    %c3_567 = arith.constant 3 : index
    %c0_568 = arith.constant 0 : index
    %496 = vector.load %arg5[%c3_567, %c0_568] : memref<14x128xf32, #tpu.memory_space<vmem>>, vector<1x128xf32>
    %497 = arith.maximumf %495, %496 : vector<1x128xf32>
    %c4_569 = arith.constant 4 : index
    %c0_570 = arith.constant 0 : index
    %498 = vector.load %arg5[%c4_569, %c0_570] : memref<14x128xf32, #tpu.memory_space<vmem>>, vector<1x128xf32>
    %499 = arith.maximumf %497, %498 : vector<1x128xf32>
    %c61 = arith.constant 61 : index
    %c0_571 = arith.constant 0 : index
    %500 = vector.load %arg6[%c61, %c0_571] : memref<72x128xf32, #tpu.memory_space<vmem>>, vector<1x128xf32>
    tpu.vector_store %arg6[%c61, %c0_571], %499 {strides = array<i32>} : memref<72x128xf32, #tpu.memory_space<vmem>>, vector<1x128xf32>,
    %c4_572 = arith.constant 4 : index
    %c0_573 = arith.constant 0 : index
    %501 = vector.load %arg5[%c4_572, %c0_573] : memref<14x128xf32, #tpu.memory_space<vmem>>, vector<1x128xf32>
    %c5_574 = arith.constant 5 : index
    %c0_575 = arith.constant 0 : index
    %502 = vector.load %arg5[%c5_574, %c0_575] : memref<14x128xf32, #tpu.memory_space<vmem>>, vector<1x128xf32>
    %503 = arith.maximumf %501, %502 : vector<1x128xf32>
    %c6_576 = arith.constant 6 : index
    %c0_577 = arith.constant 0 : index
    %504 = vector.load %arg5[%c6_576, %c0_577] : memref<14x128xf32, #tpu.memory_space<vmem>>, vector<1x128xf32>
    %505 = arith.maximumf %503, %504 : vector<1x128xf32>
    %c62 = arith.constant 62 : index
    %c0_578 = arith.constant 0 : index
    %506 = vector.load %arg6[%c62, %c0_578] : memref<72x128xf32, #tpu.memory_space<vmem>>, vector<1x128xf32>
    tpu.vector_store %arg6[%c62, %c0_578], %505 {strides = array<i32>} : memref<72x128xf32, #tpu.memory_space<vmem>>, vector<1x128xf32>,
    %c6_579 = arith.constant 6 : index
    %c0_580 = arith.constant 0 : index
    %507 = vector.load %arg5[%c6_579, %c0_580] : memref<14x128xf32, #tpu.memory_space<vmem>>, vector<1x128xf32>
    %c7_581 = arith.constant 7 : index
    %c0_582 = arith.constant 0 : index
    %508 = vector.load %arg5[%c7_581, %c0_582] : memref<14x128xf32, #tpu.memory_space<vmem>>, vector<1x128xf32>
    %509 = arith.maximumf %507, %508 : vector<1x128xf32>
    %c8_583 = arith.constant 8 : index
    %c0_584 = arith.constant 0 : index
    %510 = vector.load %arg5[%c8_583, %c0_584] : memref<14x128xf32, #tpu.memory_space<vmem>>, vector<1x128xf32>
    %511 = arith.maximumf %509, %510 : vector<1x128xf32>
    %c63 = arith.constant 63 : index
    %c0_585 = arith.constant 0 : index
    %512 = vector.load %arg6[%c63, %c0_585] : memref<72x128xf32, #tpu.memory_space<vmem>>, vector<1x128xf32>
    tpu.vector_store %arg6[%c63, %c0_585], %511 {strides = array<i32>} : memref<72x128xf32, #tpu.memory_space<vmem>>, vector<1x128xf32>,
    %c8_586 = arith.constant 8 : index
    %c0_587 = arith.constant 0 : index
    %513 = vector.load %arg5[%c8_586, %c0_587] : memref<14x128xf32, #tpu.memory_space<vmem>>, vector<1x128xf32>
    %c9_588 = arith.constant 9 : index
    %c0_589 = arith.constant 0 : index
    %514 = vector.load %arg5[%c9_588, %c0_589] : memref<14x128xf32, #tpu.memory_space<vmem>>, vector<1x128xf32>
    %515 = arith.maximumf %513, %514 : vector<1x128xf32>
    %c10_590 = arith.constant 10 : index
    %c0_591 = arith.constant 0 : index
    %516 = vector.load %arg5[%c10_590, %c0_591] : memref<14x128xf32, #tpu.memory_space<vmem>>, vector<1x128xf32>
    %517 = arith.maximumf %515, %516 : vector<1x128xf32>
    %c64 = arith.constant 64 : index
    %c0_592 = arith.constant 0 : index
    %518 = vector.load %arg6[%c64, %c0_592] : memref<72x128xf32, #tpu.memory_space<vmem>>, vector<1x128xf32>
    tpu.vector_store %arg6[%c64, %c0_592], %517 {strides = array<i32>} : memref<72x128xf32, #tpu.memory_space<vmem>>, vector<1x128xf32>,
    %c10_593 = arith.constant 10 : index
    %c0_594 = arith.constant 0 : index
    %519 = vector.load %arg5[%c10_593, %c0_594] : memref<14x128xf32, #tpu.memory_space<vmem>>, vector<1x128xf32>
    %c11_595 = arith.constant 11 : index
    %c0_596 = arith.constant 0 : index
    %520 = vector.load %arg5[%c11_595, %c0_596] : memref<14x128xf32, #tpu.memory_space<vmem>>, vector<1x128xf32>
    %521 = arith.maximumf %519, %520 : vector<1x128xf32>
    %c12_597 = arith.constant 12 : index
    %c0_598 = arith.constant 0 : index
    %522 = vector.load %arg5[%c12_597, %c0_598] : memref<14x128xf32, #tpu.memory_space<vmem>>, vector<1x128xf32>
    %523 = arith.maximumf %521, %522 : vector<1x128xf32>
    %c65 = arith.constant 65 : index
    %c0_599 = arith.constant 0 : index
    %524 = vector.load %arg6[%c65, %c0_599] : memref<72x128xf32, #tpu.memory_space<vmem>>, vector<1x128xf32>
    tpu.vector_store %arg6[%c65, %c0_599], %523 {strides = array<i32>} : memref<72x128xf32, #tpu.memory_space<vmem>>, vector<1x128xf32>,
    %c336_600 = arith.constant 336 : index
    %c0_601 = arith.constant 0 : index
    %525 = vector.load %arg4[%c336_600, %c0_601] : memref<392x128xf32, #tpu.memory_space<vmem>>, vector<14x128xf32>
    %c350 = arith.constant 350 : index
    %c0_602 = arith.constant 0 : index
    %526 = vector.load %arg4[%c350, %c0_602] : memref<392x128xf32, #tpu.memory_space<vmem>>, vector<14x128xf32>
    %527 = arith.maximumf %525, %526 : vector<14x128xf32>
    %c364 = arith.constant 364 : index
    %c0_603 = arith.constant 0 : index
    %528 = vector.load %arg4[%c364, %c0_603] : memref<392x128xf32, #tpu.memory_space<vmem>>, vector<14x128xf32>
    %529 = arith.maximumf %527, %528 : vector<14x128xf32>
    %c0_604 = arith.constant 0 : index
    %c0_605 = arith.constant 0 : index
    %530 = vector.load %arg5[%c0_604, %c0_605] : memref<14x128xf32, #tpu.memory_space<vmem>>, vector<14x128xf32>
    tpu.vector_store %arg5[%c0_604, %c0_605], %529 {strides = array<i32>} : memref<14x128xf32, #tpu.memory_space<vmem>>, vector<14x128xf32>,
    %c0_606 = arith.constant 0 : index
    %c0_607 = arith.constant 0 : index
    %531 = vector.load %arg5[%c0_606, %c0_607] : memref<14x128xf32, #tpu.memory_space<vmem>>, vector<1x128xf32>
    %c1_608 = arith.constant 1 : index
    %c0_609 = arith.constant 0 : index
    %532 = vector.load %arg5[%c1_608, %c0_609] : memref<14x128xf32, #tpu.memory_space<vmem>>, vector<1x128xf32>
    %533 = arith.maximumf %531, %532 : vector<1x128xf32>
    %c2_610 = arith.constant 2 : index
    %c0_611 = arith.constant 0 : index
    %534 = vector.load %arg5[%c2_610, %c0_611] : memref<14x128xf32, #tpu.memory_space<vmem>>, vector<1x128xf32>
    %535 = arith.maximumf %533, %534 : vector<1x128xf32>
    %c66 = arith.constant 66 : index
    %c0_612 = arith.constant 0 : index
    %536 = vector.load %arg6[%c66, %c0_612] : memref<72x128xf32, #tpu.memory_space<vmem>>, vector<1x128xf32>
    tpu.vector_store %arg6[%c66, %c0_612], %535 {strides = array<i32>} : memref<72x128xf32, #tpu.memory_space<vmem>>, vector<1x128xf32>,
    %c2_613 = arith.constant 2 : index
    %c0_614 = arith.constant 0 : index
    %537 = vector.load %arg5[%c2_613, %c0_614] : memref<14x128xf32, #tpu.memory_space<vmem>>, vector<1x128xf32>
    %c3_615 = arith.constant 3 : index
    %c0_616 = arith.constant 0 : index
    %538 = vector.load %arg5[%c3_615, %c0_616] : memref<14x128xf32, #tpu.memory_space<vmem>>, vector<1x128xf32>
    %539 = arith.maximumf %537, %538 : vector<1x128xf32>
    %c4_617 = arith.constant 4 : index
    %c0_618 = arith.constant 0 : index
    %540 = vector.load %arg5[%c4_617, %c0_618] : memref<14x128xf32, #tpu.memory_space<vmem>>, vector<1x128xf32>
    %541 = arith.maximumf %539, %540 : vector<1x128xf32>
    %c67 = arith.constant 67 : index
    %c0_619 = arith.constant 0 : index
    %542 = vector.load %arg6[%c67, %c0_619] : memref<72x128xf32, #tpu.memory_space<vmem>>, vector<1x128xf32>
    tpu.vector_store %arg6[%c67, %c0_619], %541 {strides = array<i32>} : memref<72x128xf32, #tpu.memory_space<vmem>>, vector<1x128xf32>,
    %c4_620 = arith.constant 4 : index
    %c0_621 = arith.constant 0 : index
    %543 = vector.load %arg5[%c4_620, %c0_621] : memref<14x128xf32, #tpu.memory_space<vmem>>, vector<1x128xf32>
    %c5_622 = arith.constant 5 : index
    %c0_623 = arith.constant 0 : index
    %544 = vector.load %arg5[%c5_622, %c0_623] : memref<14x128xf32, #tpu.memory_space<vmem>>, vector<1x128xf32>
    %545 = arith.maximumf %543, %544 : vector<1x128xf32>
    %c6_624 = arith.constant 6 : index
    %c0_625 = arith.constant 0 : index
    %546 = vector.load %arg5[%c6_624, %c0_625] : memref<14x128xf32, #tpu.memory_space<vmem>>, vector<1x128xf32>
    %547 = arith.maximumf %545, %546 : vector<1x128xf32>
    %c68 = arith.constant 68 : index
    %c0_626 = arith.constant 0 : index
    %548 = vector.load %arg6[%c68, %c0_626] : memref<72x128xf32, #tpu.memory_space<vmem>>, vector<1x128xf32>
    tpu.vector_store %arg6[%c68, %c0_626], %547 {strides = array<i32>} : memref<72x128xf32, #tpu.memory_space<vmem>>, vector<1x128xf32>,
    %c6_627 = arith.constant 6 : index
    %c0_628 = arith.constant 0 : index
    %549 = vector.load %arg5[%c6_627, %c0_628] : memref<14x128xf32, #tpu.memory_space<vmem>>, vector<1x128xf32>
    %c7_629 = arith.constant 7 : index
    %c0_630 = arith.constant 0 : index
    %550 = vector.load %arg5[%c7_629, %c0_630] : memref<14x128xf32, #tpu.memory_space<vmem>>, vector<1x128xf32>
    %551 = arith.maximumf %549, %550 : vector<1x128xf32>
    %c8_631 = arith.constant 8 : index
    %c0_632 = arith.constant 0 : index
    %552 = vector.load %arg5[%c8_631, %c0_632] : memref<14x128xf32, #tpu.memory_space<vmem>>, vector<1x128xf32>
    %553 = arith.maximumf %551, %552 : vector<1x128xf32>
    %c69 = arith.constant 69 : index
    %c0_633 = arith.constant 0 : index
    %554 = vector.load %arg6[%c69, %c0_633] : memref<72x128xf32, #tpu.memory_space<vmem>>, vector<1x128xf32>
    tpu.vector_store %arg6[%c69, %c0_633], %553 {strides = array<i32>} : memref<72x128xf32, #tpu.memory_space<vmem>>, vector<1x128xf32>,
    %c8_634 = arith.constant 8 : index
    %c0_635 = arith.constant 0 : index
    %555 = vector.load %arg5[%c8_634, %c0_635] : memref<14x128xf32, #tpu.memory_space<vmem>>, vector<1x128xf32>
    %c9_636 = arith.constant 9 : index
    %c0_637 = arith.constant 0 : index
    %556 = vector.load %arg5[%c9_636, %c0_637] : memref<14x128xf32, #tpu.memory_space<vmem>>, vector<1x128xf32>
    %557 = arith.maximumf %555, %556 : vector<1x128xf32>
    %c10_638 = arith.constant 10 : index
    %c0_639 = arith.constant 0 : index
    %558 = vector.load %arg5[%c10_638, %c0_639] : memref<14x128xf32, #tpu.memory_space<vmem>>, vector<1x128xf32>
    %559 = arith.maximumf %557, %558 : vector<1x128xf32>
    %c70_640 = arith.constant 70 : index
    %c0_641 = arith.constant 0 : index
    %560 = vector.load %arg6[%c70_640, %c0_641] : memref<72x128xf32, #tpu.memory_space<vmem>>, vector<1x128xf32>
    tpu.vector_store %arg6[%c70_640, %c0_641], %559 {strides = array<i32>} : memref<72x128xf32, #tpu.memory_space<vmem>>, vector<1x128xf32>,
    %c10_642 = arith.constant 10 : index
    %c0_643 = arith.constant 0 : index
    %561 = vector.load %arg5[%c10_642, %c0_643] : memref<14x128xf32, #tpu.memory_space<vmem>>, vector<1x128xf32>
    %c11_644 = arith.constant 11 : index
    %c0_645 = arith.constant 0 : index
    %562 = vector.load %arg5[%c11_644, %c0_645] : memref<14x128xf32, #tpu.memory_space<vmem>>, vector<1x128xf32>
    %563 = arith.maximumf %561, %562 : vector<1x128xf32>
    %c12_646 = arith.constant 12 : index
    %c0_647 = arith.constant 0 : index
    %564 = vector.load %arg5[%c12_646, %c0_647] : memref<14x128xf32, #tpu.memory_space<vmem>>, vector<1x128xf32>
    %565 = arith.maximumf %563, %564 : vector<1x128xf32>
    %c71 = arith.constant 71 : index
    %c0_648 = arith.constant 0 : index
    %566 = vector.load %arg6[%c71, %c0_648] : memref<72x128xf32, #tpu.memory_space<vmem>>, vector<1x128xf32>
    tpu.vector_store %arg6[%c71, %c0_648], %565 {strides = array<i32>} : memref<72x128xf32, #tpu.memory_space<vmem>>, vector<1x128xf32>,
    %c0_649 = arith.constant 0 : index
    %c0_650 = arith.constant 0 : index
    %567 = vector.load %arg6[%c0_649, %c0_650] : memref<72x128xf32, #tpu.memory_space<vmem>>, vector<72x128xf32>
    %568 = arith.mulf %567, %567 : vector<72x128xf32>
    %c1_i32 = arith.constant 1 : i32
    %569 = tpu.dynamic_rotate %568 by %c1_i32 dim 1 : vector<72x128xf32>, i32 -> vector<72x128xf32>
    %c127_i32 = arith.constant 127 : i32
    %570 = tpu.dynamic_rotate %568 by %c127_i32 dim 1 : vector<72x128xf32>, i32 -> vector<72x128xf32>
    %571 = arith.addf %568, %569 : vector<72x128xf32>
    %572 = arith.addf %571, %570 : vector<72x128xf32>
    %c2_i32 = arith.constant 2 : i32
    %573 = tpu.dynamic_rotate %568 by %c2_i32 dim 1 : vector<72x128xf32>, i32 -> vector<72x128xf32>
    %c126_i32 = arith.constant 126 : i32
    %574 = tpu.dynamic_rotate %568 by %c126_i32 dim 1 : vector<72x128xf32>, i32 -> vector<72x128xf32>
    %575 = arith.addf %572, %573 : vector<72x128xf32>
    %576 = arith.addf %575, %574 : vector<72x128xf32>
    %cst_651 = arith.constant 2.000000e-05 : f32
    %577 = vector.broadcast %cst_651 : f32 to vector<72x128xf32>
    %578 = arith.mulf %577, %576 : vector<72x128xf32>
    %cst_652 = arith.constant 1.000000e+00 : f32
    %579 = vector.broadcast %cst_652 : f32 to vector<72x128xf32>
    %580 = arith.addf %579, %578 : vector<72x128xf32>
    %581 = math.rsqrt %580 : vector<72x128xf32>
    %582 = math.sqrt %580 : vector<72x128xf32>
    %583 = math.rsqrt %582 : vector<72x128xf32>
    %584 = arith.mulf %581, %583 : vector<72x128xf32>
    %585 = arith.mulf %567, %584 : vector<72x128xf32>
    %586 = arith.truncf %585 : vector<72x128xf32> to vector<72x128xbf16>
    %c0_653 = arith.constant 0 : index
    %c0_654 = arith.constant 0 : index
    %587 = vector.load %arg3[%c0_653, %c0_654] : memref<72x128xbf16, #tpu.memory_space<vmem>>, vector<72x128xbf16>
    tpu.vector_store %arg3[%c0_653, %c0_654], %586 {strides = array<i32>} : memref<72x128xbf16, #tpu.memory_space<vmem>>, vector<72x128xbf16>,
    return
  }
}

module attributes {stable_mosaic.version = 11 : i64} {
  func.func @_conv2_pool_conv34_kernel(%arg0: memref<72x2432xbf16, #tpu.memory_space<vmem>>, %arg1: memref<2432x256xbf16, #tpu.memory_space<vmem>>, %arg2: memref<1x256xf32, #tpu.memory_space<vmem>>, %arg3: memref<2304x384xbf16, #tpu.memory_space<vmem>>, %arg4: memref<1x384xf32, #tpu.memory_space<vmem>>, %arg5: memref<384x128xbf16, #tpu.memory_space<vmem>>, %arg6: memref<1x128xf32, #tpu.memory_space<vmem>>, %arg7: memref<8x128xf32, #tpu.memory_space<vmem>>, %arg8: memref<72x256xf32, #tpu.memory_space<vmem>>, %arg9: memref<6x256xf32, #tpu.memory_space<vmem>>, %arg10: memref<8x256xf32, #tpu.memory_space<vmem>>, %arg11: memref<8x2304xf32, #tpu.memory_space<vmem>>) attributes {dimension_semantics = [], scalar_prefetch = 0 : i64, scratch_operands = 4 : i64, tpu.core_type = #tpu.core_type<tc>} {
    %c0 = arith.constant 0 : index
    %c0_0 = arith.constant 0 : index
    %0 = vector.load %arg0[%c0, %c0_0] : memref<72x2432xbf16, #tpu.memory_space<vmem>>, vector<72x2432xbf16>
    %c0_1 = arith.constant 0 : index
    %c0_2 = arith.constant 0 : index
    %1 = vector.load %arg1[%c0_1, %c0_2] : memref<2432x256xbf16, #tpu.memory_space<vmem>>, vector<2432x256xbf16>
    %cst = arith.constant dense<0.000000e+00> : vector<72x256xf32>
    %2 = tpu.matmul %0, %1, %cst {dimension_numbers = #tpu.dot_dimension_numbers<[1], [0], [0], [1], [0, 0, 1, 1], [], []>} : vector<72x2432xbf16>, vector<2432x256xbf16>, vector<72x256xf32> -> vector<72x256xf32>
    %c0_3 = arith.constant 0 : index
    %c0_4 = arith.constant 0 : index
    %3 = vector.load %arg2[%c0_3, %c0_4] : memref<1x256xf32, #tpu.memory_space<vmem>>, vector<1x256xf32>
    %4 = vector.broadcast %3 : vector<1x256xf32> to vector<72x256xf32>
    %5 = arith.addf %2, %4 : vector<72x256xf32>
    %cst_5 = arith.constant 0.000000e+00 : f32
    %6 = vector.broadcast %cst_5 : f32 to vector<72x256xf32>
    %7 = arith.maximumf %5, %6 : vector<72x256xf32>
    %c0_6 = arith.constant 0 : index
    %c0_7 = arith.constant 0 : index
    %8 = vector.load %arg8[%c0_6, %c0_7] : memref<72x256xf32, #tpu.memory_space<vmem>>, vector<72x256xf32>
    tpu.vector_store %arg8[%c0_6, %c0_7], %7 {strides = array<i32>} : memref<72x256xf32, #tpu.memory_space<vmem>>, vector<72x256xf32>,
    %c0_8 = arith.constant 0 : index
    %c0_9 = arith.constant 0 : index
    %9 = vector.load %arg8[%c0_8, %c0_9] : memref<72x256xf32, #tpu.memory_space<vmem>>, vector<6x256xf32>
    %c6 = arith.constant 6 : index
    %c0_10 = arith.constant 0 : index
    %10 = vector.load %arg8[%c6, %c0_10] : memref<72x256xf32, #tpu.memory_space<vmem>>, vector<6x256xf32>
    %11 = arith.maximumf %9, %10 : vector<6x256xf32>
    %c12 = arith.constant 12 : index
    %c0_11 = arith.constant 0 : index
    %12 = vector.load %arg8[%c12, %c0_11] : memref<72x256xf32, #tpu.memory_space<vmem>>, vector<6x256xf32>
    %13 = arith.maximumf %11, %12 : vector<6x256xf32>
    %c0_12 = arith.constant 0 : index
    %c0_13 = arith.constant 0 : index
    %14 = vector.load %arg9[%c0_12, %c0_13] : memref<6x256xf32, #tpu.memory_space<vmem>>, vector<6x256xf32>
    tpu.vector_store %arg9[%c0_12, %c0_13], %13 {strides = array<i32>} : memref<6x256xf32, #tpu.memory_space<vmem>>, vector<6x256xf32>,
    %c0_14 = arith.constant 0 : index
    %c0_15 = arith.constant 0 : index
    %15 = vector.load %arg9[%c0_14, %c0_15] : memref<6x256xf32, #tpu.memory_space<vmem>>, vector<1x256xf32>
    %c1 = arith.constant 1 : index
    %c0_16 = arith.constant 0 : index
    %16 = vector.load %arg9[%c1, %c0_16] : memref<6x256xf32, #tpu.memory_space<vmem>>, vector<1x256xf32>
    %17 = arith.maximumf %15, %16 : vector<1x256xf32>
    %c2 = arith.constant 2 : index
    %c0_17 = arith.constant 0 : index
    %18 = vector.load %arg9[%c2, %c0_17] : memref<6x256xf32, #tpu.memory_space<vmem>>, vector<1x256xf32>
    %19 = arith.maximumf %17, %18 : vector<1x256xf32>
    %c0_18 = arith.constant 0 : index
    %c0_19 = arith.constant 0 : index
    %20 = vector.load %arg10[%c0_18, %c0_19] : memref<8x256xf32, #tpu.memory_space<vmem>>, vector<1x256xf32>
    tpu.vector_store %arg10[%c0_18, %c0_19], %19 {strides = array<i32>} : memref<8x256xf32, #tpu.memory_space<vmem>>, vector<1x256xf32>,
    %c2_20 = arith.constant 2 : index
    %c0_21 = arith.constant 0 : index
    %21 = vector.load %arg9[%c2_20, %c0_21] : memref<6x256xf32, #tpu.memory_space<vmem>>, vector<1x256xf32>
    %c3 = arith.constant 3 : index
    %c0_22 = arith.constant 0 : index
    %22 = vector.load %arg9[%c3, %c0_22] : memref<6x256xf32, #tpu.memory_space<vmem>>, vector<1x256xf32>
    %23 = arith.maximumf %21, %22 : vector<1x256xf32>
    %c4 = arith.constant 4 : index
    %c0_23 = arith.constant 0 : index
    %24 = vector.load %arg9[%c4, %c0_23] : memref<6x256xf32, #tpu.memory_space<vmem>>, vector<1x256xf32>
    %25 = arith.maximumf %23, %24 : vector<1x256xf32>
    %c1_24 = arith.constant 1 : index
    %c0_25 = arith.constant 0 : index
    %26 = vector.load %arg10[%c1_24, %c0_25] : memref<8x256xf32, #tpu.memory_space<vmem>>, vector<1x256xf32>
    tpu.vector_store %arg10[%c1_24, %c0_25], %25 {strides = array<i32>} : memref<8x256xf32, #tpu.memory_space<vmem>>, vector<1x256xf32>,
    %c12_26 = arith.constant 12 : index
    %c0_27 = arith.constant 0 : index
    %27 = vector.load %arg8[%c12_26, %c0_27] : memref<72x256xf32, #tpu.memory_space<vmem>>, vector<6x256xf32>
    %c18 = arith.constant 18 : index
    %c0_28 = arith.constant 0 : index
    %28 = vector.load %arg8[%c18, %c0_28] : memref<72x256xf32, #tpu.memory_space<vmem>>, vector<6x256xf32>
    %29 = arith.maximumf %27, %28 : vector<6x256xf32>
    %c24 = arith.constant 24 : index
    %c0_29 = arith.constant 0 : index
    %30 = vector.load %arg8[%c24, %c0_29] : memref<72x256xf32, #tpu.memory_space<vmem>>, vector<6x256xf32>
    %31 = arith.maximumf %29, %30 : vector<6x256xf32>
    %c0_30 = arith.constant 0 : index
    %c0_31 = arith.constant 0 : index
    %32 = vector.load %arg9[%c0_30, %c0_31] : memref<6x256xf32, #tpu.memory_space<vmem>>, vector<6x256xf32>
    tpu.vector_store %arg9[%c0_30, %c0_31], %31 {strides = array<i32>} : memref<6x256xf32, #tpu.memory_space<vmem>>, vector<6x256xf32>,
    %c0_32 = arith.constant 0 : index
    %c0_33 = arith.constant 0 : index
    %33 = vector.load %arg9[%c0_32, %c0_33] : memref<6x256xf32, #tpu.memory_space<vmem>>, vector<1x256xf32>
    %c1_34 = arith.constant 1 : index
    %c0_35 = arith.constant 0 : index
    %34 = vector.load %arg9[%c1_34, %c0_35] : memref<6x256xf32, #tpu.memory_space<vmem>>, vector<1x256xf32>
    %35 = arith.maximumf %33, %34 : vector<1x256xf32>
    %c2_36 = arith.constant 2 : index
    %c0_37 = arith.constant 0 : index
    %36 = vector.load %arg9[%c2_36, %c0_37] : memref<6x256xf32, #tpu.memory_space<vmem>>, vector<1x256xf32>
    %37 = arith.maximumf %35, %36 : vector<1x256xf32>
    %c2_38 = arith.constant 2 : index
    %c0_39 = arith.constant 0 : index
    %38 = vector.load %arg10[%c2_38, %c0_39] : memref<8x256xf32, #tpu.memory_space<vmem>>, vector<1x256xf32>
    tpu.vector_store %arg10[%c2_38, %c0_39], %37 {strides = array<i32>} : memref<8x256xf32, #tpu.memory_space<vmem>>, vector<1x256xf32>,
    %c2_40 = arith.constant 2 : index
    %c0_41 = arith.constant 0 : index
    %39 = vector.load %arg9[%c2_40, %c0_41] : memref<6x256xf32, #tpu.memory_space<vmem>>, vector<1x256xf32>
    %c3_42 = arith.constant 3 : index
    %c0_43 = arith.constant 0 : index
    %40 = vector.load %arg9[%c3_42, %c0_43] : memref<6x256xf32, #tpu.memory_space<vmem>>, vector<1x256xf32>
    %41 = arith.maximumf %39, %40 : vector<1x256xf32>
    %c4_44 = arith.constant 4 : index
    %c0_45 = arith.constant 0 : index
    %42 = vector.load %arg9[%c4_44, %c0_45] : memref<6x256xf32, #tpu.memory_space<vmem>>, vector<1x256xf32>
    %43 = arith.maximumf %41, %42 : vector<1x256xf32>
    %c3_46 = arith.constant 3 : index
    %c0_47 = arith.constant 0 : index
    %44 = vector.load %arg10[%c3_46, %c0_47] : memref<8x256xf32, #tpu.memory_space<vmem>>, vector<1x256xf32>
    tpu.vector_store %arg10[%c3_46, %c0_47], %43 {strides = array<i32>} : memref<8x256xf32, #tpu.memory_space<vmem>>, vector<1x256xf32>,
    %c36 = arith.constant 36 : index
    %c0_48 = arith.constant 0 : index
    %45 = vector.load %arg8[%c36, %c0_48] : memref<72x256xf32, #tpu.memory_space<vmem>>, vector<6x256xf32>
    %c42 = arith.constant 42 : index
    %c0_49 = arith.constant 0 : index
    %46 = vector.load %arg8[%c42, %c0_49] : memref<72x256xf32, #tpu.memory_space<vmem>>, vector<6x256xf32>
    %47 = arith.maximumf %45, %46 : vector<6x256xf32>
    %c48 = arith.constant 48 : index
    %c0_50 = arith.constant 0 : index
    %48 = vector.load %arg8[%c48, %c0_50] : memref<72x256xf32, #tpu.memory_space<vmem>>, vector<6x256xf32>
    %49 = arith.maximumf %47, %48 : vector<6x256xf32>
    %c0_51 = arith.constant 0 : index
    %c0_52 = arith.constant 0 : index
    %50 = vector.load %arg9[%c0_51, %c0_52] : memref<6x256xf32, #tpu.memory_space<vmem>>, vector<6x256xf32>
    tpu.vector_store %arg9[%c0_51, %c0_52], %49 {strides = array<i32>} : memref<6x256xf32, #tpu.memory_space<vmem>>, vector<6x256xf32>,
    %c0_53 = arith.constant 0 : index
    %c0_54 = arith.constant 0 : index
    %51 = vector.load %arg9[%c0_53, %c0_54] : memref<6x256xf32, #tpu.memory_space<vmem>>, vector<1x256xf32>
    %c1_55 = arith.constant 1 : index
    %c0_56 = arith.constant 0 : index
    %52 = vector.load %arg9[%c1_55, %c0_56] : memref<6x256xf32, #tpu.memory_space<vmem>>, vector<1x256xf32>
    %53 = arith.maximumf %51, %52 : vector<1x256xf32>
    %c2_57 = arith.constant 2 : index
    %c0_58 = arith.constant 0 : index
    %54 = vector.load %arg9[%c2_57, %c0_58] : memref<6x256xf32, #tpu.memory_space<vmem>>, vector<1x256xf32>
    %55 = arith.maximumf %53, %54 : vector<1x256xf32>
    %c4_59 = arith.constant 4 : index
    %c0_60 = arith.constant 0 : index
    %56 = vector.load %arg10[%c4_59, %c0_60] : memref<8x256xf32, #tpu.memory_space<vmem>>, vector<1x256xf32>
    tpu.vector_store %arg10[%c4_59, %c0_60], %55 {strides = array<i32>} : memref<8x256xf32, #tpu.memory_space<vmem>>, vector<1x256xf32>,
    %c2_61 = arith.constant 2 : index
    %c0_62 = arith.constant 0 : index
    %57 = vector.load %arg9[%c2_61, %c0_62] : memref<6x256xf32, #tpu.memory_space<vmem>>, vector<1x256xf32>
    %c3_63 = arith.constant 3 : index
    %c0_64 = arith.constant 0 : index
    %58 = vector.load %arg9[%c3_63, %c0_64] : memref<6x256xf32, #tpu.memory_space<vmem>>, vector<1x256xf32>
    %59 = arith.maximumf %57, %58 : vector<1x256xf32>
    %c4_65 = arith.constant 4 : index
    %c0_66 = arith.constant 0 : index
    %60 = vector.load %arg9[%c4_65, %c0_66] : memref<6x256xf32, #tpu.memory_space<vmem>>, vector<1x256xf32>
    %61 = arith.maximumf %59, %60 : vector<1x256xf32>
    %c5 = arith.constant 5 : index
    %c0_67 = arith.constant 0 : index
    %62 = vector.load %arg10[%c5, %c0_67] : memref<8x256xf32, #tpu.memory_space<vmem>>, vector<1x256xf32>
    tpu.vector_store %arg10[%c5, %c0_67], %61 {strides = array<i32>} : memref<8x256xf32, #tpu.memory_space<vmem>>, vector<1x256xf32>,
    %c48_68 = arith.constant 48 : index
    %c0_69 = arith.constant 0 : index
    %63 = vector.load %arg8[%c48_68, %c0_69] : memref<72x256xf32, #tpu.memory_space<vmem>>, vector<6x256xf32>
    %c54 = arith.constant 54 : index
    %c0_70 = arith.constant 0 : index
    %64 = vector.load %arg8[%c54, %c0_70] : memref<72x256xf32, #tpu.memory_space<vmem>>, vector<6x256xf32>
    %65 = arith.maximumf %63, %64 : vector<6x256xf32>
    %c60 = arith.constant 60 : index
    %c0_71 = arith.constant 0 : index
    %66 = vector.load %arg8[%c60, %c0_71] : memref<72x256xf32, #tpu.memory_space<vmem>>, vector<6x256xf32>
    %67 = arith.maximumf %65, %66 : vector<6x256xf32>
    %c0_72 = arith.constant 0 : index
    %c0_73 = arith.constant 0 : index
    %68 = vector.load %arg9[%c0_72, %c0_73] : memref<6x256xf32, #tpu.memory_space<vmem>>, vector<6x256xf32>
    tpu.vector_store %arg9[%c0_72, %c0_73], %67 {strides = array<i32>} : memref<6x256xf32, #tpu.memory_space<vmem>>, vector<6x256xf32>,
    %c0_74 = arith.constant 0 : index
    %c0_75 = arith.constant 0 : index
    %69 = vector.load %arg9[%c0_74, %c0_75] : memref<6x256xf32, #tpu.memory_space<vmem>>, vector<1x256xf32>
    %c1_76 = arith.constant 1 : index
    %c0_77 = arith.constant 0 : index
    %70 = vector.load %arg9[%c1_76, %c0_77] : memref<6x256xf32, #tpu.memory_space<vmem>>, vector<1x256xf32>
    %71 = arith.maximumf %69, %70 : vector<1x256xf32>
    %c2_78 = arith.constant 2 : index
    %c0_79 = arith.constant 0 : index
    %72 = vector.load %arg9[%c2_78, %c0_79] : memref<6x256xf32, #tpu.memory_space<vmem>>, vector<1x256xf32>
    %73 = arith.maximumf %71, %72 : vector<1x256xf32>
    %c6_80 = arith.constant 6 : index
    %c0_81 = arith.constant 0 : index
    %74 = vector.load %arg10[%c6_80, %c0_81] : memref<8x256xf32, #tpu.memory_space<vmem>>, vector<1x256xf32>
    tpu.vector_store %arg10[%c6_80, %c0_81], %73 {strides = array<i32>} : memref<8x256xf32, #tpu.memory_space<vmem>>, vector<1x256xf32>,
    %c2_82 = arith.constant 2 : index
    %c0_83 = arith.constant 0 : index
    %75 = vector.load %arg9[%c2_82, %c0_83] : memref<6x256xf32, #tpu.memory_space<vmem>>, vector<1x256xf32>
    %c3_84 = arith.constant 3 : index
    %c0_85 = arith.constant 0 : index
    %76 = vector.load %arg9[%c3_84, %c0_85] : memref<6x256xf32, #tpu.memory_space<vmem>>, vector<1x256xf32>
    %77 = arith.maximumf %75, %76 : vector<1x256xf32>
    %c4_86 = arith.constant 4 : index
    %c0_87 = arith.constant 0 : index
    %78 = vector.load %arg9[%c4_86, %c0_87] : memref<6x256xf32, #tpu.memory_space<vmem>>, vector<1x256xf32>
    %79 = arith.maximumf %77, %78 : vector<1x256xf32>
    %c7 = arith.constant 7 : index
    %c0_88 = arith.constant 0 : index
    %80 = vector.load %arg10[%c7, %c0_88] : memref<8x256xf32, #tpu.memory_space<vmem>>, vector<1x256xf32>
    tpu.vector_store %arg10[%c7, %c0_88], %79 {strides = array<i32>} : memref<8x256xf32, #tpu.memory_space<vmem>>, vector<1x256xf32>,
    %c0_89 = arith.constant 0 : index
    %c0_90 = arith.constant 0 : index
    %81 = vector.load %arg10[%c0_89, %c0_90] : memref<8x256xf32, #tpu.memory_space<vmem>>, vector<8x256xf32>
    %82 = arith.mulf %81, %81 : vector<8x256xf32>
    %83 = tpu.iota {dimensions = array<i32: 1>} : vector<8x256xi32>
    %c1_i32 = arith.constant 1 : i32
    %84 = tpu.dynamic_rotate %82 by %c1_i32 dim 1 : vector<8x256xf32>, i32 -> vector<8x256xf32>
    %c255_i32 = arith.constant 255 : i32
    %85 = tpu.dynamic_rotate %82 by %c255_i32 dim 1 : vector<8x256xf32>, i32 -> vector<8x256xf32>
    %c1_i32_91 = arith.constant 1 : i32
    %86 = vector.broadcast %c1_i32_91 : i32 to vector<8x256xi32>
    %87 = arith.cmpi sge, %83, %86 : vector<8x256xi32>
    %cst_92 = arith.constant 0.000000e+00 : f32
    %88 = vector.broadcast %cst_92 : f32 to vector<8x256xf32>
    %89 = arith.select %87, %84, %88 : vector<8x256xi1>, vector<8x256xf32>
    %c255_i32_93 = arith.constant 255 : i32
    %90 = vector.broadcast %c255_i32_93 : i32 to vector<8x256xi32>
    %91 = arith.cmpi slt, %83, %90 : vector<8x256xi32>
    %cst_94 = arith.constant 0.000000e+00 : f32
    %92 = vector.broadcast %cst_94 : f32 to vector<8x256xf32>
    %93 = arith.select %91, %85, %92 : vector<8x256xi1>, vector<8x256xf32>
    %94 = arith.addf %82, %89 : vector<8x256xf32>
    %95 = arith.addf %94, %93 : vector<8x256xf32>
    %c2_i32 = arith.constant 2 : i32
    %96 = tpu.dynamic_rotate %82 by %c2_i32 dim 1 : vector<8x256xf32>, i32 -> vector<8x256xf32>
    %c254_i32 = arith.constant 254 : i32
    %97 = tpu.dynamic_rotate %82 by %c254_i32 dim 1 : vector<8x256xf32>, i32 -> vector<8x256xf32>
    %c2_i32_95 = arith.constant 2 : i32
    %98 = vector.broadcast %c2_i32_95 : i32 to vector<8x256xi32>
    %99 = arith.cmpi sge, %83, %98 : vector<8x256xi32>
    %cst_96 = arith.constant 0.000000e+00 : f32
    %100 = vector.broadcast %cst_96 : f32 to vector<8x256xf32>
    %101 = arith.select %99, %96, %100 : vector<8x256xi1>, vector<8x256xf32>
    %c254_i32_97 = arith.constant 254 : i32
    %102 = vector.broadcast %c254_i32_97 : i32 to vector<8x256xi32>
    %103 = arith.cmpi slt, %83, %102 : vector<8x256xi32>
    %cst_98 = arith.constant 0.000000e+00 : f32
    %104 = vector.broadcast %cst_98 : f32 to vector<8x256xf32>
    %105 = arith.select %103, %97, %104 : vector<8x256xi1>, vector<8x256xf32>
    %106 = arith.addf %95, %101 : vector<8x256xf32>
    %107 = arith.addf %106, %105 : vector<8x256xf32>
    %cst_99 = arith.constant 2.000000e-05 : f32
    %108 = vector.broadcast %cst_99 : f32 to vector<8x256xf32>
    %109 = arith.mulf %108, %107 : vector<8x256xf32>
    %cst_100 = arith.constant 1.000000e+00 : f32
    %110 = vector.broadcast %cst_100 : f32 to vector<8x256xf32>
    %111 = arith.addf %110, %109 : vector<8x256xf32>
    %112 = math.rsqrt %111 : vector<8x256xf32>
    %113 = math.sqrt %111 : vector<8x256xf32>
    %114 = math.rsqrt %113 : vector<8x256xf32>
    %115 = arith.mulf %112, %114 : vector<8x256xf32>
    %116 = arith.mulf %81, %115 : vector<8x256xf32>
    %c0_101 = arith.constant 0 : index
    %c0_102 = arith.constant 0 : index
    %117 = vector.load %arg10[%c0_101, %c0_102] : memref<8x256xf32, #tpu.memory_space<vmem>>, vector<8x256xf32>
    tpu.vector_store %arg10[%c0_101, %c0_102], %116 {strides = array<i32>} : memref<8x256xf32, #tpu.memory_space<vmem>>, vector<8x256xf32>,
    %cst_103 = arith.constant 0.000000e+00 : f32
    %118 = vector.broadcast %cst_103 : f32 to vector<8x2304xf32>
    %c0_104 = arith.constant 0 : index
    %c0_105 = arith.constant 0 : index
    %119 = vector.load %arg11[%c0_104, %c0_105] : memref<8x2304xf32, #tpu.memory_space<vmem>>, vector<8x2304xf32>
    tpu.vector_store %arg11[%c0_104, %c0_105], %118 {strides = array<i32>} : memref<8x2304xf32, #tpu.memory_space<vmem>>, vector<8x2304xf32>,
    %c0_106 = arith.constant 0 : index
    %c0_107 = arith.constant 0 : index
    %120 = vector.load %arg10[%c0_106, %c0_107] : memref<8x256xf32, #tpu.memory_space<vmem>>, vector<1x256xf32>
    %c0_108 = arith.constant 0 : index
    %c1024 = arith.constant 1024 : index
    %121 = vector.load %arg11[%c0_108, %c1024] : memref<8x2304xf32, #tpu.memory_space<vmem>>, vector<1x256xf32>
    tpu.vector_store %arg11[%c0_108, %c1024], %120 {strides = array<i32>} : memref<8x2304xf32, #tpu.memory_space<vmem>>, vector<1x256xf32>,
    %c1_109 = arith.constant 1 : index
    %c0_110 = arith.constant 0 : index
    %122 = vector.load %arg10[%c1_109, %c0_110] : memref<8x256xf32, #tpu.memory_space<vmem>>, vector<1x256xf32>
    %c0_111 = arith.constant 0 : index
    %c1280 = arith.constant 1280 : index
    %123 = vector.load %arg11[%c0_111, %c1280] : memref<8x2304xf32, #tpu.memory_space<vmem>>, vector<1x256xf32>
    tpu.vector_store %arg11[%c0_111, %c1280], %122 {strides = array<i32>} : memref<8x2304xf32, #tpu.memory_space<vmem>>, vector<1x256xf32>,
    %c2_112 = arith.constant 2 : index
    %c0_113 = arith.constant 0 : index
    %124 = vector.load %arg10[%c2_112, %c0_113] : memref<8x256xf32, #tpu.memory_space<vmem>>, vector<1x256xf32>
    %c0_114 = arith.constant 0 : index
    %c1792 = arith.constant 1792 : index
    %125 = vector.load %arg11[%c0_114, %c1792] : memref<8x2304xf32, #tpu.memory_space<vmem>>, vector<1x256xf32>
    tpu.vector_store %arg11[%c0_114, %c1792], %124 {strides = array<i32>} : memref<8x2304xf32, #tpu.memory_space<vmem>>, vector<1x256xf32>,
    %c3_115 = arith.constant 3 : index
    %c0_116 = arith.constant 0 : index
    %126 = vector.load %arg10[%c3_115, %c0_116] : memref<8x256xf32, #tpu.memory_space<vmem>>, vector<1x256xf32>
    %c0_117 = arith.constant 0 : index
    %c2048 = arith.constant 2048 : index
    %127 = vector.load %arg11[%c0_117, %c2048] : memref<8x2304xf32, #tpu.memory_space<vmem>>, vector<1x256xf32>
    tpu.vector_store %arg11[%c0_117, %c2048], %126 {strides = array<i32>} : memref<8x2304xf32, #tpu.memory_space<vmem>>, vector<1x256xf32>,
    %c0_118 = arith.constant 0 : index
    %c0_119 = arith.constant 0 : index
    %128 = vector.load %arg10[%c0_118, %c0_119] : memref<8x256xf32, #tpu.memory_space<vmem>>, vector<1x256xf32>
    %c1_120 = arith.constant 1 : index
    %c768 = arith.constant 768 : index
    %129 = vector.load %arg11[%c1_120, %c768] : memref<8x2304xf32, #tpu.memory_space<vmem>>, vector<1x256xf32>
    tpu.vector_store %arg11[%c1_120, %c768], %128 {strides = array<i32>} : memref<8x2304xf32, #tpu.memory_space<vmem>>, vector<1x256xf32>,
    %c1_121 = arith.constant 1 : index
    %c0_122 = arith.constant 0 : index
    %130 = vector.load %arg10[%c1_121, %c0_122] : memref<8x256xf32, #tpu.memory_space<vmem>>, vector<1x256xf32>
    %c1_123 = arith.constant 1 : index
    %c1024_124 = arith.constant 1024 : index
    %131 = vector.load %arg11[%c1_123, %c1024_124] : memref<8x2304xf32, #tpu.memory_space<vmem>>, vector<1x256xf32>
    tpu.vector_store %arg11[%c1_123, %c1024_124], %130 {strides = array<i32>} : memref<8x2304xf32, #tpu.memory_space<vmem>>, vector<1x256xf32>,
    %c2_125 = arith.constant 2 : index
    %c0_126 = arith.constant 0 : index
    %132 = vector.load %arg10[%c2_125, %c0_126] : memref<8x256xf32, #tpu.memory_space<vmem>>, vector<1x256xf32>
    %c1_127 = arith.constant 1 : index
    %c1536 = arith.constant 1536 : index
    %133 = vector.load %arg11[%c1_127, %c1536] : memref<8x2304xf32, #tpu.memory_space<vmem>>, vector<1x256xf32>
    tpu.vector_store %arg11[%c1_127, %c1536], %132 {strides = array<i32>} : memref<8x2304xf32, #tpu.memory_space<vmem>>, vector<1x256xf32>,
    %c3_128 = arith.constant 3 : index
    %c0_129 = arith.constant 0 : index
    %134 = vector.load %arg10[%c3_128, %c0_129] : memref<8x256xf32, #tpu.memory_space<vmem>>, vector<1x256xf32>
    %c1_130 = arith.constant 1 : index
    %c1792_131 = arith.constant 1792 : index
    %135 = vector.load %arg11[%c1_130, %c1792_131] : memref<8x2304xf32, #tpu.memory_space<vmem>>, vector<1x256xf32>
    tpu.vector_store %arg11[%c1_130, %c1792_131], %134 {strides = array<i32>} : memref<8x2304xf32, #tpu.memory_space<vmem>>, vector<1x256xf32>,
    %c0_132 = arith.constant 0 : index
    %c0_133 = arith.constant 0 : index
    %136 = vector.load %arg10[%c0_132, %c0_133] : memref<8x256xf32, #tpu.memory_space<vmem>>, vector<1x256xf32>
    %c2_134 = arith.constant 2 : index
    %c256 = arith.constant 256 : index
    %137 = vector.load %arg11[%c2_134, %c256] : memref<8x2304xf32, #tpu.memory_space<vmem>>, vector<1x256xf32>
    tpu.vector_store %arg11[%c2_134, %c256], %136 {strides = array<i32>} : memref<8x2304xf32, #tpu.memory_space<vmem>>, vector<1x256xf32>,
    %c1_135 = arith.constant 1 : index
    %c0_136 = arith.constant 0 : index
    %138 = vector.load %arg10[%c1_135, %c0_136] : memref<8x256xf32, #tpu.memory_space<vmem>>, vector<1x256xf32>
    %c2_137 = arith.constant 2 : index
    %c512 = arith.constant 512 : index
    %139 = vector.load %arg11[%c2_137, %c512] : memref<8x2304xf32, #tpu.memory_space<vmem>>, vector<1x256xf32>
    tpu.vector_store %arg11[%c2_137, %c512], %138 {strides = array<i32>} : memref<8x2304xf32, #tpu.memory_space<vmem>>, vector<1x256xf32>,
    %c2_138 = arith.constant 2 : index
    %c0_139 = arith.constant 0 : index
    %140 = vector.load %arg10[%c2_138, %c0_139] : memref<8x256xf32, #tpu.memory_space<vmem>>, vector<1x256xf32>
    %c2_140 = arith.constant 2 : index
    %c1024_141 = arith.constant 1024 : index
    %141 = vector.load %arg11[%c2_140, %c1024_141] : memref<8x2304xf32, #tpu.memory_space<vmem>>, vector<1x256xf32>
    tpu.vector_store %arg11[%c2_140, %c1024_141], %140 {strides = array<i32>} : memref<8x2304xf32, #tpu.memory_space<vmem>>, vector<1x256xf32>,
    %c3_142 = arith.constant 3 : index
    %c0_143 = arith.constant 0 : index
    %142 = vector.load %arg10[%c3_142, %c0_143] : memref<8x256xf32, #tpu.memory_space<vmem>>, vector<1x256xf32>
    %c2_144 = arith.constant 2 : index
    %c1280_145 = arith.constant 1280 : index
    %143 = vector.load %arg11[%c2_144, %c1280_145] : memref<8x2304xf32, #tpu.memory_space<vmem>>, vector<1x256xf32>
    tpu.vector_store %arg11[%c2_144, %c1280_145], %142 {strides = array<i32>} : memref<8x2304xf32, #tpu.memory_space<vmem>>, vector<1x256xf32>,
    %c0_146 = arith.constant 0 : index
    %c0_147 = arith.constant 0 : index
    %144 = vector.load %arg10[%c0_146, %c0_147] : memref<8x256xf32, #tpu.memory_space<vmem>>, vector<1x256xf32>
    %c3_148 = arith.constant 3 : index
    %c0_149 = arith.constant 0 : index
    %145 = vector.load %arg11[%c3_148, %c0_149] : memref<8x2304xf32, #tpu.memory_space<vmem>>, vector<1x256xf32>
    tpu.vector_store %arg11[%c3_148, %c0_149], %144 {strides = array<i32>} : memref<8x2304xf32, #tpu.memory_space<vmem>>, vector<1x256xf32>,
    %c1_150 = arith.constant 1 : index
    %c0_151 = arith.constant 0 : index
    %146 = vector.load %arg10[%c1_150, %c0_151] : memref<8x256xf32, #tpu.memory_space<vmem>>, vector<1x256xf32>
    %c3_152 = arith.constant 3 : index
    %c256_153 = arith.constant 256 : index
    %147 = vector.load %arg11[%c3_152, %c256_153] : memref<8x2304xf32, #tpu.memory_space<vmem>>, vector<1x256xf32>
    tpu.vector_store %arg11[%c3_152, %c256_153], %146 {strides = array<i32>} : memref<8x2304xf32, #tpu.memory_space<vmem>>, vector<1x256xf32>,
    %c2_154 = arith.constant 2 : index
    %c0_155 = arith.constant 0 : index
    %148 = vector.load %arg10[%c2_154, %c0_155] : memref<8x256xf32, #tpu.memory_space<vmem>>, vector<1x256xf32>
    %c3_156 = arith.constant 3 : index
    %c768_157 = arith.constant 768 : index
    %149 = vector.load %arg11[%c3_156, %c768_157] : memref<8x2304xf32, #tpu.memory_space<vmem>>, vector<1x256xf32>
    tpu.vector_store %arg11[%c3_156, %c768_157], %148 {strides = array<i32>} : memref<8x2304xf32, #tpu.memory_space<vmem>>, vector<1x256xf32>,
    %c3_158 = arith.constant 3 : index
    %c0_159 = arith.constant 0 : index
    %150 = vector.load %arg10[%c3_158, %c0_159] : memref<8x256xf32, #tpu.memory_space<vmem>>, vector<1x256xf32>
    %c3_160 = arith.constant 3 : index
    %c1024_161 = arith.constant 1024 : index
    %151 = vector.load %arg11[%c3_160, %c1024_161] : memref<8x2304xf32, #tpu.memory_space<vmem>>, vector<1x256xf32>
    tpu.vector_store %arg11[%c3_160, %c1024_161], %150 {strides = array<i32>} : memref<8x2304xf32, #tpu.memory_space<vmem>>, vector<1x256xf32>,
    %c4_162 = arith.constant 4 : index
    %c0_163 = arith.constant 0 : index
    %152 = vector.load %arg10[%c4_162, %c0_163] : memref<8x256xf32, #tpu.memory_space<vmem>>, vector<1x256xf32>
    %c4_164 = arith.constant 4 : index
    %c1024_165 = arith.constant 1024 : index
    %153 = vector.load %arg11[%c4_164, %c1024_165] : memref<8x2304xf32, #tpu.memory_space<vmem>>, vector<1x256xf32>
    tpu.vector_store %arg11[%c4_164, %c1024_165], %152 {strides = array<i32>} : memref<8x2304xf32, #tpu.memory_space<vmem>>, vector<1x256xf32>,
    %c5_166 = arith.constant 5 : index
    %c0_167 = arith.constant 0 : index
    %154 = vector.load %arg10[%c5_166, %c0_167] : memref<8x256xf32, #tpu.memory_space<vmem>>, vector<1x256xf32>
    %c4_168 = arith.constant 4 : index
    %c1280_169 = arith.constant 1280 : index
    %155 = vector.load %arg11[%c4_168, %c1280_169] : memref<8x2304xf32, #tpu.memory_space<vmem>>, vector<1x256xf32>
    tpu.vector_store %arg11[%c4_168, %c1280_169], %154 {strides = array<i32>} : memref<8x2304xf32, #tpu.memory_space<vmem>>, vector<1x256xf32>,
    %c6_170 = arith.constant 6 : index
    %c0_171 = arith.constant 0 : index
    %156 = vector.load %arg10[%c6_170, %c0_171] : memref<8x256xf32, #tpu.memory_space<vmem>>, vector<1x256xf32>
    %c4_172 = arith.constant 4 : index
    %c1792_173 = arith.constant 1792 : index
    %157 = vector.load %arg11[%c4_172, %c1792_173] : memref<8x2304xf32, #tpu.memory_space<vmem>>, vector<1x256xf32>
    tpu.vector_store %arg11[%c4_172, %c1792_173], %156 {strides = array<i32>} : memref<8x2304xf32, #tpu.memory_space<vmem>>, vector<1x256xf32>,
    %c7_174 = arith.constant 7 : index
    %c0_175 = arith.constant 0 : index
    %158 = vector.load %arg10[%c7_174, %c0_175] : memref<8x256xf32, #tpu.memory_space<vmem>>, vector<1x256xf32>
    %c4_176 = arith.constant 4 : index
    %c2048_177 = arith.constant 2048 : index
    %159 = vector.load %arg11[%c4_176, %c2048_177] : memref<8x2304xf32, #tpu.memory_space<vmem>>, vector<1x256xf32>
    tpu.vector_store %arg11[%c4_176, %c2048_177], %158 {strides = array<i32>} : memref<8x2304xf32, #tpu.memory_space<vmem>>, vector<1x256xf32>,
    %c4_178 = arith.constant 4 : index
    %c0_179 = arith.constant 0 : index
    %160 = vector.load %arg10[%c4_178, %c0_179] : memref<8x256xf32, #tpu.memory_space<vmem>>, vector<1x256xf32>
    %c5_180 = arith.constant 5 : index
    %c768_181 = arith.constant 768 : index
    %161 = vector.load %arg11[%c5_180, %c768_181] : memref<8x2304xf32, #tpu.memory_space<vmem>>, vector<1x256xf32>
    tpu.vector_store %arg11[%c5_180, %c768_181], %160 {strides = array<i32>} : memref<8x2304xf32, #tpu.memory_space<vmem>>, vector<1x256xf32>,
    %c5_182 = arith.constant 5 : index
    %c0_183 = arith.constant 0 : index
    %162 = vector.load %arg10[%c5_182, %c0_183] : memref<8x256xf32, #tpu.memory_space<vmem>>, vector<1x256xf32>
    %c5_184 = arith.constant 5 : index
    %c1024_185 = arith.constant 1024 : index
    %163 = vector.load %arg11[%c5_184, %c1024_185] : memref<8x2304xf32, #tpu.memory_space<vmem>>, vector<1x256xf32>
    tpu.vector_store %arg11[%c5_184, %c1024_185], %162 {strides = array<i32>} : memref<8x2304xf32, #tpu.memory_space<vmem>>, vector<1x256xf32>,
    %c6_186 = arith.constant 6 : index
    %c0_187 = arith.constant 0 : index
    %164 = vector.load %arg10[%c6_186, %c0_187] : memref<8x256xf32, #tpu.memory_space<vmem>>, vector<1x256xf32>
    %c5_188 = arith.constant 5 : index
    %c1536_189 = arith.constant 1536 : index
    %165 = vector.load %arg11[%c5_188, %c1536_189] : memref<8x2304xf32, #tpu.memory_space<vmem>>, vector<1x256xf32>
    tpu.vector_store %arg11[%c5_188, %c1536_189], %164 {strides = array<i32>} : memref<8x2304xf32, #tpu.memory_space<vmem>>, vector<1x256xf32>,
    %c7_190 = arith.constant 7 : index
    %c0_191 = arith.constant 0 : index
    %166 = vector.load %arg10[%c7_190, %c0_191] : memref<8x256xf32, #tpu.memory_space<vmem>>, vector<1x256xf32>
    %c5_192 = arith.constant 5 : index
    %c1792_193 = arith.constant 1792 : index
    %167 = vector.load %arg11[%c5_192, %c1792_193] : memref<8x2304xf32, #tpu.memory_space<vmem>>, vector<1x256xf32>
    tpu.vector_store %arg11[%c5_192, %c1792_193], %166 {strides = array<i32>} : memref<8x2304xf32, #tpu.memory_space<vmem>>, vector<1x256xf32>,
    %c4_194 = arith.constant 4 : index
    %c0_195 = arith.constant 0 : index
    %168 = vector.load %arg10[%c4_194, %c0_195] : memref<8x256xf32, #tpu.memory_space<vmem>>, vector<1x256xf32>
    %c6_196 = arith.constant 6 : index
    %c256_197 = arith.constant 256 : index
    %169 = vector.load %arg11[%c6_196, %c256_197] : memref<8x2304xf32, #tpu.memory_space<vmem>>, vector<1x256xf32>
    tpu.vector_store %arg11[%c6_196, %c256_197], %168 {strides = array<i32>} : memref<8x2304xf32, #tpu.memory_space<vmem>>, vector<1x256xf32>,
    %c5_198 = arith.constant 5 : index
    %c0_199 = arith.constant 0 : index
    %170 = vector.load %arg10[%c5_198, %c0_199] : memref<8x256xf32, #tpu.memory_space<vmem>>, vector<1x256xf32>
    %c6_200 = arith.constant 6 : index
    %c512_201 = arith.constant 512 : index
    %171 = vector.load %arg11[%c6_200, %c512_201] : memref<8x2304xf32, #tpu.memory_space<vmem>>, vector<1x256xf32>
    tpu.vector_store %arg11[%c6_200, %c512_201], %170 {strides = array<i32>} : memref<8x2304xf32, #tpu.memory_space<vmem>>, vector<1x256xf32>,
    %c6_202 = arith.constant 6 : index
    %c0_203 = arith.constant 0 : index
    %172 = vector.load %arg10[%c6_202, %c0_203] : memref<8x256xf32, #tpu.memory_space<vmem>>, vector<1x256xf32>
    %c6_204 = arith.constant 6 : index
    %c1024_205 = arith.constant 1024 : index
    %173 = vector.load %arg11[%c6_204, %c1024_205] : memref<8x2304xf32, #tpu.memory_space<vmem>>, vector<1x256xf32>
    tpu.vector_store %arg11[%c6_204, %c1024_205], %172 {strides = array<i32>} : memref<8x2304xf32, #tpu.memory_space<vmem>>, vector<1x256xf32>,
    %c7_206 = arith.constant 7 : index
    %c0_207 = arith.constant 0 : index
    %174 = vector.load %arg10[%c7_206, %c0_207] : memref<8x256xf32, #tpu.memory_space<vmem>>, vector<1x256xf32>
    %c6_208 = arith.constant 6 : index
    %c1280_209 = arith.constant 1280 : index
    %175 = vector.load %arg11[%c6_208, %c1280_209] : memref<8x2304xf32, #tpu.memory_space<vmem>>, vector<1x256xf32>
    tpu.vector_store %arg11[%c6_208, %c1280_209], %174 {strides = array<i32>} : memref<8x2304xf32, #tpu.memory_space<vmem>>, vector<1x256xf32>,
    %c4_210 = arith.constant 4 : index
    %c0_211 = arith.constant 0 : index
    %176 = vector.load %arg10[%c4_210, %c0_211] : memref<8x256xf32, #tpu.memory_space<vmem>>, vector<1x256xf32>
    %c7_212 = arith.constant 7 : index
    %c0_213 = arith.constant 0 : index
    %177 = vector.load %arg11[%c7_212, %c0_213] : memref<8x2304xf32, #tpu.memory_space<vmem>>, vector<1x256xf32>
    tpu.vector_store %arg11[%c7_212, %c0_213], %176 {strides = array<i32>} : memref<8x2304xf32, #tpu.memory_space<vmem>>, vector<1x256xf32>,
    %c5_214 = arith.constant 5 : index
    %c0_215 = arith.constant 0 : index
    %178 = vector.load %arg10[%c5_214, %c0_215] : memref<8x256xf32, #tpu.memory_space<vmem>>, vector<1x256xf32>
    %c7_216 = arith.constant 7 : index
    %c256_217 = arith.constant 256 : index
    %179 = vector.load %arg11[%c7_216, %c256_217] : memref<8x2304xf32, #tpu.memory_space<vmem>>, vector<1x256xf32>
    tpu.vector_store %arg11[%c7_216, %c256_217], %178 {strides = array<i32>} : memref<8x2304xf32, #tpu.memory_space<vmem>>, vector<1x256xf32>,
    %c6_218 = arith.constant 6 : index
    %c0_219 = arith.constant 0 : index
    %180 = vector.load %arg10[%c6_218, %c0_219] : memref<8x256xf32, #tpu.memory_space<vmem>>, vector<1x256xf32>
    %c7_220 = arith.constant 7 : index
    %c768_221 = arith.constant 768 : index
    %181 = vector.load %arg11[%c7_220, %c768_221] : memref<8x2304xf32, #tpu.memory_space<vmem>>, vector<1x256xf32>
    tpu.vector_store %arg11[%c7_220, %c768_221], %180 {strides = array<i32>} : memref<8x2304xf32, #tpu.memory_space<vmem>>, vector<1x256xf32>,
    %c7_222 = arith.constant 7 : index
    %c0_223 = arith.constant 0 : index
    %182 = vector.load %arg10[%c7_222, %c0_223] : memref<8x256xf32, #tpu.memory_space<vmem>>, vector<1x256xf32>
    %c7_224 = arith.constant 7 : index
    %c1024_225 = arith.constant 1024 : index
    %183 = vector.load %arg11[%c7_224, %c1024_225] : memref<8x2304xf32, #tpu.memory_space<vmem>>, vector<1x256xf32>
    tpu.vector_store %arg11[%c7_224, %c1024_225], %182 {strides = array<i32>} : memref<8x2304xf32, #tpu.memory_space<vmem>>, vector<1x256xf32>,
    %c0_226 = arith.constant 0 : index
    %c0_227 = arith.constant 0 : index
    %184 = vector.load %arg11[%c0_226, %c0_227] : memref<8x2304xf32, #tpu.memory_space<vmem>>, vector<8x2304xf32>
    %185 = arith.truncf %184 : vector<8x2304xf32> to vector<8x2304xbf16>
    %c0_228 = arith.constant 0 : index
    %c0_229 = arith.constant 0 : index
    %186 = vector.load %arg3[%c0_228, %c0_229] : memref<2304x384xbf16, #tpu.memory_space<vmem>>, vector<2304x384xbf16>
    %cst_230 = arith.constant dense<0.000000e+00> : vector<8x384xf32>
    %187 = tpu.matmul %185, %186, %cst_230 {dimension_numbers = #tpu.dot_dimension_numbers<[1], [0], [0], [1], [0, 0, 1, 1], [], []>} : vector<8x2304xbf16>, vector<2304x384xbf16>, vector<8x384xf32> -> vector<8x384xf32>
    %c0_231 = arith.constant 0 : index
    %c0_232 = arith.constant 0 : index
    %188 = vector.load %arg4[%c0_231, %c0_232] : memref<1x384xf32, #tpu.memory_space<vmem>>, vector<1x384xf32>
    %189 = vector.broadcast %188 : vector<1x384xf32> to vector<8x384xf32>
    %190 = arith.addf %187, %189 : vector<8x384xf32>
    %cst_233 = arith.constant 0.000000e+00 : f32
    %191 = vector.broadcast %cst_233 : f32 to vector<8x384xf32>
    %192 = arith.maximumf %190, %191 : vector<8x384xf32>
    %193 = arith.truncf %192 : vector<8x384xf32> to vector<8x384xbf16>
    %c0_234 = arith.constant 0 : index
    %c0_235 = arith.constant 0 : index
    %194 = vector.load %arg5[%c0_234, %c0_235] : memref<384x128xbf16, #tpu.memory_space<vmem>>, vector<384x128xbf16>
    %cst_236 = arith.constant dense<0.000000e+00> : vector<8x128xf32>
    %195 = tpu.matmul %193, %194, %cst_236 {dimension_numbers = #tpu.dot_dimension_numbers<[1], [0], [0], [1], [0, 0, 1, 1], [], []>} : vector<8x384xbf16>, vector<384x128xbf16>, vector<8x128xf32> -> vector<8x128xf32>
    %c0_237 = arith.constant 0 : index
    %c0_238 = arith.constant 0 : index
    %196 = vector.load %arg6[%c0_237, %c0_238] : memref<1x128xf32, #tpu.memory_space<vmem>>, vector<1x128xf32>
    %197 = vector.broadcast %196 : vector<1x128xf32> to vector<8x128xf32>
    %198 = arith.addf %195, %197 : vector<8x128xf32>
    %cst_239 = arith.constant 0.000000e+00 : f32
    %199 = vector.broadcast %cst_239 : f32 to vector<8x128xf32>
    %200 = arith.maximumf %198, %199 : vector<8x128xf32>
    %c0_240 = arith.constant 0 : index
    %c0_241 = arith.constant 0 : index
    %201 = vector.load %arg7[%c0_240, %c0_241] : memref<8x128xf32, #tpu.memory_space<vmem>>, vector<8x128xf32>
    tpu.vector_store %arg7[%c0_240, %c0_241], %200 {strides = array<i32>} : memref<8x128xf32, #tpu.memory_space<vmem>>, vector<8x128xf32>,
    return
  }
}

</mosaic_0001>

<bundles_post_ra>
// kernel: eyenet_forward.2
= control target key start
LH: loop header
LB: loop body
LE: loop exit
PB: predicated region body
PF: predicated region fallthrough
CT: control target
= control target key end

     0   :  { %s4933_s17 = smov 1   ;;  %s4934_s18 = smov 126   ;;  %s5968_s1 = inlined_call_operand.vmem [shape: bf16[384,128], index: 1, kind: input, shape index: {}]   ;;  %s5969_s0 = inlined_call_operand.vmem [shape: bf16[392,384], index: 0, kind: input, shape index: {}]   ;;  %s5970_s2 = inlined_call_operand.vmem [shape: f32[1,128], index: 2, kind: input, shape index: {}]   ;;  %s5971_s3 = inlined_call_operand.vmem [shape: bf16[72,128], index: 3, kind: output, shape index: {}]  }
   0x1   :  { %v4618_v0 = vld [vmem:[%s5968_s1 + $0x40] sm:$0xff]   ;;  %v4620_v2 = vld [vmem:[%s5968_s1 + $0x48] sm:$0xff]   ;;  %v4623_v5 = vld [vmem:[%s5968_s1 + $0x50] sm:$0xff]   ;;  %s4935_s19 = smov 2  }
   0x2   :  { %v4619_v1 = vld [vmem:[%s5968_s1] sm:$0xff]   ;;  %4082 = vmatprep.subr.bf16.mxu0 %v4618_v0  ;;  %v4622_v4 = vld [vmem:[%s5968_s1 + $0x8] sm:$0xff]   ;;  %v4625_v7 = vld [vmem:[%s5968_s1 + $0x10] sm:$0xff]  }
   0x3   :  { %4083 = vmatpush3.bf16.msra.mxu0 %v4619_v1  ;;  %v4621_v3 = vld [vmem:[%s5968_s1 + $0x80] sm:$0xff]   ;;  %v4624_v6 = vld [vmem:[%s5968_s1 + $0x88] sm:$0xff]   ;;  %v4626_v8 = vld [vmem:[%s5968_s1 + $0x58] sm:$0xff]  }
   0x4   :  { %4084 = vmatprep.subr.bf16.mxu0 %v4620_v2  ;;  %4446 = vmatprep.subr.bf16.mxu1 %v4621_v3  ;;  %v4627_v9 = vld [vmem:[%s5968_s1 + $0x90] sm:$0xff]   ;;  %v4628_v10 = vld [vmem:[%s5968_s1 + $0x18] sm:$0xff]   ;;  %v4629_v11 = vld [vmem:[%s5968_s1 + $0x60] sm:$0xff]  }
   0x5   :  { %4447 = vmatpush3.bf16.msra.mxu1 %v4621_v3  ;;  %v4630_v12 = vld [vmem:[%s5968_s1 + $0x98] sm:$0xff]   ;;  %v4631_v13 = vld [vmem:[%s5968_s1 + $0x20] sm:$0xff]   ;;  %v4632_v15 = vld [vmem:[%s5968_s1 + $0x68] sm:$0xff]  }
   0x6   :  { %4448 = vmatprep.subr.bf16.mxu1 %v4624_v6  ;;  %v4633_v14 = vld [vmem:[%s5968_s1 + $0xa0] sm:$0xff]   ;;  %v4634_v16 = vld [vmem:[%s5968_s1 + $0x28] sm:$0xff]   ;;  %v4635_v18 = vld [vmem:[%s5968_s1 + $0x70] sm:$0xff]  }
   0x7   :  { %4085 = vmatpush3.bf16.msra.mxu0 %v4622_v4  ;;  %v4636_v17 = vld [vmem:[%s5968_s1 + $0xa8] sm:$0xff]   ;;  %v4637_v19 = vld [vmem:[%s5968_s1 + $0x30] sm:$0xff]   ;;  %v4638_v20 = vld [vmem:[%s5968_s1 + $0x78] sm:$0xff]  }
   0x8   :  { %4086 = vmatprep.subr.bf16.mxu0 %v4623_v5  ;;  %v4639_v21 = vld [vmem:[%s5968_s1 + $0xb0] sm:$0xff]   ;;  %v4640_v23 = vld [vmem:[%s5968_s1 + $0x38] sm:$0xff]   ;;  %v4645_v25 = vld [vmem:[%s5968_s1 + $0x40] sm:$0xff]  }
   0x9   :  { %4449 = vmatpush3.bf16.msra.mxu1 %v4624_v6  ;;  %v4643_v22 = vld [vmem:[%s5969_s0 + $0x4] ss:$12 sps:$4 sm:$0xff]   ;;  %v4644_v24 = vld [vmem:[%s5968_s1 + $0xb8] sm:$0xff]   ;;  %v4647_v26 = vld [vmem:[%s5969_s0 + $0x8] ss:$12 sps:$4 sm:$0xff]  }
   0xa   :  { %4450 = vmatprep.subr.bf16.mxu1 %v4627_v9  ;;  %319 = vmatprep.mubr.bf16.mxu0 %v4643_v22  ;;  %v4641_v27 = vld [vmem:[%s5969_s0] ss:$12 sps:$4 sm:$0xff]   ;;  %v4652_v32 = vld [vmem:[%s5969_s0 + $0x1c] ss:$12 sps:$4 sm:$0xff]   ;;  %v4655_v35 = vld [vmem:[%s5968_s1 + $0x50] sm:$0xff]  }
   0xb   :  { %4087 = vmatpush3.bf16.msra.mxu0 %v4625_v7  ;;  %v4646_v28 = vld [vmem:[%s5968_s1] sm:$0xff]   ;;  %4462 = vmatprep.mubr.bf16.mxu1 %v4647_v26  ;;  %v4649_v30 = vld [vmem:[%s5968_s1 + $0x48] sm:$0xff]   ;;  %v4657_v37 = vld [vmem:[%s5968_s1 + $0x10] sm:$0xff]  }
   0xc   :  { %4088 = vmatprep.subr.bf16.mxu0 %v4626_v8  ;;  %v4650_v29 = vld [vmem:[%s5968_s1 + $0x80] sm:$0xff]   ;;  %v4651_v33 = vld [vmem:[%s5968_s1 + $0x8] sm:$0xff]   ;;  %v4659_v38 = vld [vmem:[%s5968_s1 + $0x90] sm:$0xff]  }
   0xd   :  { %4451 = vmatpush3.bf16.msra.mxu1 %v4627_v9  ;;  %v4648_v31 = vld [vmem:[%s5969_s0 + $0x20] ss:$12 sps:$4 sm:$0xff]   ;;  %v4654_v36 = vld [vmem:[%s5969_s0 + $0x18] ss:$12 sps:$4 sm:$0xff]   ;;  %v4663_v44 = vld [vmem:[%s5969_s0 + $0x30] ss:$12 sps:$4 sm:$0xff]  }
   0xe   :  { %4452 = vmatprep.subr.bf16.mxu1 %v4630_v12  ;;  %v4656_v34 = vld [vmem:[%s5968_s1 + $0x88] sm:$0xff]   ;;  %v4658_v39 = vld [vmem:[%s5968_s1 + $0x58] sm:$0xff]   ;;  %v4661_v40 = vld [vmem:[%s5969_s0 + $0x34] ss:$12 sps:$4 sm:$0xff]  }
   0xf   :  { %4089 = vmatpush3.bf16.msra.mxu0 %v4628_v10  ;;  %v4660_v41 = vld [vmem:[%s5968_s1 + $0x18] sm:$0xff]   ;;  %v4664_v42 = vld [vmem:[%s5968_s1 + $0x60] sm:$0xff]   ;;  %v4668_v46 = vld [vmem:[%s5969_s0 + $0x50] ss:$0 sps:$4 sm:$0xff]  }
  0x10   :  { %4090 = vmatprep.subr.bf16.mxu0 %v4629_v11  ;;  %v4665_v43 = vld [vmem:[%s5968_s1 + $0x98] sm:$0xff]   ;;  %v4666_v47 = vld [vmem:[%s5968_s1 + $0x20] sm:$0xff]   ;;  %v4669_v49 = vld [vmem:[%s5968_s1 + $0x68] sm:$0xff]  }
  0x11   :  { %4453 = vmatpush3.bf16.msra.mxu1 %v4630_v12  ;;  %v4667_v45 = vld [vmem:[%s5969_s0 + $0x38] ss:$12 sps:$4 sm:$0xff]   ;;  %v27_v50 = vld [vmem:[%s5969_s0 + $0x48] sm:$0xff]  ;;  %v4674_v54 = vld [vmem:[%s5968_s1 + $0x70] sm:$0xff]  }
  0x12   :  { %4454 = vmatprep.subr.bf16.mxu1 %v4633_v14  ;;  %v4670_v48 = vld [vmem:[%s5968_s1 + $0xa0] sm:$0xff]   ;;  %v3793_v51 = vcombine.high %v27_v50, %v27_v50  ;;  %v4671_v52 = vld [vmem:[%s5968_s1 + $0x28] sm:$0xff]   ;;  %v4676_v55 = vld [vmem:[%s5968_s1 + $0x30] sm:$0xff]   ;;  %v3792_v56 = vcombine.low %v27_v50, %v27_v50 }
  0x13   :  { %4091 = vmatpush3.bf16.msra.mxu0 %v4631_v13  ;;  %v4675_v53 = vld [vmem:[%s5968_s1 + $0xa8] sm:$0xff]   ;;  %v4677_v57 = vld [vmem:[%s5968_s1 + $0x78] sm:$0xff]   ;;  %v4678_v58 = vld [vmem:[%s5968_s1 + $0xb0] sm:$0xff]  }
  0x14   :  { %4092 = vmatprep.subr.bf16.mxu0 %v4632_v15  ;;  %v4682_v59 = vld [vmem:[%s5969_s0 + $0x58] ss:$12 sps:$4 sm:$0xff]   ;;  %v4686_v63 = vld [vmem:[%s5969_s0 + $0x5c] ss:$12 sps:$4 sm:$0xff]   ;;  %v4680_v0 = vld [vmem:[%s5969_s0 + $0x54] ss:$12 sps:$4 sm:$0xff]  }
  0x15   :  { %4455 = vmatpush3.bf16.msra.mxu1 %v4633_v14  ;;  %v4679_v60 = vld [vmem:[%s5968_s1 + $0x38] sm:$0xff]   ;;  %v4684_v62 = vld [vmem:[%s5968_s1 + $0x40] sm:$0xff]   ;;  %v4688_v3 = vld [vmem:[%s5968_s1 + $0x48] sm:$0xff]  }
  0x16   :  { %4456 = vmatprep.subr.bf16.mxu1 %v4636_v17  ;;  %v4683_v61 = vld [vmem:[%s5968_s1 + $0xb8] sm:$0xff]   ;;  %v4685_v1 = vld [vmem:[%s5968_s1] sm:$0xff]   ;;  %v4690_v6 = vld [vmem:[%s5968_s1 + $0x8] sm:$0xff]  }
  0x17   :  { %4093 = vmatpush3.bf16.msra.mxu0 %v4634_v16  ;;  %v4689_v2 = vld [vmem:[%s5968_s1 + $0x80] sm:$0xff]   ;;  %v4691_v5 = vld [vmem:[%s5969_s0 + $0x70] ss:$12 sps:$4 sm:$0xff]   ;;  %v4695_v7 = vld [vmem:[%s5968_s1 + $0x88] sm:$0xff]  }
  0x18   :  { %4094 = vmatprep.subr.bf16.mxu0 %v4635_v18  ;;  %v4687_v4 = vld [vmem:[%s5969_s0 + $0x74] ss:$12 sps:$4 sm:$0xff]   ;;  %v4693_v9 = vld [vmem:[%s5969_s0 + $0x6c] ss:$12 sps:$4 sm:$0xff]   ;;  %v4739_v50 = vld [vmem:[%s5969_s0 + $0xdc] ss:$12 sps:$4 sm:$0xff]  }
  0x19   :  { %4457 = vmatpush3.bf16.msra.mxu1 %v4636_v17  ;;  %v4694_v8 = vld [vmem:[%s5968_s1 + $0x50] sm:$0xff]   ;;  %v4697_v12 = vld [vmem:[%s5968_s1 + $0x58] sm:$0xff]   ;;  %v4703_v15 = vld [vmem:[%s5968_s1 + $0x60] sm:$0xff]  }
  0x1a   :  { %4458 = vmatprep.subr.bf16.mxu1 %v4639_v21  ;;  %v4696_v10 = vld [vmem:[%s5968_s1 + $0x10] sm:$0xff]   ;;  %v4699_v14 = vld [vmem:[%s5968_s1 + $0x18] sm:$0xff]   ;;  %v4708_v22 = vld [vmem:[%s5968_s1 + $0x68] sm:$0xff]  }
  0x1b   :  { %4095 = vmatpush3.bf16.msra.mxu0 %v4637_v19  ;;  %v4698_v11 = vld [vmem:[%s5968_s1 + $0x90] sm:$0xff]   ;;  %v4704_v16 = vld [vmem:[%s5968_s1 + $0x98] sm:$0xff]   ;;  %v4707_v19 = vld [vmem:[%s5969_s0 + $0xa4] ss:$0 sps:$4 sm:$0xff]  }
  0x1c   :  { %4096 = vmatprep.subr.bf16.mxu0 %v4638_v20  ;;  %v4700_v13 = vld [vmem:[%s5969_s0 + $0x88] ss:$12 sps:$4 sm:$0xff]   ;;  %v4702_v17 = vld [vmem:[%s5969_s0 + $0x84] ss:$12 sps:$4 sm:$0xff]   ;;  %v4706_v18 = vld [vmem:[%s5969_s0 + $0x8c] ss:$12 sps:$4 sm:$0xff]  }
  0x1d   :  { %4459 = vmatpush3.bf16.msra.mxu1 %v4639_v21  ;;  %v4705_v20 = vld [vmem:[%s5968_s1 + $0x20] sm:$0xff]   ;;  %v4714_v26 = vld [vmem:[%s5968_s1 + $0xa8] sm:$0xff]  }
  0x1e   :  { %4460 = vmatprep.subr.bf16.mxu1 %v4644_v24  ;;  %v4709_v21 = vld [vmem:[%s5968_s1 + $0xa0] sm:$0xff]  }
  0x1f   :  { %4097 = vmatpush3.bf16.msra.mxu0 %v4640_v23  ;;  %v441_v23 = vld [vmem:[%s5969_s0 + $0x9c] sm:$0xff] }
  0x20   :  { %4134 = vmatprep.subr.bf16.mxu0 %v4645_v25  ;;  %v4710_v25 = vld [vmem:[%s5968_s1 + $0x28] sm:$0xff]  }
  0x21   :  { %4461 = vmatpush3.bf16.msra.mxu1 %v4644_v24  ;;  %v3830_v24 = vcombine.high %v441_v23, %v441_v23 }
  0x22   :  { %320 = vmatmul.mubr.bf16.vlgmr.msra.gmra.mrb[0].mxu0 %v4641_v27  ;;  %4470 = vmatprep.subr.bf16.mxu1 %v4650_v29  ;;  %v4713_v27 = vld [vmem:[%s5968_s1 + $0x70] sm:$0xff]  }
  0x23   :  { %4135 = vmatpush3.bf16.msra.mxu0 %v4646_v28  ;;  %327 = vmatprep.mubr.bf16.mxu0 %v4652_v32  ;;  %v4715_v28 = vld [vmem:[%s5968_s1 + $0x30] sm:$0xff]   ;;  %v4721_v32 = vld [vmem:[%s5969_s0 + $0xac] ss:$12 sps:$4 sm:$0xff]  }
  0x24   :  { %4136 = vmatprep.subr.bf16.mxu0 %v4649_v30  ;;  %4463 = vmatmul.mubr.bf16.vlgmr.msra.gmra.mrb[0].mxu1 %v4648_v31  ;;  %v4716_v30 = vld [vmem:[%s5968_s1 + $0x78] sm:$0xff]   ;;  %v4717_v31 = vld [vmem:[%s5968_s1 + $0xb0] sm:$0xff]  }
  0x25   :  { %4471 = vmatpush3.bf16.msra.mxu1 %v4650_v29  ;;  %4466 = vmatprep.mubr.bf16.mxu1 %v4667_v45  ;;  %v3829_v29 = vcombine.low %v441_v23, %v441_v23  ;;  %v4733_v45 = vld [vmem:[%s5968_s1 + $0x50] sm:$0xff]  }
  0x26   :  { %4472 = vmatprep.subr.bf16.mxu1 %v4656_v34  ;;  %v4778_v23 = vld [vmem:[%s5969_s0 + $0x130] ss:$12 sps:$4 sm:$0xff]  }
  0x27   :  { %4137 = vmatpush3.bf16.msra.mxu0 %v4651_v33  ;;  %v4718_v33 = vld [vmem:[%s5968_s1 + $0x38] sm:$0xff]  }
  0x28   :  { %4138 = vmatprep.subr.bf16.mxu0 %v4655_v35  ;;  %v4723_v35 = vld [vmem:[%s5968_s1 + $0x40] sm:$0xff]  }
  0x29   :  { %4473 = vmatpush3.bf16.msra.mxu1 %v4656_v34  ;;  %v4722_v34 = vld [vmem:[%s5968_s1 + $0xb8] sm:$0xff]  }
  0x2a   :  { %328 = vmatmul.mubr.bf16.gmra.mrb[4].mxu0 %v4654_v36  ;;  %4474 = vmatprep.subr.bf16.mxu1 %v4659_v38  ;;  %v4725_v36 = vld [vmem:[%s5969_s0 + $0xb0] ss:$12 sps:$4 sm:$0xff]  }
  0x2b   :  { %4139 = vmatpush3.bf16.msra.mxu0 %v4657_v37  ;;  %335 = vmatprep.mubr.bf16.mxu0 %v4661_v40  ;;  %v4719_v37 = vld [vmem:[%s5969_s0 + $0xa8] ss:$12 sps:$4 sm:$0xff]  }
  0x2c   :  { %4140 = vmatprep.subr.bf16.mxu0 %v4658_v39  ;;  %4467 = vmatmul.mubr.bf16.gmra.mrb[4].mxu1 %v4668_v46  ;;  %v4728_v39 = vld [vmem:[%s5968_s1 + $0x80] sm:$0xff]   ;;  %v4727_v40 = vld [vmem:[%s5968_s1 + $0x48] sm:$0xff]  }
  0x2d   :  { %4475 = vmatpush3.bf16.msra.mxu1 %v4659_v38  ;;  %4486 = vmatprep.mubr.bf16.mxu1 %v4686_v63  ;;  %v4724_v38 = vld [vmem:[%s5968_s1] sm:$0xff]   ;;  %v4753_v63 = vld [vmem:[%s5968_s1 + $0xa8] sm:$0xff]  }
  0x2e   :  { %4476 = vmatprep.subr.bf16.mxu1 %v4665_v43  ;;  %v4732_v46 = vld [vmem:[%s5969_s0 + $0xc0] ss:$12 sps:$4 sm:$0xff]  }
  0x2f   :  { %4141 = vmatpush3.bf16.msra.mxu0 %v4660_v41  ;;  %v4726_v41 = vld [vmem:[%s5969_s0 + $0xc8] ss:$12 sps:$4 sm:$0xff]  }
  0x30   :  { %4142 = vmatprep.subr.bf16.mxu0 %v4664_v42  ;;  %v4730_v42 = vld [vmem:[%s5969_s0 + $0xc4] ss:$12 sps:$4 sm:$0xff]  }
  0x31   :  { %4477 = vmatpush3.bf16.msra.mxu1 %v4665_v43  ;;  %v4729_v43 = vld [vmem:[%s5968_s1 + $0x8] sm:$0xff]  }
  0x32   :  { %336 = vmatmul.mubr.bf16.gmra.mrb[8].mxu0 %v4663_v44  ;;  %4478 = vmatprep.subr.bf16.mxu1 %v4670_v48  ;;  %v4734_v44 = vld [vmem:[%s5968_s1 + $0x88] sm:$0xff]  }
  0x33   :  { %4143 = vmatpush3.bf16.msra.mxu0 %v4666_v47  ;;  %343 = vmatprep.mubr.bf16.mxu0 %v3793_v51  ;;  %v4735_v47 = vld [vmem:[%s5968_s1 + $0x10] sm:$0xff]   ;;  %v4738_v51 = vld [vmem:[%s5968_s1 + $0x18] sm:$0xff]  }
  0x34   :  { %4144 = vmatprep.subr.bf16.mxu0 %v4669_v49  ;;  %v4736_v49 = vld [vmem:[%s5968_s1 + $0x58] sm:$0xff]  }
  0x35   :  { %4479 = vmatpush3.bf16.msra.mxu1 %v4670_v48  ;;  %v4737_v48 = vld [vmem:[%s5968_s1 + $0x90] sm:$0xff]  }
  0x36   :  { %4480 = vmatprep.subr.bf16.mxu1 %v4675_v53 }
  0x37   :  { %4145 = vmatpush3.bf16.msra.mxu0 %v4671_v52  ;;  %v4742_v52 = vld [vmem:[%s5968_s1 + $0x60] sm:$0xff]  }
  0x38   :  { %4146 = vmatprep.subr.bf16.mxu0 %v4674_v54  ;;  %v4741_v54 = vld [vmem:[%s5969_s0 + $0xd8] ss:$12 sps:$4 sm:$0xff]  }
  0x39   :  { %4481 = vmatpush3.bf16.msra.mxu1 %v4675_v53  ;;  %v4743_v53 = vld [vmem:[%s5968_s1 + $0x98] sm:$0xff]  }
  0x3a   :  { %344 = vmatmul.mubr.bf16.gmra.mrb[12].mxu0 %v3792_v56  ;;  %4482 = vmatprep.subr.bf16.mxu1 %v4678_v58  ;;  %v4746_v56 = vld [vmem:[%s5969_s0 + $0xf8] ss:$0 sps:$4 sm:$0xff]  }
  0x3b   :  { %4147 = vmatpush3.bf16.msra.mxu0 %v4676_v55  ;;  %733 = vmatprep.mubr.bf16.mxu0 %v4682_v59  ;;  %v4745_v55 = vld [vmem:[%s5969_s0 + $0xe0] ss:$12 sps:$4 sm:$0xff]  }
  0x3c   :  { %4148 = vmatprep.subr.bf16.mxu0 %v4677_v57  ;;  %v4744_v57 = vld [vmem:[%s5968_s1 + $0x20] sm:$0xff]   ;;  %v4747_v59 = vld [vmem:[%s5968_s1 + $0x68] sm:$0xff]  }
  0x3d   :  { %4483 = vmatpush3.bf16.msra.mxu1 %v4678_v58  ;;  %v4748_v58 = vld [vmem:[%s5968_s1 + $0xa0] sm:$0xff]  }
  0x3e   :  { %4484 = vmatprep.subr.bf16.mxu1 %v4683_v61 }
  0x3f   :  { %4149 = vmatpush3.bf16.msra.mxu0 %v4679_v60  ;;  %v855_v60 = vld [vmem:[%s5969_s0 + $0xf0] sm:$0xff] }
  0x40   :  { %4186 = vmatprep.subr.bf16.mxu0 %v4684_v62  ;;  %v4749_v62 = vld [vmem:[%s5968_s1 + $0x28] sm:$0xff]  }
  0x41   :  { %4485 = vmatpush3.bf16.msra.mxu1 %v4683_v61  ;;  %v3867_v61 = vcombine.high %v855_v60, %v855_v60 }
  0x42   :  { %734 = vmatmul.mubr.bf16.vlgmr.msra.gmra.mrb[16].mxu0 %v4680_v0  ;;  %4494 = vmatprep.subr.bf16.mxu1 %v4689_v2  ;;  %v4752_v0 = vld [vmem:[%s5968_s1 + $0x70] sm:$0xff]  }
  0x43   :  { %4187 = vmatpush3.bf16.msra.mxu0 %v4685_v1  ;;  %741 = vmatprep.mubr.bf16.mxu0 %v4691_v5  ;;  %v4754_v1 = vld [vmem:[%s5968_s1 + $0x30] sm:$0xff]   ;;  %v4760_v5 = vld [vmem:[%s5969_s0 + $0x100] ss:$12 sps:$4 sm:$0xff]  }
  0x44   :  { %4188 = vmatprep.subr.bf16.mxu0 %v4688_v3  ;;  %4487 = vmatmul.mubr.bf16.vlgmr.msra.gmra.mrb[8].mxu1 %v4687_v4  ;;  %v4755_v3 = vld [vmem:[%s5968_s1 + $0x78] sm:$0xff]   ;;  %v4756_v4 = vld [vmem:[%s5968_s1 + $0xb0] sm:$0xff]  }
  0x45   :  { %4495 = vmatpush3.bf16.msra.mxu1 %v4689_v2  ;;  %4490 = vmatprep.mubr.bf16.mxu1 %v4706_v18  ;;  %v3866_v2 = vcombine.low %v855_v60, %v855_v60  ;;  %v4772_v18 = vld [vmem:[%s5968_s1 + $0x50] sm:$0xff]  }
  0x46   :  { %4496 = vmatprep.subr.bf16.mxu1 %v4695_v7  ;;  %v4817_v60 = vld [vmem:[%s5969_s0 + $0x184] ss:$12 sps:$4 sm:$0xff]  }
  0x47   :  { %4189 = vmatpush3.bf16.msra.mxu0 %v4690_v6  ;;  %v4757_v6 = vld [vmem:[%s5968_s1 + $0x38] sm:$0xff]  }
  0x48   :  { %4190 = vmatprep.subr.bf16.mxu0 %v4694_v8  ;;  %v4762_v8 = vld [vmem:[%s5968_s1 + $0x40] sm:$0xff]  }
  0x49   :  { %4497 = vmatpush3.bf16.msra.mxu1 %v4695_v7  ;;  %v4761_v7 = vld [vmem:[%s5968_s1 + $0xb8] sm:$0xff]  }
  0x4a   :  { %742 = vmatmul.mubr.bf16.gmra.mrb[20].mxu0 %v4693_v9  ;;  %4498 = vmatprep.subr.bf16.mxu1 %v4698_v11  ;;  %v4764_v9 = vld [vmem:[%s5969_s0 + $0x104] ss:$12 sps:$4 sm:$0xff]  }
  0x4b   :  { %4191 = vmatpush3.bf16.msra.mxu0 %v4696_v10  ;;  %749 = vmatprep.mubr.bf16.mxu0 %v4700_v13  ;;  %v4758_v10 = vld [vmem:[%s5969_s0 + $0xfc] ss:$12 sps:$4 sm:$0xff]  }
  0x4c   :  { %4192 = vmatprep.subr.bf16.mxu0 %v4697_v12  ;;  %4491 = vmatmul.mubr.bf16.gmra.mrb[12].mxu1 %v4707_v19  ;;  %v4767_v12 = vld [vmem:[%s5968_s1 + $0x80] sm:$0xff]   ;;  %v4766_v13 = vld [vmem:[%s5968_s1 + $0x48] sm:$0xff]  }
  0x4d   :  { %4499 = vmatpush3.bf16.msra.mxu1 %v4698_v11  ;;  %4510 = vmatprep.mubr.bf16.mxu1 %v4725_v36  ;;  %v4763_v11 = vld [vmem:[%s5968_s1] sm:$0xff]   ;;  %v4792_v36 = vld [vmem:[%s5968_s1 + $0xa8] sm:$0xff]  }
  0x4e   :  { %4500 = vmatprep.subr.bf16.mxu1 %v4704_v16  ;;  %v4771_v19 = vld [vmem:[%s5969_s0 + $0x114] ss:$12 sps:$4 sm:$0xff]  }
  0x4f   :  { %4193 = vmatpush3.bf16.msra.mxu0 %v4699_v14  ;;  %v4765_v14 = vld [vmem:[%s5969_s0 + $0x11c] ss:$12 sps:$4 sm:$0xff]  }
  0x50   :  { %4194 = vmatprep.subr.bf16.mxu0 %v4703_v15  ;;  %v4769_v15 = vld [vmem:[%s5969_s0 + $0x118] ss:$12 sps:$4 sm:$0xff]  }
  0x51   :  { %4501 = vmatpush3.bf16.msra.mxu1 %v4704_v16  ;;  %v4768_v16 = vld [vmem:[%s5968_s1 + $0x8] sm:$0xff]  }
  0x52   :  { %750 = vmatmul.mubr.bf16.gmra.mrb[24].mxu0 %v4702_v17  ;;  %4502 = vmatprep.subr.bf16.mxu1 %v4709_v21  ;;  %v4773_v17 = vld [vmem:[%s5968_s1 + $0x88] sm:$0xff]  }
  0x53   :  { %4195 = vmatpush3.bf16.msra.mxu0 %v4705_v20  ;;  %757 = vmatprep.mubr.bf16.mxu0 %v3830_v24  ;;  %v4774_v20 = vld [vmem:[%s5968_s1 + $0x10] sm:$0xff]   ;;  %v4777_v24 = vld [vmem:[%s5968_s1 + $0x18] sm:$0xff]  }
  0x54   :  { %4196 = vmatprep.subr.bf16.mxu0 %v4708_v22  ;;  %v4775_v22 = vld [vmem:[%s5968_s1 + $0x58] sm:$0xff]  }
  0x55   :  { %4503 = vmatpush3.bf16.msra.mxu1 %v4709_v21  ;;  %v4776_v21 = vld [vmem:[%s5968_s1 + $0x90] sm:$0xff]  }
  0x56   :  { %4504 = vmatprep.subr.bf16.mxu1 %v4714_v26 }
  0x57   :  { %4197 = vmatpush3.bf16.msra.mxu0 %v4710_v25  ;;  %v4781_v25 = vld [vmem:[%s5968_s1 + $0x60] sm:$0xff]  }
  0x58   :  { %4198 = vmatprep.subr.bf16.mxu0 %v4713_v27  ;;  %v4780_v27 = vld [vmem:[%s5969_s0 + $0x12c] ss:$12 sps:$4 sm:$0xff]  }
  0x59   :  { %4505 = vmatpush3.bf16.msra.mxu1 %v4714_v26  ;;  %v4782_v26 = vld [vmem:[%s5968_s1 + $0x98] sm:$0xff]  }
  0x5a   :  { %758 = vmatmul.mubr.bf16.gmra.mrb[28].mxu0 %v3829_v29  ;;  %4506 = vmatprep.subr.bf16.mxu1 %v4717_v31  ;;  %v4785_v29 = vld [vmem:[%s5969_s0 + $0x14c] ss:$0 sps:$4 sm:$0xff]  }
  0x5b   :  { %4199 = vmatpush3.bf16.msra.mxu0 %v4715_v28  ;;  %1147 = vmatprep.mubr.bf16.mxu0 %v4721_v32  ;;  %v4784_v28 = vld [vmem:[%s5969_s0 + $0x134] ss:$12 sps:$4 sm:$0xff]   ;;  %v4786_v32 = vld [vmem:[%s5968_s1 + $0x68] sm:$0xff]  }
  0x5c   :  { %4200 = vmatprep.subr.bf16.mxu0 %v4716_v30  ;;  %v4783_v30 = vld [vmem:[%s5968_s1 + $0x20] sm:$0xff]  }
  0x5d   :  { %4507 = vmatpush3.bf16.msra.mxu1 %v4717_v31  ;;  %v4787_v31 = vld [vmem:[%s5968_s1 + $0xa0] sm:$0xff]  }
  0x5e   :  { %4508 = vmatprep.subr.bf16.mxu1 %v4722_v34 }
  0x5f   :  { %4201 = vmatpush3.bf16.msra.mxu0 %v4718_v33  ;;  %v1269_v33 = vld [vmem:[%s5969_s0 + $0x144] sm:$0xff] }
  0x60   :  { %4238 = vmatprep.subr.bf16.mxu0 %v4723_v35  ;;  %v4788_v35 = vld [vmem:[%s5968_s1 + $0x28] sm:$0xff]  }
  0x61   :  { %4509 = vmatpush3.bf16.msra.mxu1 %v4722_v34  ;;  %v3904_v34 = vcombine.high %v1269_v33, %v1269_v33 }
  0x62   :  { %1148 = vmatmul.mubr.bf16.vlgmr.msra.gmra.mrb[32].mxu0 %v4719_v37  ;;  %4518 = vmatprep.subr.bf16.mxu1 %v4728_v39  ;;  %v4791_v37 = vld [vmem:[%s5968_s1 + $0x70] sm:$0xff]  }
  0x63   :  { %4239 = vmatpush3.bf16.msra.mxu0 %v4724_v38  ;;  %1155 = vmatprep.mubr.bf16.mxu0 %v4730_v42  ;;  %v4793_v38 = vld [vmem:[%s5968_s1 + $0x30] sm:$0xff]  }
  0x64   :  { %4240 = vmatprep.subr.bf16.mxu0 %v4727_v40  ;;  %4511 = vmatmul.mubr.bf16.vlgmr.msra.gmra.mrb[16].mxu1 %v4726_v41  ;;  %v4794_v40 = vld [vmem:[%s5968_s1 + $0x78] sm:$0xff]   ;;  %v4795_v41 = vld [vmem:[%s5968_s1 + $0xb0] sm:$0xff]  }
  0x65   :  { %4519 = vmatpush3.bf16.msra.mxu1 %v4728_v39  ;;  %4514 = vmatprep.mubr.bf16.mxu1 %v4745_v55  ;;  %v3903_v39 = vcombine.low %v1269_v33, %v1269_v33  ;;  %v4799_v42 = vld [vmem:[%s5969_s0 + $0x154] ss:$12 sps:$4 sm:$0xff]   ;;  %v4856_v33 = vld [vmem:[%s5969_s0 + $0x1d8] ss:$12 sps:$4 sm:$0xff]  }
  0x66   :  { %4520 = vmatprep.subr.bf16.mxu1 %v4734_v44  ;;  %v4811_v55 = vld [vmem:[%s5968_s1 + $0x50] sm:$0xff]  }
  0x67   :  { %4241 = vmatpush3.bf16.msra.mxu0 %v4729_v43  ;;  %v4796_v43 = vld [vmem:[%s5968_s1 + $0x38] sm:$0xff]  }
  0x68   :  { %4242 = vmatprep.subr.bf16.mxu0 %v4733_v45  ;;  %v4801_v45 = vld [vmem:[%s5968_s1 + $0x40] sm:$0xff]  }
  0x69   :  { %4521 = vmatpush3.bf16.msra.mxu1 %v4734_v44  ;;  %v4800_v44 = vld [vmem:[%s5968_s1 + $0xb8] sm:$0xff]  }
  0x6a   :  { %1156 = vmatmul.mubr.bf16.gmra.mrb[36].mxu0 %v4732_v46  ;;  %4522 = vmatprep.subr.bf16.mxu1 %v4737_v48  ;;  %v4803_v46 = vld [vmem:[%s5969_s0 + $0x158] ss:$12 sps:$4 sm:$0xff]  }
  0x6b   :  { %4243 = vmatpush3.bf16.msra.mxu0 %v4735_v47  ;;  %1163 = vmatprep.mubr.bf16.mxu0 %v4739_v50  ;;  %v4797_v47 = vld [vmem:[%s5969_s0 + $0x150] ss:$12 sps:$4 sm:$0xff]   ;;  %v4805_v50 = vld [vmem:[%s5968_s1 + $0x48] sm:$0xff]  }
  0x6c   :  { %4244 = vmatprep.subr.bf16.mxu0 %v4736_v49  ;;  %4515 = vmatmul.mubr.bf16.gmra.mrb[20].mxu1 %v4746_v56  ;;  %v4806_v49 = vld [vmem:[%s5968_s1 + $0x80] sm:$0xff]   ;;  %v4810_v56 = vld [vmem:[%s5969_s0 + $0x168] ss:$12 sps:$4 sm:$0xff]  }
  0x6d   :  { %4523 = vmatpush3.bf16.msra.mxu1 %v4737_v48  ;;  %4534 = vmatprep.mubr.bf16.mxu1 %v4764_v9  ;;  %v4802_v48 = vld [vmem:[%s5968_s1] sm:$0xff]   ;;  %v4831_v9 = vld [vmem:[%s5968_s1 + $0xa8] sm:$0xff]  }
  0x6e   :  { %4524 = vmatprep.subr.bf16.mxu1 %v4743_v53 }
  0x6f   :  { %4245 = vmatpush3.bf16.msra.mxu0 %v4738_v51  ;;  %v4804_v51 = vld [vmem:[%s5969_s0 + $0x170] ss:$12 sps:$4 sm:$0xff]  }
  0x70   :  { %4246 = vmatprep.subr.bf16.mxu0 %v4742_v52  ;;  %v4808_v52 = vld [vmem:[%s5969_s0 + $0x16c] ss:$12 sps:$4 sm:$0xff]  }
  0x71   :  { %4525 = vmatpush3.bf16.msra.mxu1 %v4743_v53  ;;  %v4807_v53 = vld [vmem:[%s5968_s1 + $0x8] sm:$0xff]  }
  0x72   :  { %1164 = vmatmul.mubr.bf16.gmra.mrb[40].mxu0 %v4741_v54  ;;  %4526 = vmatprep.subr.bf16.mxu1 %v4748_v58  ;;  %v4812_v54 = vld [vmem:[%s5968_s1 + $0x88] sm:$0xff]  }
  0x73   :  { %4247 = vmatpush3.bf16.msra.mxu0 %v4744_v57  ;;  %1171 = vmatprep.mubr.bf16.mxu0 %v3867_v61  ;;  %v4813_v57 = vld [vmem:[%s5968_s1 + $0x10] sm:$0xff]   ;;  %v4816_v61 = vld [vmem:[%s5968_s1 + $0x18] sm:$0xff]  }
  0x74   :  { %4248 = vmatprep.subr.bf16.mxu0 %v4747_v59  ;;  %v4814_v59 = vld [vmem:[%s5968_s1 + $0x58] sm:$0xff]  }
  0x75   :  { %4527 = vmatpush3.bf16.msra.mxu1 %v4748_v58  ;;  %v4815_v58 = vld [vmem:[%s5968_s1 + $0x90] sm:$0xff]  }
  0x76   :  { %4528 = vmatprep.subr.bf16.mxu1 %v4753_v63 }
  0x77   :  { %4249 = vmatpush3.bf16.msra.mxu0 %v4749_v62  ;;  %v4820_v62 = vld [vmem:[%s5968_s1 + $0x60] sm:$0xff]  }
  0x78   :  { %4250 = vmatprep.subr.bf16.mxu0 %v4752_v0  ;;  %v4819_v0 = vld [vmem:[%s5969_s0 + $0x180] ss:$12 sps:$4 sm:$0xff]  }
  0x79   :  { %4529 = vmatpush3.bf16.msra.mxu1 %v4753_v63  ;;  %v4821_v63 = vld [vmem:[%s5968_s1 + $0x98] sm:$0xff]  }
  0x7a   :  { %1172 = vmatmul.mubr.bf16.gmra.mrb[44].mxu0 %v3866_v2  ;;  %4530 = vmatprep.subr.bf16.mxu1 %v4756_v4  ;;  %v4824_v2 = vld [vmem:[%s5969_s0 + $0x1a0] ss:$0 sps:$4 sm:$0xff]  }
  0x7b   :  { %4251 = vmatpush3.bf16.msra.mxu0 %v4754_v1  ;;  %1561 = vmatprep.mubr.bf16.mxu0 %v4760_v5  ;;  %v4823_v1 = vld [vmem:[%s5969_s0 + $0x188] ss:$12 sps:$4 sm:$0xff]  }
  0x7c   :  { %4252 = vmatprep.subr.bf16.mxu0 %v4755_v3  ;;  %v4822_v3 = vld [vmem:[%s5968_s1 + $0x20] sm:$0xff]   ;;  %v4825_v5 = vld [vmem:[%s5968_s1 + $0x68] sm:$0xff]  }
  0x7d   :  { %4531 = vmatpush3.bf16.msra.mxu1 %v4756_v4  ;;  %v4826_v4 = vld [vmem:[%s5968_s1 + $0xa0] sm:$0xff]  }
  0x7e   :  { %4532 = vmatprep.subr.bf16.mxu1 %v4761_v7 }
  0x7f   :  { %4253 = vmatpush3.bf16.msra.mxu0 %v4757_v6  ;;  %v1683_v6 = vld [vmem:[%s5969_s0 + $0x198] sm:$0xff] }
  0x80   :  { %4290 = vmatprep.subr.bf16.mxu0 %v4762_v8  ;;  %v4827_v8 = vld [vmem:[%s5968_s1 + $0x28] sm:$0xff]  }
  0x81   :  { %4533 = vmatpush3.bf16.msra.mxu1 %v4761_v7  ;;  %v3941_v7 = vcombine.high %v1683_v6, %v1683_v6 }
  0x82   :  { %1562 = vmatmul.mubr.bf16.vlgmr.msra.gmra.mrb[48].mxu0 %v4758_v10  ;;  %4542 = vmatprep.subr.bf16.mxu1 %v4767_v12  ;;  %v4830_v10 = vld [vmem:[%s5968_s1 + $0x70] sm:$0xff]  }
  0x83   :  { %4291 = vmatpush3.bf16.msra.mxu0 %v4763_v11  ;;  %1569 = vmatprep.mubr.bf16.mxu0 %v4769_v15  ;;  %v4832_v11 = vld [vmem:[%s5968_s1 + $0x30] sm:$0xff]  }
  0x84   :  { %4292 = vmatprep.subr.bf16.mxu0 %v4766_v13  ;;  %4535 = vmatmul.mubr.bf16.vlgmr.msra.gmra.mrb[24].mxu1 %v4765_v14  ;;  %v4833_v13 = vld [vmem:[%s5968_s1 + $0x78] sm:$0xff]   ;;  %v4834_v14 = vld [vmem:[%s5968_s1 + $0xb0] sm:$0xff]  }
  0x85   :  { %4543 = vmatpush3.bf16.msra.mxu1 %v4767_v12  ;;  %4538 = vmatprep.mubr.bf16.mxu1 %v4784_v28  ;;  %v3940_v12 = vcombine.low %v1683_v6, %v1683_v6  ;;  %v4838_v15 = vld [vmem:[%s5969_s0 + $0x1a8] ss:$12 sps:$4 sm:$0xff]  }
  0x86   :  { %4544 = vmatprep.subr.bf16.mxu1 %v4773_v17  ;;  %v4850_v28 = vld [vmem:[%s5968_s1 + $0x50] sm:$0xff]  }
  0x87   :  { %4293 = vmatpush3.bf16.msra.mxu0 %v4768_v16  ;;  %v4835_v16 = vld [vmem:[%s5968_s1 + $0x38] sm:$0xff]  }
  0x88   :  { %4294 = vmatprep.subr.bf16.mxu0 %v4772_v18  ;;  %v4840_v18 = vld [vmem:[%s5968_s1 + $0x40] sm:$0xff]  }
  0x89   :  { %4545 = vmatpush3.bf16.msra.mxu1 %v4773_v17  ;;  %v4839_v17 = vld [vmem:[%s5968_s1 + $0xb8] sm:$0xff]  }
  0x8a   :  { %1570 = vmatmul.mubr.bf16.gmra.mrb[52].mxu0 %v4771_v19  ;;  %4546 = vmatprep.subr.bf16.mxu1 %v4776_v21  ;;  %v4842_v19 = vld [vmem:[%s5969_s0 + $0x1ac] ss:$12 sps:$4 sm:$0xff]  }
  0x8b   :  { %4295 = vmatpush3.bf16.msra.mxu0 %v4774_v20  ;;  %1577 = vmatprep.mubr.bf16.mxu0 %v4778_v23  ;;  %v4836_v20 = vld [vmem:[%s5969_s0 + $0x1a4] ss:$12 sps:$4 sm:$0xff]   ;;  %v4844_v23 = vld [vmem:[%s5968_s1 + $0x48] sm:$0xff]  }
  0x8c   :  { %4296 = vmatprep.subr.bf16.mxu0 %v4775_v22  ;;  %4539 = vmatmul.mubr.bf16.gmra.mrb[28].mxu1 %v4785_v29  ;;  %v4845_v22 = vld [vmem:[%s5968_s1 + $0x80] sm:$0xff]   ;;  %v4849_v29 = vld [vmem:[%s5969_s0 + $0x1bc] ss:$12 sps:$4 sm:$0xff]  }
  0x8d   :  { %4547 = vmatpush3.bf16.msra.mxu1 %v4776_v21  ;;  %4558 = vmatprep.mubr.bf16.mxu1 %v4803_v46  ;;  %v4841_v21 = vld [vmem:[%s5968_s1] sm:$0xff]   ;;  %v4870_v46 = vld [vmem:[%s5968_s1 + $0xa8] sm:$0xff]  }
  0x8e   :  { %4548 = vmatprep.subr.bf16.mxu1 %v4782_v26 }
  0x8f   :  { %4297 = vmatpush3.bf16.msra.mxu0 %v4777_v24  ;;  %v4843_v24 = vld [vmem:[%s5969_s0 + $0x1c4] ss:$12 sps:$4 sm:$0xff]  }
  0x90   :  { %4298 = vmatprep.subr.bf16.mxu0 %v4781_v25  ;;  %v4847_v25 = vld [vmem:[%s5969_s0 + $0x1c0] ss:$12 sps:$4 sm:$0xff]  }
  0x91   :  { %4549 = vmatpush3.bf16.msra.mxu1 %v4782_v26  ;;  %v4846_v26 = vld [vmem:[%s5968_s1 + $0x8] sm:$0xff]  }
  0x92   :  { %1578 = vmatmul.mubr.bf16.gmra.mrb[56].mxu0 %v4780_v27  ;;  %4550 = vmatprep.subr.bf16.mxu1 %v4787_v31  ;;  %v4851_v27 = vld [vmem:[%s5968_s1 + $0x88] sm:$0xff]  }
  0x93   :  { %4299 = vmatpush3.bf16.msra.mxu0 %v4783_v30  ;;  %1585 = vmatprep.mubr.bf16.mxu0 %v3904_v34  ;;  %v4852_v30 = vld [vmem:[%s5968_s1 + $0x10] sm:$0xff]   ;;  %v4855_v34 = vld [vmem:[%s5968_s1 + $0x18] sm:$0xff]  }
  0x94   :  { %4300 = vmatprep.subr.bf16.mxu0 %v4786_v32  ;;  %v4853_v32 = vld [vmem:[%s5968_s1 + $0x58] sm:$0xff]  }
  0x95   :  { %4551 = vmatpush3.bf16.msra.mxu1 %v4787_v31  ;;  %v4854_v31 = vld [vmem:[%s5968_s1 + $0x90] sm:$0xff]  }
  0x96   :  { %4552 = vmatprep.subr.bf16.mxu1 %v4792_v36 }
  0x97   :  { %4301 = vmatpush3.bf16.msra.mxu0 %v4788_v35  ;;  %v4859_v35 = vld [vmem:[%s5968_s1 + $0x60] sm:$0xff]  }
  0x98   :  { %4302 = vmatprep.subr.bf16.mxu0 %v4791_v37  ;;  %v4858_v37 = vld [vmem:[%s5969_s0 + $0x1d4] ss:$12 sps:$4 sm:$0xff]  }
  0x99   :  { %4553 = vmatpush3.bf16.msra.mxu1 %v4792_v36  ;;  %v4860_v36 = vld [vmem:[%s5968_s1 + $0x98] sm:$0xff]  }
  0x9a   :  { %1586 = vmatmul.mubr.bf16.gmra.mrb[60].mxu0 %v3903_v39  ;;  %4554 = vmatprep.subr.bf16.mxu1 %v4795_v41  ;;  %v4863_v39 = vld [vmem:[%s5969_s0 + $0x1f4] ss:$0 sps:$4 sm:$0xff]  }
  0x9b   :  { %4303 = vmatpush3.bf16.msra.mxu0 %v4793_v38  ;;  %1975 = vmatprep.mubr.bf16.mxu0 %v4799_v42  ;;  %v4862_v38 = vld [vmem:[%s5969_s0 + $0x1dc] ss:$12 sps:$4 sm:$0xff]  }
  0x9c   :  { %4304 = vmatprep.subr.bf16.mxu0 %v4794_v40  ;;  %v4861_v40 = vld [vmem:[%s5968_s1 + $0x20] sm:$0xff]   ;;  %v4864_v42 = vld [vmem:[%s5968_s1 + $0x68] sm:$0xff]  }
  0x9d   :  { %4555 = vmatpush3.bf16.msra.mxu1 %v4795_v41  ;;  %v4865_v41 = vld [vmem:[%s5968_s1 + $0xa0] sm:$0xff]  }
  0x9e   :  { %4556 = vmatprep.subr.bf16.mxu1 %v4800_v44 }
  0x9f   :  { %4305 = vmatpush3.bf16.msra.mxu0 %v4796_v43  ;;  %v2097_v43 = vld [vmem:[%s5969_s0 + $0x1ec] sm:$0xff] }
  0xa0   :  { %4342 = vmatprep.subr.bf16.mxu0 %v4801_v45  ;;  %v4866_v45 = vld [vmem:[%s5968_s1 + $0x28] sm:$0xff]  }
  0xa1   :  { %4557 = vmatpush3.bf16.msra.mxu1 %v4800_v44  ;;  %v3978_v44 = vcombine.high %v2097_v43, %v2097_v43 }
  0xa2   :  { %1976 = vmatmul.mubr.bf16.vlgmr.msra.gmra.mrb[64].mxu0 %v4797_v47  ;;  %4566 = vmatprep.subr.bf16.mxu1 %v4806_v49  ;;  %v4869_v47 = vld [vmem:[%s5968_s1 + $0x70] sm:$0xff]  }
  0xa3   :  { %4343 = vmatpush3.bf16.msra.mxu0 %v4802_v48  ;;  %1983 = vmatprep.mubr.bf16.mxu0 %v4808_v52  ;;  %v4871_v48 = vld [vmem:[%s5968_s1 + $0x30] sm:$0xff]   ;;  %v4877_v52 = vld [vmem:[%s5969_s0 + $0x1fc] ss:$12 sps:$4 sm:$0xff]  }
  0xa4   :  { %4344 = vmatprep.subr.bf16.mxu0 %v4805_v50  ;;  %4559 = vmatmul.mubr.bf16.vlgmr.msra.gmra.mrb[32].mxu1 %v4804_v51  ;;  %v4872_v50 = vld [vmem:[%s5968_s1 + $0x78] sm:$0xff]   ;;  %v4873_v51 = vld [vmem:[%s5968_s1 + $0xb0] sm:$0xff]  }
  0xa5   :  { %4567 = vmatpush3.bf16.msra.mxu1 %v4806_v49  ;;  %4562 = vmatprep.mubr.bf16.mxu1 %v4823_v1  ;;  %v3977_v49 = vcombine.low %v2097_v43, %v2097_v43 }
  0xa6   :  { %4568 = vmatprep.subr.bf16.mxu1 %v4812_v54 }
  0xa7   :  { %4345 = vmatpush3.bf16.msra.mxu0 %v4807_v53  ;;  %v4874_v53 = vld [vmem:[%s5968_s1 + $0x38] sm:$0xff]  }
  0xa8   :  { %4346 = vmatprep.subr.bf16.mxu0 %v4811_v55  ;;  %v4878_v55 = vld [vmem:[%s5968_s1 + $0xb8] sm:$0xff]  }
  0xa9   :  { %4569 = vmatpush3.bf16.msra.mxu1 %v4812_v54  ;;  %v4879_v54 = vld [vmem:[%s5969_s0 + $0x200] ss:$12 sps:$4 sm:$0xff]  }
  0xaa   :  { %1984 = vmatmul.mubr.bf16.gmra.mrb[68].mxu0 %v4810_v56  ;;  %4570 = vmatprep.subr.bf16.mxu1 %v4815_v58  ;;  %v4875_v56 = vld [vmem:[%s5969_s0 + $0x1f8] ss:$12 sps:$4 sm:$0xff]  }
  0xab   :  { %4347 = vmatpush3.bf16.msra.mxu0 %v4813_v57  ;;  %1991 = vmatprep.mubr.bf16.mxu0 %v4817_v60  ;;  %v4881_v57 = vld [vmem:[%s5969_s0 + $0x214] ss:$12 sps:$4 sm:$0xff]   ;;  %v4883_v60 = vld [vmem:[%s5969_s0 + $0x210] ss:$12 sps:$4 sm:$0xff]  }
  0xac   :  { %4348 = vmatprep.subr.bf16.mxu0 %v4814_v59  ;;  %4563 = vmatmul.mubr.bf16.gmra.mrb[36].mxu1 %v4824_v2  ;;  %v4887_v59 = vld [vmem:[%s5969_s0 + $0x230] ss:$12 sps:$4 sm:$0xff]  }
  0xad   :  { %4571 = vmatpush3.bf16.msra.mxu1 %v4815_v58  ;;  %4582 = vmatprep.mubr.bf16.mxu1 %v4842_v19  ;;  %v4880_v58 = vld [vmem:[%s5969_s0 + $0x218] ss:$12 sps:$4 sm:$0xff]  }
  0xae   :  { %4572 = vmatprep.subr.bf16.mxu1 %v4821_v63 }
  0xaf   :  { %4349 = vmatpush3.bf16.msra.mxu0 %v4816_v61  ;;  %v4884_v61 = vld [vmem:[%s5969_s0 + $0x22c] ss:$12 sps:$4 sm:$0xff]  }
  0xb0   :  { %4350 = vmatprep.subr.bf16.mxu0 %v4820_v62  ;;  %v4888_v62 = vld [vmem:[%s5969_s0 + $0x248] ss:$0 sps:$4 sm:$0xff]  }
  0xb1   :  { %4573 = vmatpush3.bf16.msra.mxu1 %v4821_v63  ;;  %v2511_v63 = vld [vmem:[%s5969_s0 + $0x240] sm:$0xff] }
  0xb2   :  { %1992 = vmatmul.mubr.bf16.gmra.mrb[72].mxu0 %v4819_v0  ;;  %4574 = vmatprep.subr.bf16.mxu1 %v4826_v4  ;;  %v4886_v0 = vld [vmem:[%s5969_s0 + $0x228] ss:$12 sps:$4 sm:$0xff]   ;;  %v4015_v1 = vcombine.high %v2511_v63, %v2511_v63  ;;  %s4932_s0 = smov 127  }
  0xb3   :  { %4351 = vmatpush3.bf16.msra.mxu0 %v4822_v3  ;;  %1999 = vmatprep.mubr.bf16.mxu0 %v3941_v7 }
  0xb4   :  { %4352 = vmatprep.subr.bf16.mxu0 %v4825_v5  ;;  %v4014_v5 = vcombine.low %v2511_v63, %v2511_v63 }
  0xb5   :  { %4575 = vmatpush3.bf16.msra.mxu1 %v4826_v4  ;;  %v5694_v4 = vld [vmem:[%s5970_s2] ss:$0 sm:$0xff] }
  0xb6   :  { %4576 = vmatprep.subr.bf16.mxu1 %v4831_v9 }
  0xb7   :  { %4353 = vmatpush3.bf16.msra.mxu0 %v4827_v8 }
  0xb8   :  { %4354 = vmatprep.subr.bf16.mxu0 %v4830_v10 }
  0xb9   :  { %4577 = vmatpush3.bf16.msra.mxu1 %v4831_v9 }
  0xba   :  { %2000 = vmatmul.mubr.bf16.gmra.mrb[76].mxu0 %v3940_v12  ;;  %4578 = vmatprep.subr.bf16.mxu1 %v4834_v14 }
  0xbb   :  { %4355 = vmatpush3.bf16.msra.mxu0 %v4832_v11  ;;  %2389 = vmatprep.mubr.bf16.mxu0 %v4838_v15 }
  0xbc   :  { %4356 = vmatprep.subr.bf16.mxu0 %v4833_v13 }
  0xbd   :  { %4579 = vmatpush3.bf16.msra.mxu1 %v4834_v14 }
  0xbe   :  { %4580 = vmatprep.subr.bf16.mxu1 %v4839_v17 }
  0xbf   :  { %4357 = vmatpush3.bf16.msra.mxu0 %v4835_v16 }
  0xc0   :  { %4394 = vmatprep.subr.bf16.mxu0 %v4840_v18 }
  0xc1   :  { %4581 = vmatpush3.bf16.msra.mxu1 %v4839_v17 }
  0xc2   :  { %2390 = vmatmul.mubr.bf16.vlgmr.msra.gmra.mrb[80].mxu0 %v4836_v20  ;;  %4590 = vmatprep.subr.bf16.mxu1 %v4845_v22 }
  0xc3   :  { %4395 = vmatpush3.bf16.msra.mxu0 %v4841_v21  ;;  %2397 = vmatprep.mubr.bf16.mxu0 %v4847_v25 }
  0xc4   :  { %4396 = vmatprep.subr.bf16.mxu0 %v4844_v23  ;;  %4583 = vmatmul.mubr.bf16.vlgmr.msra.gmra.mrb[40].mxu1 %v4843_v24 }
  0xc5   :  { %4591 = vmatpush3.bf16.msra.mxu1 %v4845_v22  ;;  %4586 = vmatprep.mubr.bf16.mxu1 %v4862_v38 }
  0xc6   :  { %4592 = vmatprep.subr.bf16.mxu1 %v4851_v27 }
  0xc7   :  { %4397 = vmatpush3.bf16.msra.mxu0 %v4846_v26 }
  0xc8   :  { %4398 = vmatprep.subr.bf16.mxu0 %v4850_v28 }
  0xc9   :  { %4593 = vmatpush3.bf16.msra.mxu1 %v4851_v27 }
  0xca   :  { %2398 = vmatmul.mubr.bf16.gmra.mrb[84].mxu0 %v4849_v29  ;;  %4594 = vmatprep.subr.bf16.mxu1 %v4854_v31 }
  0xcb   :  { %4399 = vmatpush3.bf16.msra.mxu0 %v4852_v30  ;;  %2405 = vmatprep.mubr.bf16.mxu0 %v4856_v33 }
  0xcc   :  { %4400 = vmatprep.subr.bf16.mxu0 %v4853_v32  ;;  %4587 = vmatmul.mubr.bf16.gmra.mrb[44].mxu1 %v4863_v39 }
  0xcd   :  { %4595 = vmatpush3.bf16.msra.mxu1 %v4854_v31  ;;  %4606 = vmatprep.mubr.bf16.mxu1 %v4879_v54 }
  0xce   :  { %4596 = vmatprep.subr.bf16.mxu1 %v4860_v36 }
  0xcf   :  { %4401 = vmatpush3.bf16.msra.mxu0 %v4855_v34 }
  0xd0   :  { %4402 = vmatprep.subr.bf16.mxu0 %v4859_v35 }
  0xd1   :  { %4597 = vmatpush3.bf16.msra.mxu1 %v4860_v36 }
  0xd2   :  { %2406 = vmatmul.mubr.bf16.gmra.mrb[88].mxu0 %v4858_v37  ;;  %4598 = vmatprep.subr.bf16.mxu1 %v4865_v41 }
  0xd3   :  { %4403 = vmatpush3.bf16.msra.mxu0 %v4861_v40  ;;  %2413 = vmatprep.mubr.bf16.mxu0 %v3978_v44 }
  0xd4   :  { %4404 = vmatprep.subr.bf16.mxu0 %v4864_v42 }
  0xd5   :  { %4599 = vmatpush3.bf16.msra.mxu1 %v4865_v41 }
  0xd6   :  { %4600 = vmatprep.subr.bf16.mxu1 %v4870_v46 }
  0xd7   :  { %4405 = vmatpush3.bf16.msra.mxu0 %v4866_v45 }
  0xd8   :  { %4406 = vmatprep.subr.bf16.mxu0 %v4869_v47 }
  0xd9   :  { %4601 = vmatpush3.bf16.msra.mxu1 %v4870_v46 }
  0xda   :  { %2414 = vmatmul.mubr.bf16.gmra.mrb[92].mxu0 %v3977_v49  ;;  %4602 = vmatprep.subr.bf16.mxu1 %v4873_v51 }
  0xdb   :  { %4407 = vmatpush3.bf16.msra.mxu0 %v4871_v48  ;;  %2803 = vmatprep.mubr.bf16.mxu0 %v4877_v52 }
  0xdc   :  { %4408 = vmatprep.subr.bf16.mxu0 %v4872_v50 }
  0xdd   :  { %4603 = vmatpush3.bf16.msra.mxu1 %v4873_v51 }
  0xde   :  { %4604 = vmatprep.subr.bf16.mxu1 %v4878_v55 }
  0xdf   :  { %4409 = vmatpush3.bf16.msra.mxu0 %v4874_v53 }
  0xe1   :  { %4605 = vmatpush3.bf16.msra.mxu1 %v4878_v55 }
  0xe2   :  { %2804 = vmatmul.mubr.bf16.vlgmr.msra.gmra.mrb[96].mxu0 %v4875_v56 }
  0xe3   :  { %2811 = vmatprep.mubr.bf16.mxu0 %v4881_v57 }
  0xe4   :  { %4607 = vmatmul.mubr.bf16.vlgmr.msra.gmra.mrb[48].mxu1 %v4880_v58 }
  0xe5   :  { %4610 = vmatprep.mubr.bf16.mxu1 %v4887_v59 }
  0xea   :  { %2812 = vmatmul.mubr.bf16.gmra.mrb[100].mxu0 %v4883_v60 }
  0xeb   :  { %2819 = vmatprep.mubr.bf16.mxu0 %v4884_v61 }
  0xec   :  { %4611 = vmatmul.mubr.bf16.gmra.mrb[52].mxu1 %v4888_v62 }
  0xf2   :  { %2820 = vmatmul.mubr.bf16.gmra.mrb[104].mxu0 %v4886_v0 }
  0xf3   :  { %2827 = vmatprep.mubr.bf16.mxu0 %v4015_v1 }
  0xf5   :  { %v4098_v2 = vpop.f32.mrb[0].mxu0 }
  0xf6   :  { %v4099_v3 = vpop.f32.mrb[1].mxu0 }
  0xf7   :  { %v4100_v6 = vadd.f32 %v4099_v3, %v4098_v2  ;;  %v4101_v7 = vpop.f32.mrb[2].mxu0  ;;  %v4464_v9 = vpop.f32.mrb[0].mxu1 }
  0xf8   :  { %v4102_v8 = vpop.f32.mrb[3].mxu0  ;;  %v385_v12 = vpop.f32.mrb[1].mxu1 }
  0xf9   :  { %v4103_v10 = vadd.f32 %v4102_v8, %v4101_v7  ;;  %v322_v11 = vadd.f32 %v4100_v6, %v5694_v4  ;;  %v4465_v13 = vpop.f32.mrb[2].mxu1 }
  0xfa   :  { %2828 = vmatmul.mubr.bf16.gmra.mrb[108].mxu0 %v4014_v5  ;;  %v388_v16 = vpop.f32.mrb[3].mxu1 }
  0xfb   :  { %v386_v14 = vadd.f32 %v385_v12, %v322_v11  ;;  %v325_v15 = vadd.f32 %v4103_v10, %v5694_v4 }
  0xfd   :  { %v415_v17 = vmax.f32 %v386_v14, 0.0  ;;  %v389_v18 = vadd.f32 %v388_v16, %v325_v15  ;;  %v4104_v19 = vpop.f32.mrb[4].mxu0 }
  0xfe   :  { %v4105_v20 = vpop.f32.mrb[5].mxu0 }
  0xff   :  { %v416_v21 = vmax.f32 %v389_v18, 0.0  ;;  %v4106_v22 = vadd.f32 %v4105_v20, %v4104_v19  ;;  %v4107_v23 = vpop.f32.mrb[6].mxu0  ;;  %v4468_v29 = vpop.f32.mrb[4].mxu1 }
 0x100   :  { %v4108_v24 = vpop.f32.mrb[7].mxu0  ;;  %v401_v30 = vpop.f32.mrb[5].mxu1 }
 0x101   :  { %423 = vst [vmem:[#allocation2 + $0x8] sm:$0xff] %v416_v21  ;;  %v330_v25 = vadd.f32 %v4106_v22, %v5694_v4  ;;  %v4109_v26 = vadd.f32 %v4108_v24, %v4107_v23  ;;  %v4469_v34 = vpop.f32.mrb[6].mxu1 }
 0x102   :  { %v404_v36 = vpop.f32.mrb[7].mxu1 }
 0x103   :  { %v394_v27 = vadd.f32 %v4464_v9, %v330_v25  ;;  %v333_v28 = vadd.f32 %v4109_v26, %v5694_v4 }
 0x105   :  { %v417_v31 = vmax.f32 %v394_v27, 0.0  ;;  %v397_v32 = vadd.f32 %v4465_v13, %v333_v28  ;;  %v4110_v33 = vpop.f32.mrb[8].mxu0 }
 0x106   :  { %v4111_v35 = vpop.f32.mrb[9].mxu0 }
 0x107   :  { %424 = vst [vmem:[#allocation2 + $0x10] sm:$0xff] %v417_v31  ;;  %v418_v37 = vmax.f32 %v397_v32, 0.0  ;;  %v4112_v38 = vadd.f32 %v4111_v35, %v4110_v33  ;;  %v4113_v39 = vpop.f32.mrb[10].mxu0 }
 0x108   :  { %v4114_v40 = vpop.f32.mrb[11].mxu0  ;;  %v2914_v60 = vld [vmem:[#allocation2 + $0x8] sm:$0x3f] }
 0x109   :  { %425 = vst [vmem:[#allocation2 + $0x18] sm:$0xff] %v418_v37  ;;  %v4115_v41 = vadd.f32 %v4114_v40, %v4113_v39  ;;  %v338_v42 = vadd.f32 %v4112_v38, %v5694_v4 }
 0x10b   :  { %v402_v43 = vadd.f32 %v401_v30, %v338_v42  ;;  %v341_v44 = vadd.f32 %v4115_v41, %v5694_v4 }
 0x10d   :  { %v419_v45 = vmax.f32 %v402_v43, 0.0  ;;  %v405_v46 = vadd.f32 %v404_v36, %v341_v44  ;;  %v4116_v47 = vpop.f32.mrb[12].mxu0 }
 0x10e   :  { %v4117_v48 = vpop.f32.mrb[13].mxu0  ;;  %v2915_v54 = vld [vmem:[#allocation2 + $0xe] sm:$0xff] }
 0x10f   :  { %426 = vst [vmem:[#allocation2 + $0x20] sm:$0xff] %v419_v45  ;;  %v420_v49 = vmax.f32 %v405_v46, 0.0  ;;  %v4118_v50 = vadd.f32 %v4117_v48, %v4116_v47  ;;  %v4119_v51 = vpop.f32.mrb[14].mxu0  ;;  %v2917_v57 = vmax.f32 %v415_v17, %v2915_v54 }
 0x110   :  { %v4120_v52 = vpop.f32.mrb[15].mxu0  ;;  %v2916_v56 = vld [vmem:[#allocation2 + $0x16] sm:$0x3f] }
 0x111   :  { %427 = vst [vmem:[#allocation2 + $0x28] sm:$0xff] %v420_v49  ;;  %v346_v53 = vadd.f32 %v4118_v50, %v5694_v4  ;;  %v2918_v0 = vmax.f32 %v2914_v60, %v2916_v56 }
 0x113   :  { %v410_v55 = vadd.f32 %v4468_v29, %v346_v53 }
 0x115   :  { %v421_v58 = vmax.f32 %v410_v55, 0.0  ;;  %v4150_v59 = vpop.f32.mrb[16].mxu0 }
 0x116   :  { %v2919_v61 = vld [vmem:[#allocation2 + $0x1c] sm:$0xff]  ;;  %v4151_v62 = vpop.f32.mrb[17].mxu0 }
 0x117   :  { %v2921_v63 = vmax.f32 %v2917_v57, %v2919_v61  ;;  %428 = vst [vmem:[#allocation2 + $0x30] sm:$0xff] %v421_v58  ;;  %v4152_v1 = vadd.f32 %v4151_v62, %v4150_v59  ;;  %v4153_v2 = vpop.f32.mrb[18].mxu0  ;;  %v4488_v6 = vpop.f32.mrb[8].mxu1 }
 0x118   :  { %v2920_v3 = vld [vmem:[#allocation2 + $0x24] sm:$0x3f]  ;;  %v4154_v5 = vpop.f32.mrb[19].mxu0  ;;  %v799_v10 = vpop.f32.mrb[9].mxu1 }
 0x119   :  { %2923 = vst [vmem:[#allocation3] sm:$0xff] %v2921_v63  ;;  %v2922_v7 = vmax.f32 %v2918_v0, %v2920_v3  ;;  %v4155_v8 = vadd.f32 %v4154_v5, %v4153_v2  ;;  %v736_v9 = vadd.f32 %v4152_v1, %v5694_v4  ;;  %v5704_v11 = vpop.f32.mrb[10].mxu1  ;;  %v2962_v43 = vld [vmem:[#allocation2 + $0x24] sm:$0x3f] }
 0x11a   :  { %v802_v14 = vpop.f32.mrb[11].mxu1 }
 0x11b   :  { %2924 = vst [vmem:[#allocation3 + $0x8] sm:$0x3f] %v2922_v7  ;;  %v5706_v12 = vadd.f32 %v799_v10, %v736_v9  ;;  %v739_v13 = vadd.f32 %v4155_v8, %v5694_v4 }
 0x11d   :  { %v829_v15 = vmax.f32 %v5706_v12, 0.0  ;;  %v803_v16 = vadd.f32 %v802_v14, %v739_v13  ;;  %v4156_v17 = vpop.f32.mrb[20].mxu0 }
 0x11e   :  { %v2963_v18 = vld [vmem:[#allocation2 + $0x2a] sm:$0xff]  ;;  %v4157_v19 = vpop.f32.mrb[21].mxu0  ;;  %v2964_v32 = vld [vmem:[#allocation2 + $0x32] sm:$0x3f] }
 0x11f   :  { %v2965_v20 = vmax.f32 %v2919_v61, %v2963_v18  ;;  %v830_v21 = vmax.f32 %v803_v16, 0.0  ;;  %v4158_v22 = vadd.f32 %v4157_v19, %v4156_v17  ;;  %v4159_v23 = vpop.f32.mrb[22].mxu0  ;;  %v5713_v55 = vpop.f32.mrb[12].mxu1  ;;  %v2966_v60 = vmax.f32 %v2962_v43, %v2964_v32 }
 0x120   :  { %v2931_v24 = vld [vmem:[#allocation3 + $0x2] sm:$0x1]  ;;  %v2932_v25 = vld [vmem:[#allocation3 + $0x3] sm:$0x1]  ;;  %v2937_v26 = vld [vmem:[#allocation3 + $0x4] sm:$0x1] }
 0x121   :  { %837 = vst [vmem:[#allocation2 + $0x40] sm:$0xff] %v830_v21  ;;  %v744_v27 = vadd.f32 %v4158_v22, %v5694_v4  ;;  %v2926_v28 = vld [vmem:[#allocation3 + $0x1] sm:$0x1]  ;;  %v2934_v29 = vld [vmem:[#allocation3 + $0x4] sm:$0x1]  ;;  %v2933_v33 = vmax.f32 %v2931_v24, %v2932_v25  ;;  %v2969_v37 = vmax.f32 %v2965_v20, %v829_v15  ;;  %v4160_v49 = vpop.f32.mrb[23].mxu0 }
 0x122   :  { %v2938_v30 = vld [vmem:[#allocation3 + $0x5] sm:$0x1]  ;;  %v2943_v31 = vld [vmem:[#allocation3 + $0x6] sm:$0x1]  ;;  %v2944_v34 = vld [vmem:[#allocation3 + $0x7] sm:$0x1]  ;;  %v4161_v53 = vadd.f32 %v4160_v49, %v4159_v23 }
 0x123   :  { %v2946_v35 = vld [vmem:[#allocation3 + $0x8] sm:$0x1]  ;;  %v808_v38 = vadd.f32 %v4488_v6, %v744_v27  ;;  %v2939_v39 = vmax.f32 %v2937_v26, %v2938_v30  ;;  %v2940_v40 = vld [vmem:[#allocation3 + $0x6] sm:$0x1]  ;;  %v2950_v41 = vld [vmem:[#allocation3 + $0x9] sm:$0x1]  ;;  %v2935_v44 = vmax.f32 %v2933_v33, %v2934_v29  ;;  %v2945_v45 = vmax.f32 %v2943_v31, %v2944_v34 }
 0x124   :  { %v2949_v36 = vld [vmem:[#allocation3 + $0x8] sm:$0x1]  ;;  %v2955_v42 = vld [vmem:[#allocation3 + $0xa] sm:$0x1]  ;;  %v2928_v46 = vld [vmem:[#allocation3 + $0x2] sm:$0x1]  ;;  %v747_v2 = vadd.f32 %v4161_v53, %v5694_v4 }
 0x125   :  { %v2956_v47 = vld [vmem:[#allocation3 + $0xb] sm:$0x1]  ;;  %v831_v48 = vmax.f32 %v808_v38, 0.0  ;;  %v2941_v50 = vmax.f32 %v2939_v39, %v2940_v40  ;;  %v2951_v51 = vmax.f32 %v2949_v36, %v2950_v41  ;;  %v2952_v52 = vld [vmem:[#allocation3 + $0xa] sm:$0x1]  ;;  %v4162_v54 = vpop.f32.mrb[24].mxu0  ;;  %v2947_v57 = vmax.f32 %v2945_v45, %v2946_v35 }
 0x126   :  { %v2925_v56 = vld [vmem:[#allocation3] sm:$0x1]  ;;  %2936 = vst [vmem:[#allocation4 + $0x1] sm:$0x1] %v2935_v44  ;;  %v2957_v58 = vmax.f32 %v2955_v42, %v2956_v47  ;;  %v2958_v59 = vld [vmem:[#allocation3 + $0xc] sm:$0x1]  ;;  %v811_v14 = vadd.f32 %v5704_v11, %v747_v2 }
 0x127   :  { %838 = vst [vmem:[#allocation2 + $0x48] sm:$0xff] %v831_v48  ;;  %v4163_v61 = vpop.f32.mrb[25].mxu0  ;;  %v815_v62 = vpop.f32.mrb[13].mxu1  ;;  %v2927_v63 = vmax.f32 %v2925_v56, %v2926_v28  ;;  %2942 = vst [vmem:[#allocation4 + $0x2] sm:$0x1] %v2941_v50  ;;  %v2953_v0 = vmax.f32 %v2951_v51, %v2952_v52 }
 0x128   :  { %2971 = vst [vmem:[#allocation3] sm:$0xff] %v2969_v37  ;;  %v2968_v1 = vld [vmem:[#allocation2 + $0x40] sm:$0x3f]  ;;  %v4164_v3 = vadd.f32 %v4163_v61, %v4162_v54  ;;  %v4165_v5 = vpop.f32.mrb[26].mxu0  ;;  %v4493_v6 = vpop.f32.mrb[14].mxu1  ;;  %v2959_v7 = vmax.f32 %v2957_v58, %v2958_v59  ;;  %v832_v18 = vmax.f32 %v811_v14, 0.0 }
 0x129   :  { %2948 = vst [vmem:[#allocation4 + $0x3] sm:$0x1] %v2947_v57  ;;  %v2970_v8 = vmax.f32 %v2966_v60, %v2968_v1  ;;  %v4166_v9 = vpop.f32.mrb[27].mxu0  ;;  %v818_v10 = vpop.f32.mrb[15].mxu1  ;;  %v2929_v13 = vmax.f32 %v2927_v63, %v2928_v46  ;;  %2954 = vst [vmem:[#allocation4 + $0x4] sm:$0x1] %v2953_v0 }
 0x12a   :  { %v4167_v16 = vadd.f32 %v4166_v9, %v4165_v5  ;;  %v752_v17 = vadd.f32 %v4164_v3, %v5694_v4  ;;  %2960 = vst [vmem:[#allocation4 + $0x5] sm:$0x1] %v2959_v7  ;;  %839 = vst [vmem:[#allocation2 + $0x50] sm:$0xff] %v832_v18  ;;  %v3010_v1 = vld [vmem:[#allocation2 + $0x40] sm:$0x3f] }
 0x12b   :  { %2972 = vst [vmem:[#allocation3 + $0x8] sm:$0x3f] %v2970_v8  ;;  %2930 = vst [vmem:[#allocation4] sm:$0x1] %v2929_v13 }
 0x12c   :  { %v816_v19 = vadd.f32 %v815_v62, %v752_v17  ;;  %v755_v20 = vadd.f32 %v4167_v16, %v5694_v4 }
 0x12d   :  { %v4168_v21 = vpop.f32.mrb[28].mxu0 }
 0x12e   :  { %v833_v22 = vmax.f32 %v816_v19, 0.0  ;;  %v819_v23 = vadd.f32 %v818_v10, %v755_v20  ;;  %v4169_v24 = vpop.f32.mrb[29].mxu0  ;;  %v3011_v34 = vld [vmem:[#allocation2 + $0x46] sm:$0xff] }
 0x12f   :  { %v2973_v25 = vld [vmem:[#allocation3] sm:$0x1]  ;;  %v4170_v26 = vadd.f32 %v4169_v24, %v4168_v21  ;;  %v4171_v27 = vpop.f32.mrb[30].mxu0  ;;  %v2974_v28 = vld [vmem:[#allocation3 + $0x1] sm:$0x1] }
 0x130   :  { %v2976_v11 = vld [vmem:[#allocation3 + $0x2] sm:$0x1]  ;;  %840 = vst [vmem:[#allocation2 + $0x58] sm:$0xff] %v833_v22  ;;  %v834_v29 = vmax.f32 %v819_v23, 0.0  ;;  %v4172_v30 = vpop.f32.mrb[31].mxu0  ;;  %v2975_v31 = vmax.f32 %v2973_v25, %v2974_v28 }
 0x131   :  { %v2979_v32 = vld [vmem:[#allocation3 + $0x2] sm:$0x1]  ;;  %v2980_v33 = vld [vmem:[#allocation3 + $0x3] sm:$0x1]  ;;  %v760_v35 = vadd.f32 %v4170_v26, %v5694_v4  ;;  %v2982_v37 = vld [vmem:[#allocation3 + $0x4] sm:$0x1] }
 0x132   :  { %v2981_v36 = vmax.f32 %v2979_v32, %v2980_v33  ;;  %v2985_v38 = vld [vmem:[#allocation3 + $0x4] sm:$0x1]  ;;  %v2986_v39 = vld [vmem:[#allocation3 + $0x5] sm:$0x1]  ;;  %841 = vst [vmem:[#allocation2 + $0x60] sm:$0xff] %v834_v29  ;;  %v2977_v40 = vmax.f32 %v2975_v31, %v2976_v11 }
 0x133   :  { %v2987_v41 = vmax.f32 %v2985_v38, %v2986_v39  ;;  %v2988_v42 = vld [vmem:[#allocation3 + $0x6] sm:$0x1]  ;;  %v2992_v44 = vld [vmem:[#allocation3 + $0x7] sm:$0x1]  ;;  %v824_v45 = vadd.f32 %v5713_v55, %v760_v35  ;;  %v2994_v48 = vld [vmem:[#allocation3 + $0x8] sm:$0x1]  ;;  %v3013_v55 = vmax.f32 %v829_v15, %v3011_v34 }
 0x134   :  { %v2991_v43 = vld [vmem:[#allocation3 + $0x6] sm:$0x1]  ;;  %v2983_v46 = vmax.f32 %v2981_v36, %v2982_v37  ;;  %v2997_v49 = vld [vmem:[#allocation3 + $0x8] sm:$0x1]  ;;  %v2998_v50 = vld [vmem:[#allocation3 + $0x9] sm:$0x1] }
 0x135   :  { %v2993_v47 = vmax.f32 %v2991_v43, %v2992_v44  ;;  %2978 = vst [vmem:[#allocation4 + $0x6] sm:$0x1] %v2977_v40  ;;  %v2989_v51 = vmax.f32 %v2987_v41, %v2988_v42  ;;  %v2999_v52 = vmax.f32 %v2997_v49, %v2998_v50  ;;  %v3003_v53 = vld [vmem:[#allocation3 + $0xa] sm:$0x1]  ;;  %v3004_v54 = vld [vmem:[#allocation3 + $0xb] sm:$0x1] }
 0x136   :  { %v3012_v56 = vld [vmem:[#allocation2 + $0x4e] sm:$0x3f]  ;;  %v835_v57 = vmax.f32 %v824_v45, 0.0  ;;  %v4202_v58 = vpop.f32.mrb[32].mxu0  ;;  %2984 = vst [vmem:[#allocation4 + $0x7] sm:$0x1] %v2983_v46  ;;  %v3005_v61 = vmax.f32 %v3003_v53, %v3004_v54 }
 0x137   :  { %v2995_v59 = vmax.f32 %v2993_v47, %v2994_v48  ;;  %v3000_v60 = vld [vmem:[#allocation3 + $0xa] sm:$0x1]  ;;  %v4203_v62 = vpop.f32.mrb[33].mxu0  ;;  %2990 = vst [vmem:[#allocation4 + $0x8] sm:$0x1] %v2989_v51  ;;  %v3015_v2 = vld [vmem:[#allocation2 + $0x54] sm:$0xff]  ;;  %v3014_v8 = vmax.f32 %v3010_v1, %v3012_v56 }
 0x138   :  { %v3001_v63 = vmax.f32 %v2999_v52, %v3000_v60  ;;  %v3006_v0 = vld [vmem:[#allocation3 + $0xc] sm:$0x1]  ;;  %842 = vst [vmem:[#allocation2 + $0x68] sm:$0xff] %v835_v57  ;;  %v4204_v3 = vadd.f32 %v4203_v62, %v4202_v58  ;;  %v4205_v5 = vpop.f32.mrb[34].mxu0  ;;  %v3017_v7 = vmax.f32 %v3013_v55, %v3015_v2  ;;  %v4512_v10 = vpop.f32.mrb[16].mxu1 }
 0x139   :  { %2996 = vst [vmem:[#allocation4 + $0x9] sm:$0x1] %v2995_v59  ;;  %v3007_v6 = vmax.f32 %v3005_v61, %v3006_v0  ;;  %v4206_v9 = vpop.f32.mrb[35].mxu0  ;;  %v3016_v13 = vld [vmem:[#allocation2 + $0x5c] sm:$0x3f]  ;;  %v1213_v15 = vpop.f32.mrb[17].mxu1 }
 0x13a   :  { %3002 = vst [vmem:[#allocation4 + $0xa] sm:$0x1] %v3001_v63  ;;  %v4207_v14 = vadd.f32 %v4206_v9, %v4205_v5  ;;  %v1150_v12 = vadd.f32 %v4204_v3, %v5694_v4  ;;  %v3018_v16 = vmax.f32 %v3014_v8, %v3016_v13  ;;  %v4513_v17 = vpop.f32.mrb[18].mxu1  ;;  %3019 = vst [vmem:[#allocation3] sm:$0xff] %v3017_v7  ;;  %v3058_v49 = vld [vmem:[#allocation2 + $0x5c] sm:$0x3f] }
 0x13b   :  { %3008 = vst [vmem:[#allocation4 + $0xb] sm:$0x1] %v3007_v6  ;;  %v1216_v20 = vpop.f32.mrb[19].mxu1 }
 0x13c   :  { %v5724_v18 = vadd.f32 %v1213_v15, %v1150_v12  ;;  %v1153_v19 = vadd.f32 %v4207_v14, %v5694_v4  ;;  %3020 = vst [vmem:[#allocation3 + $0x8] sm:$0x3f] %v3018_v16 }
 0x13d   :  { %v3489_v21 = vld [vmem:[#allocation4] sm:$0xff]  ;;  %v4208_v24 = vpop.f32.mrb[36].mxu0 }
 0x13e   :  { %v1243_v22 = vmax.f32 %v5724_v18, 0.0  ;;  %v1217_v23 = vadd.f32 %v1216_v20, %v1153_v19  ;;  %v5728_v25 = vmul.f32 %v3489_v21, %v3489_v21  ;;  %v4209_v27 = vpop.f32.mrb[37].mxu0 }
 0x13f   :  { %v3059_v26 = vld [vmem:[#allocation2 + $0x62] sm:$0xff]  ;;  %v4210_v29 = vadd.f32 %v4209_v27, %v4208_v24  ;;  %v4211_v30 = vpop.f32.mrb[38].mxu0  ;;  %v3060_v38 = vld [vmem:[#allocation2 + $0x6a] sm:$0x3f]  ;;  %v5742_v45 = vpop.f32.mrb[20].mxu1 }
 0x140   :  { %v3061_v28 = vmax.f32 %v3015_v2, %v3059_v26  ;;  %v1244_v11 = vmax.f32 %v1217_v23, 0.0  ;;  %3525 = vrot.lane.b32.xlu1 %v5728_v25, %s4932_s0  ;;  %3507 = vrot.lane.b32.xlu0 %v5728_v25, %s4933_s17  ;;  %v4212_v31 = vpop.f32.mrb[39].mxu0  ;;  %v1229_v50 = vpop.f32.mrb[21].mxu1  ;;  %v3062_v3 = vmax.f32 %v3058_v49, %v3060_v38 }
 0x141   :  { %v1158_v32 = vadd.f32 %v4210_v29, %v5694_v4  ;;  %v4213_v33 = vadd.f32 %v4212_v31, %v4211_v30  ;;  %v3021_v34 = vld [vmem:[#allocation3] sm:$0x1]  ;;  %v3022_v35 = vld [vmem:[#allocation3 + $0x1] sm:$0x1]  ;;  %v3024_v36 = vld [vmem:[#allocation3 + $0x2] sm:$0x1] }
 0x142   :  { %1251 = vst [vmem:[#allocation2 + $0x78] sm:$0xff] %v1244_v11  ;;  %v3065_v37 = vmax.f32 %v3061_v28, %v1243_v22  ;;  %v3023_v39 = vmax.f32 %v3021_v34, %v3022_v35  ;;  %v3027_v40 = vld [vmem:[#allocation3 + $0x2] sm:$0x1]  ;;  %v3028_v41 = vld [vmem:[#allocation3 + $0x3] sm:$0x1]  ;;  %v4517_v59 = vpop.f32.mrb[22].mxu1 }
 0x143   :  { %v3030_v42 = vld [vmem:[#allocation3 + $0x4] sm:$0x1]  ;;  %v1222_v43 = vadd.f32 %v4512_v10, %v1158_v32  ;;  %v1161_v44 = vadd.f32 %v4213_v33, %v5694_v4  ;;  %v3029_v46 = vmax.f32 %v3027_v40, %v3028_v41  ;;  %v3034_v48 = vld [vmem:[#allocation3 + $0x5] sm:$0x1]  ;;  %v3036_v53 = vld [vmem:[#allocation3 + $0x6] sm:$0x1] }
 0x144   :  { %3579 = vrot.lane.b32.xlu1 %v5728_v25, %s4934_s18  ;;  %3561 = vrot.lane.b32.xlu0 %v5728_v25, %s4935_s19  ;;  %v3033_v47 = vld [vmem:[#allocation3 + $0x4] sm:$0x1]  ;;  %v3025_v51 = vmax.f32 %v3023_v39, %v3024_v36  ;;  %v3039_v54 = vld [vmem:[#allocation3 + $0x6] sm:$0x1]  ;;  %v3040_v61 = vld [vmem:[#allocation3 + $0x7] sm:$0x1] }
 0x145   :  { %v3035_v52 = vmax.f32 %v3033_v47, %v3034_v48  ;;  %v1245_v56 = vmax.f32 %v1222_v43, 0.0  ;;  %v1225_v57 = vadd.f32 %v4513_v17, %v1161_v44  ;;  %v4214_v58 = vpop.f32.mrb[40].mxu0  ;;  %v3031_v60 = vmax.f32 %v3029_v46, %v3030_v42  ;;  %v1232_v62 = vpop.f32.mrb[23].mxu1  ;;  %v3042_v1 = vld [vmem:[#allocation3 + $0x8] sm:$0x1]  ;;  %3067 = vst [vmem:[#allocation3] sm:$0xff] %v3065_v37 }
 0x146   :  { %v4215_v55 = vpop.f32.mrb[41].mxu0  ;;  %3026 = vst [vmem:[#allocation4 + $0xc] sm:$0x1] %v3025_v51  ;;  %v3041_v0 = vmax.f32 %v3039_v54, %v3040_v61  ;;  %v3045_v2 = vld [vmem:[#allocation3 + $0x8] sm:$0x1] }
 0x147   :  { %v3037_v63 = vmax.f32 %v3035_v52, %v3036_v53  ;;  %1252 = vst [vmem:[#allocation2 + $0x80] sm:$0xff] %v1245_v56  ;;  %v1246_v5 = vmax.f32 %v1225_v57, 0.0  ;;  %v4216_v6 = vadd.f32 %v4215_v55, %v4214_v58  ;;  %v4217_v7 = vpop.f32.mrb[42].mxu0  ;;  %3032 = vst [vmem:[#allocation4 + $0xd] sm:$0x1] %v3031_v60 }
 0x148   :  { %v3046_v8 = vld [vmem:[#allocation3 + $0x9] sm:$0x1]  ;;  %v4218_v10 = vpop.f32.mrb[43].mxu0  ;;  %v3043_v13 = vmax.f32 %v3041_v0, %v3042_v1  ;;  %v3048_v17 = vld [vmem:[#allocation3 + $0xa] sm:$0x1] }
 0x149   :  { %v3064_v9 = vld [vmem:[#allocation2 + $0x78] sm:$0x3f]  ;;  %3038 = vst [vmem:[#allocation4 + $0xe] sm:$0x1] %v3037_v63  ;;  %v3047_v14 = vmax.f32 %v3045_v2, %v3046_v8  ;;  %1253 = vst [vmem:[#allocation2 + $0x88] sm:$0xff] %v1246_v5  ;;  %v4219_v15 = vadd.f32 %v4218_v10, %v4217_v7  ;;  %v1166_v16 = vadd.f32 %v4216_v6, %v5694_v4 }
 0x14a   :  { %v3066_v12 = vmax.f32 %v3062_v3, %v3064_v9  ;;  %v3051_v19 = vld [vmem:[#allocation3 + $0xa] sm:$0x1]  ;;  %v3052_v20 = vld [vmem:[#allocation3 + $0xb] sm:$0x1]  ;;  %3044 = vst [vmem:[#allocation4 + $0xf] sm:$0x1] %v3043_v13 }
 0x14b   :  { %v3049_v21 = vmax.f32 %v3047_v14, %v3048_v17  ;;  %v3053_v23 = vmax.f32 %v3051_v19, %v3052_v20  ;;  %v3054_v24 = vld [vmem:[#allocation3 + $0xc] sm:$0x1]  ;;  %v1230_v26 = vadd.f32 %v1229_v50, %v1166_v16  ;;  %v1169_v27 = vadd.f32 %v4219_v15, %v5694_v4  ;;  %v3106_v9 = vld [vmem:[#allocation2 + $0x78] sm:$0x3f] }
 0x14c   :  { %3068 = vst [vmem:[#allocation3 + $0x8] sm:$0x3f] %v3066_v12  ;;  %v3069_v31 = vld [vmem:[#allocation3] sm:$0x1]  ;;  %v3070_v32 = vld [vmem:[#allocation3 + $0x1] sm:$0x1] }
 0x14d   :  { %3050 = vst [vmem:[#allocation4 + $0x10] sm:$0x1] %v3049_v21  ;;  %v3055_v28 = vmax.f32 %v3053_v23, %v3054_v24  ;;  %v1247_v11 = vmax.f32 %v1230_v26, 0.0  ;;  %v1233_v29 = vadd.f32 %v1232_v62, %v1169_v27  ;;  %v4220_v30 = vpop.f32.mrb[44].mxu0  ;;  %v3071_v34 = vmax.f32 %v3069_v31, %v3070_v32  ;;  %v3075_v35 = vld [vmem:[#allocation3 + $0x2] sm:$0x1] }
 0x14e   :  { %v4221_v33 = vpop.f32.mrb[45].mxu0  ;;  %v3072_v39 = vld [vmem:[#allocation3 + $0x2] sm:$0x1]  ;;  %v3076_v40 = vld [vmem:[#allocation3 + $0x3] sm:$0x1]  ;;  %v3107_v41 = vld [vmem:[#allocation2 + $0x7e] sm:$0xff] }
 0x14f   :  { %3056 = vst [vmem:[#allocation4 + $0x11] sm:$0x1] %v3055_v28  ;;  %1254 = vst [vmem:[#allocation2 + $0x90] sm:$0xff] %v1247_v11  ;;  %v1248_v36 = vmax.f32 %v1233_v29, 0.0  ;;  %v4222_v37 = vadd.f32 %v4221_v33, %v4220_v30  ;;  %v4223_v38 = vpop.f32.mrb[46].mxu0  ;;  %v3073_v43 = vmax.f32 %v3071_v34, %v3072_v39  ;;  %v3077_v44 = vmax.f32 %v3075_v35, %v3076_v40 }
 0x150   :  { %v4224_v42 = vpop.f32.mrb[47].mxu0  ;;  %v3081_v46 = vld [vmem:[#allocation3 + $0x4] sm:$0x1]  ;;  %v3082_v50 = vld [vmem:[#allocation3 + $0x5] sm:$0x1]  ;;  %v3109_v3 = vmax.f32 %v1243_v22, %v3107_v41 }
 0x151   :  { %1255 = vst [vmem:[#allocation2 + $0x98] sm:$0xff] %v1248_v36  ;;  %v1174_v47 = vadd.f32 %v4222_v37, %v5694_v4  ;;  %v3490_v48 = vld [vmem:[#allocation4 + $0x8] sm:$0xff]  ;;  %v3078_v49 = vld [vmem:[#allocation3 + $0x4] sm:$0x1]  ;;  %3074 = vst [vmem:[#allocation4 + $0x12] sm:$0x1] %v3073_v43  ;;  %v3083_v53 = vmax.f32 %v3081_v46, %v3082_v50 }
 0x152   :  { %v5747_v51 = vmul.f32 %v3490_v48, %v3490_v48  ;;  %v3079_v52 = vmax.f32 %v3077_v44, %v3078_v49  ;;  %v3087_v54 = vld [vmem:[#allocation3 + $0x6] sm:$0x1]  ;;  %v3088_v56 = vld [vmem:[#allocation3 + $0x7] sm:$0x1]  ;;  %v3108_v62 = vld [vmem:[#allocation2 + $0x86] sm:$0x3f] }
 0x153   :  { %v3090_v57 = vld [vmem:[#allocation3 + $0x8] sm:$0x1]  ;;  %v1238_v58 = vadd.f32 %v5742_v45, %v1174_v47  ;;  %v3084_v59 = vld [vmem:[#allocation3 + $0x6] sm:$0x1]  ;;  %v3089_v60 = vmax.f32 %v3087_v54, %v3088_v56  ;;  %v3094_v55 = vld [vmem:[#allocation3 + $0x9] sm:$0x1]  ;;  %v3110_v16 = vmax.f32 %v3106_v9, %v3108_v62 }
 0x154   :  { %v3093_v61 = vld [vmem:[#allocation3 + $0x8] sm:$0x1]  ;;  %3563 = vrot.lane.b32.xlu1 %v5747_v51, %s4935_s19  ;;  %3509 = vrot.lane.b32.xlu0 %v5747_v51, %s4933_s17  ;;  %3080 = vst [vmem:[#allocation4 + $0x13] sm:$0x1] %v3079_v52  ;;  %v3085_v63 = vmax.f32 %v3083_v53, %v3084_v59  ;;  %v3099_v1 = vld [vmem:[#allocation3 + $0xa] sm:$0x1] }
 0x155   :  { %v3095_v0 = vmax.f32 %v3093_v61, %v3094_v55  ;;  %v3100_v2 = vld [vmem:[#allocation3 + $0xb] sm:$0x1]  ;;  %v1249_v45 = vmax.f32 %v1238_v58, 0.0  ;;  %v4254_v5 = vpop.f32.mrb[48].mxu0  ;;  %v3091_v6 = vmax.f32 %v3089_v60, %v3090_v57  ;;  %v3096_v7 = vld [vmem:[#allocation3 + $0xa] sm:$0x1] }
 0x156   :  { %v3101_v8 = vmax.f32 %v3099_v1, %v3100_v2  ;;  %v3111_v10 = vld [vmem:[#allocation2 + $0x8c] sm:$0xff]  ;;  %v4255_v13 = vpop.f32.mrb[49].mxu0  ;;  %3086 = vst [vmem:[#allocation4 + $0x14] sm:$0x1] %v3085_v63  ;;  %v3102_v12 = vld [vmem:[#allocation3 + $0xc] sm:$0x1] }
 0x157   :  { %v3097_v14 = vmax.f32 %v3095_v0, %v3096_v7  ;;  %v3113_v15 = vmax.f32 %v3109_v3, %v3111_v10  ;;  %1256 = vst [vmem:[#allocation2 + $0xa0] sm:$0xff] %v1249_v45  ;;  %v4256_v17 = vadd.f32 %v4255_v13, %v4254_v5  ;;  %v4257_v19 = vpop.f32.mrb[50].mxu0  ;;  %3092 = vst [vmem:[#allocation4 + $0x15] sm:$0x1] %v3091_v6  ;;  %v4536_v21 = vpop.f32.mrb[24].mxu1 }
 0x158   :  { %v3103_v20 = vmax.f32 %v3101_v8, %v3102_v12  ;;  %v3112_v18 = vld [vmem:[#allocation2 + $0x94] sm:$0x3f]  ;;  %3527 = vrot.lane.b32.xlu0 %v5747_v51, %s4932_s0  ;;  %v4258_v22 = vpop.f32.mrb[51].mxu0  ;;  %v1627_v27 = vpop.f32.mrb[25].mxu1 }
 0x159   :  { %3098 = vst [vmem:[#allocation4 + $0x16] sm:$0x1] %v3097_v14  ;;  %v3114_v23 = vmax.f32 %v3110_v16, %v3112_v18  ;;  %v4259_v24 = vadd.f32 %v4258_v22, %v4257_v19  ;;  %v1564_v26 = vadd.f32 %v4256_v17, %v5694_v4  ;;  %3115 = vst [vmem:[#allocation3] sm:$0xff] %v3113_v15  ;;  %v4537_v28 = vpop.f32.mrb[26].mxu1  ;;  %v3154_v58 = vld [vmem:[#allocation2 + $0x94] sm:$0x3f] }
 0x15a   :  { %3104 = vst [vmem:[#allocation4 + $0x17] sm:$0x1] %v3103_v20  ;;  %v1630_v30 = vpop.f32.mrb[27].mxu1 }
 0x15b   :  { %v1628_v11 = vadd.f32 %v1627_v27, %v1564_v26  ;;  %v1567_v29 = vadd.f32 %v4259_v24, %v5694_v4  ;;  %3116 = vst [vmem:[#allocation3 + $0x8] sm:$0x3f] %v3114_v23 }
 0x15c   :  { %3581 = vrot.lane.b32.xlu0 %v5747_v51, %s4934_s18 }
 0x15d   :  { %v1657_v31 = vmax.f32 %v1628_v11, 0.0  ;;  %v1631_v32 = vadd.f32 %v1630_v30, %v1567_v29  ;;  %v4260_v33 = vpop.f32.mrb[52].mxu0 }
 0x15e   :  { %v3155_v34 = vld [vmem:[#allocation2 + $0x9a] sm:$0xff]  ;;  %v4261_v35 = vpop.f32.mrb[53].mxu0  ;;  %v3156_v44 = vld [vmem:[#allocation2 + $0xa2] sm:$0x3f] }
 0x15f   :  { %v3157_v36 = vmax.f32 %v3111_v10, %v3155_v34  ;;  %v1658_v37 = vmax.f32 %v1631_v32, 0.0  ;;  %v4263_v38 = vpop.f32.mrb[54].mxu0  ;;  %v5769_v60 = vpop.f32.mrb[28].mxu1  ;;  %v3158_v10 = vmax.f32 %v3154_v58, %v3156_v44 }
 0x160   :  { %v4264_v39 = vpop.f32.mrb[55].mxu0  ;;  %v3117_v41 = vld [vmem:[#allocation3] sm:$0x1]  ;;  %v3118_v42 = vld [vmem:[#allocation3 + $0x1] sm:$0x1]  ;;  %v1643_v63 = vpop.f32.mrb[29].mxu1 }
 0x161   :  { %v3491_v40 = vld [vmem:[#allocation4 + $0x10] sm:$0xff]  ;;  %v3161_v43 = vmax.f32 %v3157_v36, %v1657_v31  ;;  %1665 = vst [vmem:[#allocation2 + $0xb0] sm:$0xff] %v1658_v37  ;;  %v4265_v46 = vadd.f32 %v4264_v39, %v4263_v38  ;;  %v3119_v52 = vmax.f32 %v3117_v41, %v3118_v42  ;;  %v4541_v6 = vpop.f32.mrb[30].mxu1 }
 0x162   :  { %v5762_v47 = vmul.f32 %v3491_v40, %v3491_v40  ;;  %v3120_v48 = vld [vmem:[#allocation3 + $0x2] sm:$0x1]  ;;  %v3124_v50 = vld [vmem:[#allocation3 + $0x3] sm:$0x1]  ;;  %v3126_v54 = vld [vmem:[#allocation3 + $0x4] sm:$0x1] }
 0x163   :  { %v3123_v49 = vld [vmem:[#allocation3 + $0x2] sm:$0x1]  ;;  %v3129_v56 = vld [vmem:[#allocation3 + $0x4] sm:$0x1]  ;;  %v3130_v57 = vld [vmem:[#allocation3 + $0x5] sm:$0x1]  ;;  %v1575_v59 = vadd.f32 %v4265_v46, %v5694_v4  ;;  %v3121_v0 = vmax.f32 %v3119_v52, %v3120_v48 }
 0x164   :  { %v3125_v53 = vmax.f32 %v3123_v49, %v3124_v50  ;;  %3511 = vrot.lane.b32.xlu1 %v5762_v47, %s4933_s17  ;;  %3565 = vrot.lane.b32.xlu0 %v5762_v47, %s4935_s19  ;;  %v3131_v61 = vmax.f32 %v3129_v56, %v3130_v57  ;;  %v3132_v55 = vld [vmem:[#allocation3 + $0x6] sm:$0x1]  ;;  %v3136_v2 = vld [vmem:[#allocation3 + $0x7] sm:$0x1]  ;;  %v3138_v3 = vld [vmem:[#allocation3 + $0x8] sm:$0x1] }
 0x165   :  { %v3135_v62 = vld [vmem:[#allocation3 + $0x6] sm:$0x1]  ;;  %v1639_v45 = vadd.f32 %v4537_v28, %v1575_v59  ;;  %v4266_v5 = vpop.f32.mrb[56].mxu0  ;;  %v3141_v9 = vld [vmem:[#allocation3 + $0x8] sm:$0x1]  ;;  %v1646_v14 = vpop.f32.mrb[31].mxu1 }
 0x166   :  { %v3127_v1 = vmax.f32 %v3125_v53, %v3126_v54  ;;  %v3133_v7 = vmax.f32 %v3131_v61, %v3132_v55  ;;  %v3137_v8 = vmax.f32 %v3135_v62, %v3136_v2  ;;  %3163 = vst [vmem:[#allocation3] sm:$0xff] %v3161_v43  ;;  %v4267_v13 = vpop.f32.mrb[57].mxu0  ;;  %3122 = vst [vmem:[#allocation4 + $0x18] sm:$0x1] %v3121_v0  ;;  %v3142_v12 = vld [vmem:[#allocation3 + $0x9] sm:$0x1] }
 0x167   :  { %v1660_v15 = vmax.f32 %v1639_v45, 0.0  ;;  %v4268_v16 = vadd.f32 %v4267_v13, %v4266_v5  ;;  %v4269_v17 = vpop.f32.mrb[58].mxu0  ;;  %v3143_v20 = vmax.f32 %v3141_v9, %v3142_v12  ;;  %v3147_v18 = vld [vmem:[#allocation3 + $0xa] sm:$0x1]  ;;  %v3148_v22 = vld [vmem:[#allocation3 + $0xb] sm:$0x1] }
 0x168   :  { %3128 = vst [vmem:[#allocation4 + $0x19] sm:$0x1] %v3127_v1  ;;  %3529 = vrot.lane.b32.xlu1 %v5762_v47, %s4932_s0  ;;  %3134 = vst [vmem:[#allocation4 + $0x1a] sm:$0x1] %v3133_v7  ;;  %v3139_v19 = vmax.f32 %v3137_v8, %v3138_v3  ;;  %v3160_v21 = vld [vmem:[#allocation2 + $0xb0] sm:$0x3f]  ;;  %v3149_v26 = vmax.f32 %v3147_v18, %v3148_v22 }
 0x169   :  { %v4270_v23 = vpop.f32.mrb[59].mxu0  ;;  %v3144_v24 = vld [vmem:[#allocation3 + $0xa] sm:$0x1]  ;;  %v3162_v27 = vmax.f32 %v3158_v10, %v3160_v21  ;;  %1667 = vst [vmem:[#allocation2 + $0xc0] sm:$0xff] %v1660_v15  ;;  %v1580_v11 = vadd.f32 %v4268_v16, %v5694_v4  ;;  %v3150_v30 = vld [vmem:[#allocation3 + $0xc] sm:$0x1] }
 0x16a   :  { %v4271_v28 = vadd.f32 %v4270_v23, %v4269_v17  ;;  %3140 = vst [vmem:[#allocation4 + $0x1b] sm:$0x1] %v3139_v19  ;;  %v3145_v29 = vmax.f32 %v3143_v20, %v3144_v24  ;;  %v3151_v31 = vmax.f32 %v3149_v26, %v3150_v30  ;;  %v5780_v61 = vld [vmem:[%s5970_s2] ss:$0 sm:$0xff] }
 0x16b   :  { %v1644_v32 = vadd.f32 %v1643_v63, %v1580_v11  ;;  %3164 = vst [vmem:[#allocation3 + $0x8] sm:$0x3f] %v3162_v27 }
 0x16c   :  { %3583 = vrot.lane.b32.xlu1 %v5762_v47, %s4934_s18  ;;  %v1583_v33 = vadd.f32 %v4271_v28, %v5694_v4  ;;  %3146 = vst [vmem:[#allocation4 + $0x1c] sm:$0x1] %v3145_v29  ;;  %3152 = vst [vmem:[#allocation4 + $0x1d] sm:$0x1] %v3151_v31 }
 0x16d   :  { %v3165_v34 = vld [vmem:[#allocation3] sm:$0x1]  ;;  %v3166_v35 = vld [vmem:[#allocation3 + $0x1] sm:$0x1]  ;;  %v1661_v36 = vmax.f32 %v1644_v32, 0.0  ;;  %v4272_v38 = vpop.f32.mrb[60].mxu0 }
 0x16e   :  { %v1647_v37 = vadd.f32 %v1646_v14, %v1583_v33  ;;  %v3167_v39 = vmax.f32 %v3165_v34, %v3166_v35  ;;  %v3171_v40 = vld [vmem:[#allocation3 + $0x2] sm:$0x1]  ;;  %v3172_v41 = vld [vmem:[#allocation3 + $0x3] sm:$0x1]  ;;  %v4273_v42 = vpop.f32.mrb[61].mxu0 }
 0x16f   :  { %v3168_v43 = vld [vmem:[#allocation3 + $0x2] sm:$0x1]  ;;  %v3173_v44 = vmax.f32 %v3171_v40, %v3172_v41  ;;  %v3177_v46 = vld [vmem:[#allocation3 + $0x4] sm:$0x1]  ;;  %1668 = vst [vmem:[#allocation2 + $0xc8] sm:$0xff] %v1661_v36  ;;  %v4274_v49 = vadd.f32 %v4273_v42, %v4272_v38  ;;  %v4275_v50 = vpop.f32.mrb[62].mxu0 }
 0x170   :  { %v1662_v48 = vmax.f32 %v1647_v37, 0.0  ;;  %v3169_v4 = vmax.f32 %v3167_v39, %v3168_v43  ;;  %v3174_v52 = vld [vmem:[#allocation3 + $0x4] sm:$0x1]  ;;  %v3178_v53 = vld [vmem:[#allocation3 + $0x5] sm:$0x1]  ;;  %v4276_v54 = vpop.f32.mrb[63].mxu0 }
 0x171   :  { %v3175_v56 = vmax.f32 %v3173_v44, %v3174_v52  ;;  %v3179_v57 = vmax.f32 %v3177_v46, %v3178_v53  ;;  %v3183_v58 = vld [vmem:[#allocation3 + $0x6] sm:$0x1]  ;;  %v3184_v59 = vld [vmem:[#allocation3 + $0x7] sm:$0x1]  ;;  %v1588_v55 = vadd.f32 %v5780_v61, %v4274_v49 }
 0x172   :  { %1669 = vst [vmem:[#allocation2 + $0xd0] sm:$0xff] %v1662_v48  ;;  %3170 = vst [vmem:[#allocation4 + $0x1e] sm:$0x1] %v3169_v4  ;;  %v3180_v62 = vld [vmem:[#allocation3 + $0x6] sm:$0x1]  ;;  %v3185_v63 = vmax.f32 %v3183_v58, %v3184_v59 }
 0x173   :  { %3176 = vst [vmem:[#allocation4 + $0x1f] sm:$0x1] %v3175_v56  ;;  %v3181_v0 = vmax.f32 %v3179_v57, %v3180_v62  ;;  %v3186_v1 = vld [vmem:[#allocation3 + $0x8] sm:$0x1]  ;;  %v3190_v3 = vld [vmem:[#allocation3 + $0x9] sm:$0x1]  ;;  %v1652_v45 = vadd.f32 %v5769_v60, %v1588_v55 }
 0x174   :  { %v3189_v2 = vld [vmem:[#allocation3 + $0x8] sm:$0x1]  ;;  %v3187_v5 = vmax.f32 %v3185_v63, %v3186_v1  ;;  %v3195_v7 = vld [vmem:[#allocation3 + $0xa] sm:$0x1]  ;;  %v3196_v8 = vld [vmem:[#allocation3 + $0xb] sm:$0x1] }
 0x175   :  { %v3191_v6 = vmax.f32 %v3189_v2, %v3190_v3  ;;  %3182 = vst [vmem:[#allocation4 + $0x20] sm:$0x1] %v3181_v0  ;;  %v3192_v9 = vld [vmem:[#allocation3 + $0xa] sm:$0x1]  ;;  %v3197_v10 = vmax.f32 %v3195_v7, %v3196_v8  ;;  %v1663_v13 = vmax.f32 %v1652_v45, 0.0  ;;  %v4306_v14 = vpop.f32.mrb[64].mxu0 }
 0x176   :  { %3188 = vst [vmem:[#allocation4 + $0x21] sm:$0x1] %v3187_v5  ;;  %v3198_v15 = vld [vmem:[#allocation3 + $0xc] sm:$0x1]  ;;  %v4307_v16 = vpop.f32.mrb[65].mxu0  ;;  %v3201_v33 = vld [vmem:[#allocation2 + $0xc4] sm:$0xff] }
 0x177   :  { %v3193_v12 = vmax.f32 %v3191_v6, %v3192_v9  ;;  %v3199_v17 = vmax.f32 %v3197_v10, %v3198_v15  ;;  %1670 = vst [vmem:[#allocation2 + $0xd8] sm:$0xff] %v1663_v13  ;;  %v4308_v19 = vadd.f32 %v4307_v16, %v4306_v14  ;;  %v4309_v20 = vpop.f32.mrb[66].mxu0  ;;  %v4560_v60 = vpop.f32.mrb[32].mxu1 }
 0x178   :  { %v4310_v18 = vpop.f32.mrb[67].mxu0  ;;  %v2041_v23 = vpop.f32.mrb[33].mxu1 }
 0x179   :  { %3194 = vst [vmem:[#allocation4 + $0x22] sm:$0x1] %v3193_v12  ;;  %3200 = vst [vmem:[#allocation4 + $0x23] sm:$0x1] %v3199_v17  ;;  %v4311_v22 = vadd.f32 %v4310_v18, %v4309_v20  ;;  %v1978_v21 = vadd.f32 %v5780_v61, %v4308_v19  ;;  %v4561_v26 = vpop.f32.mrb[34].mxu1 }
 0x17a   :  { %v3492_v24 = vld [vmem:[#allocation4 + $0x18] sm:$0xff]  ;;  %v2044_v29 = vpop.f32.mrb[35].mxu1 }
 0x17b   :  { %v5785_v27 = vmul.f32 %v3492_v24, %v3492_v24  ;;  %v5787_v28 = vadd.f32 %v2041_v23, %v1978_v21  ;;  %v1981_v11 = vadd.f32 %v5780_v61, %v4311_v22  ;;  %v3202_v56 = vld [vmem:[#allocation2 + $0xcc] sm:$0x3f] }
 0x17d   :  { %3513 = vrot.lane.b32.xlu1 %v5785_v27, %s4933_s17  ;;  %3531 = vrot.lane.b32.xlu0 %v5785_v27, %s4932_s0  ;;  %v2071_v30 = vmax.f32 %v5787_v28, 0.0  ;;  %v2045_v31 = vadd.f32 %v2044_v29, %v1981_v11  ;;  %v4312_v32 = vpop.f32.mrb[68].mxu0 }
 0x17e   :  { %v3203_v34 = vld [vmem:[#allocation2 + $0xd2] sm:$0xff]  ;;  %v4313_v35 = vpop.f32.mrb[69].mxu0  ;;  %v3204_v49 = vld [vmem:[#allocation2 + $0xda] sm:$0x3f] }
 0x17f   :  { %v3205_v36 = vmax.f32 %v3201_v33, %v3203_v34  ;;  %v2072_v37 = vmax.f32 %v2045_v31, 0.0  ;;  %v4314_v38 = vadd.f32 %v4313_v35, %v4312_v32  ;;  %v4315_v39 = vpop.f32.mrb[70].mxu0  ;;  %v4564_v48 = vpop.f32.mrb[36].mxu1  ;;  %v3206_v59 = vmax.f32 %v3202_v56, %v3204_v49 }
 0x180   :  { %v4316_v40 = vpop.f32.mrb[71].mxu0  ;;  %v2057_v50 = vpop.f32.mrb[37].mxu1 }
 0x181   :  { %3567 = vrot.lane.b32.xlu1 %v5785_v27, %s4935_s19  ;;  %3585 = vrot.lane.b32.xlu0 %v5785_v27, %s4934_s18  ;;  %v3209_v41 = vmax.f32 %v3205_v36, %v2071_v30  ;;  %2079 = vst [vmem:[#allocation2 + $0xe8] sm:$0xff] %v2072_v37  ;;  %v1986_v42 = vadd.f32 %v5780_v61, %v4314_v38  ;;  %v4565_v54 = vpop.f32.mrb[38].mxu1 }
 0x182   :  { %v4317_v43 = vadd.f32 %v4316_v40, %v4315_v39  ;;  %v2060_v58 = vpop.f32.mrb[39].mxu1 }
 0x183   :  { %v2050_v44 = vadd.f32 %v4560_v60, %v1986_v42  ;;  %3211 = vst [vmem:[#allocation3] sm:$0xff] %v3209_v41 }
 0x184   :  { %v1989_v46 = vadd.f32 %v5780_v61, %v4317_v43 }
 0x185   :  { %v2073_v4 = vmax.f32 %v2050_v44, 0.0  ;;  %v4318_v53 = vpop.f32.mrb[72].mxu0 }
 0x186   :  { %v2053_v52 = vadd.f32 %v4561_v26, %v1989_v46  ;;  %v4319_v57 = vpop.f32.mrb[73].mxu0 }
 0x187   :  { %2080 = vst [vmem:[#allocation2 + $0xf0] sm:$0xff] %v2073_v4  ;;  %v4320_v62 = vadd.f32 %v4319_v57, %v4318_v53  ;;  %v4321_v63 = vpop.f32.mrb[74].mxu0 }
 0x188   :  { %v2074_v55 = vmax.f32 %v2053_v52, 0.0  ;;  %v3208_v0 = vld [vmem:[#allocation2 + $0xe8] sm:$0x3f]  ;;  %v4322_v1 = vpop.f32.mrb[75].mxu0 }
 0x189   :  { %v3210_v2 = vmax.f32 %v3206_v59, %v3208_v0  ;;  %v4323_v3 = vadd.f32 %v4322_v1, %v4321_v63  ;;  %v1994_v45 = vadd.f32 %v5780_v61, %v4320_v62  ;;  %v3250_v57 = vld [vmem:[#allocation2 + $0xe8] sm:$0x3f] }
 0x18a   :  { %2081 = vst [vmem:[#allocation2 + $0xf8] sm:$0xff] %v2074_v55  ;;  %v3213_v5 = vld [vmem:[#allocation3] sm:$0x1]  ;;  %v3214_v6 = vld [vmem:[#allocation3 + $0x1] sm:$0x1] }
 0x18b   :  { %v2058_v7 = vadd.f32 %v2057_v50, %v1994_v45  ;;  %v1997_v8 = vadd.f32 %v5780_v61, %v4323_v3  ;;  %3212 = vst [vmem:[#allocation3 + $0x8] sm:$0x3f] %v3210_v2  ;;  %v3215_v9 = vmax.f32 %v3213_v5, %v3214_v6  ;;  %v3219_v10 = vld [vmem:[#allocation3 + $0x2] sm:$0x1]  ;;  %v3220_v13 = vld [vmem:[#allocation3 + $0x3] sm:$0x1] }
 0x18c   :  { %v3216_v14 = vld [vmem:[#allocation3 + $0x2] sm:$0x1]  ;;  %v3221_v12 = vmax.f32 %v3219_v10, %v3220_v13  ;;  %v3225_v15 = vld [vmem:[#allocation3 + $0x4] sm:$0x1]  ;;  %v3226_v16 = vld [vmem:[#allocation3 + $0x5] sm:$0x1] }
 0x18d   :  { %v2075_v17 = vmax.f32 %v2058_v7, 0.0  ;;  %v2061_v19 = vadd.f32 %v2060_v58, %v1997_v8  ;;  %v4324_v20 = vpop.f32.mrb[76].mxu0  ;;  %v3217_v18 = vmax.f32 %v3215_v9, %v3216_v14  ;;  %v3222_v60 = vld [vmem:[#allocation3 + $0x4] sm:$0x1]  ;;  %v3227_v22 = vmax.f32 %v3225_v15, %v3226_v16  ;;  %v3228_v21 = vld [vmem:[#allocation3 + $0x6] sm:$0x1] }
 0x18e   :  { %v4325_v23 = vpop.f32.mrb[77].mxu0  ;;  %v3223_v24 = vmax.f32 %v3221_v12, %v3222_v60  ;;  %v3231_v26 = vld [vmem:[#allocation3 + $0x6] sm:$0x1]  ;;  %v3232_v11 = vld [vmem:[#allocation3 + $0x7] sm:$0x1] }
 0x18f   :  { %2082 = vst [vmem:[#allocation2 + $0x100] sm:$0xff] %v2075_v17  ;;  %v2076_v29 = vmax.f32 %v2061_v19, 0.0  ;;  %v4326_v31 = vadd.f32 %v4325_v23, %v4324_v20  ;;  %v4327_v32 = vpop.f32.mrb[78].mxu0  ;;  %3218 = vst [vmem:[#allocation4 + $0x24] sm:$0x1] %v3217_v18  ;;  %v3229_v33 = vmax.f32 %v3227_v22, %v3228_v21  ;;  %v3251_v35 = vld [vmem:[#allocation2 + $0xee] sm:$0xff]  ;;  %v3233_v37 = vmax.f32 %v3231_v26, %v3232_v11 }
 0x190   :  { %v4328_v34 = vpop.f32.mrb[79].mxu0  ;;  %3224 = vst [vmem:[#allocation4 + $0x25] sm:$0x1] %v3223_v24  ;;  %v3253_v52 = vmax.f32 %v2071_v30, %v3251_v35 }
 0x191   :  { %2083 = vst [vmem:[#allocation2 + $0x108] sm:$0xff] %v2076_v29  ;;  %v2002_v36 = vadd.f32 %v5780_v61, %v4326_v31  ;;  %3230 = vst [vmem:[#allocation4 + $0x26] sm:$0x1] %v3229_v33  ;;  %v3252_v49 = vld [vmem:[#allocation2 + $0xf6] sm:$0x3f] }
 0x192   :  { %v3234_v38 = vld [vmem:[#allocation3 + $0x8] sm:$0x1]  ;;  %v3238_v40 = vld [vmem:[#allocation3 + $0x9] sm:$0x1]  ;;  %v3243_v44 = vld [vmem:[#allocation3 + $0xa] sm:$0x1]  ;;  %v3254_v63 = vmax.f32 %v3250_v57, %v3252_v49 }
 0x193   :  { %v3237_v39 = vld [vmem:[#allocation3 + $0x8] sm:$0x1]  ;;  %v2066_v41 = vadd.f32 %v4564_v48, %v2002_v36  ;;  %v3235_v42 = vmax.f32 %v3233_v37, %v3234_v38  ;;  %v3244_v46 = vld [vmem:[#allocation3 + $0xb] sm:$0x1]  ;;  %v3240_v50 = vld [vmem:[#allocation3 + $0xa] sm:$0x1] }
 0x194   :  { %v3239_v43 = vmax.f32 %v3237_v39, %v3238_v40  ;;  %v3245_v4 = vmax.f32 %v3243_v44, %v3244_v46  ;;  %v3246_v56 = vld [vmem:[#allocation3 + $0xc] sm:$0x1]  ;;  %v5811_v48 = vld [vmem:[%s5970_s2] ss:$0 sm:$0xff] }
 0x195   :  { %v2077_v53 = vmax.f32 %v2066_v41, 0.0  ;;  %v4358_v54 = vpop.f32.mrb[80].mxu0  ;;  %3236 = vst [vmem:[#allocation4 + $0x27] sm:$0x1] %v3235_v42 }
 0x196   :  { %v3241_v61 = vmax.f32 %v3239_v43, %v3240_v50  ;;  %v3255_v58 = vld [vmem:[#allocation2 + $0xfc] sm:$0xff]  ;;  %v4359_v59 = vpop.f32.mrb[81].mxu0  ;;  %v3247_v55 = vmax.f32 %v3245_v4, %v3246_v56 }
 0x197   :  { %v3257_v62 = vmax.f32 %v3253_v52, %v3255_v58  ;;  %2084 = vst [vmem:[#allocation2 + $0x110] sm:$0xff] %v2077_v53  ;;  %v4360_v0 = vadd.f32 %v4359_v59, %v4358_v54  ;;  %v4361_v28 = vpop.f32.mrb[82].mxu0  ;;  %v4584_v2 = vpop.f32.mrb[40].mxu1 }
 0x198   :  { %3242 = vst [vmem:[#allocation4 + $0x28] sm:$0x1] %v3241_v61  ;;  %v3256_v30 = vld [vmem:[#allocation2 + $0x104] sm:$0x3f]  ;;  %v4362_v1 = vpop.f32.mrb[83].mxu0  ;;  %v2455_v6 = vpop.f32.mrb[41].mxu1 }
 0x199   :  { %3248 = vst [vmem:[#allocation4 + $0x29] sm:$0x1] %v3247_v55  ;;  %v3258_v3 = vmax.f32 %v3254_v63, %v3256_v30  ;;  %v4363_v45 = vadd.f32 %v4362_v1, %v4361_v28  ;;  %v2392_v5 = vadd.f32 %v4360_v0, %v5811_v48  ;;  %3259 = vst [vmem:[#allocation3] sm:$0xff] %v3257_v62  ;;  %v4585_v7 = vpop.f32.mrb[42].mxu1  ;;  %v3298_v40 = vld [vmem:[#allocation2 + $0x104] sm:$0x3f] }
 0x19a   :  { %v2458_v10 = vpop.f32.mrb[43].mxu1 }
 0x19b   :  { %v5814_v8 = vadd.f32 %v2455_v6, %v2392_v5  ;;  %v2395_v9 = vadd.f32 %v4363_v45, %v5811_v48  ;;  %3260 = vst [vmem:[#allocation3 + $0x8] sm:$0x3f] %v3258_v3 }
 0x19c   :  { %v5817_v13 = vld [vmem:[#allocation4 + $0x20] sm:$0xff] }
 0x19d   :  { %v2485_v14 = vmax.f32 %v5814_v8, 0.0  ;;  %v2459_v12 = vadd.f32 %v2458_v10, %v2395_v9  ;;  %v4364_v15 = vpop.f32.mrb[84].mxu0  ;;  %v5822_v16 = vmul.f32 %v5817_v13, %v5817_v13 }
 0x19e   :  { %v3299_v17 = vld [vmem:[#allocation2 + $0x10a] sm:$0xff]  ;;  %v4365_v19 = vpop.f32.mrb[85].mxu0  ;;  %v3300_v11 = vld [vmem:[#allocation2 + $0x112] sm:$0x3f] }
 0x19f   :  { %v3301_v20 = vmax.f32 %v3255_v58, %v3299_v17  ;;  %v2486_v18 = vmax.f32 %v2459_v12, 0.0  ;;  %v4366_v60 = vadd.f32 %v4365_v19, %v4364_v15  ;;  %v4367_v22 = vpop.f32.mrb[86].mxu0  ;;  %3533 = vrot.lane.b32.xlu1 %v5822_v16, %s4932_s0  ;;  %3515 = vrot.lane.b32.xlu0 %v5822_v16, %s4933_s17  ;;  %v5836_v43 = vpop.f32.mrb[44].mxu1  ;;  %v3302_v62 = vmax.f32 %v3298_v40, %v3300_v11 }
 0x1a0   :  { %v4368_v21 = vpop.f32.mrb[87].mxu0  ;;  %v3261_v23 = vld [vmem:[#allocation3] sm:$0x1]  ;;  %v3262_v24 = vld [vmem:[#allocation3 + $0x1] sm:$0x1]  ;;  %v2471_v50 = vpop.f32.mrb[45].mxu1 }
 0x1a1   :  { %v3305_v26 = vmax.f32 %v3301_v20, %v2485_v14  ;;  %2493 = vst [vmem:[#allocation2 + $0x120] sm:$0xff] %v2486_v18  ;;  %v2400_v29 = vadd.f32 %v4366_v60, %v5811_v48  ;;  %v4369_v31 = vadd.f32 %v4368_v21, %v4367_v22  ;;  %v3263_v32 = vmax.f32 %v3261_v23, %v3262_v24  ;;  %v3264_v33 = vld [vmem:[#allocation3 + $0x2] sm:$0x1]  ;;  %v3268_v35 = vld [vmem:[#allocation3 + $0x3] sm:$0x1]  ;;  %v4589_v58 = vpop.f32.mrb[46].mxu1 }
 0x1a2   :  { %v3267_v34 = vld [vmem:[#allocation3 + $0x2] sm:$0x1]  ;;  %v3270_v37 = vld [vmem:[#allocation3 + $0x4] sm:$0x1]  ;;  %v3274_v39 = vld [vmem:[#allocation3 + $0x5] sm:$0x1] }
 0x1a3   :  { %v3269_v36 = vmax.f32 %v3267_v34, %v3268_v35  ;;  %v3273_v38 = vld [vmem:[#allocation3 + $0x4] sm:$0x1]  ;;  %v2464_v41 = vadd.f32 %v4584_v2, %v2400_v29  ;;  %v2403_v42 = vadd.f32 %v4369_v31, %v5811_v48  ;;  %3587 = vrot.lane.b32.xlu1 %v5822_v16, %s4934_s18  ;;  %3569 = vrot.lane.b32.xlu0 %v5822_v16, %s4935_s19  ;;  %v3276_v46 = vld [vmem:[#allocation3 + $0x6] sm:$0x1]  ;;  %v3280_v53 = vld [vmem:[#allocation3 + $0x7] sm:$0x1] }
 0x1a4   :  { %v3265_v44 = vmax.f32 %v3263_v32, %v3264_v33  ;;  %v3279_v49 = vld [vmem:[#allocation3 + $0x6] sm:$0x1]  ;;  %v3275_v52 = vmax.f32 %v3273_v38, %v3274_v39  ;;  %v3282_v54 = vld [vmem:[#allocation3 + $0x8] sm:$0x1]  ;;  %v2474_v0 = vpop.f32.mrb[47].mxu1 }
 0x1a5   :  { %v3271_v4 = vmax.f32 %v3269_v36, %v3270_v37  ;;  %v2487_v61 = vmax.f32 %v2464_v41, 0.0  ;;  %v2467_v56 = vadd.f32 %v4585_v7, %v2403_v42  ;;  %v4370_v57 = vpop.f32.mrb[88].mxu0  ;;  %v3281_v59 = vmax.f32 %v3279_v49, %v3280_v53  ;;  %v3285_v55 = vld [vmem:[#allocation3 + $0x8] sm:$0x1]  ;;  %3307 = vst [vmem:[#allocation3] sm:$0xff] %v3305_v26 }
 0x1a6   :  { %3266 = vst [vmem:[#allocation4 + $0x2a] sm:$0x1] %v3265_v44  ;;  %v4371_v63 = vpop.f32.mrb[89].mxu0  ;;  %v3277_v28 = vmax.f32 %v3275_v52, %v3276_v46  ;;  %v3286_v30 = vld [vmem:[#allocation3 + $0x9] sm:$0x1] }
 0x1a7   :  { %3272 = vst [vmem:[#allocation4 + $0x2b] sm:$0x1] %v3271_v4  ;;  %2494 = vst [vmem:[#allocation2 + $0x128] sm:$0xff] %v2487_v61  ;;  %v2488_v1 = vmax.f32 %v2467_v56, 0.0  ;;  %v4372_v2 = vadd.f32 %v4371_v63, %v4370_v57  ;;  %v4373_v3 = vpop.f32.mrb[90].mxu0  ;;  %v3283_v45 = vmax.f32 %v3281_v59, %v3282_v54  ;;  %v3287_v5 = vmax.f32 %v3285_v55, %v3286_v30 }
 0x1a8   :  { %v3291_v6 = vld [vmem:[#allocation3 + $0xa] sm:$0x1]  ;;  %v3292_v7 = vld [vmem:[#allocation3 + $0xb] sm:$0x1]  ;;  %v3304_v9 = vld [vmem:[#allocation2 + $0x120] sm:$0x3f] }
 0x1a9   :  { %v4374_v10 = vpop.f32.mrb[91].mxu0  ;;  %3278 = vst [vmem:[#allocation4 + $0x2c] sm:$0x1] %v3277_v28  ;;  %v3288_v12 = vld [vmem:[#allocation3 + $0xa] sm:$0x1]  ;;  %v3293_v15 = vmax.f32 %v3291_v6, %v3292_v7  ;;  %v3306_v17 = vmax.f32 %v3302_v62, %v3304_v9  ;;  %2495 = vst [vmem:[#allocation2 + $0x130] sm:$0xff] %v2488_v1  ;;  %v2408_v20 = vadd.f32 %v4372_v2, %v5811_v48 }
 0x1aa   :  { %v4375_v19 = vadd.f32 %v4374_v10, %v4373_v3  ;;  %3284 = vst [vmem:[#allocation4 + $0x2d] sm:$0x1] %v3283_v45  ;;  %v3289_v18 = vmax.f32 %v3287_v5, %v3288_v12  ;;  %v3294_v60 = vld [vmem:[#allocation3 + $0xc] sm:$0x1]  ;;  %v3346_v10 = vld [vmem:[#allocation2 + $0x120] sm:$0x3f] }
 0x1ab   :  { %v3295_v22 = vmax.f32 %v3293_v15, %v3294_v60  ;;  %v2472_v21 = vadd.f32 %v2471_v50, %v2408_v20  ;;  %3308 = vst [vmem:[#allocation3 + $0x8] sm:$0x3f] %v3306_v17 }
 0x1ac   :  { %v2411_v23 = vadd.f32 %v4375_v19, %v5811_v48  ;;  %3290 = vst [vmem:[#allocation4 + $0x2e] sm:$0x1] %v3289_v18  ;;  %v3309_v24 = vld [vmem:[#allocation3] sm:$0x1]  ;;  %v3310_v26 = vld [vmem:[#allocation3 + $0x1] sm:$0x1] }
 0x1ad   :  { %3296 = vst [vmem:[#allocation4 + $0x2f] sm:$0x1] %v3295_v22  ;;  %v2489_v11 = vmax.f32 %v2472_v21, 0.0  ;;  %v4376_v31 = vpop.f32.mrb[92].mxu0  ;;  %v3311_v32 = vmax.f32 %v3309_v24, %v3310_v26  ;;  %v3315_v33 = vld [vmem:[#allocation3 + $0x2] sm:$0x1] }
 0x1ae   :  { %v2475_v29 = vadd.f32 %v2474_v0, %v2411_v23  ;;  %v3316_v34 = vld [vmem:[#allocation3 + $0x3] sm:$0x1]  ;;  %v4377_v35 = vpop.f32.mrb[93].mxu0  ;;  %v3312_v36 = vld [vmem:[#allocation3 + $0x2] sm:$0x1] }
 0x1af   :  { %v3317_v37 = vmax.f32 %v3315_v33, %v3316_v34  ;;  %v3321_v38 = vld [vmem:[#allocation3 + $0x4] sm:$0x1]  ;;  %2496 = vst [vmem:[#allocation2 + $0x138] sm:$0xff] %v2489_v11  ;;  %v4378_v40 = vadd.f32 %v4377_v35, %v4376_v31  ;;  %v4379_v41 = vpop.f32.mrb[94].mxu0  ;;  %v3313_v42 = vmax.f32 %v3311_v32, %v3312_v36  ;;  %v3322_v46 = vld [vmem:[#allocation3 + $0x5] sm:$0x1] }
 0x1b0   :  { %v2490_v39 = vmax.f32 %v2475_v29, 0.0  ;;  %v3318_v44 = vld [vmem:[#allocation3 + $0x4] sm:$0x1]  ;;  %v4380_v49 = vpop.f32.mrb[95].mxu0  ;;  %v3323_v4 = vmax.f32 %v3321_v38, %v3322_v46  ;;  %v3327_v52 = vld [vmem:[#allocation3 + $0x6] sm:$0x1] }
 0x1b1   :  { %v3319_v50 = vmax.f32 %v3317_v37, %v3318_v44  ;;  %v3347_v53 = vld [vmem:[#allocation2 + $0x126] sm:$0xff]  ;;  %v2416_v54 = vadd.f32 %v4378_v40, %v5811_v48  ;;  %3314 = vst [vmem:[#allocation4 + $0x30] sm:$0x1] %v3313_v42  ;;  %v3324_v56 = vld [vmem:[#allocation3 + $0x6] sm:$0x1] }
 0x1b2   :  { %2497 = vst [vmem:[#allocation2 + $0x140] sm:$0xff] %v2490_v39  ;;  %v3508_v61 = vpop.permute.xlu0 %3507  ;;  %v3328_v57 = vld [vmem:[#allocation3 + $0x7] sm:$0x1]  ;;  %v3325_v59 = vmax.f32 %v3323_v4, %v3324_v56  ;;  %v3330_v62 = vld [vmem:[#allocation3 + $0x8] sm:$0x1]  ;;  %v3526_v2 = vpop.permute.xlu1 %3525  ;;  %v3349_v12 = vmax.f32 %v2485_v14, %v3347_v53 }
 0x1b3   :  { %v3543_v58 = vadd.f32 %v3508_v61, %v5728_v25  ;;  %3320 = vst [vmem:[#allocation4 + $0x31] sm:$0x1] %v3319_v50  ;;  %v3329_v55 = vmax.f32 %v3327_v52, %v3328_v57  ;;  %v3333_v63 = vld [vmem:[#allocation3 + $0x8] sm:$0x1]  ;;  %v3334_v0 = vld [vmem:[#allocation3 + $0x9] sm:$0x1]  ;;  %v2480_v30 = vadd.f32 %v5836_v43, %v2416_v54 }
 0x1b4   :  { %v3348_v28 = vld [vmem:[#allocation2 + $0x12e] sm:$0x3f]  ;;  %v5843_v1 = vld [vmem:[#allocation4 + $0x28] sm:$0xff]  ;;  %v3335_v3 = vmax.f32 %v3333_v63, %v3334_v0  ;;  %3326 = vst [vmem:[#allocation4 + $0x32] sm:$0x1] %v3325_v59 }
 0x1b5   :  { %v3339_v45 = vld [vmem:[#allocation3 + $0xa] sm:$0x1]  ;;  %v5847_v5 = vmul.f32 %v5843_v1, %v5843_v1  ;;  %v3552_v6 = vadd.f32 %v3543_v58, %v3526_v2  ;;  %v3331_v25 = vmax.f32 %v3329_v55, %v3330_v62  ;;  %v3340_v9 = vld [vmem:[#allocation3 + $0xb] sm:$0x1]  ;;  %v2491_v15 = vmax.f32 %v2480_v30, 0.0  ;;  %v4410_v43 = vpop.f32.mrb[96].mxu0 }
 0x1b6   :  { %v3336_v7 = vld [vmem:[#allocation3 + $0xa] sm:$0x1]  ;;  %v3341_v19 = vmax.f32 %v3339_v45, %v3340_v9  ;;  %v3351_v20 = vld [vmem:[#allocation2 + $0x134] sm:$0xff]  ;;  %v3350_v18 = vmax.f32 %v3346_v10, %v3348_v28  ;;  %v3562_v60 = vpop.permute.xlu0 %3561  ;;  %v4411_v22 = vpop.f32.mrb[97].mxu0 }
 0x1b7   :  { %v3337_v17 = vmax.f32 %v3335_v3, %v3336_v7  ;;  %3517 = vrot.lane.b32.xlu1 %v5847_v5, %s4933_s17  ;;  %3535 = vrot.lane.b32.xlu0 %v5847_v5, %s4932_s0  ;;  %3332 = vst [vmem:[#allocation4 + $0x33] sm:$0x1] %v3331_v25  ;;  %v3342_v21 = vld [vmem:[#allocation3 + $0xc] sm:$0x1]  ;;  %v3353_v23 = vmax.f32 %v3349_v12, %v3351_v20  ;;  %2498 = vst [vmem:[#allocation2 + $0x148] sm:$0xff] %v2491_v15  ;;  %v4413_v24 = vpop.f32.mrb[98].mxu0  ;;  %v3580_v36 = vpop.permute.xlu1 %3579 }
 0x1b8   :  { %v3597_v8 = vadd.f32 %v3562_v60, %v3552_v6  ;;  %v4412_v14 = vadd.f32 %v4411_v22, %v4410_v43  ;;  %v3343_v26 = vmax.f32 %v3341_v19, %v3342_v21  ;;  %v4414_v29 = vpop.f32.mrb[99].mxu0  ;;  %v4608_v31 = vpop.f32.mrb[48].mxu1 }
 0x1b9   :  { %3338 = vst [vmem:[#allocation4 + $0x34] sm:$0x1] %v3337_v17  ;;  %v3352_v11 = vld [vmem:[#allocation2 + $0x13c] sm:$0x3f]  ;;  %v4415_v33 = vadd.f32 %v4414_v29, %v4413_v24  ;;  %v2869_v35 = vpop.f32.mrb[49].mxu1  ;;  %3355 = vst [vmem:[#allocation3] sm:$0xff] %v3353_v23 }
 0x1ba   :  { %v3354_v32 = vmax.f32 %v3350_v18, %v3352_v11  ;;  %v2806_v34 = vadd.f32 %v4412_v14, %v5811_v48  ;;  %3344 = vst [vmem:[#allocation4 + $0x35] sm:$0x1] %v3343_v26  ;;  %v4609_v37 = vpop.f32.mrb[50].mxu1  ;;  %v3606_v38 = vadd.f32 %v3597_v8, %v3580_v36 }
 0x1bb   :  { %3571 = vrot.lane.b32.xlu1 %v5847_v5, %s4935_s19  ;;  %3589 = vrot.lane.b32.xlu0 %v5847_v5, %s4934_s18  ;;  %v2809_v40 = vadd.f32 %v4415_v33, %v5811_v48  ;;  %v2872_v41 = vpop.f32.mrb[51].mxu1  ;;  %v3394_v33 = vld [vmem:[#allocation2 + $0x13c] sm:$0x3f] }
 0x1bc   :  { %v5860_v39 = vadd.f32 %v2869_v35, %v2806_v34  ;;  %3356 = vst [vmem:[#allocation3 + $0x8] sm:$0x3f] %v3354_v32  ;;  %v3615_v4 = vmul.f32 2e-05, %v3606_v38 }
 0x1bd   :  { %v2873_v44 = vadd.f32 %v2872_v41, %v2809_v40  ;;  %v4416_v46 = vpop.f32.mrb[100].mxu0 }
 0x1be   :  { %v2899_v42 = vmax.f32 %v5860_v39, 0.0  ;;  %v3395_v49 = vld [vmem:[#allocation2 + $0x142] sm:$0xff]  ;;  %v4417_v50 = vpop.f32.mrb[101].mxu0  ;;  %v5869_v6 = vadd.f32 1.0, %v3615_v4  ;;  %v3396_v25 = vld [vmem:[#allocation2 + $0x14a] sm:$0x3f] }
 0x1bf   :  { %v4419_v52 = vpop.f32.mrb[102].mxu0  ;;  %v3397_v53 = vmax.f32 %v3351_v20, %v3395_v49  ;;  %v2900_v54 = vmax.f32 %v2873_v44, 0.0  ;;  %v4418_v61 = vadd.f32 %v4417_v50, %v4416_v46  ;;  %v4612_v57 = vpop.f32.mrb[52].mxu1 }
 0x1c0   :  { %v4420_v56 = vpop.f32.mrb[103].mxu0  ;;  %v3357_v58 = vld [vmem:[#allocation3] sm:$0x1]  ;;  %v5864_v55 = vpop.f32.mrb[53].mxu1  ;;  %v3358_v62 = vld [vmem:[#allocation3 + $0x1] sm:$0x1]  ;;  %4891 = vrsqrt.f32 %v5869_v6 }
 0x1c1   :  { %v4421_v59 = vadd.f32 %v4420_v56, %v4419_v52  ;;  %v3360_v63 = vld [vmem:[#allocation3 + $0x2] sm:$0x1]  ;;  %v3401_v0 = vmax.f32 %v3397_v53, %v2899_v42  ;;  %2907 = vst [vmem:[#allocation2 + $0x158] sm:$0xff] %v2900_v54  ;;  %v2814_v28 = vadd.f32 %v4418_v61, %v5811_v48  ;;  %v4613_v30 = vpop.f32.mrb[54].mxu1  ;;  %v3359_v2 = vmax.f32 %v3357_v58, %v3358_v62  ;;  %v3364_v45 = vld [vmem:[#allocation3 + $0x3] sm:$0x1] }
 0x1c2   :  { %v3363_v3 = vld [vmem:[#allocation3 + $0x2] sm:$0x1]  ;;  %v5872_v9 = vpop.f32.mrb[55].mxu1  ;;  %v3366_v12 = vld [vmem:[#allocation3 + $0x4] sm:$0x1]  ;;  %vm3644_vm0 = vcmp.eq.f32.partialorder %v5869_v6, inf }
 0x1c3   :  { %v2817_v7 = vadd.f32 %v4421_v59, %v5811_v48  ;;  %v3365_v10 = vmax.f32 %v3363_v3, %v3364_v45  ;;  %v3369_v15 = vld [vmem:[#allocation3 + $0x4] sm:$0x1]  ;;  %v2878_v43 = vadd.f32 %v4608_v31, %v2814_v28  ;;  %v3361_v17 = vmax.f32 %v3359_v2, %v3360_v63  ;;  %v3370_v19 = vld [vmem:[#allocation3 + $0x5] sm:$0x1]  ;;  %v3372_v20 = vld [vmem:[#allocation3 + $0x6] sm:$0x1] }
 0x1c4   :  { %v3375_v18 = vld [vmem:[#allocation3 + $0x6] sm:$0x1]  ;;  %v3371_v23 = vmax.f32 %v3369_v15, %v3370_v19  ;;  %v3376_v8 = vld [vmem:[#allocation3 + $0x7] sm:$0x1]  ;;  %v3378_v14 = vld [vmem:[#allocation3 + $0x8] sm:$0x1] }
 0x1c5   :  { %v2881_v60 = vadd.f32 %v4609_v37, %v2817_v7  ;;  %v4422_v22 = vpop.f32.mrb[104].mxu0  ;;  %v3367_v21 = vmax.f32 %v3365_v10, %v3366_v12  ;;  %v2901_v24 = vmax.f32 %v2878_v43, 0.0  ;;  %3362 = vst [vmem:[#allocation4 + $0x36] sm:$0x1] %v3361_v17  ;;  %v3377_v11 = vmax.f32 %v3375_v18, %v3376_v8  ;;  %v3381_v29 = vld [vmem:[#allocation3 + $0x8] sm:$0x1] }
 0x1c6   :  { %v3510_v26 = vpop.permute.xlu0 %3509  ;;  %v3382_v32 = vld [vmem:[#allocation3 + $0x9] sm:$0x1]  ;;  %3403 = vst [vmem:[#allocation3] sm:$0xff] %v3401_v0  ;;  %v4423_v31 = vpop.f32.mrb[105].mxu0  ;;  %v3373_v35 = vmax.f32 %v3371_v23, %v3372_v20  ;;  %v3387_v38 = vld [vmem:[#allocation3 + $0xa] sm:$0x1]  ;;  %v3398_v37 = vmax.f32 %v3394_v33, %v3396_v25 }
 0x1c7   :  { %v2902_v34 = vmax.f32 %v2881_v60, 0.0  ;;  %3368 = vst [vmem:[#allocation4 + $0x37] sm:$0x1] %v3367_v21  ;;  %v3383_v36 = vmax.f32 %v3381_v29, %v3382_v32  ;;  %2908 = vst [vmem:[#allocation2 + $0x160] sm:$0xff] %v2901_v24  ;;  %v4424_v40 = vadd.f32 %v4423_v31, %v4422_v22  ;;  %v4425_v41 = vpop.f32.mrb[106].mxu0  ;;  %v3379_v44 = vmax.f32 %v3377_v11, %v3378_v14  ;;  %v3564_v0 = vpop.permute.xlu1 %3563 }
 0x1c8   :  { %v3384_v46 = vld [vmem:[#allocation3 + $0xa] sm:$0x1]  ;;  %v3388_v49 = vld [vmem:[#allocation3 + $0xb] sm:$0x1]  ;;  %v3400_v50 = vld [vmem:[#allocation2 + $0x158] sm:$0x3f]  ;;  %v3544_v4 = vadd.f32 %v3510_v26, %v5747_v51 }
 0x1c9   :  { %2909 = vst [vmem:[#allocation2 + $0x168] sm:$0xff] %v2902_v34  ;;  %v4426_v52 = vpop.f32.mrb[107].mxu0  ;;  %3374 = vst [vmem:[#allocation4 + $0x38] sm:$0x1] %v3373_v35  ;;  %v3385_v53 = vmax.f32 %v3383_v36, %v3384_v46  ;;  %v3389_v54 = vmax.f32 %v3387_v38, %v3388_v49  ;;  %v3402_v61 = vmax.f32 %v3398_v37, %v3400_v50  ;;  %v3390_v59 = vld [vmem:[#allocation3 + $0xc] sm:$0x1] }
 0x1ca   :  { %v3528_v56 = vpop.permute.xlu0 %3527  ;;  %v4427_v57 = vadd.f32 %v4426_v52, %v4425_v41  ;;  %v2822_v58 = vadd.f32 %v4424_v40, %v5811_v48  ;;  %3380 = vst [vmem:[#allocation4 + $0x39] sm:$0x1] %v3379_v44  ;;  %v5890_v26 = vpop.eup %4891  ;;  %vm3646_vm1 = vcmp.eq.f32.partialorder %v5869_v6, 0.0 }
 0x1cb   :  { %v3553_v62 = vadd.f32 %v3544_v4, %v3528_v56  ;;  %3386 = vst [vmem:[#allocation4 + $0x3a] sm:$0x1] %v3385_v53  ;;  %v3391_v63 = vmax.f32 %v3389_v54, %v3390_v59  ;;  %3404 = vst [vmem:[#allocation3 + $0x8] sm:$0x3f] %v3402_v61  ;;  %v3643_v46 = vmul.f32 %v5890_v26, %v5869_v6  ;;  %v3442_v61 = vld [vmem:[#allocation2 + $0x158] sm:$0x3f] }
 0x1cc   :  { %v2886_v28 = vadd.f32 %v5864_v55, %v2822_v58  ;;  %v2825_v30 = vadd.f32 %v4427_v57, %v5811_v48 }
 0x1cd   :  { %v3598_v51 = vadd.f32 %v3564_v0, %v3553_v62  ;;  %v4428_v2 = vpop.f32.mrb[108].mxu0  ;;  %3392 = vst [vmem:[#allocation4 + $0x3b] sm:$0x1] %v3391_v63  ;;  %v3405_v3 = vld [vmem:[#allocation3] sm:$0x1] }
 0x1ce   :  { %v3406_v45 = vld [vmem:[#allocation3 + $0x1] sm:$0x1]  ;;  %v2903_v25 = vmax.f32 %v2886_v28, 0.0  ;;  %v3582_v7 = vpop.permute.xlu0 %3581  ;;  %v2889_v10 = vadd.f32 %v5872_v9, %v2825_v30  ;;  %v4429_v12 = vpop.f32.mrb[109].mxu0  ;;  %v3408_v17 = vld [vmem:[#allocation3 + $0x2] sm:$0x1] }
 0x1cf   :  { %v5880_v15 = vld [vmem:[#allocation4 + $0x30] sm:$0xff]  ;;  %v3407_v43 = vmax.f32 %v3405_v3, %v3406_v45  ;;  %v3607_v19 = vadd.f32 %v3598_v51, %v3582_v7  ;;  %v4431_v18 = vpop.f32.mrb[110].mxu0  ;;  %v3443_v31 = vld [vmem:[#allocation2 + $0x15e] sm:$0xff]  ;;  %v3647_v3 = vand.u32 2147483648, %v5869_v6 }
 0x1d0   :  { %v5884_v55 = vmul.f32 %v5880_v15, %v5880_v15  ;;  %v3411_v48 = vld [vmem:[#allocation3 + $0x2] sm:$0x1]  ;;  %v3412_v20 = vld [vmem:[#allocation3 + $0x3] sm:$0x1]  ;;  %2910 = vst [vmem:[#allocation2 + $0x170] sm:$0xff] %v2903_v25  ;;  %v2904_v60 = vmax.f32 %v2889_v10, 0.0  ;;  %v3445_v52 = vmax.f32 %v2899_v42, %v3443_v31  ;;  %v3645_v42 = vsel %vm3644_vm0, %v5869_v6, %v3643_v46 }
 0x1d1   :  { %v3409_v22 = vmax.f32 %v3407_v43, %v3408_v17  ;;  %v3413_v21 = vmax.f32 %v3411_v48, %v3412_v20  ;;  %v3414_v23 = vld [vmem:[#allocation3 + $0x4] sm:$0x1]  ;;  %v4432_v8 = vpop.f32.mrb[111].mxu0  ;;  %v3616_v9 = vmul.f32 2e-05, %v3607_v19  ;;  %v3648_v25 = vsel %vm3646_vm1, %v3647_v3, %v3645_v42 }
 0x1d2   :  { %3537 = vrot.lane.b32.xlu1 %v5884_v55, %s4932_s0  ;;  %3519 = vrot.lane.b32.xlu0 %v5884_v55, %s4933_s17  ;;  %v3417_v14 = vld [vmem:[#allocation3 + $0x4] sm:$0x1]  ;;  %v3418_v24 = vld [vmem:[#allocation3 + $0x5] sm:$0x1]  ;;  %2911 = vst [vmem:[#allocation2 + $0x178] sm:$0xff] %v2904_v60 }
 0x1d3   :  { %3410 = vst [vmem:[#allocation4 + $0x3c] sm:$0x1] %v3409_v22  ;;  %v3415_v11 = vmax.f32 %v3413_v21, %v3414_v23  ;;  %v3419_v29 = vmax.f32 %v3417_v14, %v3418_v24  ;;  %v3420_v32 = vld [vmem:[#allocation3 + $0x6] sm:$0x1]  ;;  %v3424_v34 = vld [vmem:[#allocation3 + $0x7] sm:$0x1] }
 0x1d4   :  { %v3423_v33 = vld [vmem:[#allocation3 + $0x6] sm:$0x1]  ;;  %v5892_v35 = vadd.f32 1.0, %v3616_v9  ;;  %v3426_v36 = vld [vmem:[#allocation3 + $0x8] sm:$0x1] }
 0x1d5   :  { %v3429_v38 = vld [vmem:[#allocation3 + $0x8] sm:$0x1]  ;;  %3416 = vst [vmem:[#allocation4 + $0x3d] sm:$0x1] %v3415_v11  ;;  %v3421_v37 = vmax.f32 %v3419_v29, %v3420_v32  ;;  %v3425_v40 = vmax.f32 %v3423_v33, %v3424_v34  ;;  %v3430_v41 = vld [vmem:[#allocation3 + $0x9] sm:$0x1] }
 0x1d6   :  { %v3435_v44 = vld [vmem:[#allocation3 + $0xa] sm:$0x1]  ;;  %4893 = vrsqrt.f32 %v5892_v35  ;;  %v3444_v49 = vld [vmem:[#allocation2 + $0x166] sm:$0x3f]  ;;  %3591 = vrot.lane.b32.xlu1 %v5884_v55, %s4934_s18  ;;  %v3512_v50 = vpop.permute.xlu1 %3511  ;;  %3573 = vrot.lane.b32.xlu0 %v5884_v55, %s4935_s19  ;;  %v3436_v4 = vld [vmem:[#allocation3 + $0xb] sm:$0x1]  ;;  %v3431_v54 = vmax.f32 %v3429_v38, %v3430_v41  ;;  %v3566_v7 = vpop.permute.xlu0 %3565 }
 0x1d7   :  { %3422 = vst [vmem:[#allocation4 + $0x3e] sm:$0x1] %v3421_v37  ;;  %v3427_v53 = vmax.f32 %v3425_v40, %v3426_v36  ;;  %v3447_v56 = vld [vmem:[#allocation2 + $0x16c] sm:$0xff]  ;;  %v3437_v58 = vmax.f32 %v3435_v44, %v3436_v4  ;;  %v3446_v62 = vmax.f32 %v3442_v61, %v3444_v49  ;;  %v3438_v0 = vld [vmem:[#allocation3 + $0xc] sm:$0x1]  ;;  %v3545_v30 = vadd.f32 %v3512_v50, %v5762_v47 }
 0x1d8   :  { %v3432_v57 = vld [vmem:[#allocation3 + $0xa] sm:$0x1]  ;;  %v3449_v59 = vmax.f32 %v3445_v52, %v3447_v56  ;;  %4895 = vrsqrt.f32 %v3648_v25  ;;  %vm3651_vm2 = vcmp.eq.f32.partialorder %v5892_v35, inf  ;;  %v3654_v48 = vand.u32 2147483648, %v5892_v35 }
 0x1d9   :  { %3428 = vst [vmem:[#allocation4 + $0x3f] sm:$0x1] %v3427_v53  ;;  %v3433_v63 = vmax.f32 %v3431_v54, %v3432_v57  ;;  %v3448_v28 = vld [vmem:[#allocation2 + $0x174] sm:$0x3f]  ;;  %v3439_v39 = vmax.f32 %v3437_v58, %v3438_v0  ;;  %vm3653_vm3 = vcmp.eq.f32.partialorder %v5892_v35, 0.0 }
 0x1da   :  { %v3530_v51 = vpop.permute.xlu1 %3529  ;;  %v3450_v2 = vmax.f32 %v3446_v62, %v3448_v28  ;;  %3451 = vst [vmem:[#allocation3] sm:$0xff] %v3449_v59 }
 0x1db   :  { %3434 = vst [vmem:[#allocation4 + $0x40] sm:$0x1] %v3433_v63  ;;  %v3554_v45 = vadd.f32 %v3545_v30, %v3530_v51  ;;  %3440 = vst [vmem:[#allocation4 + $0x41] sm:$0x1] %v3439_v39  ;;  %v4928_v39 = vld [vmem:[#allocation4] sm:$0xff] }
 0x1dc   :  { %3452 = vst [vmem:[#allocation3 + $0x8] sm:$0x3f] %v3450_v2  ;;  %v4929_v2 = vld [vmem:[#allocation4 + $0x8] sm:$0xff] }
 0x1dd   :  { %v3599_v12 = vadd.f32 %v3566_v7, %v3554_v45 }
 0x1de   :  { %v3584_v17 = vpop.permute.xlu1 %3583 }
 0x1df   :  { %v3608_v8 = vadd.f32 %v3599_v12, %v3584_v17 }
 0x1e0   :  { %v4894_v10 = vpop.eup %4893  ;;  %v5908_v43 = vld [vmem:[#allocation4 + $0x38] sm:$0xff] }
 0x1e1   :  { %v3650_v47 = vmul.f32 %v4894_v10, %v5892_v35  ;;  %v5913_v19 = vmul.f32 %v5908_v43, %v5908_v43  ;;  %v3453_v6 = vld [vmem:[#allocation3] sm:$0x1]  ;;  %v3454_v20 = vld [vmem:[#allocation3 + $0x1] sm:$0x1]  ;;  %v3459_v22 = vld [vmem:[#allocation3 + $0x2] sm:$0x1] }
 0x1e2   :  { %v3455_v60 = vmax.f32 %v3453_v6, %v3454_v20  ;;  %v3460_v21 = vld [vmem:[#allocation3 + $0x3] sm:$0x1]  ;;  %v3465_v14 = vld [vmem:[#allocation3 + $0x4] sm:$0x1]  ;;  %v3466_v24 = vld [vmem:[#allocation3 + $0x5] sm:$0x1]  ;;  %v4896_v57 = vpop.eup %4895 }
 0x1e3   :  { %v3652_v18 = vsel %vm3651_vm2, %v5892_v35, %v3650_v47  ;;  %3521 = vrot.lane.b32.xlu1 %v5913_v19, %s4933_s17  ;;  %3539 = vrot.lane.b32.xlu0 %v5913_v19, %s4932_s0  ;;  %v3461_v9 = vmax.f32 %v3459_v22, %v3460_v21  ;;  %v3456_v11 = vld [vmem:[#allocation3 + $0x2] sm:$0x1]  ;;  %v3462_v29 = vld [vmem:[#allocation3 + $0x4] sm:$0x1]  ;;  %v3467_v34 = vmax.f32 %v3465_v14, %v3466_v24  ;;  %v3471_v31 = vld [vmem:[#allocation3 + $0x6] sm:$0x1] }
 0x1e4   :  { %v3655_v23 = vsel %vm3653_vm3, %v3654_v48, %v3652_v18  ;;  %v3457_v32 = vmax.f32 %v3455_v60, %v3456_v11  ;;  %v3472_v35 = vld [vmem:[#allocation3 + $0x7] sm:$0x1]  ;;  %v3474_v36 = vld [vmem:[#allocation3 + $0x8] sm:$0x1]  ;;  %v3468_v38 = vld [vmem:[#allocation3 + $0x6] sm:$0x1]  ;;  %v3714_v62 = vmul.f32 %v4896_v57, %v5890_v26 }
 0x1e5   :  { %4897 = vrsqrt.f32 %v3655_v23  ;;  %v3463_v33 = vmax.f32 %v3461_v9, %v3462_v29  ;;  %v3473_v37 = vmax.f32 %v3471_v31, %v3472_v35  ;;  %v3477_v40 = vld [vmem:[#allocation3 + $0x8] sm:$0x1]  ;;  %v3478_v41 = vld [vmem:[#allocation3 + $0x9] sm:$0x1]  ;;  %v3617_v44 = vmul.f32 2e-05, %v3608_v8 }
 0x1e6   :  { %3458 = vst [vmem:[#allocation4 + $0x42] sm:$0x1] %v3457_v32  ;;  %v3469_v46 = vmax.f32 %v3467_v34, %v3468_v38  ;;  %v3479_v49 = vmax.f32 %v3477_v40, %v3478_v41  ;;  %v3483_v50 = vld [vmem:[#allocation3 + $0xa] sm:$0x1]  ;;  %v3484_v4 = vld [vmem:[#allocation3 + $0xb] sm:$0x1]  ;;  %v3723_v42 = vmul.f32 %v4928_v39, %v3714_v62 }
 0x1e7   :  { %3575 = vrot.lane.b32.xlu1 %v5913_v19, %s4935_s19  ;;  %3464 = vst [vmem:[#allocation4 + $0x43] sm:$0x1] %v3463_v33  ;;  %v3475_v52 = vmax.f32 %v3473_v37, %v3474_v36  ;;  %v3480_v53 = vld [vmem:[#allocation3 + $0xa] sm:$0x1]  ;;  %v3485_v54 = vmax.f32 %v3483_v50, %v3484_v4  ;;  %v3486_v56 = vld [vmem:[#allocation3 + $0xc] sm:$0x1] }
 0x1e8   :  { %3470 = vst [vmem:[#allocation4 + $0x44] sm:$0x1] %v3469_v46  ;;  %v3481_v61 = vmax.f32 %v3479_v49, %v3480_v53  ;;  %v3626_v59 = vadd.f32 1.0, %v3617_v44  ;;  %v4930_v38 = vld [vmem:[#allocation4 + $0x10] sm:$0xff]  ;;  %v4931_v40 = vld [vmem:[#allocation4 + $0x18] sm:$0xff] }
 0x1e9   :  { %3476 = vst [vmem:[#allocation4 + $0x45] sm:$0x1] %v3475_v52  ;;  %v3487_v58 = vmax.f32 %v3485_v54, %v3486_v56 }
 0x1ea   :  { %3482 = vst [vmem:[#allocation4 + $0x46] sm:$0x1] %v3481_v61  ;;  %4899 = vrsqrt.f32 %v3626_v59  ;;  %vm3658_vm4 = vcmp.eq.f32.partialorder %v3626_v59, inf  ;;  %v3661_v60 = vand.u32 2147483648, %v3626_v59  ;;  %vm3660_vm5 = vcmp.eq.f32.partialorder %v3626_v59, 0.0 }
 0x1eb   :  { %3488 = vst [vmem:[#allocation4 + $0x47] sm:$0x1] %v3487_v58 }
 0x1ef   :  { %v4898_v63 = vpop.eup %4897  ;;  %v3514_v0 = vpop.permute.xlu1 %3513 }
 0x1f0   :  { %v3532_v28 = vpop.permute.xlu0 %3531  ;;  %v3715_v30 = vmul.f32 %v4898_v63, %v4894_v10  ;;  %v3546_v51 = vadd.f32 %v3514_v0, %v5785_v27 }
 0x1f2   :  { %v3724_v3 = vmul.f32 %v4929_v2, %v3715_v30  ;;  %v3555_v45 = vadd.f32 %v3546_v51, %v3532_v28  ;;  %v5927_v12 = vld [vmem:[#allocation4 + $0x40] sm:$0xff] }
 0x1f3   :  { %v3568_v25 = vpop.permute.xlu1 %3567  ;;  %v5931_v26 = vmul.f32 %v5927_v12, %v5927_v12 }
 0x1f4   :  { %v4062_v7 = vpack.c.bf16 %v3724_v3, %v3723_v42  ;;  %v3600_v47 = vadd.f32 %v3568_v25, %v3555_v45  ;;  %v3586_v17 = vpop.permute.xlu0 %3585  ;;  %v4900_v48 = vpop.eup %4899 }
 0x1f5   :  { %3541 = vrot.lane.b32.xlu1 %v5931_v26, %s4932_s0  ;;  %3523 = vrot.lane.b32.xlu0 %v5931_v26, %s4933_s17  ;;  %v3657_v20 = vmul.f32 %v4900_v48, %v3626_v59 }
 0x1f6   :  { %4063 = vst [vmem:[%s5971_s3] sm:$0xff] %v4062_v7   ;;  %v3609_v27 = vadd.f32 %v3600_v47, %v3586_v17 }
 0x1f7   :  { %v3659_v18 = vsel %vm3658_vm4, %v3626_v59, %v3657_v20 }
 0x1f8   :  { %v3618_v10 = vmul.f32 2e-05, %v3609_v27  ;;  %v3662_v22 = vsel %vm3660_vm5, %v3661_v60, %v3659_v18 }
 0x1f9   :  { %3595 = vrot.lane.b32.xlu1 %v5931_v26, %s4934_s18  ;;  %3577 = vrot.lane.b32.xlu0 %v5931_v26, %s4935_s19 }
 0x1fa   :  { %v3627_v6 = vadd.f32 1.0, %v3618_v10 }
 0x1fc   :  { %4901 = vrsqrt.f32 %v3627_v6  ;;  %vm3665_vm6 = vcmp.eq.f32.partialorder %v3627_v6, inf  ;;  %v3668_v8 = vand.u32 2147483648, %v3627_v6  ;;  %vm3667_vm7 = vcmp.eq.f32.partialorder %v3627_v6, 0.0 }
 0x1fd   :  { %3593 = vrot.lane.b32.xlu0 %v5913_v19, %s4934_s18  ;;  %4903 = vrsqrt.f32 %v3662_v22 }
 0x206   :  { %v4902_v21 = vpop.eup %4901 }
 0x207   :  { %v3664_v23 = vmul.f32 %v4902_v21, %v3627_v6  ;;  %v4904_v24 = vpop.eup %4903 }
 0x208   :  { %v3716_v32 = vmul.f32 %v4904_v24, %v4900_v48 }
 0x209   :  { %v3666_v9 = vsel %vm3665_vm6, %v3627_v6, %v3664_v23 }
 0x20a   :  { %v3669_v14 = vsel %vm3667_vm7, %v3668_v8, %v3666_v9  ;;  %v3725_v37 = vmul.f32 %v4930_v38, %v3716_v32 }
 0x20b   :  { %4905 = vrsqrt.f32 %v3669_v14 }
 0x211   :  { %v3516_v11 = vpop.permute.xlu0 %3515  ;;  %v3534_v34 = vpop.permute.xlu1 %3533 }
 0x212   :  { %v3547_v29 = vadd.f32 %v3516_v11, %v5822_v16 }
 0x214   :  { %v3556_v35 = vadd.f32 %v3547_v29, %v3534_v34 }
 0x215   :  { %v4906_v33 = vpop.eup %4905  ;;  %v3570_v36 = vpop.permute.xlu0 %3569 }
 0x216   :  { %v3717_v31 = vmul.f32 %v4906_v33, %v4902_v21  ;;  %v3601_v46 = vadd.f32 %v3570_v36, %v3556_v35  ;;  %v3588_v49 = vpop.permute.xlu1 %3587 }
 0x218   :  { %v3726_v41 = vmul.f32 %v4931_v40, %v3717_v31  ;;  %v3610_v50 = vadd.f32 %v3601_v46, %v3588_v49 }
 0x21a   :  { %v4067_v44 = vpack.c.bf16 %v3726_v41, %v3725_v37  ;;  %v3619_v4 = vmul.f32 2e-05, %v3610_v50 }
 0x21c   :  { %4079 = vst [vmem:[%s5971_s3 + $0x8] sm:$0xff] %v4067_v44   ;;  %v3628_v16 = vadd.f32 1.0, %v3619_v4 }
 0x21e   :  { %4907 = vrsqrt.f32 %v3628_v16  ;;  %vm3672_vm8 = vcmp.eq.f32.partialorder %v3628_v16, inf  ;;  %v3675_v51 = vand.u32 2147483648, %v3628_v16  ;;  %vm3674_vm9 = vcmp.eq.f32.partialorder %v3628_v16, 0.0 }
 0x228   :  { %v4908_v63 = vpop.eup %4907 }
 0x229   :  { %v3518_v52 = vpop.permute.xlu1 %3517  ;;  %v3536_v53 = vpop.permute.xlu0 %3535  ;;  %v3671_v28 = vmul.f32 %v4908_v63, %v3628_v16 }
 0x22a   :  { %v3548_v54 = vadd.f32 %v3518_v52, %v5847_v5 }
 0x22b   :  { %v3673_v30 = vsel %vm3672_vm8, %v3628_v16, %v3671_v28 }
 0x22c   :  { %v3557_v61 = vadd.f32 %v3548_v54, %v3536_v53  ;;  %v3676_v39 = vsel %vm3674_vm9, %v3675_v51, %v3673_v30 }
 0x22d   :  { %v3572_v56 = vpop.permute.xlu1 %3571  ;;  %v3590_v58 = vpop.permute.xlu0 %3589 }
 0x22e   :  { %v3602_v57 = vadd.f32 %v3572_v56, %v3557_v61 }
 0x230   :  { %v3611_v59 = vadd.f32 %v3602_v57, %v3590_v58 }
 0x232   :  { %v3620_v62 = vmul.f32 2e-05, %v3611_v59 }
 0x234   :  { %v3629_v0 = vadd.f32 1.0, %v3620_v62 }
 0x236   :  { %4909 = vrsqrt.f32 %v3629_v0  ;;  %vm3679_vm10 = vcmp.eq.f32.partialorder %v3629_v0, inf  ;;  %v3682_v5 = vand.u32 2147483648, %v3629_v0  ;;  %vm3681_vm11 = vcmp.eq.f32.partialorder %v3629_v0, 0.0 }
 0x237   :  { %4911 = vrsqrt.f32 %v3676_v39 }
 0x240   :  { %v4910_v42 = vpop.eup %4909 }
 0x241   :  { %v3678_v2 = vmul.f32 %v4910_v42, %v3629_v0  ;;  %v4912_v25 = vpop.eup %4911 }
 0x242   :  { %v3718_v7 = vmul.f32 %v4912_v25, %v4908_v63 }
 0x243   :  { %v3680_v3 = vsel %vm3679_vm10, %v3629_v0, %v3678_v2 }
 0x244   :  { %v3683_v45 = vsel %vm3681_vm11, %v3682_v5, %v3680_v3  ;;  %v3727_v27 = vmul.f32 %v3718_v7, %v5817_v13  ;;  %v3520_v48 = vpop.permute.xlu0 %3519  ;;  %v3538_v20 = vpop.permute.xlu1 %3537 }
 0x245   :  { %4913 = vrsqrt.f32 %v3683_v45  ;;  %v3549_v18 = vadd.f32 %v3520_v48, %v5884_v55 }
 0x247   :  { %v3558_v60 = vadd.f32 %v3549_v18, %v3538_v20 }
 0x248   :  { %v3574_v22 = vpop.permute.xlu0 %3573  ;;  %v3592_v21 = vpop.permute.xlu1 %3591 }
 0x249   :  { %v3603_v23 = vadd.f32 %v3574_v22, %v3558_v60 }
 0x24b   :  { %v3612_v9 = vadd.f32 %v3603_v23, %v3592_v21 }
 0x24d   :  { %v3621_v14 = vmul.f32 2e-05, %v3612_v9 }
 0x24f   :  { %v4914_v47 = vpop.eup %4913  ;;  %v3630_v11 = vadd.f32 1.0, %v3621_v14 }
 0x250   :  { %v3719_v17 = vmul.f32 %v4914_v47, %v4910_v42 }
 0x251   :  { %4915 = vrsqrt.f32 %v3630_v11  ;;  %vm3686_vm12 = vcmp.eq.f32.partialorder %v3630_v11, inf  ;;  %v3689_v16 = vand.u32 2147483648, %v3630_v11  ;;  %vm3688_vm13 = vcmp.eq.f32.partialorder %v3630_v11, 0.0 }
 0x252   :  { %v3728_v10 = vmul.f32 %v3719_v17, %v5843_v1 }
 0x254   :  { %v4072_v6 = vpack.c.bf16 %v3728_v10, %v3727_v27 }
 0x255   :  { %v3522_v8 = vpop.permute.xlu1 %3521  ;;  %v3540_v24 = vpop.permute.xlu0 %3539 }
 0x256   :  { %4080 = vst [vmem:[%s5971_s3 + $0x10] sm:$0xff] %v4072_v6   ;;  %v3550_v1 = vadd.f32 %v3522_v8, %v5913_v19 }
 0x258   :  { %v3559_v33 = vadd.f32 %v3550_v1, %v3540_v24 }
 0x259   :  { %v3576_v13 = vpop.permute.xlu1 %3575 }
 0x25a   :  { %v3604_v38 = vadd.f32 %v3576_v13, %v3559_v33 }
 0x25b   :  { %v4916_v19 = vpop.eup %4915 }
 0x25c   :  { %v3685_v4 = vmul.f32 %v4916_v19, %v3630_v11 }
 0x267   :  { %v3542_v29 = vpop.permute.xlu1 %3541  ;;  %v3524_v32 = vpop.permute.xlu0 %3523 }
 0x268   :  { %v3551_v55 = vadd.f32 %v3524_v32, %v5931_v26  ;;  %v3687_v26 = vsel %vm3686_vm12, %v3630_v11, %v3685_v4 }
 0x269   :  { %v3690_v53 = vsel %vm3688_vm13, %v3689_v16, %v3687_v26 }
 0x26a   :  { %v3560_v34 = vadd.f32 %v3551_v55, %v3542_v29 }
 0x26b   :  { %v3578_v31 = vpop.permute.xlu0 %3577  ;;  %v3596_v36 = vpop.permute.xlu1 %3595 }
 0x26c   :  { %v3605_v35 = vadd.f32 %v3578_v31, %v3560_v34 }
 0x26e   :  { %v3614_v37 = vadd.f32 %v3605_v35, %v3596_v36 }
 0x26f   :  { %v3594_v40 = vpop.permute.xlu0 %3593 }
 0x270   :  { %v3623_v41 = vmul.f32 2e-05, %v3614_v37  ;;  %v3613_v44 = vadd.f32 %v3604_v38, %v3594_v40 }
 0x272   :  { %v3632_v46 = vadd.f32 1.0, %v3623_v41  ;;  %v3622_v49 = vmul.f32 2e-05, %v3613_v44 }
 0x274   :  { %4917 = vrsqrt.f32 %v3632_v46  ;;  %v3631_v50 = vadd.f32 1.0, %v3622_v49  ;;  %vm3700_vm14 = vcmp.eq.f32.partialorder %v3632_v46, inf  ;;  %v3703_v61 = vand.u32 2147483648, %v3632_v46 }
 0x275   :  { %vm3702_vm15 = vcmp.eq.f32.partialorder %v3632_v46, 0.0 }
 0x276   :  { %4919 = vrsqrt.f32 %v3631_v50  ;;  %vm3693_vm0 = vcmp.eq.f32.partialorder %v3631_v50, inf  ;;  %v3696_v62 = vand.u32 2147483648, %v3631_v50  ;;  %vm3695_vm1 = vcmp.eq.f32.partialorder %v3631_v50, 0.0 }
 0x277   :  { %4921 = vrsqrt.f32 %v3690_v53 }
 0x27e   :  { %v4918_v52 = vpop.eup %4917 }
 0x27f   :  { %v3699_v54 = vmul.f32 %v4918_v52, %v3632_v46 }
 0x280   :  { %v4920_v56 = vpop.eup %4919 }
 0x281   :  { %v3701_v57 = vsel %vm3700_vm14, %v3632_v46, %v3699_v54  ;;  %v3692_v59 = vmul.f32 %v4920_v56, %v3631_v50  ;;  %v4922_v28 = vpop.eup %4921 }
 0x282   :  { %v3704_v58 = vsel %vm3702_vm15, %v3703_v61, %v3701_v57  ;;  %v3720_v39 = vmul.f32 %v4922_v28, %v4916_v19 }
 0x283   :  { %4923 = vrsqrt.f32 %v3704_v58  ;;  %v3694_v63 = vsel %vm3693_vm0, %v3631_v50, %v3692_v59 }
 0x284   :  { %v3697_v0 = vsel %vm3695_vm1, %v3696_v62, %v3694_v63  ;;  %v3729_v45 = vmul.f32 %v3720_v39, %v5880_v15 }
 0x285   :  { %4925 = vrsqrt.f32 %v3697_v0 }
 0x28d   :  { %v4924_v30 = vpop.eup %4923 }
 0x28e   :  { %v3722_v51 = vmul.f32 %v4924_v30, %v4918_v52 }
 0x28f   :  { %v4926_v42 = vpop.eup %4925 }
 0x290   :  { %v3731_v2 = vmul.f32 %v3722_v51, %v5927_v12  ;;  %v3721_v5 = vmul.f32 %v4926_v42, %v4920_v56 }
 0x292   :  { %v4058_v3 = vpack.c.bf16 %v3731_v2, %v3731_v2  ;;  %v3730_v25 = vmul.f32 %v3721_v5, %v5908_v43 }
 0x294   :  { %3777 = vst [vmem:[%s5971_s3 + $0x20] sm:$0xf] %v4058_v3  ;;  %v4077_v7 = vpack.c.bf16 %v3730_v25, %v3729_v45 }
 0x296   :  { %4081 = vst [vmem:[%s5971_s3 + $0x18] sm:$0xff] %v4077_v7  }

// kernel: eyenet_forward.3
= control target key start
LH: loop header
LB: loop body
LE: loop exit
PB: predicated region body
PF: predicated region fallthrough
CT: control target
= control target key end

     0   :  { %vm3260_vm0 = vcmask 1041408   ;;  %vm3279_vm1 = vcmask 1043456   ;;  %s10215_s10 = smov 127   ;;  %s10216_s11 = smov 1   ;;  %vm10220_vm15 = vmmov 0   ;;  %s13070_s1 = inlined_call_operand.vmem [shape: bf16[2432,256], index: 1, kind: input, shape index: {}]   ;;  %s13071_s0 = inlined_call_operand.vmem [shape: bf16[72,2432], index: 0, kind: input, shape index: {}]   ;;  %s13072_s2 = inlined_call_operand.vmem [shape: f32[1,256], index: 2, kind: input, shape index: {}]   ;;  %s13073_s3 = inlined_call_operand.vmem [shape: bf16[2304,384], index: 3, kind: input, shape index: {}]   ;;  %s13074_s5 = inlined_call_operand.vmem [shape: bf16[384,128], index: 5, kind: input, shape index: {}]   ;;  %s13075_s4 = inlined_call_operand.vmem [shape: f32[1,384], index: 4, kind: input, shape index: {}]   ;;  %s13076_s6 = inlined_call_operand.vmem [shape: f32[1,128], index: 6, kind: input, shape index: {}]   ;;  %s13077_s7 = inlined_call_operand.vmem [shape: f32[8,128], index: 7, kind: output, shape index: {}]  }
   0x1   :  { %v9017_v0 = vld [vmem:[%s13070_s1 + $0x4] ss:$8 sps:$4 sm:$0xff]   ;;  %v9019_v1 = vld [vmem:[%s13070_s1] ss:$8 sps:$4 sm:$0xff]   ;;  %v9020_v2 = vld [vmem:[%s13070_s1 + $0x14] ss:$8 sps:$4 sm:$0xff]  }
   0x2   :  { %2404 = vmatprep.subr.bf16.mxu0 %v9017_v0  ;;  %v9022_v3 = vld [vmem:[%s13070_s1 + $0x10] ss:$8 sps:$4 sm:$0xff]   ;;  %v9023_v4 = vld [vmem:[%s13070_s1 + $0x24] ss:$8 sps:$4 sm:$0xff]   ;;  %v9025_v5 = vld [vmem:[%s13070_s1 + $0x20] ss:$8 sps:$4 sm:$0xff]  }
   0x3   :  { %2405 = vmatpush1.bf16.msra.mxu0 %v9019_v1  ;;  %v9026_v6 = vld [vmem:[%s13070_s1 + $0x34] ss:$8 sps:$4 sm:$0xff]   ;;  %v9028_v7 = vld [vmem:[%s13070_s1 + $0x30] ss:$8 sps:$4 sm:$0xff]   ;;  %v9029_v8 = vld [vmem:[%s13070_s1 + $0x44] ss:$8 sps:$4 sm:$0xff]  }
   0x4   :  { %2406 = vmatprep.subr.bf16.mxu0 %v9020_v2  ;;  %v9031_v9 = vld [vmem:[%s13070_s1 + $0x40] ss:$8 sps:$4 sm:$0xff]   ;;  %v9032_v10 = vld [vmem:[%s13070_s1 + $0x54] ss:$8 sps:$4 sm:$0xff]   ;;  %v9034_v11 = vld [vmem:[%s13070_s1 + $0x50] ss:$8 sps:$4 sm:$0xff]  }
   0x5   :  { %v9035_v12 = vld [vmem:[%s13070_s1 + $0x64] ss:$8 sps:$4 sm:$0xff]   ;;  %v9037_v14 = vld [vmem:[%s13070_s1 + $0x60] ss:$8 sps:$4 sm:$0xff]   ;;  %v9038_v15 = vld [vmem:[%s13070_s1 + $0x74] ss:$8 sps:$4 sm:$0xff]  }
   0x6   :  { %v9067_v13 = vld [vmem:[%s13071_s0 + $0x4] ss:$76 sps:$4 sm:$0xff]   ;;  %v9043_v18 = vld [vmem:[%s13070_s1 + $0x80] ss:$8 sps:$4 sm:$0xff]   ;;  %v9044_v19 = vld [vmem:[%s13070_s1 + $0x94] ss:$8 sps:$4 sm:$0xff]  }
   0x7   :  { %2407 = vmatpush1.bf16.msra.mxu0 %v9022_v3  ;;  %2436 = vmatprep.mubr.bf16.mxu0 %v9067_v13  ;;  %v9040_v16 = vld [vmem:[%s13070_s1 + $0x70] ss:$8 sps:$4 sm:$0xff]   ;;  %v9041_v17 = vld [vmem:[%s13070_s1 + $0x84] ss:$8 sps:$4 sm:$0xff]   ;;  %v9049_v22 = vld [vmem:[%s13070_s1 + $0xa0] ss:$8 sps:$4 sm:$0xff]  }
   0x8   :  { %2408 = vmatprep.subr.bf16.mxu0 %v9023_v4  ;;  %v9046_v20 = vld [vmem:[%s13070_s1 + $0x90] ss:$8 sps:$4 sm:$0xff]   ;;  %v9047_v21 = vld [vmem:[%s13070_s1 + $0xa4] ss:$8 sps:$4 sm:$0xff]   ;;  %v9050_v23 = vld [vmem:[%s13070_s1 + $0xb4] ss:$8 sps:$4 sm:$0xff]  }
   0x9   :  { %v9052_v24 = vld [vmem:[%s13070_s1 + $0xb0] ss:$8 sps:$4 sm:$0xff]   ;;  %v9053_v25 = vld [vmem:[%s13070_s1 + $0xc4] ss:$8 sps:$4 sm:$0xff]   ;;  %v9055_v26 = vld [vmem:[%s13070_s1 + $0xc0] ss:$8 sps:$4 sm:$0xff]  }
   0xa   :  { %v9056_v27 = vld [vmem:[%s13070_s1 + $0xd4] ss:$8 sps:$4 sm:$0xff]   ;;  %v9058_v28 = vld [vmem:[%s13070_s1 + $0xd0] ss:$8 sps:$4 sm:$0xff]   ;;  %v9059_v29 = vld [vmem:[%s13070_s1 + $0xe4] ss:$8 sps:$4 sm:$0xff]  }
   0xb   :  { %2409 = vmatpush1.bf16.msra.mxu0 %v9025_v5  ;;  %v9061_v30 = vld [vmem:[%s13070_s1 + $0xe0] ss:$8 sps:$4 sm:$0xff]   ;;  %v9062_v31 = vld [vmem:[%s13070_s1 + $0xf4] ss:$8 sps:$4 sm:$0xff]   ;;  %v9064_v32 = vld [vmem:[%s13070_s1 + $0xf0] ss:$8 sps:$4 sm:$0xff]  }
   0xc   :  { %2410 = vmatprep.subr.bf16.mxu0 %v9026_v6  ;;  %v9070_v33 = vld [vmem:[%s13070_s1 + $0x104] ss:$8 sps:$4 sm:$0xff]   ;;  %v9068_v35 = vld [vmem:[%s13070_s1 + $0x100] ss:$8 sps:$4 sm:$0xff]   ;;  %v9073_v37 = vld [vmem:[%s13070_s1 + $0x114] ss:$8 sps:$4 sm:$0xff]  }
   0xd   :  { %v9065_v34 = vld [vmem:[%s13071_s0] ss:$76 sps:$4 sm:$0xff]   ;;  %v9092_v36 = vld [vmem:[%s13071_s0 + $0x9c] ss:$76 sps:$4 sm:$0xff]   ;;  %v9071_v38 = vld [vmem:[%s13070_s1 + $0x110] ss:$8 sps:$4 sm:$0xff]  }
   0xe   :  { %v9076_v39 = vld [vmem:[%s13070_s1 + $0x124] ss:$8 sps:$4 sm:$0xff]   ;;  %v9074_v40 = vld [vmem:[%s13070_s1 + $0x120] ss:$8 sps:$4 sm:$0xff]   ;;  %v9079_v43 = vld [vmem:[%s13070_s1 + $0x134] ss:$8 sps:$4 sm:$0xff]  }
   0xf   :  { %2411 = vmatpush1.bf16.msra.mxu0 %v9028_v7  ;;  %v9097_v41 = vld [vmem:[%s13071_s0 + $0x98] ss:$76 sps:$4 sm:$0xff]   ;;  %v9101_v42 = vld [vmem:[%s13071_s0 + $0x134] ss:$76 sps:$4 sm:$0xff]   ;;  %v9106_v47 = vld [vmem:[%s13071_s0 + $0x130] ss:$76 sps:$4 sm:$0xff]  }
  0x10   :  { %2412 = vmatprep.subr.bf16.mxu0 %v9029_v8  ;;  %v9077_v44 = vld [vmem:[%s13070_s1 + $0x130] ss:$8 sps:$4 sm:$0xff]   ;;  %v9082_v45 = vld [vmem:[%s13070_s1 + $0x144] ss:$8 sps:$4 sm:$0xff]   ;;  %v9080_v46 = vld [vmem:[%s13070_s1 + $0x140] ss:$8 sps:$4 sm:$0xff]  }
  0x11   :  { %v9110_v48 = vld [vmem:[%s13071_s0 + $0x1cc] ss:$76 sps:$4 sm:$0xff]   ;;  %v9085_v49 = vld [vmem:[%s13070_s1 + $0x154] ss:$8 sps:$4 sm:$0xff]   ;;  %v107_v53 = vld [vmem:[%s13071_s0 + $0x260] sm:$0xff]  ;;  %s10217_s19 = smov 2  }
  0x12   :  { %v9083_v50 = vld [vmem:[%s13070_s1 + $0x150] ss:$8 sps:$4 sm:$0xff]   ;;  %v9088_v51 = vld [vmem:[%s13070_s1 + $0x164] ss:$8 sps:$4 sm:$0xff]   ;;  %v9115_v52 = vld [vmem:[%s13071_s0 + $0x1c8] ss:$76 sps:$4 sm:$0xff]   ;;  %v7750_v56 = vcombine.high %v107_v53, %v107_v53  ;;  %v7749_v59 = vcombine.low %v107_v53, %v107_v53 }
  0x13   :  { %2413 = vmatpush1.bf16.msra.mxu0 %v9031_v9  ;;  %v9086_v54 = vld [vmem:[%s13070_s1 + $0x160] ss:$8 sps:$4 sm:$0xff]   ;;  %v9091_v55 = vld [vmem:[%s13070_s1 + $0x174] ss:$8 sps:$4 sm:$0xff]   ;;  %v9089_v57 = vld [vmem:[%s13070_s1 + $0x170] ss:$8 sps:$4 sm:$0xff]  }
  0x14   :  { %2414 = vmatprep.subr.bf16.mxu0 %v9032_v10  ;;  %v9096_v58 = vld [vmem:[%s13070_s1 + $0x184] ss:$8 sps:$4 sm:$0xff]   ;;  %v9094_v60 = vld [vmem:[%s13070_s1 + $0x180] ss:$8 sps:$4 sm:$0xff]   ;;  %v9100_v62 = vld [vmem:[%s13070_s1 + $0x194] ss:$8 sps:$4 sm:$0xff]  }
  0x15   :  { %v9129_v61 = vld [vmem:[%s13071_s0 + $0xc] ss:$76 sps:$4 sm:$0xff]   ;;  %v9103_v1 = vld [vmem:[%s13070_s1 + $0x1a0] ss:$8 sps:$4 sm:$0xff]   ;;  %v9109_v2 = vld [vmem:[%s13070_s1 + $0x1b4] ss:$8 sps:$4 sm:$0xff]  }
  0x16   :  { %v9098_v63 = vld [vmem:[%s13070_s1 + $0x190] ss:$8 sps:$4 sm:$0xff]   ;;  %v9105_v0 = vld [vmem:[%s13070_s1 + $0x1a4] ss:$8 sps:$4 sm:$0xff]   ;;  %v9112_v5 = vld [vmem:[%s13070_s1 + $0x1c0] ss:$8 sps:$4 sm:$0xff]  }
  0x17   :  { %2415 = vmatpush1.bf16.msra.mxu0 %v9034_v11  ;;  %v9107_v3 = vld [vmem:[%s13070_s1 + $0x1b0] ss:$8 sps:$4 sm:$0xff]   ;;  %v9114_v4 = vld [vmem:[%s13070_s1 + $0x1c4] ss:$8 sps:$4 sm:$0xff]   ;;  %v9118_v6 = vld [vmem:[%s13070_s1 + $0x1d4] ss:$8 sps:$4 sm:$0xff]  }
  0x18   :  { %2416 = vmatprep.subr.bf16.mxu0 %v9035_v12  ;;  %v9116_v7 = vld [vmem:[%s13070_s1 + $0x1d0] ss:$8 sps:$4 sm:$0xff]   ;;  %v9122_v8 = vld [vmem:[%s13070_s1 + $0x1e4] ss:$8 sps:$4 sm:$0xff]   ;;  %v9120_v9 = vld [vmem:[%s13070_s1 + $0x1e0] ss:$8 sps:$4 sm:$0xff]  }
  0x19   :  { %v9126_v10 = vld [vmem:[%s13070_s1 + $0x1f4] ss:$8 sps:$4 sm:$0xff]   ;;  %v9124_v11 = vld [vmem:[%s13070_s1 + $0x1f0] ss:$8 sps:$4 sm:$0xff]   ;;  %v9132_v12 = vld [vmem:[%s13070_s1 + $0x204] ss:$8 sps:$4 sm:$0xff]  }
  0x1a   :  { %v9127_v13 = vld [vmem:[%s13071_s0 + $0x8] ss:$76 sps:$4 sm:$0xff]  }
  0x1b   :  { %2417 = vmatpush1.bf16.msra.mxu0 %v9037_v14  ;;  %v9130_v14 = vld [vmem:[%s13070_s1 + $0x200] ss:$8 sps:$4 sm:$0xff]   ;;  %v9188_v53 = vld [vmem:[%s13070_s1 + $0x2f4] ss:$8 sps:$4 sm:$0xff]  }
  0x1c   :  { %2418 = vmatprep.subr.bf16.mxu0 %v9038_v15  ;;  %v9154_v15 = vld [vmem:[%s13071_s0 + $0xa4] ss:$76 sps:$4 sm:$0xff]  }
  0x1f   :  { %2419 = vmatpush1.bf16.msra.mxu0 %v9040_v16  ;;  %v9135_v16 = vld [vmem:[%s13070_s1 + $0x214] ss:$8 sps:$4 sm:$0xff]  }
  0x20   :  { %2420 = vmatprep.subr.bf16.mxu0 %v9041_v17  ;;  %v9133_v17 = vld [vmem:[%s13070_s1 + $0x210] ss:$8 sps:$4 sm:$0xff]  }
  0x23   :  { %2421 = vmatpush1.bf16.msra.mxu0 %v9043_v18  ;;  %v9138_v18 = vld [vmem:[%s13070_s1 + $0x224] ss:$8 sps:$4 sm:$0xff]  }
  0x24   :  { %2422 = vmatprep.subr.bf16.mxu0 %v9044_v19  ;;  %v9159_v19 = vld [vmem:[%s13071_s0 + $0xa0] ss:$76 sps:$4 sm:$0xff]  }
  0x27   :  { %2423 = vmatpush1.bf16.msra.mxu0 %v9046_v20  ;;  %v9136_v20 = vld [vmem:[%s13070_s1 + $0x220] ss:$8 sps:$4 sm:$0xff]  }
  0x28   :  { %2424 = vmatprep.subr.bf16.mxu0 %v9047_v21  ;;  %v9141_v21 = vld [vmem:[%s13070_s1 + $0x234] ss:$8 sps:$4 sm:$0xff]  }
  0x2b   :  { %2425 = vmatpush1.bf16.msra.mxu0 %v9049_v22  ;;  %v9163_v22 = vld [vmem:[%s13071_s0 + $0x13c] ss:$76 sps:$4 sm:$0xff]  }
  0x2c   :  { %2426 = vmatprep.subr.bf16.mxu0 %v9050_v23  ;;  %v9139_v23 = vld [vmem:[%s13070_s1 + $0x230] ss:$8 sps:$4 sm:$0xff]  }
  0x2f   :  { %2427 = vmatpush1.bf16.msra.mxu0 %v9052_v24  ;;  %v9144_v24 = vld [vmem:[%s13070_s1 + $0x244] ss:$8 sps:$4 sm:$0xff]  }
  0x30   :  { %2428 = vmatprep.subr.bf16.mxu0 %v9053_v25  ;;  %v9168_v25 = vld [vmem:[%s13071_s0 + $0x138] ss:$76 sps:$4 sm:$0xff]  }
  0x33   :  { %2429 = vmatpush1.bf16.msra.mxu0 %v9055_v26  ;;  %v9142_v26 = vld [vmem:[%s13070_s1 + $0x240] ss:$8 sps:$4 sm:$0xff]  }
  0x34   :  { %2430 = vmatprep.subr.bf16.mxu0 %v9056_v27  ;;  %v9147_v27 = vld [vmem:[%s13070_s1 + $0x254] ss:$8 sps:$4 sm:$0xff]  }
  0x37   :  { %2431 = vmatpush1.bf16.msra.mxu0 %v9058_v28  ;;  %v9172_v28 = vld [vmem:[%s13071_s0 + $0x1d4] ss:$76 sps:$4 sm:$0xff]  }
  0x38   :  { %2432 = vmatprep.subr.bf16.mxu0 %v9059_v29  ;;  %v9145_v29 = vld [vmem:[%s13070_s1 + $0x250] ss:$8 sps:$4 sm:$0xff]  }
  0x3b   :  { %2433 = vmatpush1.bf16.msra.mxu0 %v9061_v30  ;;  %v9150_v30 = vld [vmem:[%s13070_s1 + $0x264] ss:$8 sps:$4 sm:$0xff]  }
  0x3c   :  { %2434 = vmatprep.subr.bf16.mxu0 %v9062_v31  ;;  %v108_v31 = vld [vmem:[%s13071_s0 + $0x268] sm:$0xff] }
  0x3f   :  { %2435 = vmatpush1.bf16.msra.mxu0 %v9064_v32  ;;  %v9177_v32 = vld [vmem:[%s13071_s0 + $0x1d0] ss:$76 sps:$4 sm:$0xff]  }
  0x40   :  { %2485 = vmatprep.subr.bf16.mxu0 %v9070_v33  ;;  %v9148_v33 = vld [vmem:[%s13070_s1 + $0x260] ss:$8 sps:$4 sm:$0xff]  }
  0x42   :  { %2437 = vmatmul.mubr.bf16.vlgmr.msra.gmra.mrb[0].mxu0 %v9065_v34  ;;  %v9153_v34 = vld [vmem:[%s13070_s1 + $0x274] ss:$8 sps:$4 sm:$0xff]  }
  0x43   :  { %2486 = vmatpush1.bf16.msra.mxu0 %v9068_v35  ;;  %2446 = vmatprep.mubr.bf16.mxu0 %v9092_v36  ;;  %v7752_v35 = vcombine.high %v108_v31, %v108_v31  ;;  %v9151_v36 = vld [vmem:[%s13070_s1 + $0x270] ss:$8 sps:$4 sm:$0xff]  }
  0x44   :  { %2487 = vmatprep.subr.bf16.mxu0 %v9073_v37  ;;  %v9158_v37 = vld [vmem:[%s13070_s1 + $0x284] ss:$8 sps:$4 sm:$0xff]  }
  0x47   :  { %2488 = vmatpush1.bf16.msra.mxu0 %v9071_v38  ;;  %v7751_v38 = vcombine.low %v108_v31, %v108_v31  ;;  %v9244_v31 = vld [vmem:[%s13070_s1 + $0x3e0] ss:$8 sps:$4 sm:$0xff]  }
  0x48   :  { %2489 = vmatprep.subr.bf16.mxu0 %v9076_v39  ;;  %v9156_v39 = vld [vmem:[%s13070_s1 + $0x280] ss:$8 sps:$4 sm:$0xff]  }
  0x4a   :  { %2447 = vmatmul.mubr.bf16.gmra.mrb[4].mxu0 %v9097_v41  ;;  %v9162_v41 = vld [vmem:[%s13070_s1 + $0x294] ss:$8 sps:$4 sm:$0xff]  }
  0x4b   :  { %2490 = vmatpush1.bf16.msra.mxu0 %v9074_v40  ;;  %2456 = vmatprep.mubr.bf16.mxu0 %v9101_v42  ;;  %v9191_v40 = vld [vmem:[%s13071_s0 + $0x14] ss:$76 sps:$4 sm:$0xff]   ;;  %v9160_v42 = vld [vmem:[%s13070_s1 + $0x290] ss:$8 sps:$4 sm:$0xff]  }
  0x4c   :  { %2491 = vmatprep.subr.bf16.mxu0 %v9079_v43  ;;  %v9167_v43 = vld [vmem:[%s13070_s1 + $0x2a4] ss:$8 sps:$4 sm:$0xff]  }
  0x4f   :  { %2492 = vmatpush1.bf16.msra.mxu0 %v9077_v44  ;;  %v9165_v44 = vld [vmem:[%s13070_s1 + $0x2a0] ss:$8 sps:$4 sm:$0xff]  }
  0x50   :  { %2493 = vmatprep.subr.bf16.mxu0 %v9082_v45  ;;  %v9171_v45 = vld [vmem:[%s13070_s1 + $0x2b4] ss:$8 sps:$4 sm:$0xff]  }
  0x52   :  { %2457 = vmatmul.mubr.bf16.gmra.mrb[8].mxu0 %v9106_v47  ;;  %v9176_v47 = vld [vmem:[%s13070_s1 + $0x2c4] ss:$8 sps:$4 sm:$0xff]  }
  0x53   :  { %2494 = vmatpush1.bf16.msra.mxu0 %v9080_v46  ;;  %2466 = vmatprep.mubr.bf16.mxu0 %v9110_v48  ;;  %v9169_v46 = vld [vmem:[%s13070_s1 + $0x2b0] ss:$8 sps:$4 sm:$0xff]   ;;  %v9174_v48 = vld [vmem:[%s13070_s1 + $0x2c0] ss:$8 sps:$4 sm:$0xff]  }
  0x54   :  { %2495 = vmatprep.subr.bf16.mxu0 %v9085_v49  ;;  %v9180_v49 = vld [vmem:[%s13070_s1 + $0x2d4] ss:$8 sps:$4 sm:$0xff]  }
  0x57   :  { %2496 = vmatpush1.bf16.msra.mxu0 %v9083_v50  ;;  %v9178_v50 = vld [vmem:[%s13070_s1 + $0x2d0] ss:$8 sps:$4 sm:$0xff]  }
  0x58   :  { %2497 = vmatprep.subr.bf16.mxu0 %v9088_v51  ;;  %v9184_v51 = vld [vmem:[%s13070_s1 + $0x2e4] ss:$8 sps:$4 sm:$0xff]  }
  0x5a   :  { %2467 = vmatmul.mubr.bf16.gmra.mrb[12].mxu0 %v9115_v52  ;;  %v9182_v52 = vld [vmem:[%s13070_s1 + $0x2e0] ss:$8 sps:$4 sm:$0xff]  }
  0x5b   :  { %2498 = vmatpush1.bf16.msra.mxu0 %v9086_v54  ;;  %2476 = vmatprep.mubr.bf16.mxu0 %v7750_v56  ;;  %v9186_v54 = vld [vmem:[%s13070_s1 + $0x2f0] ss:$8 sps:$4 sm:$0xff]  }
  0x5c   :  { %2499 = vmatprep.subr.bf16.mxu0 %v9091_v55  ;;  %v9194_v55 = vld [vmem:[%s13070_s1 + $0x304] ss:$8 sps:$4 sm:$0xff]   ;;  %v9189_v56 = vld [vmem:[%s13071_s0 + $0x10] ss:$76 sps:$4 sm:$0xff]  }
  0x5f   :  { %2500 = vmatpush1.bf16.msra.mxu0 %v9089_v57  ;;  %v9192_v57 = vld [vmem:[%s13070_s1 + $0x300] ss:$8 sps:$4 sm:$0xff]  }
  0x60   :  { %2501 = vmatprep.subr.bf16.mxu0 %v9096_v58  ;;  %v9216_v58 = vld [vmem:[%s13071_s0 + $0xac] ss:$76 sps:$4 sm:$0xff]  }
  0x62   :  { %2477 = vmatmul.mubr.bf16.gmra.mrb[16].mxu0 %v7749_v59  ;;  %v9197_v59 = vld [vmem:[%s13070_s1 + $0x314] ss:$8 sps:$4 sm:$0xff]  }
  0x63   :  { %2502 = vmatpush1.bf16.msra.mxu0 %v9094_v60  ;;  %2517 = vmatprep.mubr.bf16.mxu0 %v9129_v61  ;;  %v9195_v60 = vld [vmem:[%s13070_s1 + $0x310] ss:$8 sps:$4 sm:$0xff]   ;;  %v9200_v61 = vld [vmem:[%s13070_s1 + $0x324] ss:$8 sps:$4 sm:$0xff]  }
  0x64   :  { %2503 = vmatprep.subr.bf16.mxu0 %v9100_v62  ;;  %v9221_v62 = vld [vmem:[%s13071_s0 + $0xa8] ss:$76 sps:$4 sm:$0xff]  }
  0x67   :  { %2504 = vmatpush1.bf16.msra.mxu0 %v9098_v63  ;;  %v9198_v63 = vld [vmem:[%s13070_s1 + $0x320] ss:$8 sps:$4 sm:$0xff]  }
  0x68   :  { %2505 = vmatprep.subr.bf16.mxu0 %v9105_v0  ;;  %v9225_v0 = vld [vmem:[%s13071_s0 + $0x144] ss:$76 sps:$4 sm:$0xff]  }
  0x6b   :  { %2506 = vmatpush1.bf16.msra.mxu0 %v9103_v1  ;;  %v9203_v1 = vld [vmem:[%s13070_s1 + $0x334] ss:$8 sps:$4 sm:$0xff]  }
  0x6c   :  { %2507 = vmatprep.subr.bf16.mxu0 %v9109_v2  ;;  %v9201_v2 = vld [vmem:[%s13070_s1 + $0x330] ss:$8 sps:$4 sm:$0xff]  }
  0x6f   :  { %2508 = vmatpush1.bf16.msra.mxu0 %v9107_v3  ;;  %v9206_v3 = vld [vmem:[%s13070_s1 + $0x344] ss:$8 sps:$4 sm:$0xff]  }
  0x70   :  { %2509 = vmatprep.subr.bf16.mxu0 %v9114_v4  ;;  %v9230_v4 = vld [vmem:[%s13071_s0 + $0x140] ss:$76 sps:$4 sm:$0xff]  }
  0x73   :  { %2510 = vmatpush1.bf16.msra.mxu0 %v9112_v5  ;;  %v9204_v5 = vld [vmem:[%s13070_s1 + $0x340] ss:$8 sps:$4 sm:$0xff]  }
  0x74   :  { %2511 = vmatprep.subr.bf16.mxu0 %v9118_v6  ;;  %v9234_v6 = vld [vmem:[%s13071_s0 + $0x1dc] ss:$76 sps:$4 sm:$0xff]  }
  0x77   :  { %2512 = vmatpush1.bf16.msra.mxu0 %v9116_v7  ;;  %v9209_v7 = vld [vmem:[%s13070_s1 + $0x354] ss:$8 sps:$4 sm:$0xff]  }
  0x78   :  { %2513 = vmatprep.subr.bf16.mxu0 %v9122_v8  ;;  %v9207_v8 = vld [vmem:[%s13070_s1 + $0x350] ss:$8 sps:$4 sm:$0xff]  }
  0x7b   :  { %2514 = vmatpush1.bf16.msra.mxu0 %v9120_v9  ;;  %v9212_v9 = vld [vmem:[%s13070_s1 + $0x364] ss:$8 sps:$4 sm:$0xff]  }
  0x7c   :  { %2515 = vmatprep.subr.bf16.mxu0 %v9126_v10  ;;  %v109_v10 = vld [vmem:[%s13071_s0 + $0x270] sm:$0xff] }
  0x7f   :  { %2516 = vmatpush1.bf16.msra.mxu0 %v9124_v11  ;;  %v9239_v11 = vld [vmem:[%s13071_s0 + $0x1d8] ss:$76 sps:$4 sm:$0xff]  }
  0x80   :  { %2566 = vmatprep.subr.bf16.mxu0 %v9132_v12  ;;  %v9210_v12 = vld [vmem:[%s13070_s1 + $0x360] ss:$8 sps:$4 sm:$0xff]  }
  0x82   :  { %2518 = vmatmul.mubr.bf16.vlgmr.msra.gmra.mrb[0].mxu0 %v9127_v13  ;;  %v7754_v13 = vcombine.high %v109_v10, %v109_v10 }
  0x83   :  { %2567 = vmatpush1.bf16.msra.mxu0 %v9130_v14  ;;  %2527 = vmatprep.mubr.bf16.mxu0 %v9154_v15  ;;  %v9215_v14 = vld [vmem:[%s13070_s1 + $0x374] ss:$8 sps:$4 sm:$0xff]   ;;  %v9213_v15 = vld [vmem:[%s13070_s1 + $0x370] ss:$8 sps:$4 sm:$0xff]  }
  0x84   :  { %2568 = vmatprep.subr.bf16.mxu0 %v9135_v16  ;;  %v9220_v16 = vld [vmem:[%s13070_s1 + $0x384] ss:$8 sps:$4 sm:$0xff]  }
  0x87   :  { %2569 = vmatpush1.bf16.msra.mxu0 %v9133_v17  ;;  %v7753_v17 = vcombine.low %v109_v10, %v109_v10  ;;  %v9306_v10 = vld [vmem:[%s13070_s1 + $0x4e0] ss:$8 sps:$4 sm:$0xff]  }
  0x88   :  { %2570 = vmatprep.subr.bf16.mxu0 %v9138_v18  ;;  %v9218_v18 = vld [vmem:[%s13070_s1 + $0x380] ss:$8 sps:$4 sm:$0xff]  }
  0x8a   :  { %2528 = vmatmul.mubr.bf16.gmra.mrb[4].mxu0 %v9159_v19  ;;  %v9253_v19 = vld [vmem:[%s13071_s0 + $0x1c] ss:$76 sps:$4 sm:$0xff]  }
  0x8b   :  { %2571 = vmatpush1.bf16.msra.mxu0 %v9136_v20  ;;  %2537 = vmatprep.mubr.bf16.mxu0 %v9163_v22  ;;  %v9224_v20 = vld [vmem:[%s13070_s1 + $0x394] ss:$8 sps:$4 sm:$0xff]   ;;  %v9229_v22 = vld [vmem:[%s13070_s1 + $0x3a4] ss:$8 sps:$4 sm:$0xff]  }
  0x8c   :  { %2572 = vmatprep.subr.bf16.mxu0 %v9141_v21  ;;  %v9222_v21 = vld [vmem:[%s13070_s1 + $0x390] ss:$8 sps:$4 sm:$0xff]  }
  0x8f   :  { %2573 = vmatpush1.bf16.msra.mxu0 %v9139_v23  ;;  %v9227_v23 = vld [vmem:[%s13070_s1 + $0x3a0] ss:$8 sps:$4 sm:$0xff]  }
  0x90   :  { %2574 = vmatprep.subr.bf16.mxu0 %v9144_v24  ;;  %v9233_v24 = vld [vmem:[%s13070_s1 + $0x3b4] ss:$8 sps:$4 sm:$0xff]  }
  0x92   :  { %2538 = vmatmul.mubr.bf16.gmra.mrb[8].mxu0 %v9168_v25  ;;  %v9231_v25 = vld [vmem:[%s13070_s1 + $0x3b0] ss:$8 sps:$4 sm:$0xff]  }
  0x93   :  { %2575 = vmatpush1.bf16.msra.mxu0 %v9142_v26  ;;  %2547 = vmatprep.mubr.bf16.mxu0 %v9172_v28  ;;  %v9238_v26 = vld [vmem:[%s13070_s1 + $0x3c4] ss:$8 sps:$4 sm:$0xff]   ;;  %v9242_v28 = vld [vmem:[%s13070_s1 + $0x3d4] ss:$8 sps:$4 sm:$0xff]  }
  0x94   :  { %2576 = vmatprep.subr.bf16.mxu0 %v9147_v27  ;;  %v9236_v27 = vld [vmem:[%s13070_s1 + $0x3c0] ss:$8 sps:$4 sm:$0xff]  }
  0x97   :  { %2577 = vmatpush1.bf16.msra.mxu0 %v9145_v29  ;;  %v9240_v29 = vld [vmem:[%s13070_s1 + $0x3d0] ss:$8 sps:$4 sm:$0xff]  }
  0x98   :  { %2578 = vmatprep.subr.bf16.mxu0 %v9150_v30  ;;  %v9246_v30 = vld [vmem:[%s13070_s1 + $0x3e4] ss:$8 sps:$4 sm:$0xff]  }
  0x9a   :  { %2548 = vmatmul.mubr.bf16.gmra.mrb[12].mxu0 %v9177_v32  ;;  %v9250_v32 = vld [vmem:[%s13070_s1 + $0x3f4] ss:$8 sps:$4 sm:$0xff]  }
  0x9b   :  { %2579 = vmatpush1.bf16.msra.mxu0 %v9148_v33  ;;  %2557 = vmatprep.mubr.bf16.mxu0 %v7752_v35  ;;  %v9248_v33 = vld [vmem:[%s13070_s1 + $0x3f0] ss:$8 sps:$4 sm:$0xff]  }
  0x9c   :  { %2580 = vmatprep.subr.bf16.mxu0 %v9153_v34  ;;  %v9256_v34 = vld [vmem:[%s13070_s1 + $0x404] ss:$8 sps:$4 sm:$0xff]  }
  0x9d   :  { %v9251_v35 = vld [vmem:[%s13071_s0 + $0x18] ss:$76 sps:$4 sm:$0xff]  }
  0x9f   :  { %2581 = vmatpush1.bf16.msra.mxu0 %v9151_v36  ;;  %v9254_v36 = vld [vmem:[%s13070_s1 + $0x400] ss:$8 sps:$4 sm:$0xff]  }
  0xa0   :  { %2582 = vmatprep.subr.bf16.mxu0 %v9158_v37  ;;  %v9278_v37 = vld [vmem:[%s13071_s0 + $0xb4] ss:$76 sps:$4 sm:$0xff]  }
  0xa2   :  { %2558 = vmatmul.mubr.bf16.gmra.mrb[16].mxu0 %v7751_v38  ;;  %v9259_v38 = vld [vmem:[%s13070_s1 + $0x414] ss:$8 sps:$4 sm:$0xff]  }
  0xa3   :  { %2583 = vmatpush1.bf16.msra.mxu0 %v9156_v39  ;;  %2598 = vmatprep.mubr.bf16.mxu0 %v9191_v40  ;;  %v9257_v39 = vld [vmem:[%s13070_s1 + $0x410] ss:$8 sps:$4 sm:$0xff]   ;;  %v9262_v40 = vld [vmem:[%s13070_s1 + $0x424] ss:$8 sps:$4 sm:$0xff]  }
  0xa4   :  { %2584 = vmatprep.subr.bf16.mxu0 %v9162_v41  ;;  %v9283_v41 = vld [vmem:[%s13071_s0 + $0xb0] ss:$76 sps:$4 sm:$0xff]  }
  0xa7   :  { %2585 = vmatpush1.bf16.msra.mxu0 %v9160_v42  ;;  %v9260_v42 = vld [vmem:[%s13070_s1 + $0x420] ss:$8 sps:$4 sm:$0xff]  }
  0xa8   :  { %2586 = vmatprep.subr.bf16.mxu0 %v9167_v43  ;;  %v9287_v43 = vld [vmem:[%s13071_s0 + $0x14c] ss:$76 sps:$4 sm:$0xff]  }
  0xab   :  { %2587 = vmatpush1.bf16.msra.mxu0 %v9165_v44  ;;  %v9265_v44 = vld [vmem:[%s13070_s1 + $0x434] ss:$8 sps:$4 sm:$0xff]  }
  0xac   :  { %2588 = vmatprep.subr.bf16.mxu0 %v9171_v45  ;;  %v9263_v45 = vld [vmem:[%s13070_s1 + $0x430] ss:$8 sps:$4 sm:$0xff]  }
  0xaf   :  { %2589 = vmatpush1.bf16.msra.mxu0 %v9169_v46  ;;  %v9268_v46 = vld [vmem:[%s13070_s1 + $0x444] ss:$8 sps:$4 sm:$0xff]  }
  0xb0   :  { %2590 = vmatprep.subr.bf16.mxu0 %v9176_v47  ;;  %v9292_v47 = vld [vmem:[%s13071_s0 + $0x148] ss:$76 sps:$4 sm:$0xff]  }
  0xb3   :  { %2591 = vmatpush1.bf16.msra.mxu0 %v9174_v48  ;;  %v9266_v48 = vld [vmem:[%s13070_s1 + $0x440] ss:$8 sps:$4 sm:$0xff]  }
  0xb4   :  { %2592 = vmatprep.subr.bf16.mxu0 %v9180_v49  ;;  %v9296_v49 = vld [vmem:[%s13071_s0 + $0x1e4] ss:$76 sps:$4 sm:$0xff]  }
  0xb7   :  { %2593 = vmatpush1.bf16.msra.mxu0 %v9178_v50  ;;  %v9271_v50 = vld [vmem:[%s13070_s1 + $0x454] ss:$8 sps:$4 sm:$0xff]  }
  0xb8   :  { %2594 = vmatprep.subr.bf16.mxu0 %v9184_v51  ;;  %v9269_v51 = vld [vmem:[%s13070_s1 + $0x450] ss:$8 sps:$4 sm:$0xff]  }
  0xbb   :  { %2595 = vmatpush1.bf16.msra.mxu0 %v9182_v52  ;;  %v9274_v52 = vld [vmem:[%s13070_s1 + $0x464] ss:$8 sps:$4 sm:$0xff]  }
  0xbc   :  { %2596 = vmatprep.subr.bf16.mxu0 %v9188_v53  ;;  %v110_v53 = vld [vmem:[%s13071_s0 + $0x278] sm:$0xff] }
  0xbf   :  { %2597 = vmatpush1.bf16.msra.mxu0 %v9186_v54  ;;  %v9301_v54 = vld [vmem:[%s13071_s0 + $0x1e0] ss:$76 sps:$4 sm:$0xff]  }
  0xc0   :  { %2647 = vmatprep.subr.bf16.mxu0 %v9194_v55  ;;  %v9272_v55 = vld [vmem:[%s13070_s1 + $0x460] ss:$8 sps:$4 sm:$0xff]  }
  0xc2   :  { %2599 = vmatmul.mubr.bf16.vlgmr.msra.gmra.mrb[0].mxu0 %v9189_v56  ;;  %v7756_v56 = vcombine.high %v110_v53, %v110_v53 }
  0xc3   :  { %2648 = vmatpush1.bf16.msra.mxu0 %v9192_v57  ;;  %2608 = vmatprep.mubr.bf16.mxu0 %v9216_v58  ;;  %v9277_v57 = vld [vmem:[%s13070_s1 + $0x474] ss:$8 sps:$4 sm:$0xff]   ;;  %v9275_v58 = vld [vmem:[%s13070_s1 + $0x470] ss:$8 sps:$4 sm:$0xff]  }
  0xc4   :  { %2649 = vmatprep.subr.bf16.mxu0 %v9197_v59  ;;  %v9282_v59 = vld [vmem:[%s13070_s1 + $0x484] ss:$8 sps:$4 sm:$0xff]  }
  0xc7   :  { %2650 = vmatpush1.bf16.msra.mxu0 %v9195_v60  ;;  %v7755_v60 = vcombine.low %v110_v53, %v110_v53  ;;  %v9368_v53 = vld [vmem:[%s13070_s1 + $0x5e0] ss:$8 sps:$4 sm:$0xff]  }
  0xc8   :  { %2651 = vmatprep.subr.bf16.mxu0 %v9200_v61  ;;  %v9280_v61 = vld [vmem:[%s13070_s1 + $0x480] ss:$8 sps:$4 sm:$0xff]  }
  0xca   :  { %2609 = vmatmul.mubr.bf16.gmra.mrb[4].mxu0 %v9221_v62  ;;  %v9315_v62 = vld [vmem:[%s13071_s0 + $0x24] ss:$76 sps:$4 sm:$0xff]  }
  0xcb   :  { %2652 = vmatpush1.bf16.msra.mxu0 %v9198_v63  ;;  %2618 = vmatprep.mubr.bf16.mxu0 %v9225_v0  ;;  %v9286_v63 = vld [vmem:[%s13070_s1 + $0x494] ss:$8 sps:$4 sm:$0xff]   ;;  %v9284_v0 = vld [vmem:[%s13070_s1 + $0x490] ss:$8 sps:$4 sm:$0xff]  }
  0xcc   :  { %2653 = vmatprep.subr.bf16.mxu0 %v9203_v1  ;;  %v9291_v1 = vld [vmem:[%s13070_s1 + $0x4a4] ss:$8 sps:$4 sm:$0xff]  }
  0xcf   :  { %2654 = vmatpush1.bf16.msra.mxu0 %v9201_v2  ;;  %v9289_v2 = vld [vmem:[%s13070_s1 + $0x4a0] ss:$8 sps:$4 sm:$0xff]  }
  0xd0   :  { %2655 = vmatprep.subr.bf16.mxu0 %v9206_v3  ;;  %v9295_v3 = vld [vmem:[%s13070_s1 + $0x4b4] ss:$8 sps:$4 sm:$0xff]  }
  0xd2   :  { %2619 = vmatmul.mubr.bf16.gmra.mrb[8].mxu0 %v9230_v4  ;;  %v9293_v4 = vld [vmem:[%s13070_s1 + $0x4b0] ss:$8 sps:$4 sm:$0xff]  }
  0xd3   :  { %2656 = vmatpush1.bf16.msra.mxu0 %v9204_v5  ;;  %2628 = vmatprep.mubr.bf16.mxu0 %v9234_v6  ;;  %v9300_v5 = vld [vmem:[%s13070_s1 + $0x4c4] ss:$8 sps:$4 sm:$0xff]   ;;  %v9298_v6 = vld [vmem:[%s13070_s1 + $0x4c0] ss:$8 sps:$4 sm:$0xff]  }
  0xd4   :  { %2657 = vmatprep.subr.bf16.mxu0 %v9209_v7  ;;  %v9304_v7 = vld [vmem:[%s13070_s1 + $0x4d4] ss:$8 sps:$4 sm:$0xff]  }
  0xd7   :  { %2658 = vmatpush1.bf16.msra.mxu0 %v9207_v8  ;;  %v9302_v8 = vld [vmem:[%s13070_s1 + $0x4d0] ss:$8 sps:$4 sm:$0xff]  }
  0xd8   :  { %2659 = vmatprep.subr.bf16.mxu0 %v9212_v9  ;;  %v9308_v9 = vld [vmem:[%s13070_s1 + $0x4e4] ss:$8 sps:$4 sm:$0xff]  }
  0xda   :  { %2629 = vmatmul.mubr.bf16.gmra.mrb[12].mxu0 %v9239_v11  ;;  %v9312_v11 = vld [vmem:[%s13070_s1 + $0x4f4] ss:$8 sps:$4 sm:$0xff]  }
  0xdb   :  { %2660 = vmatpush1.bf16.msra.mxu0 %v9210_v12  ;;  %2638 = vmatprep.mubr.bf16.mxu0 %v7754_v13  ;;  %v9310_v12 = vld [vmem:[%s13070_s1 + $0x4f0] ss:$8 sps:$4 sm:$0xff]   ;;  %v9318_v13 = vld [vmem:[%s13070_s1 + $0x504] ss:$8 sps:$4 sm:$0xff]  }
  0xdc   :  { %2661 = vmatprep.subr.bf16.mxu0 %v9215_v14  ;;  %v9313_v14 = vld [vmem:[%s13071_s0 + $0x20] ss:$76 sps:$4 sm:$0xff]  }
  0xdf   :  { %2662 = vmatpush1.bf16.msra.mxu0 %v9213_v15  ;;  %v9316_v15 = vld [vmem:[%s13070_s1 + $0x500] ss:$8 sps:$4 sm:$0xff]  }
  0xe0   :  { %2663 = vmatprep.subr.bf16.mxu0 %v9220_v16  ;;  %v9340_v16 = vld [vmem:[%s13071_s0 + $0xbc] ss:$76 sps:$4 sm:$0xff]  }
  0xe2   :  { %2639 = vmatmul.mubr.bf16.gmra.mrb[16].mxu0 %v7753_v17  ;;  %v9321_v17 = vld [vmem:[%s13070_s1 + $0x514] ss:$8 sps:$4 sm:$0xff]  }
  0xe3   :  { %2664 = vmatpush1.bf16.msra.mxu0 %v9218_v18  ;;  %2679 = vmatprep.mubr.bf16.mxu0 %v9253_v19  ;;  %v9319_v18 = vld [vmem:[%s13070_s1 + $0x510] ss:$8 sps:$4 sm:$0xff]   ;;  %v9324_v19 = vld [vmem:[%s13070_s1 + $0x524] ss:$8 sps:$4 sm:$0xff]  }
  0xe4   :  { %2665 = vmatprep.subr.bf16.mxu0 %v9224_v20  ;;  %v9345_v20 = vld [vmem:[%s13071_s0 + $0xb8] ss:$76 sps:$4 sm:$0xff]  }
  0xe7   :  { %2666 = vmatpush1.bf16.msra.mxu0 %v9222_v21  ;;  %v9322_v21 = vld [vmem:[%s13070_s1 + $0x520] ss:$8 sps:$4 sm:$0xff]  }
  0xe8   :  { %2667 = vmatprep.subr.bf16.mxu0 %v9229_v22  ;;  %v9349_v22 = vld [vmem:[%s13071_s0 + $0x154] ss:$76 sps:$4 sm:$0xff]  }
  0xeb   :  { %2668 = vmatpush1.bf16.msra.mxu0 %v9227_v23  ;;  %v9327_v23 = vld [vmem:[%s13070_s1 + $0x534] ss:$8 sps:$4 sm:$0xff]  }
  0xec   :  { %2669 = vmatprep.subr.bf16.mxu0 %v9233_v24  ;;  %v9325_v24 = vld [vmem:[%s13070_s1 + $0x530] ss:$8 sps:$4 sm:$0xff]  }
  0xef   :  { %2670 = vmatpush1.bf16.msra.mxu0 %v9231_v25  ;;  %v9330_v25 = vld [vmem:[%s13070_s1 + $0x544] ss:$8 sps:$4 sm:$0xff]  }
  0xf0   :  { %2671 = vmatprep.subr.bf16.mxu0 %v9238_v26  ;;  %v9354_v26 = vld [vmem:[%s13071_s0 + $0x150] ss:$76 sps:$4 sm:$0xff]  }
  0xf3   :  { %2672 = vmatpush1.bf16.msra.mxu0 %v9236_v27  ;;  %v9328_v27 = vld [vmem:[%s13070_s1 + $0x540] ss:$8 sps:$4 sm:$0xff]  }
  0xf4   :  { %2673 = vmatprep.subr.bf16.mxu0 %v9242_v28  ;;  %v9358_v28 = vld [vmem:[%s13071_s0 + $0x1ec] ss:$76 sps:$4 sm:$0xff]  }
  0xf7   :  { %2674 = vmatpush1.bf16.msra.mxu0 %v9240_v29  ;;  %v9333_v29 = vld [vmem:[%s13070_s1 + $0x554] ss:$8 sps:$4 sm:$0xff]  }
  0xf8   :  { %2675 = vmatprep.subr.bf16.mxu0 %v9246_v30  ;;  %v9331_v30 = vld [vmem:[%s13070_s1 + $0x550] ss:$8 sps:$4 sm:$0xff]  }
  0xfb   :  { %2676 = vmatpush1.bf16.msra.mxu0 %v9244_v31  ;;  %v9336_v31 = vld [vmem:[%s13070_s1 + $0x564] ss:$8 sps:$4 sm:$0xff]  }
  0xfc   :  { %2677 = vmatprep.subr.bf16.mxu0 %v9250_v32  ;;  %v111_v32 = vld [vmem:[%s13071_s0 + $0x280] sm:$0xff] }
  0xff   :  { %2678 = vmatpush1.bf16.msra.mxu0 %v9248_v33  ;;  %v9363_v33 = vld [vmem:[%s13071_s0 + $0x1e8] ss:$76 sps:$4 sm:$0xff]  }
 0x100   :  { %2728 = vmatprep.subr.bf16.mxu0 %v9256_v34  ;;  %v9334_v34 = vld [vmem:[%s13070_s1 + $0x560] ss:$8 sps:$4 sm:$0xff]  }
 0x102   :  { %2680 = vmatmul.mubr.bf16.vlgmr.msra.gmra.mrb[0].mxu0 %v9251_v35  ;;  %v7758_v35 = vcombine.high %v111_v32, %v111_v32 }
 0x103   :  { %2729 = vmatpush1.bf16.msra.mxu0 %v9254_v36  ;;  %2689 = vmatprep.mubr.bf16.mxu0 %v9278_v37  ;;  %v9339_v36 = vld [vmem:[%s13070_s1 + $0x574] ss:$8 sps:$4 sm:$0xff]   ;;  %v9337_v37 = vld [vmem:[%s13070_s1 + $0x570] ss:$8 sps:$4 sm:$0xff]  }
 0x104   :  { %2730 = vmatprep.subr.bf16.mxu0 %v9259_v38  ;;  %v9344_v38 = vld [vmem:[%s13070_s1 + $0x584] ss:$8 sps:$4 sm:$0xff]  }
 0x107   :  { %2731 = vmatpush1.bf16.msra.mxu0 %v9257_v39  ;;  %v7757_v39 = vcombine.low %v111_v32, %v111_v32  ;;  %v9430_v32 = vld [vmem:[%s13070_s1 + $0x6e0] ss:$8 sps:$4 sm:$0xff]  }
 0x108   :  { %2732 = vmatprep.subr.bf16.mxu0 %v9262_v40  ;;  %v9342_v40 = vld [vmem:[%s13070_s1 + $0x580] ss:$8 sps:$4 sm:$0xff]  }
 0x10a   :  { %2690 = vmatmul.mubr.bf16.gmra.mrb[4].mxu0 %v9283_v41  ;;  %v9377_v41 = vld [vmem:[%s13071_s0 + $0x2c] ss:$76 sps:$4 sm:$0xff]  }
 0x10b   :  { %2733 = vmatpush1.bf16.msra.mxu0 %v9260_v42  ;;  %2699 = vmatprep.mubr.bf16.mxu0 %v9287_v43  ;;  %v9348_v42 = vld [vmem:[%s13070_s1 + $0x594] ss:$8 sps:$4 sm:$0xff]   ;;  %v9346_v43 = vld [vmem:[%s13070_s1 + $0x590] ss:$8 sps:$4 sm:$0xff]  }
 0x10c   :  { %2734 = vmatprep.subr.bf16.mxu0 %v9265_v44  ;;  %v9353_v44 = vld [vmem:[%s13070_s1 + $0x5a4] ss:$8 sps:$4 sm:$0xff]  }
 0x10f   :  { %2735 = vmatpush1.bf16.msra.mxu0 %v9263_v45  ;;  %v9351_v45 = vld [vmem:[%s13070_s1 + $0x5a0] ss:$8 sps:$4 sm:$0xff]  }
 0x110   :  { %2736 = vmatprep.subr.bf16.mxu0 %v9268_v46  ;;  %v9357_v46 = vld [vmem:[%s13070_s1 + $0x5b4] ss:$8 sps:$4 sm:$0xff]  }
 0x112   :  { %2700 = vmatmul.mubr.bf16.gmra.mrb[8].mxu0 %v9292_v47  ;;  %v9355_v47 = vld [vmem:[%s13070_s1 + $0x5b0] ss:$8 sps:$4 sm:$0xff]  }
 0x113   :  { %2737 = vmatpush1.bf16.msra.mxu0 %v9266_v48  ;;  %2709 = vmatprep.mubr.bf16.mxu0 %v9296_v49  ;;  %v9362_v48 = vld [vmem:[%s13070_s1 + $0x5c4] ss:$8 sps:$4 sm:$0xff]   ;;  %v9360_v49 = vld [vmem:[%s13070_s1 + $0x5c0] ss:$8 sps:$4 sm:$0xff]  }
 0x114   :  { %2738 = vmatprep.subr.bf16.mxu0 %v9271_v50  ;;  %v9366_v50 = vld [vmem:[%s13070_s1 + $0x5d4] ss:$8 sps:$4 sm:$0xff]  }
 0x117   :  { %2739 = vmatpush1.bf16.msra.mxu0 %v9269_v51  ;;  %v9364_v51 = vld [vmem:[%s13070_s1 + $0x5d0] ss:$8 sps:$4 sm:$0xff]  }
 0x118   :  { %2740 = vmatprep.subr.bf16.mxu0 %v9274_v52  ;;  %v9370_v52 = vld [vmem:[%s13070_s1 + $0x5e4] ss:$8 sps:$4 sm:$0xff]  }
 0x11a   :  { %2710 = vmatmul.mubr.bf16.gmra.mrb[12].mxu0 %v9301_v54  ;;  %v9374_v54 = vld [vmem:[%s13070_s1 + $0x5f4] ss:$8 sps:$4 sm:$0xff]  }
 0x11b   :  { %2741 = vmatpush1.bf16.msra.mxu0 %v9272_v55  ;;  %2719 = vmatprep.mubr.bf16.mxu0 %v7756_v56  ;;  %v9372_v55 = vld [vmem:[%s13070_s1 + $0x5f0] ss:$8 sps:$4 sm:$0xff]   ;;  %v9380_v56 = vld [vmem:[%s13070_s1 + $0x604] ss:$8 sps:$4 sm:$0xff]  }
 0x11c   :  { %2742 = vmatprep.subr.bf16.mxu0 %v9277_v57  ;;  %v9375_v57 = vld [vmem:[%s13071_s0 + $0x28] ss:$76 sps:$4 sm:$0xff]  }
 0x11f   :  { %2743 = vmatpush1.bf16.msra.mxu0 %v9275_v58  ;;  %v9378_v58 = vld [vmem:[%s13070_s1 + $0x600] ss:$8 sps:$4 sm:$0xff]  }
 0x120   :  { %2744 = vmatprep.subr.bf16.mxu0 %v9282_v59  ;;  %v9402_v59 = vld [vmem:[%s13071_s0 + $0xc4] ss:$76 sps:$4 sm:$0xff]  }
 0x122   :  { %2720 = vmatmul.mubr.bf16.gmra.mrb[16].mxu0 %v7755_v60  ;;  %v9383_v60 = vld [vmem:[%s13070_s1 + $0x614] ss:$8 sps:$4 sm:$0xff]  }
 0x123   :  { %2745 = vmatpush1.bf16.msra.mxu0 %v9280_v61  ;;  %2760 = vmatprep.mubr.bf16.mxu0 %v9315_v62  ;;  %v9381_v61 = vld [vmem:[%s13070_s1 + $0x610] ss:$8 sps:$4 sm:$0xff]   ;;  %v9386_v62 = vld [vmem:[%s13070_s1 + $0x624] ss:$8 sps:$4 sm:$0xff]  }
 0x124   :  { %2746 = vmatprep.subr.bf16.mxu0 %v9286_v63  ;;  %v9407_v63 = vld [vmem:[%s13071_s0 + $0xc0] ss:$76 sps:$4 sm:$0xff]  }
 0x127   :  { %2747 = vmatpush1.bf16.msra.mxu0 %v9284_v0  ;;  %v9384_v0 = vld [vmem:[%s13070_s1 + $0x620] ss:$8 sps:$4 sm:$0xff]  }
 0x128   :  { %2748 = vmatprep.subr.bf16.mxu0 %v9291_v1  ;;  %v9411_v1 = vld [vmem:[%s13071_s0 + $0x15c] ss:$76 sps:$4 sm:$0xff]  }
 0x12b   :  { %2749 = vmatpush1.bf16.msra.mxu0 %v9289_v2  ;;  %v9389_v2 = vld [vmem:[%s13070_s1 + $0x634] ss:$8 sps:$4 sm:$0xff]  }
 0x12c   :  { %2750 = vmatprep.subr.bf16.mxu0 %v9295_v3  ;;  %v9387_v3 = vld [vmem:[%s13070_s1 + $0x630] ss:$8 sps:$4 sm:$0xff]  }
 0x12f   :  { %2751 = vmatpush1.bf16.msra.mxu0 %v9293_v4  ;;  %v9392_v4 = vld [vmem:[%s13070_s1 + $0x644] ss:$8 sps:$4 sm:$0xff]  }
 0x130   :  { %2752 = vmatprep.subr.bf16.mxu0 %v9300_v5  ;;  %v9416_v5 = vld [vmem:[%s13071_s0 + $0x158] ss:$76 sps:$4 sm:$0xff]  }
 0x133   :  { %2753 = vmatpush1.bf16.msra.mxu0 %v9298_v6  ;;  %v9390_v6 = vld [vmem:[%s13070_s1 + $0x640] ss:$8 sps:$4 sm:$0xff]  }
 0x134   :  { %2754 = vmatprep.subr.bf16.mxu0 %v9304_v7  ;;  %v9420_v7 = vld [vmem:[%s13071_s0 + $0x1f4] ss:$76 sps:$4 sm:$0xff]  }
 0x137   :  { %2755 = vmatpush1.bf16.msra.mxu0 %v9302_v8  ;;  %v9395_v8 = vld [vmem:[%s13070_s1 + $0x654] ss:$8 sps:$4 sm:$0xff]  }
 0x138   :  { %2756 = vmatprep.subr.bf16.mxu0 %v9308_v9  ;;  %v9393_v9 = vld [vmem:[%s13070_s1 + $0x650] ss:$8 sps:$4 sm:$0xff]  }
 0x13b   :  { %2757 = vmatpush1.bf16.msra.mxu0 %v9306_v10  ;;  %v9398_v10 = vld [vmem:[%s13070_s1 + $0x664] ss:$8 sps:$4 sm:$0xff]  }
 0x13c   :  { %2758 = vmatprep.subr.bf16.mxu0 %v9312_v11  ;;  %v112_v11 = vld [vmem:[%s13071_s0 + $0x288] sm:$0xff] }
 0x13f   :  { %2759 = vmatpush1.bf16.msra.mxu0 %v9310_v12  ;;  %v9425_v12 = vld [vmem:[%s13071_s0 + $0x1f0] ss:$76 sps:$4 sm:$0xff]  }
 0x140   :  { %2809 = vmatprep.subr.bf16.mxu0 %v9318_v13  ;;  %v9396_v13 = vld [vmem:[%s13070_s1 + $0x660] ss:$8 sps:$4 sm:$0xff]  }
 0x142   :  { %2761 = vmatmul.mubr.bf16.vlgmr.msra.gmra.mrb[0].mxu0 %v9313_v14  ;;  %v7760_v14 = vcombine.high %v112_v11, %v112_v11 }
 0x143   :  { %2810 = vmatpush1.bf16.msra.mxu0 %v9316_v15  ;;  %2770 = vmatprep.mubr.bf16.mxu0 %v9340_v16  ;;  %v9401_v15 = vld [vmem:[%s13070_s1 + $0x674] ss:$8 sps:$4 sm:$0xff]   ;;  %v9399_v16 = vld [vmem:[%s13070_s1 + $0x670] ss:$8 sps:$4 sm:$0xff]  }
 0x144   :  { %2811 = vmatprep.subr.bf16.mxu0 %v9321_v17  ;;  %v9406_v17 = vld [vmem:[%s13070_s1 + $0x684] ss:$8 sps:$4 sm:$0xff]  }
 0x147   :  { %2812 = vmatpush1.bf16.msra.mxu0 %v9319_v18  ;;  %v7759_v18 = vcombine.low %v112_v11, %v112_v11  ;;  %v9492_v11 = vld [vmem:[%s13070_s1 + $0x7e0] ss:$8 sps:$4 sm:$0xff]  }
 0x148   :  { %2813 = vmatprep.subr.bf16.mxu0 %v9324_v19  ;;  %v9404_v19 = vld [vmem:[%s13070_s1 + $0x680] ss:$8 sps:$4 sm:$0xff]  }
 0x14a   :  { %2771 = vmatmul.mubr.bf16.gmra.mrb[4].mxu0 %v9345_v20  ;;  %v9439_v20 = vld [vmem:[%s13071_s0 + $0x34] ss:$76 sps:$4 sm:$0xff]  }
 0x14b   :  { %2814 = vmatpush1.bf16.msra.mxu0 %v9322_v21  ;;  %2780 = vmatprep.mubr.bf16.mxu0 %v9349_v22  ;;  %v9410_v21 = vld [vmem:[%s13070_s1 + $0x694] ss:$8 sps:$4 sm:$0xff]   ;;  %v9408_v22 = vld [vmem:[%s13070_s1 + $0x690] ss:$8 sps:$4 sm:$0xff]  }
 0x14c   :  { %2815 = vmatprep.subr.bf16.mxu0 %v9327_v23  ;;  %v9415_v23 = vld [vmem:[%s13070_s1 + $0x6a4] ss:$8 sps:$4 sm:$0xff]  }
 0x14f   :  { %2816 = vmatpush1.bf16.msra.mxu0 %v9325_v24  ;;  %v9413_v24 = vld [vmem:[%s13070_s1 + $0x6a0] ss:$8 sps:$4 sm:$0xff]  }
 0x150   :  { %2817 = vmatprep.subr.bf16.mxu0 %v9330_v25  ;;  %v9419_v25 = vld [vmem:[%s13070_s1 + $0x6b4] ss:$8 sps:$4 sm:$0xff]  }
 0x152   :  { %2781 = vmatmul.mubr.bf16.gmra.mrb[8].mxu0 %v9354_v26  ;;  %v9417_v26 = vld [vmem:[%s13070_s1 + $0x6b0] ss:$8 sps:$4 sm:$0xff]  }
 0x153   :  { %2818 = vmatpush1.bf16.msra.mxu0 %v9328_v27  ;;  %2790 = vmatprep.mubr.bf16.mxu0 %v9358_v28  ;;  %v9424_v27 = vld [vmem:[%s13070_s1 + $0x6c4] ss:$8 sps:$4 sm:$0xff]   ;;  %v9422_v28 = vld [vmem:[%s13070_s1 + $0x6c0] ss:$8 sps:$4 sm:$0xff]  }
 0x154   :  { %2819 = vmatprep.subr.bf16.mxu0 %v9333_v29  ;;  %v9428_v29 = vld [vmem:[%s13070_s1 + $0x6d4] ss:$8 sps:$4 sm:$0xff]  }
 0x157   :  { %2820 = vmatpush1.bf16.msra.mxu0 %v9331_v30  ;;  %v9426_v30 = vld [vmem:[%s13070_s1 + $0x6d0] ss:$8 sps:$4 sm:$0xff]  }
 0x158   :  { %2821 = vmatprep.subr.bf16.mxu0 %v9336_v31  ;;  %v9432_v31 = vld [vmem:[%s13070_s1 + $0x6e4] ss:$8 sps:$4 sm:$0xff]  }
 0x15a   :  { %2791 = vmatmul.mubr.bf16.gmra.mrb[12].mxu0 %v9363_v33  ;;  %v9436_v33 = vld [vmem:[%s13070_s1 + $0x6f4] ss:$8 sps:$4 sm:$0xff]  }
 0x15b   :  { %2822 = vmatpush1.bf16.msra.mxu0 %v9334_v34  ;;  %2800 = vmatprep.mubr.bf16.mxu0 %v7758_v35  ;;  %v9434_v34 = vld [vmem:[%s13070_s1 + $0x6f0] ss:$8 sps:$4 sm:$0xff]   ;;  %v9442_v35 = vld [vmem:[%s13070_s1 + $0x704] ss:$8 sps:$4 sm:$0xff]  }
 0x15c   :  { %2823 = vmatprep.subr.bf16.mxu0 %v9339_v36  ;;  %v9437_v36 = vld [vmem:[%s13071_s0 + $0x30] ss:$76 sps:$4 sm:$0xff]  }
 0x15f   :  { %2824 = vmatpush1.bf16.msra.mxu0 %v9337_v37  ;;  %v9440_v37 = vld [vmem:[%s13070_s1 + $0x700] ss:$8 sps:$4 sm:$0xff]  }
 0x160   :  { %2825 = vmatprep.subr.bf16.mxu0 %v9344_v38  ;;  %v9464_v38 = vld [vmem:[%s13071_s0 + $0xcc] ss:$76 sps:$4 sm:$0xff]  }
 0x162   :  { %2801 = vmatmul.mubr.bf16.gmra.mrb[16].mxu0 %v7757_v39  ;;  %v9445_v39 = vld [vmem:[%s13070_s1 + $0x714] ss:$8 sps:$4 sm:$0xff]  }
 0x163   :  { %2826 = vmatpush1.bf16.msra.mxu0 %v9342_v40  ;;  %2841 = vmatprep.mubr.bf16.mxu0 %v9377_v41  ;;  %v9443_v40 = vld [vmem:[%s13070_s1 + $0x710] ss:$8 sps:$4 sm:$0xff]   ;;  %v9448_v41 = vld [vmem:[%s13070_s1 + $0x724] ss:$8 sps:$4 sm:$0xff]  }
 0x164   :  { %2827 = vmatprep.subr.bf16.mxu0 %v9348_v42  ;;  %v9469_v42 = vld [vmem:[%s13071_s0 + $0xc8] ss:$76 sps:$4 sm:$0xff]  }
 0x167   :  { %2828 = vmatpush1.bf16.msra.mxu0 %v9346_v43  ;;  %v9446_v43 = vld [vmem:[%s13070_s1 + $0x720] ss:$8 sps:$4 sm:$0xff]  }
 0x168   :  { %2829 = vmatprep.subr.bf16.mxu0 %v9353_v44  ;;  %v9473_v44 = vld [vmem:[%s13071_s0 + $0x164] ss:$76 sps:$4 sm:$0xff]  }
 0x16b   :  { %2830 = vmatpush1.bf16.msra.mxu0 %v9351_v45  ;;  %v9451_v45 = vld [vmem:[%s13070_s1 + $0x734] ss:$8 sps:$4 sm:$0xff]  }
 0x16c   :  { %2831 = vmatprep.subr.bf16.mxu0 %v9357_v46  ;;  %v9449_v46 = vld [vmem:[%s13070_s1 + $0x730] ss:$8 sps:$4 sm:$0xff]  }
 0x16f   :  { %2832 = vmatpush1.bf16.msra.mxu0 %v9355_v47  ;;  %v9454_v47 = vld [vmem:[%s13070_s1 + $0x744] ss:$8 sps:$4 sm:$0xff]  }
 0x170   :  { %2833 = vmatprep.subr.bf16.mxu0 %v9362_v48  ;;  %v9478_v48 = vld [vmem:[%s13071_s0 + $0x160] ss:$76 sps:$4 sm:$0xff]  }
 0x173   :  { %2834 = vmatpush1.bf16.msra.mxu0 %v9360_v49  ;;  %v9452_v49 = vld [vmem:[%s13070_s1 + $0x740] ss:$8 sps:$4 sm:$0xff]  }
 0x174   :  { %2835 = vmatprep.subr.bf16.mxu0 %v9366_v50  ;;  %v9482_v50 = vld [vmem:[%s13071_s0 + $0x1fc] ss:$76 sps:$4 sm:$0xff]  }
 0x177   :  { %2836 = vmatpush1.bf16.msra.mxu0 %v9364_v51  ;;  %v9457_v51 = vld [vmem:[%s13070_s1 + $0x754] ss:$8 sps:$4 sm:$0xff]  }
 0x178   :  { %2837 = vmatprep.subr.bf16.mxu0 %v9370_v52  ;;  %v9455_v52 = vld [vmem:[%s13070_s1 + $0x750] ss:$8 sps:$4 sm:$0xff]  }
 0x17b   :  { %2838 = vmatpush1.bf16.msra.mxu0 %v9368_v53  ;;  %v9460_v53 = vld [vmem:[%s13070_s1 + $0x764] ss:$8 sps:$4 sm:$0xff]  }
 0x17c   :  { %2839 = vmatprep.subr.bf16.mxu0 %v9374_v54  ;;  %v113_v54 = vld [vmem:[%s13071_s0 + $0x290] sm:$0xff] }
 0x17f   :  { %2840 = vmatpush1.bf16.msra.mxu0 %v9372_v55  ;;  %v9487_v55 = vld [vmem:[%s13071_s0 + $0x1f8] ss:$76 sps:$4 sm:$0xff]  }
 0x180   :  { %2890 = vmatprep.subr.bf16.mxu0 %v9380_v56  ;;  %v9458_v56 = vld [vmem:[%s13070_s1 + $0x760] ss:$8 sps:$4 sm:$0xff]  }
 0x182   :  { %2842 = vmatmul.mubr.bf16.vlgmr.msra.gmra.mrb[0].mxu0 %v9375_v57  ;;  %v7762_v57 = vcombine.high %v113_v54, %v113_v54 }
 0x183   :  { %2891 = vmatpush1.bf16.msra.mxu0 %v9378_v58  ;;  %2851 = vmatprep.mubr.bf16.mxu0 %v9402_v59  ;;  %v9463_v58 = vld [vmem:[%s13070_s1 + $0x774] ss:$8 sps:$4 sm:$0xff]   ;;  %v9461_v59 = vld [vmem:[%s13070_s1 + $0x770] ss:$8 sps:$4 sm:$0xff]  }
 0x184   :  { %2892 = vmatprep.subr.bf16.mxu0 %v9383_v60  ;;  %v9468_v60 = vld [vmem:[%s13070_s1 + $0x784] ss:$8 sps:$4 sm:$0xff]  }
 0x187   :  { %2893 = vmatpush1.bf16.msra.mxu0 %v9381_v61  ;;  %v7761_v61 = vcombine.low %v113_v54, %v113_v54  ;;  %v9555_v54 = vld [vmem:[%s13070_s1 + $0x8e0] ss:$8 sps:$4 sm:$0xff]  }
 0x188   :  { %2894 = vmatprep.subr.bf16.mxu0 %v9386_v62  ;;  %v9466_v62 = vld [vmem:[%s13070_s1 + $0x780] ss:$8 sps:$4 sm:$0xff]  }
 0x18a   :  { %2852 = vmatmul.mubr.bf16.gmra.mrb[4].mxu0 %v9407_v63  ;;  %v9501_v63 = vld [vmem:[%s13071_s0 + $0x3c] ss:$76 sps:$4 sm:$0xff]  }
 0x18b   :  { %2895 = vmatpush1.bf16.msra.mxu0 %v9384_v0  ;;  %2861 = vmatprep.mubr.bf16.mxu0 %v9411_v1  ;;  %v9472_v0 = vld [vmem:[%s13070_s1 + $0x794] ss:$8 sps:$4 sm:$0xff]   ;;  %v9470_v1 = vld [vmem:[%s13070_s1 + $0x790] ss:$8 sps:$4 sm:$0xff]  }
 0x18c   :  { %2896 = vmatprep.subr.bf16.mxu0 %v9389_v2  ;;  %v9477_v2 = vld [vmem:[%s13070_s1 + $0x7a4] ss:$8 sps:$4 sm:$0xff]  }
 0x18f   :  { %2897 = vmatpush1.bf16.msra.mxu0 %v9387_v3  ;;  %v9475_v3 = vld [vmem:[%s13070_s1 + $0x7a0] ss:$8 sps:$4 sm:$0xff]  }
 0x190   :  { %2898 = vmatprep.subr.bf16.mxu0 %v9392_v4  ;;  %v9481_v4 = vld [vmem:[%s13070_s1 + $0x7b4] ss:$8 sps:$4 sm:$0xff]  }
 0x192   :  { %2862 = vmatmul.mubr.bf16.gmra.mrb[8].mxu0 %v9416_v5  ;;  %v9479_v5 = vld [vmem:[%s13070_s1 + $0x7b0] ss:$8 sps:$4 sm:$0xff]  }
 0x193   :  { %2899 = vmatpush1.bf16.msra.mxu0 %v9390_v6  ;;  %2871 = vmatprep.mubr.bf16.mxu0 %v9420_v7  ;;  %v9486_v6 = vld [vmem:[%s13070_s1 + $0x7c4] ss:$8 sps:$4 sm:$0xff]   ;;  %v9484_v7 = vld [vmem:[%s13070_s1 + $0x7c0] ss:$8 sps:$4 sm:$0xff]  }
 0x194   :  { %2900 = vmatprep.subr.bf16.mxu0 %v9395_v8  ;;  %v9490_v8 = vld [vmem:[%s13070_s1 + $0x7d4] ss:$8 sps:$4 sm:$0xff]  }
 0x197   :  { %2901 = vmatpush1.bf16.msra.mxu0 %v9393_v9  ;;  %v9488_v9 = vld [vmem:[%s13070_s1 + $0x7d0] ss:$8 sps:$4 sm:$0xff]  }
 0x198   :  { %2902 = vmatprep.subr.bf16.mxu0 %v9398_v10  ;;  %v9494_v10 = vld [vmem:[%s13070_s1 + $0x7e4] ss:$8 sps:$4 sm:$0xff]  }
 0x19a   :  { %2872 = vmatmul.mubr.bf16.gmra.mrb[12].mxu0 %v9425_v12  ;;  %v9498_v12 = vld [vmem:[%s13070_s1 + $0x7f4] ss:$8 sps:$4 sm:$0xff]  }
 0x19b   :  { %2903 = vmatpush1.bf16.msra.mxu0 %v9396_v13  ;;  %2881 = vmatprep.mubr.bf16.mxu0 %v7760_v14  ;;  %v9496_v13 = vld [vmem:[%s13070_s1 + $0x7f0] ss:$8 sps:$4 sm:$0xff]   ;;  %v9504_v14 = vld [vmem:[%s13070_s1 + $0x804] ss:$8 sps:$4 sm:$0xff]  }
 0x19c   :  { %2904 = vmatprep.subr.bf16.mxu0 %v9401_v15  ;;  %v9499_v15 = vld [vmem:[%s13071_s0 + $0x38] ss:$76 sps:$4 sm:$0xff]  }
 0x19f   :  { %2905 = vmatpush1.bf16.msra.mxu0 %v9399_v16  ;;  %v9502_v16 = vld [vmem:[%s13070_s1 + $0x800] ss:$8 sps:$4 sm:$0xff]  }
 0x1a0   :  { %2906 = vmatprep.subr.bf16.mxu0 %v9406_v17  ;;  %v9526_v17 = vld [vmem:[%s13071_s0 + $0xd4] ss:$76 sps:$4 sm:$0xff]  }
 0x1a2   :  { %2882 = vmatmul.mubr.bf16.gmra.mrb[16].mxu0 %v7759_v18  ;;  %v9507_v18 = vld [vmem:[%s13070_s1 + $0x814] ss:$8 sps:$4 sm:$0xff]  }
 0x1a3   :  { %2907 = vmatpush1.bf16.msra.mxu0 %v9404_v19  ;;  %2922 = vmatprep.mubr.bf16.mxu0 %v9439_v20  ;;  %v9505_v19 = vld [vmem:[%s13070_s1 + $0x810] ss:$8 sps:$4 sm:$0xff]   ;;  %v9510_v20 = vld [vmem:[%s13070_s1 + $0x824] ss:$8 sps:$4 sm:$0xff]  }
 0x1a4   :  { %2908 = vmatprep.subr.bf16.mxu0 %v9410_v21  ;;  %v9528_v21 = vld [vmem:[%s13071_s0 + $0xd0] ss:$76 sps:$4 sm:$0xff]  }
 0x1a7   :  { %2909 = vmatpush1.bf16.msra.mxu0 %v9408_v22  ;;  %v9508_v22 = vld [vmem:[%s13070_s1 + $0x820] ss:$8 sps:$4 sm:$0xff]  }
 0x1a8   :  { %2910 = vmatprep.subr.bf16.mxu0 %v9415_v23  ;;  %v9535_v23 = vld [vmem:[%s13071_s0 + $0x16c] ss:$76 sps:$4 sm:$0xff]  }
 0x1ab   :  { %2911 = vmatpush1.bf16.msra.mxu0 %v9413_v24  ;;  %v9513_v24 = vld [vmem:[%s13070_s1 + $0x834] ss:$8 sps:$4 sm:$0xff]  }
 0x1ac   :  { %2912 = vmatprep.subr.bf16.mxu0 %v9419_v25  ;;  %v9511_v25 = vld [vmem:[%s13070_s1 + $0x830] ss:$8 sps:$4 sm:$0xff]  }
 0x1af   :  { %2913 = vmatpush1.bf16.msra.mxu0 %v9417_v26  ;;  %v9516_v26 = vld [vmem:[%s13070_s1 + $0x844] ss:$8 sps:$4 sm:$0xff]  }
 0x1b0   :  { %2914 = vmatprep.subr.bf16.mxu0 %v9424_v27  ;;  %v9537_v27 = vld [vmem:[%s13071_s0 + $0x168] ss:$76 sps:$4 sm:$0xff]  }
 0x1b3   :  { %2915 = vmatpush1.bf16.msra.mxu0 %v9422_v28  ;;  %v9514_v28 = vld [vmem:[%s13070_s1 + $0x840] ss:$8 sps:$4 sm:$0xff]  }
 0x1b4   :  { %2916 = vmatprep.subr.bf16.mxu0 %v9428_v29  ;;  %v9544_v29 = vld [vmem:[%s13071_s0 + $0x204] ss:$76 sps:$4 sm:$0xff]  }
 0x1b7   :  { %2917 = vmatpush1.bf16.msra.mxu0 %v9426_v30  ;;  %v9519_v30 = vld [vmem:[%s13070_s1 + $0x854] ss:$8 sps:$4 sm:$0xff]  }
 0x1b8   :  { %2918 = vmatprep.subr.bf16.mxu0 %v9432_v31  ;;  %v9517_v31 = vld [vmem:[%s13070_s1 + $0x850] ss:$8 sps:$4 sm:$0xff]  }
 0x1bb   :  { %2919 = vmatpush1.bf16.msra.mxu0 %v9430_v32  ;;  %v9522_v32 = vld [vmem:[%s13070_s1 + $0x864] ss:$8 sps:$4 sm:$0xff]  }
 0x1bc   :  { %2920 = vmatprep.subr.bf16.mxu0 %v9436_v33  ;;  %v114_v33 = vld [vmem:[%s13071_s0 + $0x298] sm:$0xff] }
 0x1bf   :  { %2921 = vmatpush1.bf16.msra.mxu0 %v9434_v34  ;;  %v9546_v34 = vld [vmem:[%s13071_s0 + $0x200] ss:$76 sps:$4 sm:$0xff]  }
 0x1c0   :  { %2971 = vmatprep.subr.bf16.mxu0 %v9442_v35  ;;  %v9520_v35 = vld [vmem:[%s13070_s1 + $0x860] ss:$8 sps:$4 sm:$0xff]  }
 0x1c2   :  { %2923 = vmatmul.mubr.bf16.vlgmr.msra.gmra.mrb[0].mxu0 %v9437_v36  ;;  %v7764_v36 = vcombine.high %v114_v33, %v114_v33 }
 0x1c3   :  { %2972 = vmatpush1.bf16.msra.mxu0 %v9440_v37  ;;  %2932 = vmatprep.mubr.bf16.mxu0 %v9464_v38  ;;  %v9525_v37 = vld [vmem:[%s13070_s1 + $0x874] ss:$8 sps:$4 sm:$0xff]   ;;  %v9523_v38 = vld [vmem:[%s13070_s1 + $0x870] ss:$8 sps:$4 sm:$0xff]  }
 0x1c4   :  { %2973 = vmatprep.subr.bf16.mxu0 %v9445_v39  ;;  %v9531_v39 = vld [vmem:[%s13070_s1 + $0x884] ss:$8 sps:$4 sm:$0xff]  }
 0x1c7   :  { %2974 = vmatpush1.bf16.msra.mxu0 %v9443_v40  ;;  %v7763_v40 = vcombine.low %v114_v33, %v114_v33 }
 0x1c8   :  { %2975 = vmatprep.subr.bf16.mxu0 %v9448_v41  ;;  %v9529_v41 = vld [vmem:[%s13070_s1 + $0x880] ss:$8 sps:$4 sm:$0xff]  }
 0x1ca   :  { %2933 = vmatmul.mubr.bf16.gmra.mrb[4].mxu0 %v9469_v42  ;;  %v9563_v42 = vld [vmem:[%s13071_s0 + $0x44] ss:$76 sps:$4 sm:$0xff]  }
 0x1cb   :  { %2976 = vmatpush1.bf16.msra.mxu0 %v9446_v43  ;;  %2942 = vmatprep.mubr.bf16.mxu0 %v9473_v44  ;;  %v9534_v43 = vld [vmem:[%s13070_s1 + $0x894] ss:$8 sps:$4 sm:$0xff]   ;;  %v9532_v44 = vld [vmem:[%s13070_s1 + $0x890] ss:$8 sps:$4 sm:$0xff]  }
 0x1cc   :  { %2977 = vmatprep.subr.bf16.mxu0 %v9451_v45  ;;  %v9540_v45 = vld [vmem:[%s13070_s1 + $0x8a4] ss:$8 sps:$4 sm:$0xff]  }
 0x1cf   :  { %2978 = vmatpush1.bf16.msra.mxu0 %v9449_v46  ;;  %v9538_v46 = vld [vmem:[%s13070_s1 + $0x8a0] ss:$8 sps:$4 sm:$0xff]  }
 0x1d0   :  { %2979 = vmatprep.subr.bf16.mxu0 %v9454_v47  ;;  %v9543_v47 = vld [vmem:[%s13070_s1 + $0x8b4] ss:$8 sps:$4 sm:$0xff]  }
 0x1d2   :  { %2943 = vmatmul.mubr.bf16.gmra.mrb[8].mxu0 %v9478_v48  ;;  %v9541_v48 = vld [vmem:[%s13070_s1 + $0x8b0] ss:$8 sps:$4 sm:$0xff]  }
 0x1d3   :  { %2980 = vmatpush1.bf16.msra.mxu0 %v9452_v49  ;;  %2952 = vmatprep.mubr.bf16.mxu0 %v9482_v50  ;;  %v9549_v49 = vld [vmem:[%s13070_s1 + $0x8c4] ss:$8 sps:$4 sm:$0xff]   ;;  %v9547_v50 = vld [vmem:[%s13070_s1 + $0x8c0] ss:$8 sps:$4 sm:$0xff]  }
 0x1d4   :  { %2981 = vmatprep.subr.bf16.mxu0 %v9457_v51  ;;  %v9552_v51 = vld [vmem:[%s13070_s1 + $0x8d4] ss:$8 sps:$4 sm:$0xff]  }
 0x1d7   :  { %2982 = vmatpush1.bf16.msra.mxu0 %v9455_v52  ;;  %v9550_v52 = vld [vmem:[%s13070_s1 + $0x8d0] ss:$8 sps:$4 sm:$0xff]  }
 0x1d8   :  { %2983 = vmatprep.subr.bf16.mxu0 %v9460_v53  ;;  %v9557_v53 = vld [vmem:[%s13070_s1 + $0x8e4] ss:$8 sps:$4 sm:$0xff]  }
 0x1da   :  { %2953 = vmatmul.mubr.bf16.gmra.mrb[12].mxu0 %v9487_v55  ;;  %v9560_v55 = vld [vmem:[%s13070_s1 + $0x8f4] ss:$8 sps:$4 sm:$0xff]  }
 0x1db   :  { %2984 = vmatpush1.bf16.msra.mxu0 %v9458_v56  ;;  %2962 = vmatprep.mubr.bf16.mxu0 %v7762_v57  ;;  %v9558_v56 = vld [vmem:[%s13070_s1 + $0x8f0] ss:$8 sps:$4 sm:$0xff]   ;;  %v9566_v57 = vld [vmem:[%s13070_s1 + $0x904] ss:$8 sps:$4 sm:$0xff]  }
 0x1dc   :  { %2985 = vmatprep.subr.bf16.mxu0 %v9463_v58  ;;  %v9561_v58 = vld [vmem:[%s13071_s0 + $0x40] ss:$76 sps:$4 sm:$0xff]  }
 0x1df   :  { %2986 = vmatpush1.bf16.msra.mxu0 %v9461_v59  ;;  %v9564_v59 = vld [vmem:[%s13070_s1 + $0x900] ss:$8 sps:$4 sm:$0xff]  }
 0x1e0   :  { %2987 = vmatprep.subr.bf16.mxu0 %v9468_v60  ;;  %v9570_v60 = vld [vmem:[%s13071_s0 + $0xdc] ss:$76 sps:$4 sm:$0xff]  }
 0x1e2   :  { %2963 = vmatmul.mubr.bf16.gmra.mrb[16].mxu0 %v7761_v61  ;;  %v9569_v61 = vld [vmem:[%s13070_s1 + $0x914] ss:$8 sps:$4 sm:$0xff]  }
 0x1e3   :  { %2988 = vmatpush1.bf16.msra.mxu0 %v9466_v62  ;;  %3003 = vmatprep.mubr.bf16.mxu0 %v9501_v63  ;;  %v9567_v62 = vld [vmem:[%s13070_s1 + $0x910] ss:$8 sps:$4 sm:$0xff]   ;;  %v9575_v63 = vld [vmem:[%s13070_s1 + $0x924] ss:$8 sps:$4 sm:$0xff]  }
 0x1e4   :  { %2989 = vmatprep.subr.bf16.mxu0 %v9472_v0  ;;  %v9572_v0 = vld [vmem:[%s13071_s0 + $0xd8] ss:$76 sps:$4 sm:$0xff]  }
 0x1e7   :  { %2990 = vmatpush1.bf16.msra.mxu0 %v9470_v1  ;;  %v9573_v1 = vld [vmem:[%s13070_s1 + $0x920] ss:$8 sps:$4 sm:$0xff]  }
 0x1e8   :  { %2991 = vmatprep.subr.bf16.mxu0 %v9477_v2  ;;  %v9576_v2 = vld [vmem:[%s13071_s0 + $0x174] ss:$76 sps:$4 sm:$0xff]  }
 0x1eb   :  { %2992 = vmatpush1.bf16.msra.mxu0 %v9475_v3  ;;  %v9580_v3 = vld [vmem:[%s13070_s1 + $0x934] ss:$8 sps:$4 sm:$0xff]  }
 0x1ec   :  { %2993 = vmatprep.subr.bf16.mxu0 %v9481_v4  ;;  %v9578_v4 = vld [vmem:[%s13070_s1 + $0x930] ss:$8 sps:$4 sm:$0xff]  }
 0x1ef   :  { %2994 = vmatpush1.bf16.msra.mxu0 %v9479_v5  ;;  %v9584_v5 = vld [vmem:[%s13070_s1 + $0x944] ss:$8 sps:$4 sm:$0xff]  }
 0x1f0   :  { %2995 = vmatprep.subr.bf16.mxu0 %v9486_v6  ;;  %v9581_v6 = vld [vmem:[%s13071_s0 + $0x170] ss:$76 sps:$4 sm:$0xff]  }
 0x1f3   :  { %2996 = vmatpush1.bf16.msra.mxu0 %v9484_v7  ;;  %v9582_v7 = vld [vmem:[%s13070_s1 + $0x940] ss:$8 sps:$4 sm:$0xff]  }
 0x1f4   :  { %2997 = vmatprep.subr.bf16.mxu0 %v9490_v8  ;;  %v9585_v8 = vld [vmem:[%s13071_s0 + $0x20c] ss:$76 sps:$4 sm:$0xff]  }
 0x1f7   :  { %2998 = vmatpush1.bf16.msra.mxu0 %v9488_v9  ;;  %v9590_v9 = vld [vmem:[%s13070_s1 + $0x954] ss:$8 sps:$4 sm:$0xff]  }
 0x1f8   :  { %2999 = vmatprep.subr.bf16.mxu0 %v9494_v10  ;;  %v9588_v10 = vld [vmem:[%s13070_s1 + $0x950] ss:$8 sps:$4 sm:$0xff]  }
 0x1fb   :  { %3000 = vmatpush1.bf16.msra.mxu0 %v9492_v11  ;;  %v9593_v11 = vld [vmem:[%s13070_s1 + $0x964] ss:$8 sps:$4 sm:$0xff]  }
 0x1fc   :  { %3001 = vmatprep.subr.bf16.mxu0 %v9498_v12  ;;  %v115_v12 = vld [vmem:[%s13071_s0 + $0x2a0] sm:$0xff] }
 0x1ff   :  { %3002 = vmatpush1.bf16.msra.mxu0 %v9496_v13  ;;  %v9587_v13 = vld [vmem:[%s13071_s0 + $0x208] ss:$76 sps:$4 sm:$0xff]  }
 0x200   :  { %3052 = vmatprep.subr.bf16.mxu0 %v9504_v14  ;;  %v9591_v14 = vld [vmem:[%s13070_s1 + $0x960] ss:$8 sps:$4 sm:$0xff]  }
 0x202   :  { %3004 = vmatmul.mubr.bf16.vlgmr.msra.gmra.mrb[0].mxu0 %v9499_v15  ;;  %v7766_v15 = vcombine.high %v115_v12, %v115_v12 }
 0x203   :  { %3053 = vmatpush1.bf16.msra.mxu0 %v9502_v16  ;;  %3013 = vmatprep.mubr.bf16.mxu0 %v9526_v17  ;;  %v9598_v16 = vld [vmem:[%s13070_s1 + $0x974] ss:$8 sps:$4 sm:$0xff]   ;;  %v9596_v17 = vld [vmem:[%s13070_s1 + $0x970] ss:$8 sps:$4 sm:$0xff]  }
 0x204   :  { %3054 = vmatprep.subr.bf16.mxu0 %v9507_v18  ;;  %v7765_v18 = vcombine.low %v115_v12, %v115_v12 }
 0x207   :  { %3055 = vmatpush1.bf16.msra.mxu0 %v9505_v19  ;;  %v10214_v19 = vmov 0  }
 0x208   :  { %3056 = vmatprep.subr.bf16.mxu0 %v9510_v20  ;;  %v9599_v20 = vld [vmem:[%s13071_s0 + $0x48] ss:$76 sps:$4 sm:$0xff]  }
 0x20a   :  { %3014 = vmatmul.mubr.bf16.gmra.mrb[4].mxu0 %v9528_v21  ;;  %v9600_v21 = vld [vmem:[%s13071_s0 + $0xe0] ss:$76 sps:$4 sm:$0xff]  }
 0x20b   :  { %3057 = vmatpush1.bf16.msra.mxu0 %v9508_v22  ;;  %3023 = vmatprep.mubr.bf16.mxu0 %v9535_v23  ;;  %v9601_v22 = vld [vmem:[%s13071_s0 + $0x178] ss:$76 sps:$4 sm:$0xff]   ;;  %v9602_v23 = vld [vmem:[%s13071_s0 + $0x210] ss:$76 sps:$4 sm:$0xff]  }
 0x20c   :  { %3058 = vmatprep.subr.bf16.mxu0 %v9513_v24  ;;  %v9603_v24 = vld [vmem:[%s13071_s0 + $0x2a8] ss:$0 sps:$4 sm:$0xff]  }
 0x20f   :  { %3059 = vmatpush1.bf16.msra.mxu0 %v9511_v25  ;;  %v423_v25 = vlaneseq }
 0x210   :  { %3060 = vmatprep.subr.bf16.mxu0 %v9516_v26 }
 0x211   :  { %v11432_v26 = vshrl.u32 %v423_v25, 7  ;;  %vm11468_vm2 = vcmp.lt.s32.totalorder %v423_v25, 256 }
 0x212   :  { %3024 = vmatmul.mubr.bf16.gmra.mrb[8].mxu0 %v9537_v27 }
 0x213   :  { %3061 = vmatpush1.bf16.msra.mxu0 %v9514_v28  ;;  %3033 = vmatprep.mubr.bf16.mxu0 %v9544_v29  ;;  %v425_v27 = vsub.s32 0, %v11432_v26  ;;  %v421_v28 = vld [vmem:[%s13072_s2] sm:$0x3]  ;;  %v429_v29 = vsub.s32 1, %v11432_v26  ;;  %s10218_s2 = smov 126  }
 0x214   :  { %3062 = vmatprep.subr.bf16.mxu0 %v9519_v30 }
 0x215   :  { %v11441_v30 = vrot.slane %v421_v28, %v425_v27 }
 0x217   :  { %3063 = vmatpush1.bf16.msra.mxu0 %v9517_v31  ;;  %v11445_v31 = vrot.slane %v421_v28, %v429_v29 }
 0x218   :  { %3064 = vmatprep.subr.bf16.mxu0 %v9522_v32 }
 0x21a   :  { %3034 = vmatmul.mubr.bf16.gmra.mrb[12].mxu0 %v9546_v34 }
 0x21b   :  { %3065 = vmatpush1.bf16.msra.mxu0 %v9520_v35  ;;  %3043 = vmatprep.mubr.bf16.mxu0 %v7764_v36 }
 0x21c   :  { %3066 = vmatprep.subr.bf16.mxu0 %v9525_v37 }
 0x21f   :  { %3067 = vmatpush1.bf16.msra.mxu0 %v9523_v38 }
 0x220   :  { %3068 = vmatprep.subr.bf16.mxu0 %v9531_v39 }
 0x222   :  { %3044 = vmatmul.mubr.bf16.gmra.mrb[16].mxu0 %v7763_v40 }
 0x223   :  { %3069 = vmatpush1.bf16.msra.mxu0 %v9529_v41  ;;  %3084 = vmatprep.mubr.bf16.mxu0 %v9563_v42 }
 0x224   :  { %3070 = vmatprep.subr.bf16.mxu0 %v9534_v43 }
 0x227   :  { %3071 = vmatpush1.bf16.msra.mxu0 %v9532_v44 }
 0x228   :  { %3072 = vmatprep.subr.bf16.mxu0 %v9540_v45 }
 0x22b   :  { %3073 = vmatpush1.bf16.msra.mxu0 %v9538_v46 }
 0x22c   :  { %3074 = vmatprep.subr.bf16.mxu0 %v9543_v47 }
 0x22f   :  { %3075 = vmatpush1.bf16.msra.mxu0 %v9541_v48 }
 0x230   :  { %3076 = vmatprep.subr.bf16.mxu0 %v9549_v49 }
 0x233   :  { %3077 = vmatpush1.bf16.msra.mxu0 %v9547_v50 }
 0x234   :  { %3078 = vmatprep.subr.bf16.mxu0 %v9552_v51 }
 0x237   :  { %3079 = vmatpush1.bf16.msra.mxu0 %v9550_v52 }
 0x238   :  { %3080 = vmatprep.subr.bf16.mxu0 %v9557_v53 }
 0x23b   :  { %3081 = vmatpush1.bf16.msra.mxu0 %v9555_v54 }
 0x23c   :  { %3082 = vmatprep.subr.bf16.mxu0 %v9560_v55 }
 0x23f   :  { %3083 = vmatpush1.bf16.msra.mxu0 %v9558_v56 }
 0x240   :  { %3133 = vmatprep.subr.bf16.mxu0 %v9566_v57 }
 0x242   :  { %3085 = vmatmul.mubr.bf16.vlgmr.msra.gmra.mrb[0].mxu0 %v9561_v58 }
 0x243   :  { %3134 = vmatpush1.bf16.msra.mxu0 %v9564_v59  ;;  %3094 = vmatprep.mubr.bf16.mxu0 %v9570_v60 }
 0x244   :  { %3135 = vmatprep.subr.bf16.mxu0 %v9569_v61 }
 0x247   :  { %3136 = vmatpush1.bf16.msra.mxu0 %v9567_v62 }
 0x248   :  { %3137 = vmatprep.subr.bf16.mxu0 %v9575_v63 }
 0x24a   :  { %3095 = vmatmul.mubr.bf16.gmra.mrb[4].mxu0 %v9572_v0 }
 0x24b   :  { %3138 = vmatpush1.bf16.msra.mxu0 %v9573_v1  ;;  %3104 = vmatprep.mubr.bf16.mxu0 %v9576_v2 }
 0x24c   :  { %3139 = vmatprep.subr.bf16.mxu0 %v9580_v3 }
 0x24f   :  { %3140 = vmatpush1.bf16.msra.mxu0 %v9578_v4 }
 0x250   :  { %3141 = vmatprep.subr.bf16.mxu0 %v9584_v5 }
 0x252   :  { %3105 = vmatmul.mubr.bf16.gmra.mrb[8].mxu0 %v9581_v6 }
 0x253   :  { %3142 = vmatpush1.bf16.msra.mxu0 %v9582_v7  ;;  %3114 = vmatprep.mubr.bf16.mxu0 %v9585_v8 }
 0x254   :  { %3143 = vmatprep.subr.bf16.mxu0 %v9590_v9 }
 0x257   :  { %3144 = vmatpush1.bf16.msra.mxu0 %v9588_v10 }
 0x258   :  { %3145 = vmatprep.subr.bf16.mxu0 %v9593_v11 }
 0x25a   :  { %3115 = vmatmul.mubr.bf16.gmra.mrb[12].mxu0 %v9587_v13 }
 0x25b   :  { %3124 = vmatprep.mubr.bf16.mxu0 %v7766_v15  ;;  %3146 = vmatpush1.bf16.msra.mxu0 %v9591_v14 }
 0x25c   :  { %3147 = vmatprep.subr.bf16.mxu0 %v9598_v16 }
 0x25f   :  { %3148 = vmatpush1.bf16.msra.mxu0 %v9596_v17 }
 0x262   :  { %3125 = vmatmul.mubr.bf16.gmra.mrb[16].mxu0 %v7765_v18 }
 0x263   :  { %3165 = vmatprep.mubr.bf16.mxu0 %v10214_v19 }
 0x26a   :  { %3166 = vmatmul.mubr.bf16.vlgmr.msra.gmra.mrb[0].mxu0 %v9599_v20 }
 0x26b   :  { %3175 = vmatprep.mubr.bf16.mxu0 %v10214_v19 }
 0x272   :  { %3176 = vmatmul.mubr.bf16.gmra.mrb[4].mxu0 %v9600_v21 }
 0x273   :  { %3185 = vmatprep.mubr.bf16.mxu0 %v10214_v19 }
 0x27a   :  { %3186 = vmatmul.mubr.bf16.gmra.mrb[8].mxu0 %v9601_v22 }
 0x27b   :  { %3195 = vmatprep.mubr.bf16.mxu0 %v10214_v19 }
 0x282   :  { %3196 = vmatmul.mubr.bf16.gmra.mrb[12].mxu0 %v9602_v23 }
 0x283   :  { %3205 = vmatprep.mubr.bf16.mxu0 %v10214_v19 }
 0x28a   :  { %3206 = vmatmul.mubr.bf16.gmra.mrb[16].mxu0 %v9603_v24 }
 0x33d   :  { %v3167_v32 = vpop.f32.mrb[0].mxu0 }
 0x33e   :  { %v8778_v33 = vadd.f32 %v3167_v32, %v11441_v30  ;;  %v3169_v34 = vpop.f32.mrb[1].mxu0 }
 0x33f   :  { %v8779_v35 = vadd.f32 %v3169_v34, %v11445_v31  ;;  %v3171_v36 = vpop.f32.mrb[2].mxu0 }
 0x340   :  { %v3214_v37 = vmax.f32 %v8778_v33, 0.0  ;;  %v8780_v38 = vadd.f32 %v3171_v36, %v11441_v30  ;;  %v3173_v39 = vpop.f32.mrb[3].mxu0 }
 0x341   :  { %v3215_v40 = vmax.f32 %v8779_v35, 0.0  ;;  %v8781_v41 = vadd.f32 %v3173_v39, %v11445_v31 }
 0x342   :  { %3232 = vst [vmem:[#allocation2] sm:$0xff] %v3214_v37  ;;  %v3216_v42 = vmax.f32 %v8780_v38, 0.0 }
 0x343   :  { %3233 = vst [vmem:[#allocation2 + $0x8] sm:$0xff] %v3215_v40  ;;  %v3217_v43 = vmax.f32 %v8781_v41, 0.0 }
 0x344   :  { %3234 = vst [vmem:[#allocation2 + $0x10] sm:$0xff] %v3216_v42 }
 0x345   :  { %3235 = vst [vmem:[#allocation2 + $0x18] sm:$0xff] %v3217_v43  ;;  %v3177_v44 = vpop.f32.mrb[4].mxu0 }
 0x346   :  { %v8782_v45 = vadd.f32 %v3177_v44, %v11441_v30  ;;  %v3179_v46 = vpop.f32.mrb[5].mxu0 }
 0x347   :  { %v8783_v47 = vadd.f32 %v3179_v46, %v11445_v31  ;;  %v3181_v48 = vpop.f32.mrb[6].mxu0 }
 0x348   :  { %v3218_v49 = vmax.f32 %v8782_v45, 0.0  ;;  %v8784_v50 = vadd.f32 %v3181_v48, %v11441_v30  ;;  %v3183_v51 = vpop.f32.mrb[7].mxu0 }
 0x349   :  { %v3219_v52 = vmax.f32 %v8783_v47, 0.0  ;;  %v8785_v53 = vadd.f32 %v3183_v51, %v11445_v31  ;;  %v3252_v54 = vld [vmem:[#allocation2] sm:$0xc0]  ;;  %v3250_v8 = vld [vmem:[#allocation2] sm:$0x3f] }
 0x34a   :  { %3236 = vst [vmem:[#allocation2 + $0x20] sm:$0xff] %v3218_v49  ;;  %v3220_v55 = vmax.f32 %v8784_v50, 0.0  ;;  %v3253_v56 = vld [vmem:[#allocation2 + $0x8] sm:$0xc0]  ;;  %v3261_v61 = vrot.slane %v3252_v54, 6 }
 0x34b   :  { %v3254_v57 = vld [vmem:[#allocation2 + $0x10] sm:$0xf]  ;;  %3237 = vst [vmem:[#allocation2 + $0x28] sm:$0xff] %v3219_v52  ;;  %v3221_v58 = vmax.f32 %v8785_v53, 0.0  ;;  %v3264_v0 = vrot.slane %v3253_v56, 6 }
 0x34c   :  { %v3262_v59 = vrot.slane %v3254_v57, 6  ;;  %v3255_v60 = vld [vmem:[#allocation2 + $0x18] sm:$0xf]  ;;  %3238 = vst [vmem:[#allocation2 + $0x30] sm:$0xff] %v3220_v55  ;;  %v3271_v1 = vld [vmem:[#allocation2 + $0x10] sm:$0xf0] }
 0x34d   :  { %v3265_v62 = vrot.slane %v3255_v60, 6  ;;  %3239 = vst [vmem:[#allocation2 + $0x38] sm:$0xff] %v3221_v58  ;;  %v3187_v63 = vpop.f32.mrb[8].mxu0  ;;  %v3272_v2 = vld [vmem:[#allocation2 + $0x18] sm:$0xf0]  ;;  %v3280_v13 = vrot.slane %v3271_v1, 4 }
 0x34e   :  { %v8786_v3 = vadd.f32 %v3187_v63, %v11441_v30  ;;  %v3189_v4 = vpop.f32.mrb[9].mxu0  ;;  %v3263_v5 = vsel %vm3260_vm0, %v3261_v61, %v3262_v59  ;;  %v3251_v9 = vld [vmem:[#allocation2 + $0x8] sm:$0x3f]  ;;  %v3315_v14 = vld [vmem:[#allocation2 + $0x10] sm:$0xf0]  ;;  %v3283_v15 = vrot.slane %v3272_v2, 4 }
 0x34f   :  { %v8787_v6 = vadd.f32 %v3189_v4, %v11445_v31  ;;  %v3191_v7 = vpop.f32.mrb[10].mxu0  ;;  %v3266_v10 = vsel %vm3260_vm0, %v3264_v0, %v3265_v62  ;;  %v3269_v18 = vmax.f32 %v3250_v8, %v3263_v5  ;;  %v3316_v36 = vld [vmem:[#allocation2 + $0x18] sm:$0xf0] }
 0x350   :  { %v3222_v11 = vmax.f32 %v8786_v3, 0.0  ;;  %v3193_v12 = vpop.f32.mrb[11].mxu0  ;;  %v8788_v23 = vadd.f32 %v3191_v7, %v11441_v30  ;;  %v3270_v24 = vmax.f32 %v3251_v9, %v3266_v10  ;;  %v9697_v9 = vld [vmem:[%s13073_s3 + $0x680] ss:$12 sps:$4 sm:$0xff]  }
 0x351   :  { %v3273_v16 = vld [vmem:[#allocation2 + $0x20] sm:$0x3]  ;;  %v3319_v17 = vld [vmem:[#allocation2 + $0x20] sm:$0xfc]  ;;  %v3223_v34 = vmax.f32 %v8787_v6, 0.0  ;;  %v8789_v35 = vadd.f32 %v3193_v12, %v11445_v31 }
 0x352   :  { %v3281_v19 = vrot.slane %v3273_v16, 4  ;;  %v3317_v20 = vld [vmem:[#allocation2 + $0x20] sm:$0x3]  ;;  %v3323_v21 = vrot.slane %v3319_v17, 6  ;;  %v3274_v22 = vld [vmem:[#allocation2 + $0x28] sm:$0x3] }
 0x353   :  { %3240 = vst [vmem:[#allocation2 + $0x40] sm:$0xff] %v3222_v11  ;;  %v3284_v28 = vrot.slane %v3274_v22, 4  ;;  %v3320_v32 = vld [vmem:[#allocation2 + $0x28] sm:$0xfc]  ;;  %v3331_v33 = vld [vmem:[#allocation2 + $0x30] sm:$0x3f] }
 0x354   :  { %v3282_v37 = vsel %vm3279_vm1, %v3280_v13, %v3281_v19  ;;  %v3327_v38 = vmax.f32 %v3315_v14, %v3323_v21  ;;  %v3329_v39 = vmax.f32 %v3317_v20, %v3323_v21  ;;  %v3324_v40 = vrot.slane %v3320_v32, 6  ;;  %v3332_v41 = vld [vmem:[#allocation2 + $0x38] sm:$0x3f]  ;;  %v3318_v44 = vld [vmem:[#allocation2 + $0x28] sm:$0x3]  ;;  %3241 = vst [vmem:[#allocation2 + $0x48] sm:$0xff] %v3223_v34 }
 0x355   :  { %v3288_v42 = vmax.f32 %v3269_v18, %v3282_v37  ;;  %v3285_v43 = vsel %vm3279_vm1, %v3283_v15, %v3284_v28  ;;  %v3335_v45 = vrot.slane %v3331_v33, 4  ;;  %v3336_v46 = vrot.slane %v3332_v41, 4  ;;  %v3197_v47 = vpop.f32.mrb[12].mxu0 }
 0x356   :  { %v3289_v48 = vmax.f32 %v3270_v24, %v3285_v43  ;;  %v3328_v49 = vmax.f32 %v3316_v36, %v3324_v40  ;;  %v3330_v50 = vmax.f32 %v3318_v44, %v3324_v40  ;;  %v3224_v51 = vmax.f32 %v8788_v23, 0.0  ;;  %v3199_v52 = vpop.f32.mrb[13].mxu0 }
 0x357   :  { %3290 = vst [vmem:[#allocation3] sm:$0x3f] %v3288_v42  ;;  %v3225_v53 = vmax.f32 %v8789_v35, 0.0  ;;  %v8790_v54 = vadd.f32 %v3197_v47, %v11441_v30  ;;  %v3201_v55 = vpop.f32.mrb[14].mxu0  ;;  %v3339_v56 = vmax.f32 %v3327_v38, %v3335_v45  ;;  %v3341_v57 = vmax.f32 %v3329_v39, %v3335_v45 }
 0x358   :  { %3291 = vst [vmem:[#allocation3 + $0x8] sm:$0x3f] %v3289_v48  ;;  %3242 = vst [vmem:[#allocation2 + $0x50] sm:$0xff] %v3224_v51  ;;  %v8791_v58 = vadd.f32 %v3199_v52, %v11445_v31  ;;  %v8792_v59 = vadd.f32 %v3201_v55, %v11441_v30  ;;  %v3203_v60 = vpop.f32.mrb[15].mxu0  ;;  %v3340_v61 = vmax.f32 %v3328_v49, %v3336_v46 }
 0x359   :  { %v3342_v62 = vmax.f32 %v3330_v50, %v3336_v46  ;;  %3243 = vst [vmem:[#allocation2 + $0x58] sm:$0xff] %v3225_v53  ;;  %v3226_v63 = vmax.f32 %v8790_v54, 0.0  ;;  %v8793_v0 = vadd.f32 %v3203_v60, %v11445_v31  ;;  %v3347_v4 = vrot.slane %v3339_v56, 4 }
 0x35a   :  { %v3227_v1 = vmax.f32 %v8791_v58, 0.0  ;;  %v3228_v2 = vmax.f32 %v8792_v59, 0.0  ;;  %v3348_v5 = vrot.slane %v3341_v57, 4  ;;  %v3350_v6 = vrot.slane %v3340_v61, 4  ;;  %v3373_v22 = vld [vmem:[#allocation2 + $0x40] sm:$0xf0] }
 0x35b   :  { %3244 = vst [vmem:[#allocation2 + $0x60] sm:$0xff] %v3226_v63  ;;  %v3229_v3 = vmax.f32 %v8793_v0, 0.0  ;;  %v3351_v7 = vrot.slane %v3342_v62, 4  ;;  %v3374_v35 = vld [vmem:[#allocation2 + $0x48] sm:$0xf0] }
 0x35c   :  { %3245 = vst [vmem:[#allocation2 + $0x68] sm:$0xff] %v3227_v1  ;;  %3246 = vst [vmem:[#allocation2 + $0x70] sm:$0xff] %v3228_v2  ;;  %v3349_v19 = vsel %vm3279_vm1, %v3347_v4, %v3348_v5 }
 0x35d   :  { %3247 = vst [vmem:[#allocation2 + $0x78] sm:$0xff] %v3229_v3  ;;  %v3207_v8 = vpop.f32.mrb[16].mxu0  ;;  %v3352_v20 = vsel %vm3279_vm1, %v3350_v6, %v3351_v7 }
 0x35e   :  { %v3209_v10 = vpop.f32.mrb[17].mxu0  ;;  %v8794_v13 = vadd.f32 %v3207_v8, %v11441_v30 }
 0x35f   :  { %v3292_v11 = vld [vmem:[#allocation3] ss:$8 sm:$0x3]  ;;  %v3294_v12 = vld [vmem:[#allocation3 + $0x1] ss:$8 sm:$0x3]  ;;  %v8795_v21 = vadd.f32 %v3209_v10, %v11445_v31 }
 0x360   :  { %v3297_v14 = vld [vmem:[#allocation3 + $0x2] ss:$8 sm:$0x3]  ;;  %v3295_v16 = vmax.f32 %v3292_v11, %v3294_v12  ;;  %v3307_v17 = vld [vmem:[#allocation3 + $0x3] ss:$8 sm:$0x3] }
 0x361   :  { %v3305_v15 = vld [vmem:[#allocation3 + $0x2] ss:$8 sm:$0x3]  ;;  %v3310_v18 = vld [vmem:[#allocation3 + $0x4] ss:$8 sm:$0x3] }
 0x362   :  { %3355 = vst [vmem:[#allocation3] sm:$0x3f] %v3349_v19  ;;  %3356 = vst [vmem:[#allocation3 + $0x8] sm:$0x3f] %v3352_v20  ;;  %v3377_v23 = vld [vmem:[#allocation2 + $0x50] sm:$0xfc]  ;;  %v3298_v24 = vmax.f32 %v3295_v16, %v3297_v14  ;;  %v3308_v28 = vmax.f32 %v3305_v15, %v3307_v17 }
 0x363   :  { %v3381_v32 = vrot.slane %v3377_v23, 6  ;;  %v3378_v33 = vld [vmem:[#allocation2 + $0x58] sm:$0xfc]  ;;  %v3389_v30 = vld [vmem:[#allocation2 + $0x60] sm:$0x3f]  ;;  %v3230_v34 = vmax.f32 %v8794_v13, 0.0 }
 0x364   :  { %v3375_v36 = vld [vmem:[#allocation2 + $0x50] sm:$0x3]  ;;  %v3382_v37 = vrot.slane %v3378_v33, 6  ;;  %v3393_v38 = vrot.slane %v3389_v30, 4  ;;  %v3311_v39 = vmax.f32 %v3308_v28, %v3310_v18  ;;  %v3376_v41 = vld [vmem:[#allocation2 + $0x58] sm:$0x3] }
 0x365   :  { %3303 = vst.msk [vmem:[#allocation4] ss:$8 sm:$0x3] %vm11468_vm2, %v3298_v24  ;;  %v3385_v40 = vmax.f32 %v3373_v22, %v3381_v32  ;;  %v3387_v31 = vmax.f32 %v3375_v36, %v3381_v32  ;;  %v3390_v42 = vld [vmem:[#allocation2 + $0x68] sm:$0x3f]  ;;  %3248 = vst [vmem:[#allocation2 + $0x80] sm:$0xff] %v3230_v34 }
 0x366   :  { %v3231_v43 = vmax.f32 %v8795_v21, 0.0  ;;  %v3386_v44 = vmax.f32 %v3374_v35, %v3382_v37  ;;  %v3388_v45 = vmax.f32 %v3376_v41, %v3382_v37  ;;  %v3394_v46 = vrot.slane %v3390_v42, 4  ;;  %v3211_v47 = vpop.f32.mrb[18].mxu0  ;;  %3313 = vst.msk [vmem:[#allocation4 + $0x1] ss:$8 sm:$0x3] %vm11468_vm2, %v3311_v39 }
 0x367   :  { %v3397_v48 = vmax.f32 %v3385_v40, %v3393_v38  ;;  %v3399_v49 = vmax.f32 %v3387_v31, %v3393_v38  ;;  %v3433_v50 = vld [vmem:[#allocation2 + $0x60] sm:$0xc0]  ;;  %v3435_v53 = vld [vmem:[#allocation2 + $0x70] sm:$0xf]  ;;  %v3436_v54 = vld [vmem:[#allocation2 + $0x78] sm:$0xf] }
 0x368   :  { %3249 = vst [vmem:[#allocation2 + $0x88] sm:$0xff] %v3231_v43  ;;  %v3398_v51 = vmax.f32 %v3386_v44, %v3394_v46  ;;  %v3400_v52 = vmax.f32 %v3388_v45, %v3394_v46  ;;  %v3212_v55 = vpop.f32.mrb[19].mxu0  ;;  %v3434_v61 = vld [vmem:[#allocation2 + $0x68] sm:$0xc0]  ;;  %v3441_v3 = vrot.slane %v3433_v50, 6  ;;  %v3442_v7 = vrot.slane %v3435_v53, 6 }
 0x369   :  { %v3405_v56 = vrot.slane %v3397_v48, 4  ;;  %v3406_v57 = vrot.slane %v3399_v49, 4  ;;  %v3357_v58 = vld [vmem:[#allocation3] ss:$8 sm:$0x3]  ;;  %v3445_v8 = vrot.slane %v3436_v54, 6 }
 0x36a   :  { %v3408_v59 = vrot.slane %v3398_v51, 4  ;;  %v3409_v60 = vrot.slane %v3400_v52, 4  ;;  %v3358_v62 = vld [vmem:[#allocation3 + $0x1] ss:$8 sm:$0x3]  ;;  %v3444_v16 = vrot.slane %v3434_v61, 6  ;;  %v3443_v20 = vsel %vm3260_vm0, %v3441_v3, %v3442_v7 }
 0x36b   :  { %v3407_v63 = vsel %vm3279_vm1, %v3405_v56, %v3406_v57  ;;  %v3359_v0 = vmax.f32 %v3357_v58, %v3358_v62  ;;  %v3360_v1 = vld [vmem:[#allocation3 + $0x2] ss:$8 sm:$0x3]  ;;  %v3366_v6 = vld [vmem:[#allocation3 + $0x3] ss:$8 sm:$0x3] }
 0x36c   :  { %v3365_v2 = vld [vmem:[#allocation3 + $0x2] ss:$8 sm:$0x3]  ;;  %v3410_v4 = vsel %vm3279_vm1, %v3408_v59, %v3409_v60  ;;  %v3453_v5 = vld [vmem:[#allocation2 + $0x80] sm:$0x3]  ;;  %v3446_v22 = vsel %vm3260_vm0, %v3444_v16, %v3445_v8 }
 0x36d   :  { %v3361_v10 = vmax.f32 %v3359_v0, %v3360_v1  ;;  %v3367_v11 = vmax.f32 %v3365_v2, %v3366_v6  ;;  %v3368_v12 = vld [vmem:[#allocation3 + $0x4] ss:$8 sm:$0x3]  ;;  %v3460_v17 = vrot.slane %v3453_v5, 4  ;;  %v3431_v24 = vld [vmem:[#allocation2 + $0x60] sm:$0x3f] }
 0x36e   :  { %v3451_v13 = vld [vmem:[#allocation2 + $0x70] sm:$0xf0]  ;;  %v3452_v14 = vld [vmem:[#allocation2 + $0x78] sm:$0xf0]  ;;  %3413 = vst [vmem:[#allocation3] sm:$0x3f] %v3407_v63  ;;  %v3449_v30 = vmax.f32 %v3431_v24, %v3443_v20 }
 0x36f   :  { %v3454_v15 = vld [vmem:[#allocation2 + $0x88] sm:$0x3]  ;;  %3414 = vst [vmem:[#allocation3 + $0x8] sm:$0x3f] %v3410_v4  ;;  %v3369_v19 = vmax.f32 %v3367_v11, %v3368_v12  ;;  %v3459_v21 = vrot.slane %v3451_v13, 4  ;;  %v3462_v23 = vrot.slane %v3452_v14, 4 }
 0x370   :  { %v3463_v18 = vrot.slane %v3454_v15, 4  ;;  %3363 = vst.msk [vmem:[#allocation4 + $0x2] ss:$8 sm:$0x3] %vm11468_vm2, %v3361_v10  ;;  %v3432_v28 = vld [vmem:[#allocation2 + $0x68] sm:$0x3f] }
 0x371   :  { %3371 = vst.msk [vmem:[#allocation4 + $0x3] ss:$8 sm:$0x3] %vm11468_vm2, %v3369_v19  ;;  %v3461_v32 = vsel %vm3279_vm1, %v3459_v21, %v3460_v17  ;;  %v3450_v34 = vmax.f32 %v3432_v28, %v3446_v22  ;;  %v9604_v56 = vld [vmem:[%s13073_s3 + $0x4] ss:$12 sps:$4 sm:$0xff]  }
 0x372   :  { %v3464_v33 = vsel %vm3279_vm1, %v3462_v23, %v3463_v18  ;;  %v3467_v37 = vmax.f32 %v3449_v30, %v3461_v32  ;;  %v9606_v57 = vld [vmem:[%s13073_s3] ss:$12 sps:$4 sm:$0xff]   ;;  %6653 = vmatprep.subr.bf16.mxu1 %v9604_v56  ;;  %v9607_v58 = vld [vmem:[%s13073_s3 + $0x1c] ss:$12 sps:$4 sm:$0xff]   ;;  %v9609_v59 = vld [vmem:[%s13073_s3 + $0x18] ss:$12 sps:$4 sm:$0xff]  }
 0x373   :  { %v3468_v38 = vmax.f32 %v3450_v34, %v3464_v33  ;;  %6654 = vmatpush1.bf16.msra.mxu1 %v9606_v57  ;;  %v9610_v61 = vld [vmem:[%s13073_s3 + $0x34] ss:$12 sps:$4 sm:$0xff]   ;;  %v9612_v0 = vld [vmem:[%s13073_s3 + $0x30] ss:$12 sps:$4 sm:$0xff]   ;;  %v9613_v1 = vld [vmem:[%s13073_s3 + $0x4c] ss:$12 sps:$4 sm:$0xff]  }
 0x374   :  { %6655 = vmatprep.subr.bf16.mxu1 %v9607_v58  ;;  %v9615_v3 = vld [vmem:[%s13073_s3 + $0x48] ss:$12 sps:$4 sm:$0xff]   ;;  %v9616_v4 = vld [vmem:[%s13073_s3 + $0x64] ss:$12 sps:$4 sm:$0xff]   ;;  %v9618_v5 = vld [vmem:[%s13073_s3 + $0x60] ss:$12 sps:$4 sm:$0xff]  }
 0x375   :  { %v9619_v6 = vld [vmem:[%s13073_s3 + $0x7c] ss:$12 sps:$4 sm:$0xff]   ;;  %v9621_v7 = vld [vmem:[%s13073_s3 + $0x78] ss:$12 sps:$4 sm:$0xff]   ;;  %v9622_v8 = vld [vmem:[%s13073_s3 + $0x94] ss:$12 sps:$4 sm:$0xff]  }
 0x376   :  { %v3415_v35 = vld [vmem:[#allocation3] ss:$8 sm:$0x3]  ;;  %v3416_v36 = vld [vmem:[#allocation3 + $0x1] ss:$8 sm:$0x3] }
 0x377   :  { %v3417_v39 = vmax.f32 %v3415_v35, %v3416_v36  ;;  %v3418_v40 = vld [vmem:[#allocation3 + $0x2] ss:$8 sm:$0x3]  ;;  %v3424_v41 = vld [vmem:[#allocation3 + $0x3] ss:$8 sm:$0x3]  ;;  %6656 = vmatpush1.bf16.msra.mxu1 %v9609_v59 }
 0x378   :  { %v3423_v31 = vld [vmem:[#allocation3 + $0x2] ss:$8 sm:$0x3]  ;;  %v3426_v42 = vld [vmem:[#allocation3 + $0x4] ss:$8 sm:$0x3]  ;;  %6657 = vmatprep.subr.bf16.mxu1 %v9610_v61 }
 0x379   :  { %v3419_v43 = vmax.f32 %v3417_v39, %v3418_v40  ;;  %v3425_v44 = vmax.f32 %v3423_v31, %v3424_v41  ;;  %3469 = vst [vmem:[#allocation3] sm:$0x3f] %v3467_v37  ;;  %3470 = vst [vmem:[#allocation3 + $0x8] sm:$0x3f] %v3468_v38  ;;  %v9624_v10 = vld [vmem:[%s13073_s3 + $0x90] ss:$12 sps:$4 sm:$0xff]  }
 0x37a   :  { %v9625_v11 = vld [vmem:[%s13073_s3 + $0xac] ss:$12 sps:$4 sm:$0xff]   ;;  %v9627_v12 = vld [vmem:[%s13073_s3 + $0xa8] ss:$12 sps:$4 sm:$0xff]   ;;  %v9628_v13 = vld [vmem:[%s13073_s3 + $0xc4] ss:$12 sps:$4 sm:$0xff]  }
 0x37b   :  { %3421 = vst.msk [vmem:[#allocation4 + $0x4] ss:$8 sm:$0x3] %vm11468_vm2, %v3419_v43  ;;  %v3427_v45 = vmax.f32 %v3425_v44, %v3426_v42  ;;  %6658 = vmatpush1.bf16.msra.mxu1 %v9612_v0  ;;  %v9630_v14 = vld [vmem:[%s13073_s3 + $0x3c8] ss:$12 sps:$4 sm:$0xff]  }
 0x37c   :  { %6659 = vmatprep.subr.bf16.mxu1 %v9613_v1  ;;  %v9631_v15 = vld [vmem:[%s13073_s3 + $0xc0] ss:$12 sps:$4 sm:$0xff]   ;;  %v9632_v16 = vld [vmem:[%s13073_s3 + $0x308] ss:$12 sps:$4 sm:$0xff]   ;;  %8573 = vmatprep.subr.bf16.mxu0 %v9630_v14  ;;  %v9636_v19 = vld [vmem:[%s13073_s3 + $0xd8] ss:$12 sps:$4 sm:$0xff]  }
 0x37d   :  { %3429 = vst.msk [vmem:[#allocation4 + $0x5] ss:$8 sm:$0x3] %vm11468_vm2, %v3427_v45  ;;  %8574 = vmatpush3.bf16.msra.mxu0 %v9632_v16  ;;  %v9633_v17 = vld [vmem:[%s13073_s3 + $0xdc] ss:$12 sps:$4 sm:$0xff]  }
 0x37e   :  { %v9635_v18 = vld [vmem:[%s13073_s3 + $0x3e0] ss:$12 sps:$4 sm:$0xff]   ;;  %v9640_v22 = vld [vmem:[%s13073_s3 + $0x3f8] ss:$12 sps:$4 sm:$0xff]   ;;  %v9641_v23 = vld [vmem:[%s13073_s3 + $0xf0] ss:$12 sps:$4 sm:$0xff]  }
 0x37f   :  { %6660 = vmatpush1.bf16.msra.mxu1 %v9615_v3  ;;  %v9637_v20 = vld [vmem:[%s13073_s3 + $0x320] ss:$12 sps:$4 sm:$0xff]   ;;  %8575 = vmatprep.subr.bf16.mxu0 %v9635_v18  ;;  %v9642_v24 = vld [vmem:[%s13073_s3 + $0x338] ss:$12 sps:$4 sm:$0xff]   ;;  %v9645_v32 = vld [vmem:[%s13073_s3 + $0x410] ss:$12 sps:$4 sm:$0xff]  }
 0x380   :  { %v3471_v46 = vld [vmem:[#allocation3] ss:$8 sm:$0x3]  ;;  %v3472_v47 = vld [vmem:[#allocation3 + $0x1] ss:$8 sm:$0x3]  ;;  %6661 = vmatprep.subr.bf16.mxu1 %v9616_v4 }
 0x381   :  { %v3473_v48 = vmax.f32 %v3471_v46, %v3472_v47  ;;  %v3479_v49 = vld [vmem:[#allocation3 + $0x2] ss:$8 sm:$0x3]  ;;  %v3480_v51 = vld [vmem:[#allocation3 + $0x3] ss:$8 sm:$0x3]  ;;  %8576 = vmatpush3.bf16.msra.mxu0 %v9637_v20 }
 0x382   :  { %v3474_v50 = vld [vmem:[#allocation3 + $0x2] ss:$8 sm:$0x3]  ;;  %v3481_v53 = vmax.f32 %v3479_v49, %v3480_v51  ;;  %v3482_v54 = vld [vmem:[#allocation3 + $0x4] ss:$8 sm:$0x3]  ;;  %8577 = vmatprep.subr.bf16.mxu0 %v9640_v22 }
 0x383   :  { %v3475_v52 = vmax.f32 %v3473_v48, %v3474_v50  ;;  %6662 = vmatpush1.bf16.msra.mxu1 %v9618_v5  ;;  %v9638_v21 = vld [vmem:[%s13073_s3 + $0xf4] ss:$12 sps:$4 sm:$0xff]   ;;  %v9643_v28 = vld [vmem:[%s13073_s3 + $0x10c] ss:$12 sps:$4 sm:$0xff]   ;;  %v9647_v30 = vld [vmem:[%s13073_s3 + $0x350] ss:$12 sps:$4 sm:$0xff]  }
 0x384   :  { %v3483_v55 = vmax.f32 %v3481_v53, %v3482_v54  ;;  %6663 = vmatprep.subr.bf16.mxu1 %v9619_v6  ;;  %v9646_v33 = vld [vmem:[%s13073_s3 + $0x108] ss:$12 sps:$4 sm:$0xff]   ;;  %v9648_v34 = vld [vmem:[%s13073_s3 + $0x124] ss:$12 sps:$4 sm:$0xff]   ;;  %v9651_v36 = vld [vmem:[%s13073_s3 + $0x120] ss:$12 sps:$4 sm:$0xff]  }
 0x385   :  { %3477 = vst.msk [vmem:[#allocation4 + $0x6] ss:$8 sm:$0x3] %vm11468_vm2, %v3475_v52  ;;  %8578 = vmatpush3.bf16.msra.mxu0 %v9642_v24  ;;  %v9650_v35 = vld [vmem:[%s13073_s3 + $0x428] ss:$12 sps:$4 sm:$0xff]   ;;  %v10219_v46 = vmov 0.0  }
 0x386   :  { %3485 = vst.msk [vmem:[#allocation4 + $0x7] ss:$8 sm:$0x3] %vm11468_vm2, %v3483_v55  ;;  %8579 = vmatprep.subr.bf16.mxu0 %v9645_v32  ;;  %v9652_v37 = vld [vmem:[%s13073_s3 + $0x368] ss:$12 sps:$4 sm:$0xff]   ;;  %3574 = vst [vmem:[#allocation5] sm:$0xff] %v10219_v46 }
 0x387   :  { %6664 = vmatpush1.bf16.msra.mxu1 %v9621_v7  ;;  %v9653_v38 = vld [vmem:[%s13073_s3 + $0x13c] ss:$12 sps:$4 sm:$0xff]   ;;  %v9655_v39 = vld [vmem:[%s13073_s3 + $0x440] ss:$12 sps:$4 sm:$0xff]   ;;  %v9656_v31 = vld [vmem:[%s13073_s3 + $0x138] ss:$12 sps:$4 sm:$0xff]  }
 0x388   :  { %6665 = vmatprep.subr.bf16.mxu1 %v9622_v8  ;;  %v9657_v40 = vld [vmem:[%s13073_s3 + $0x380] ss:$12 sps:$4 sm:$0xff]   ;;  %v9660_v42 = vld [vmem:[%s13073_s3 + $0x458] ss:$12 sps:$4 sm:$0xff]   ;;  %v9661_v44 = vld [vmem:[%s13073_s3 + $0x150] ss:$12 sps:$4 sm:$0xff]  }
 0x389   :  { %8580 = vmatpush3.bf16.msra.mxu0 %v9647_v30  ;;  %v9658_v41 = vld [vmem:[%s13073_s3 + $0x154] ss:$12 sps:$4 sm:$0xff]   ;;  %v9662_v43 = vld [vmem:[%s13073_s3 + $0x398] ss:$12 sps:$4 sm:$0xff]   ;;  %v9665_v45 = vld [vmem:[%s13073_s3 + $0x470] ss:$12 sps:$4 sm:$0xff]  }
 0x38a   :  { %8581 = vmatprep.subr.bf16.mxu0 %v9650_v35  ;;  %3575 = vst [vmem:[#allocation5 + $0x8] sm:$0xff] %v10219_v46  ;;  %3576 = vst [vmem:[#allocation5 + $0x10] sm:$0xff] %v10219_v46  ;;  %v9663_v47 = vld [vmem:[%s13073_s3 + $0x16c] ss:$12 sps:$4 sm:$0xff]   ;;  %v9667_v48 = vld [vmem:[%s13073_s3 + $0x3b0] ss:$12 sps:$4 sm:$0xff]  }
 0x38b   :  { %6666 = vmatpush1.bf16.msra.mxu1 %v9624_v10  ;;  %3577 = vst [vmem:[#allocation5 + $0x18] sm:$0xff] %v10219_v46  ;;  %3578 = vst [vmem:[#allocation5 + $0x20] sm:$0xff] %v10219_v46  ;;  %v9666_v49 = vld [vmem:[%s13073_s3 + $0x168] ss:$12 sps:$4 sm:$0xff]   ;;  %v9670_v50 = vld [vmem:[%s13073_s3 + $0x184] ss:$12 sps:$4 sm:$0xff]  }
 0x38c   :  { %6667 = vmatprep.subr.bf16.mxu1 %v9625_v11  ;;  %3579 = vst [vmem:[#allocation5 + $0x28] sm:$0xff] %v10219_v46  ;;  %3580 = vst [vmem:[#allocation5 + $0x30] sm:$0xff] %v10219_v46  ;;  %v9671_v51 = vld [vmem:[%s13073_s3 + $0x6c8] ss:$12 sps:$4 sm:$0xff]   ;;  %v3492_v52 = vand.u32 127, %v423_v25 }
 0x38d   :  { %v3487_v60 = vld [vmem:[#allocation4] sm:$0xff]  ;;  %v3488_v63 = vld [vmem:[#allocation4 + $0x8] sm:$0xff]  ;;  %8582 = vmatpush3.bf16.msra.mxu0 %v9652_v37  ;;  %3581 = vst [vmem:[#allocation5 + $0x38] sm:$0xff] %v10219_v46  ;;  %3582 = vst [vmem:[#allocation5 + $0x40] sm:$0xff] %v10219_v46 }
 0x38e   :  { %v11513_v62 = vmul.f32 %v3487_v60, %v3487_v60  ;;  %v11523_v2 = vmul.f32 %v3488_v63, %v3488_v63  ;;  %8583 = vmatprep.subr.bf16.mxu0 %v9655_v39  ;;  %3583 = vst [vmem:[#allocation5 + $0x48] sm:$0xff] %v10219_v46  ;;  %3584 = vst [vmem:[#allocation5 + $0x50] sm:$0xff] %v10219_v46  ;;  %v3493_v53 = vadd.s32 128, %v3492_v52  ;;  %vm3505_vm3 = vcmp.lt.s32.totalorder %v3492_v52, 127 }
 0x38f   :  { %6668 = vmatpush1.bf16.msra.mxu1 %v9627_v12  ;;  %3585 = vst [vmem:[#allocation5 + $0x58] sm:$0xff] %v10219_v46  ;;  %3586 = vst [vmem:[#allocation5 + $0x60] sm:$0xff] %v10219_v46  ;;  %vm3498_vm4 = vcmp.lt.s32.totalorder %v3492_v52, 1  ;;  %vm3508_vm6 = vcmp.ge.s32.totalorder %v3492_v52, 1  ;;  %vm3524_vm7 = vcmp.lt.s32.totalorder %v3492_v52, 2  ;;  %vm3534_vm8 = vcmp.ge.s32.totalorder %v3492_v52, 2 }
 0x390   :  { %3501 = vrot.lane.b32.xlu1 %v11513_v62, %s10215_s10  ;;  %3494 = vrot.lane.b32.xlu0 %v11513_v62, %s10216_s11  ;;  %3587 = vst [vmem:[#allocation5 + $0x68] sm:$0xff] %v10219_v46  ;;  %3588 = vst [vmem:[#allocation5 + $0x70] sm:$0xff] %v10219_v46  ;;  %vm3513_vm5 = vcmp.lt.s32.totalorder %v3493_v53, 255  ;;  %vm3531_vm9 = vcmp.lt.s32.totalorder %v3492_v52, 126  ;;  %vm3539_vm10 = vcmp.lt.s32.totalorder %v3493_v53, 254 }
 0x391   :  { %6669 = vmatprep.subr.bf16.mxu1 %v9628_v13  ;;  %3589 = vst [vmem:[#allocation5 + $0x78] sm:$0xff] %v10219_v46  ;;  %3590 = vst [vmem:[#allocation5 + $0x80] sm:$0xff] %v10219_v46  ;;  %8584 = vmatpush3.bf16.msra.mxu0 %v9657_v40 }
 0x392   :  { %3591 = vst [vmem:[#allocation5 + $0x88] sm:$0xff] %v10219_v46  ;;  %8585 = vmatprep.subr.bf16.mxu0 %v9660_v42  ;;  %v10213_v42 = vld [vmem:[#allocation4 + $0x8] sm:$0xff] }
 0x393   :  { %6670 = vmatpush1.bf16.msra.mxu1 %v9631_v15 }
 0x394   :  { %3503 = vrot.lane.b32.xlu1 %v11523_v2, %s10215_s10  ;;  %3496 = vrot.lane.b32.xlu0 %v11523_v2, %s10216_s11 }
 0x395   :  { %6671 = vmatprep.subr.bf16.mxu1 %v9633_v17  ;;  %8586 = vmatpush3.bf16.msra.mxu0 %v9662_v43 }
 0x396   :  { %8587 = vmatprep.subr.bf16.mxu0 %v9665_v45 }
 0x397   :  { %6672 = vmatpush1.bf16.msra.mxu1 %v9636_v19 }
 0x398   :  { %3522 = vrot.lane.b32.xlu1 %v11523_v2, %s10217_s19  ;;  %3520 = vrot.lane.b32.xlu0 %v11513_v62, %s10217_s19 }
 0x399   :  { %6673 = vmatprep.subr.bf16.mxu1 %v9638_v21  ;;  %8588 = vmatpush3.bf16.msra.mxu0 %v9667_v48 }
 0x39a   :  { %8617 = vmatprep.subr.bf16.mxu0 %v9671_v51 }
 0x39b   :  { %6674 = vmatpush1.bf16.msra.mxu1 %v9641_v23 }
 0x39c   :  { %3529 = vrot.lane.b32.xlu1 %v11523_v2, %s10218_s2  ;;  %3527 = vrot.lane.b32.xlu0 %v11513_v62, %s10218_s2 }
 0x39d   :  { %6675 = vmatprep.subr.bf16.mxu1 %v9643_v28 }
 0x39f   :  { %6676 = vmatpush1.bf16.msra.mxu1 %v9646_v33 }
 0x3a0   :  { %6677 = vmatprep.subr.bf16.mxu1 %v9648_v34 }
 0x3a3   :  { %6678 = vmatpush1.bf16.msra.mxu1 %v9651_v36 }
 0x3a4   :  { %6679 = vmatprep.subr.bf16.mxu1 %v9653_v38 }
 0x3a7   :  { %6680 = vmatpush1.bf16.msra.mxu1 %v9656_v31  ;;  %v10212_v31 = vld [vmem:[#allocation4] sm:$0xff] }
 0x3a8   :  { %6681 = vmatprep.subr.bf16.mxu1 %v9658_v41 }
 0x3ab   :  { %6682 = vmatpush1.bf16.msra.mxu1 %v9661_v44 }
 0x3ac   :  { %6683 = vmatprep.subr.bf16.mxu1 %v9663_v47 }
 0x3af   :  { %6684 = vmatpush1.bf16.msra.mxu1 %v9666_v49 }
 0x3b0   :  { %6694 = vmatprep.subr.bf16.mxu1 %v9670_v50 }
 0x402   :  { %v3502_v54 = vpop.permute.xlu1 %3501  ;;  %v3495_v55 = vpop.permute.xlu0 %3494 }
 0x406   :  { %v3504_v56 = vpop.permute.xlu1 %3503  ;;  %v3497_v57 = vpop.permute.xlu0 %3496 }
 0x407   :  { %v3507_v58 = vsel %vm3505_vm3, %v3504_v56, %v3502_v54  ;;  %v3499_v59 = vsel %vm3498_vm4, %v3495_v55, %v3497_v57  ;;  %v3500_v60 = vsel %vm3498_vm4, %v3497_v57, %v3495_v55  ;;  %v3506_v25 = vsel %vm3505_vm3, %v3502_v54, %v3504_v56 }
 0x408   :  { %v3515_v61 = vsel %vm3513_vm5, %v3507_v58, 0.0  ;;  %v3510_v63 = vsel %vm3508_vm6, %v3500_v60, 0.0  ;;  %v3517_v0 = vadd.f32 %v3499_v59, %v11523_v2  ;;  %v9668_v59 = vld [vmem:[%s13073_s3 + $0x180] ss:$12 sps:$4 sm:$0xff]  }
 0x409   :  { %v3516_v1 = vadd.f32 %v3510_v63, %v11513_v62 }
 0x40a   :  { %v3523_v3 = vpop.permute.xlu1 %3522  ;;  %v3521_v4 = vpop.permute.xlu0 %3520  ;;  %v3519_v6 = vadd.f32 %v3517_v0, %v3515_v61 }
 0x40b   :  { %v3518_v5 = vadd.f32 %v3516_v1, %v3506_v25  ;;  %v3526_v7 = vsel %vm3524_vm7, %v3523_v3, %v3521_v4  ;;  %v3525_v8 = vsel %vm3524_vm7, %v3521_v4, %v3523_v3  ;;  %v9672_v1 = vld [vmem:[%s13073_s3 + $0x608] ss:$12 sps:$4 sm:$0xff]  }
 0x40c   :  { %v3536_v10 = vsel %vm3534_vm8, %v3526_v7, 0.0  ;;  %v3543_v14 = vadd.f32 %v3525_v8, %v3519_v6 }
 0x40d   :  { %v3542_v11 = vadd.f32 %v3536_v10, %v3518_v5 }
 0x40e   :  { %v3530_v12 = vpop.permute.xlu1 %3529  ;;  %v3528_v13 = vpop.permute.xlu0 %3527 }
 0x40f   :  { %v3532_v15 = vsel %vm3531_vm9, %v3528_v13, %v3530_v12  ;;  %v3533_v2 = vsel %vm3531_vm9, %v3530_v12, %v3528_v13 }
 0x410   :  { %v3541_v16 = vsel %vm3539_vm10, %v3533_v2, 0.0  ;;  %v3544_v17 = vadd.f32 %v3542_v11, %v3532_v15  ;;  %v9676_v15 = vld [vmem:[%s13073_s3 + $0x6e0] ss:$12 sps:$4 sm:$0xff]  }
 0x411   :  { %v3545_v62 = vadd.f32 %v3543_v14, %v3541_v16  ;;  %v9675_v14 = vld [vmem:[%s13073_s3 + $0x19c] ss:$12 sps:$4 sm:$0xff]   ;;  %v9673_v16 = vld [vmem:[%s13073_s3 + $0x198] ss:$12 sps:$4 sm:$0xff]  }
 0x412   :  { %v3546_v18 = vmul.f32 2e-05, %v3544_v17  ;;  %v9677_v17 = vld [vmem:[%s13073_s3 + $0x620] ss:$12 sps:$4 sm:$0xff]  }
 0x413   :  { %v3547_v19 = vmul.f32 2e-05, %v3545_v62  ;;  %v9680_v62 = vld [vmem:[%s13073_s3 + $0x1b4] ss:$12 sps:$4 sm:$0xff]  }
 0x414   :  { %v3548_v20 = vadd.f32 1.0, %v3546_v18 }
 0x415   :  { %v3549_v21 = vadd.f32 1.0, %v3547_v19 }
 0x416   :  { %10204 = vrsqrt.f32 %v3548_v20  ;;  %vm3554_vm11 = vcmp.eq.f32.partialorder %v3548_v20, inf  ;;  %v3557_v28 = vand.u32 2147483648, %v3548_v20  ;;  %vm3556_vm12 = vcmp.eq.f32.partialorder %v3548_v20, 0.0 }
 0x417   :  { %10206 = vrsqrt.f32 %v3549_v21  ;;  %vm3561_vm13 = vcmp.eq.f32.partialorder %v3549_v21, inf  ;;  %v3564_v30 = vand.u32 2147483648, %v3549_v21  ;;  %vm3563_vm14 = vcmp.eq.f32.partialorder %v3549_v21, 0.0 }
 0x420   :  { %v10205_v22 = vpop.eup %10204 }
 0x421   :  { %v10207_v23 = vpop.eup %10206  ;;  %v3553_v24 = vmul.f32 %v10205_v22, %v3548_v20 }
 0x422   :  { %v3560_v32 = vmul.f32 %v10207_v23, %v3549_v21 }
 0x423   :  { %v3555_v33 = vsel %vm3554_vm11, %v3548_v20, %v3553_v24 }
 0x424   :  { %v3558_v34 = vsel %vm3556_vm12, %v3557_v28, %v3555_v33  ;;  %v3562_v35 = vsel %vm3561_vm13, %v3549_v21, %v3560_v32  ;;  %v9681_v21 = vld [vmem:[%s13073_s3 + $0x6f8] ss:$12 sps:$4 sm:$0xff]   ;;  %v9678_v28 = vld [vmem:[%s13073_s3 + $0x1b0] ss:$12 sps:$4 sm:$0xff]  }
 0x425   :  { %v3565_v36 = vsel %vm3563_vm14, %v3564_v30, %v3562_v35  ;;  %10208 = vrsqrt.f32 %v3558_v34  ;;  %v9682_v32 = vld [vmem:[%s13073_s3 + $0x638] ss:$12 sps:$4 sm:$0xff]   ;;  %v9686_v30 = vld [vmem:[%s13073_s3 + $0x710] ss:$12 sps:$4 sm:$0xff]   ;;  %v9683_v34 = vld [vmem:[%s13073_s3 + $0x1c8] ss:$12 sps:$4 sm:$0xff]  }
 0x426   :  { %10210 = vrsqrt.f32 %v3565_v36  ;;  %v9685_v33 = vld [vmem:[%s13073_s3 + $0x1cc] ss:$12 sps:$4 sm:$0xff]  }
 0x42f   :  { %v10209_v37 = vpop.eup %10208 }
 0x430   :  { %v10211_v38 = vpop.eup %10210  ;;  %v3568_v39 = vmul.f32 %v10209_v37, %v10205_v22  ;;  %v9687_v37 = vld [vmem:[%s13073_s3 + $0x650] ss:$12 sps:$4 sm:$0xff]  }
 0x431   :  { %v3569_v40 = vmul.f32 %v10211_v38, %v10207_v23 }
 0x432   :  { %v3570_v41 = vmul.f32 %v10212_v31, %v3568_v39  ;;  %v9691_v31 = vld [vmem:[%s13073_s3 + $0x728] ss:$12 sps:$4 sm:$0xff]  }
 0x433   :  { %v3571_v43 = vmul.f32 %v10213_v42, %v3569_v40  ;;  %v9690_v40 = vld [vmem:[%s13073_s3 + $0x1e4] ss:$12 sps:$4 sm:$0xff]  }
 0x434   :  { %3572 = vst [vmem:[#allocation4] sm:$0xff] %v3570_v41 }
 0x435   :  { %3573 = vst [vmem:[#allocation4 + $0x8] sm:$0xff] %v3571_v43 }
 0x43c   :  { %v3640_v44 = vld [vmem:[#allocation4] ss:$8 sm:$0x3]  ;;  %v3704_v45 = vld [vmem:[#allocation4 + $0x4] ss:$8 sm:$0x3] }
 0x43d   :  { %3642 = vst.msk [vmem:[#allocation5 + $0x3] ss:$8 sm:$0x3] %vm11468_vm2, %v3640_v44  ;;  %3706 = vst.msk [vmem:[#allocation5 + $0x7] ss:$8 sm:$0x3] %vm11468_vm2, %v3704_v45 }
 0x43e   :  { %v3628_v47 = vld [vmem:[#allocation4 + $0x1] ss:$8 sm:$0x3]  ;;  %v3692_v48 = vld [vmem:[#allocation4 + $0x5] ss:$8 sm:$0x3] }
 0x43f   :  { %3630 = vst.msk [vmem:[#allocation5 + $0x22] ss:$8 sm:$0x3] %vm11468_vm2, %v3628_v47  ;;  %3694 = vst.msk [vmem:[#allocation5 + $0x26] ss:$8 sm:$0x3] %vm11468_vm2, %v3692_v48 }
 0x440   :  { %v3624_v49 = vld [vmem:[#allocation4] ss:$8 sm:$0x3]  ;;  %v3644_v50 = vld [vmem:[#allocation4 + $0x1] ss:$8 sm:$0x3] }
 0x441   :  { %3626 = vst.msk [vmem:[#allocation5 + $0x12] ss:$8 sm:$0x3] %vm11468_vm2, %v3624_v49  ;;  %3646 = vst.msk [vmem:[#allocation5 + $0x13] ss:$8 sm:$0x3] %vm11468_vm2, %v3644_v50 }
 0x442   :  { %v3688_v51 = vld [vmem:[#allocation4 + $0x4] ss:$8 sm:$0x3]  ;;  %v3708_v52 = vld [vmem:[#allocation4 + $0x5] ss:$8 sm:$0x3] }
 0x443   :  { %3690 = vst.msk [vmem:[#allocation5 + $0x16] ss:$8 sm:$0x3] %vm11468_vm2, %v3688_v51  ;;  %3710 = vst.msk [vmem:[#allocation5 + $0x17] ss:$8 sm:$0x3] %vm11468_vm2, %v3708_v52 }
 0x444   :  { %v3592_v53 = vld [vmem:[#allocation4] ss:$8 sm:$0x3]  ;;  %v3612_v54 = vld [vmem:[#allocation4 + $0x1] ss:$8 sm:$0x3] }
 0x445   :  { %3594 = vst.msk [vmem:[#allocation5 + $0x40] ss:$8 sm:$0x3] %vm11468_vm2, %v3592_v53  ;;  %3614 = vst.msk [vmem:[#allocation5 + $0x41] ss:$8 sm:$0x3] %vm11468_vm2, %v3612_v54 }
 0x446   :  { %v3632_v55 = vld [vmem:[#allocation4 + $0x2] ss:$8 sm:$0x3]  ;;  %v3652_v56 = vld [vmem:[#allocation4 + $0x3] ss:$8 sm:$0x3] }
 0x447   :  { %3634 = vst.msk [vmem:[#allocation5 + $0x42] ss:$8 sm:$0x3] %vm11468_vm2, %v3632_v55  ;;  %3654 = vst.msk [vmem:[#allocation5 + $0x43] ss:$8 sm:$0x3] %vm11468_vm2, %v3652_v56 }
 0x448   :  { %v3656_v57 = vld [vmem:[#allocation4 + $0x4] ss:$8 sm:$0x3]  ;;  %v3676_v58 = vld [vmem:[#allocation4 + $0x5] ss:$8 sm:$0x3] }
 0x449   :  { %3658 = vst.msk [vmem:[#allocation5 + $0x44] ss:$8 sm:$0x3] %vm11468_vm2, %v3656_v57  ;;  %3678 = vst.msk [vmem:[#allocation5 + $0x45] ss:$8 sm:$0x3] %vm11468_vm2, %v3676_v58 }
 0x44a   :  { %v3696_v60 = vld [vmem:[#allocation4 + $0x6] ss:$8 sm:$0x3]  ;;  %v3716_v61 = vld [vmem:[#allocation4 + $0x7] ss:$8 sm:$0x3] }
 0x44b   :  { %v3721_v63 = vld [vmem:[#allocation5 + $0x8] sm:$0xff]  ;;  %v3720_v0 = vld [vmem:[#allocation5] sm:$0xff]  ;;  %3698 = vst.msk [vmem:[#allocation5 + $0x46] ss:$8 sm:$0x3] %vm11468_vm2, %v3696_v60  ;;  %v3723_v13 = vld [vmem:[#allocation5 + $0x18] sm:$0xff] }
 0x44c   :  { %3718 = vst.msk [vmem:[#allocation5 + $0x47] ss:$8 sm:$0x3] %vm11468_vm2, %v3716_v61  ;;  %v3616_v25 = vld [vmem:[#allocation4 + $0x2] ss:$8 sm:$0x3]  ;;  %v11719_v3 = vpack.c.bf16 %v3721_v63, %v3721_v63  ;;  %v11721_v5 = vpack.c.bf16 %v3720_v0, %v3720_v0  ;;  %v11744_v2 = vpack.c.bf16 %v3723_v13, %v3723_v13 }
 0x44d   :  { %v3725_v4 = vld [vmem:[#allocation5 + $0x28] sm:$0xff]  ;;  %v3724_v6 = vld [vmem:[#allocation5 + $0x20] sm:$0xff]  ;;  %3618 = vst.msk [vmem:[#allocation5 + $0x61] ss:$8 sm:$0x3] %vm11468_vm2, %v3616_v25 }
 0x44e   :  { %v3680_v7 = vld [vmem:[#allocation4 + $0x6] ss:$8 sm:$0x3]  ;;  %v11725_v8 = vpack.c.bf16 %v3725_v4, %v3725_v4  ;;  %v11727_v10 = vpack.c.bf16 %v3724_v6, %v3724_v6  ;;  %v3604_v11 = vld [vmem:[#allocation4 + $0x3] ss:$8 sm:$0x3]  ;;  %6685 = vmatprep.mubr.bf16.mxu1 %v11719_v3 }
 0x44f   :  { %3682 = vst.msk [vmem:[#allocation5 + $0x65] ss:$8 sm:$0x3] %vm11468_vm2, %v3680_v7  ;;  %v3668_v12 = vld [vmem:[#allocation4 + $0x7] ss:$8 sm:$0x3]  ;;  %6686 = vmatmul.mubr.bf16.vlgmr.msra.gmra.mrb[0].mxu1 %v11721_v5 }
 0x450   :  { %3606 = vst.msk [vmem:[#allocation5 + $0x80] ss:$8 sm:$0x3] %vm11468_vm2, %v3604_v11  ;;  %3670 = vst.msk [vmem:[#allocation5 + $0x84] ss:$8 sm:$0x3] %vm11468_vm2, %v3668_v12  ;;  %7134 = vmatprep.mubr.bf16.mxu0 %v11725_v8  ;;  %6695 = vmatpush1.bf16.msra.mxu1 %v9668_v59 }
 0x451   :  { %7135 = vmatmul.mubr.bf16.vlgmr.msra.gmra.mrb[20].mxu0 %v11727_v10  ;;  %6726 = vmatprep.mubr.bf16.mxu1 %v11744_v2  ;;  %v3608_v18 = vld [vmem:[#allocation4] ss:$8 sm:$0x3]  ;;  %v3648_v19 = vld [vmem:[#allocation4 + $0x2] ss:$8 sm:$0x3] }
 0x452   :  { %8618 = vmatpush3.bf16.msra.mxu0 %v9672_v1  ;;  %6696 = vmatprep.subr.bf16.mxu1 %v9675_v14  ;;  %3610 = vst.msk [vmem:[#allocation5 + $0x31] ss:$8 sm:$0x3] %vm11468_vm2, %v3608_v18  ;;  %3650 = vst.msk [vmem:[#allocation5 + $0x33] ss:$8 sm:$0x3] %vm11468_vm2, %v3648_v19 }
 0x453   :  { %v3729_v20 = vld [vmem:[#allocation5 + $0x48] sm:$0xff]  ;;  %8619 = vmatprep.subr.bf16.mxu0 %v9676_v15  ;;  %v3672_v22 = vld [vmem:[#allocation4 + $0x4] ss:$8 sm:$0x3]  ;;  %v9692_v47 = vld [vmem:[%s13073_s3 + $0x668] ss:$12 sps:$4 sm:$0xff]  }
 0x454   :  { %v11764_v23 = vpack.c.bf16 %v3729_v20, %v3729_v20  ;;  %3674 = vst.msk [vmem:[#allocation5 + $0x35] ss:$8 sm:$0x3] %vm11468_vm2, %v3672_v22  ;;  %v3712_v24 = vld [vmem:[#allocation4 + $0x6] ss:$8 sm:$0x3]  ;;  %6697 = vmatpush1.bf16.msra.mxu1 %v9673_v16 }
 0x455   :  { %3714 = vst.msk [vmem:[#allocation5 + $0x37] ss:$8 sm:$0x3] %vm11468_vm2, %v3712_v24  ;;  %6698 = vmatprep.subr.bf16.mxu1 %v9680_v62  ;;  %v3596_v35 = vld [vmem:[#allocation4 + $0x1] ss:$8 sm:$0x3] }
 0x456   :  { %7214 = vmatprep.mubr.bf16.mxu0 %v11764_v23  ;;  %8620 = vmatpush3.bf16.msra.mxu0 %v9677_v17  ;;  %v3636_v36 = vld [vmem:[#allocation4 + $0x3] ss:$8 sm:$0x3]  ;;  %3598 = vst.msk [vmem:[#allocation5 + $0x50] ss:$8 sm:$0x3] %vm11468_vm2, %v3596_v35 }
 0x457   :  { %8621 = vmatprep.subr.bf16.mxu0 %v9681_v21  ;;  %3638 = vst.msk [vmem:[#allocation5 + $0x52] ss:$8 sm:$0x3] %vm11468_vm2, %v3636_v36  ;;  %v3660_v38 = vld [vmem:[#allocation4 + $0x5] ss:$8 sm:$0x3] }
 0x458   :  { %v3700_v39 = vld [vmem:[#allocation4 + $0x7] ss:$8 sm:$0x3]  ;;  %6699 = vmatpush1.bf16.msra.mxu1 %v9678_v28  ;;  %3662 = vst.msk [vmem:[#allocation5 + $0x54] ss:$8 sm:$0x3] %vm11468_vm2, %v3660_v38 }
 0x459   :  { %3702 = vst.msk [vmem:[#allocation5 + $0x56] ss:$8 sm:$0x3] %vm11468_vm2, %v3700_v39  ;;  %6700 = vmatprep.subr.bf16.mxu1 %v9685_v33  ;;  %v3600_v41 = vld [vmem:[#allocation4 + $0x2] ss:$8 sm:$0x3] }
 0x45a   :  { %8622 = vmatpush3.bf16.msra.mxu0 %v9682_v32  ;;  %v3620_v42 = vld [vmem:[#allocation4 + $0x3] ss:$8 sm:$0x3]  ;;  %3602 = vst.msk [vmem:[#allocation5 + $0x70] ss:$8 sm:$0x3] %vm11468_vm2, %v3600_v41 }
 0x45b   :  { %8623 = vmatprep.subr.bf16.mxu0 %v9686_v30  ;;  %3622 = vst.msk [vmem:[#allocation5 + $0x71] ss:$8 sm:$0x3] %vm11468_vm2, %v3620_v42  ;;  %v3664_v43 = vld [vmem:[#allocation4 + $0x6] ss:$8 sm:$0x3] }
 0x45c   :  { %v3684_v44 = vld [vmem:[#allocation4 + $0x7] ss:$8 sm:$0x3]  ;;  %3666 = vst.msk [vmem:[#allocation5 + $0x74] ss:$8 sm:$0x3] %vm11468_vm2, %v3664_v43  ;;  %6701 = vmatpush1.bf16.msra.mxu1 %v9683_v34 }
 0x45d   :  { %v9688_v45 = vld [vmem:[%s13073_s3 + $0x1e0] ss:$12 sps:$4 sm:$0xff]   ;;  %3686 = vst.msk [vmem:[#allocation5 + $0x75] ss:$8 sm:$0x3] %vm11468_vm2, %v3684_v44  ;;  %6702 = vmatprep.subr.bf16.mxu1 %v9690_v40  ;;  %v3728_v61 = vld [vmem:[#allocation5 + $0x40] sm:$0xff] }
 0x45e   :  { %v9695_v48 = vld [vmem:[%s13073_s3 + $0x1fc] ss:$12 sps:$4 sm:$0xff]   ;;  %v9696_v49 = vld [vmem:[%s13073_s3 + $0x740] ss:$12 sps:$4 sm:$0xff]   ;;  %8624 = vmatpush3.bf16.msra.mxu0 %v9687_v37  ;;  %v9693_v50 = vld [vmem:[%s13073_s3 + $0x1f8] ss:$12 sps:$4 sm:$0xff]   ;;  %v11871_v6 = vpack.c.bf16 %v3728_v61, %v3728_v61 }
 0x45f   :  { %8625 = vmatprep.subr.bf16.mxu0 %v9691_v31  ;;  %v9700_v51 = vld [vmem:[%s13073_s3 + $0x214] ss:$12 sps:$4 sm:$0xff]   ;;  %v9698_v52 = vld [vmem:[%s13073_s3 + $0x210] ss:$12 sps:$4 sm:$0xff]   ;;  %v9701_v53 = vld [vmem:[%s13073_s3 + $0x758] ss:$12 sps:$4 sm:$0xff]  }
 0x460   :  { %6703 = vmatpush1.bf16.msra.mxu1 %v9688_v45  ;;  %v9702_v54 = vld [vmem:[%s13073_s3 + $0x698] ss:$12 sps:$4 sm:$0xff]   ;;  %v9706_v56 = vld [vmem:[%s13073_s3 + $0x770] ss:$12 sps:$4 sm:$0xff]   ;;  %v9703_v57 = vld [vmem:[%s13073_s3 + $0x228] ss:$12 sps:$4 sm:$0xff]  }
 0x461   :  { %6704 = vmatprep.subr.bf16.mxu1 %v9695_v48  ;;  %v9705_v55 = vld [vmem:[%s13073_s3 + $0x22c] ss:$12 sps:$4 sm:$0xff]   ;;  %v9707_v58 = vld [vmem:[%s13073_s3 + $0x6b0] ss:$12 sps:$4 sm:$0xff]   ;;  %v9711_v60 = vld [vmem:[%s13073_s3 + $0x9c8] ss:$12 sps:$4 sm:$0xff]  }
 0x462   :  { %8626 = vmatpush3.bf16.msra.mxu0 %v9692_v47  ;;  %v9710_v59 = vld [vmem:[%s13073_s3 + $0x244] ss:$12 sps:$4 sm:$0xff]   ;;  %v9708_v63 = vld [vmem:[%s13073_s3 + $0x240] ss:$12 sps:$4 sm:$0xff]   ;;  %v9712_v0 = vld [vmem:[%s13073_s3 + $0x908] ss:$12 sps:$4 sm:$0xff]  }
 0x463   :  { %8627 = vmatprep.subr.bf16.mxu0 %v9696_v49  ;;  %v3733_v1 = vld [vmem:[#allocation5 + $0x68] sm:$0xff]  ;;  %v9716_v4 = vld [vmem:[%s13073_s3 + $0x9e0] ss:$12 sps:$4 sm:$0xff]   ;;  %v9723_v18 = vld [vmem:[%s13073_s3 + $0x288] ss:$12 sps:$4 sm:$0xff]  }
 0x464   :  { %6705 = vmatpush1.bf16.msra.mxu1 %v9693_v50  ;;  %v9715_v25 = vld [vmem:[%s13073_s3 + $0x25c] ss:$12 sps:$4 sm:$0xff]   ;;  %v9713_v7 = vld [vmem:[%s13073_s3 + $0x258] ss:$12 sps:$4 sm:$0xff]   ;;  %v11876_v11 = vpack.c.bf16 %v3733_v1, %v3733_v1  ;;  %v9717_v12 = vld [vmem:[%s13073_s3 + $0x920] ss:$12 sps:$4 sm:$0xff]  }
 0x465   :  { %6706 = vmatprep.subr.bf16.mxu1 %v9700_v51  ;;  %v9720_v13 = vld [vmem:[%s13073_s3 + $0x274] ss:$12 sps:$4 sm:$0xff]   ;;  %v9721_v14 = vld [vmem:[%s13073_s3 + $0x9f8] ss:$12 sps:$4 sm:$0xff]   ;;  %v9718_v15 = vld [vmem:[%s13073_s3 + $0x270] ss:$12 sps:$4 sm:$0xff]  }
 0x466   :  { %8628 = vmatpush3.bf16.msra.mxu0 %v9697_v9  ;;  %v9722_v16 = vld [vmem:[%s13073_s3 + $0x938] ss:$12 sps:$4 sm:$0xff]   ;;  %v9726_v62 = vld [vmem:[%s13073_s3 + $0xa10] ss:$12 sps:$4 sm:$0xff]   ;;  %v9731_v21 = vld [vmem:[%s13073_s3 + $0xa28] ss:$12 sps:$4 sm:$0xff]  }
 0x467   :  { %8629 = vmatprep.subr.bf16.mxu0 %v9701_v53  ;;  %v9725_v17 = vld [vmem:[%s13073_s3 + $0x28c] ss:$12 sps:$4 sm:$0xff]   ;;  %v9727_v19 = vld [vmem:[%s13073_s3 + $0x950] ss:$12 sps:$4 sm:$0xff]   ;;  %v9732_v24 = vld [vmem:[%s13073_s3 + $0x968] ss:$12 sps:$4 sm:$0xff]  }
 0x468   :  { %6707 = vmatpush1.bf16.msra.mxu1 %v9698_v52  ;;  %v9730_v20 = vld [vmem:[%s13073_s3 + $0x2a4] ss:$12 sps:$4 sm:$0xff]   ;;  %v9728_v22 = vld [vmem:[%s13073_s3 + $0x2a0] ss:$12 sps:$4 sm:$0xff]   ;;  %v9735_v28 = vld [vmem:[%s13073_s3 + $0x2bc] ss:$12 sps:$4 sm:$0xff]  }
 0x469   :  { %6708 = vmatprep.subr.bf16.mxu1 %v9705_v55  ;;  %v9736_v32 = vld [vmem:[%s13073_s3 + $0xa40] ss:$12 sps:$4 sm:$0xff]   ;;  %v9733_v33 = vld [vmem:[%s13073_s3 + $0x2b8] ss:$12 sps:$4 sm:$0xff]   ;;  %v9738_v36 = vld [vmem:[%s13073_s3 + $0x2d0] ss:$12 sps:$4 sm:$0xff]  }
 0x46a   :  { %8630 = vmatpush3.bf16.msra.mxu0 %v9702_v54  ;;  %v9737_v30 = vld [vmem:[%s13073_s3 + $0x980] ss:$12 sps:$4 sm:$0xff]   ;;  %v9741_v35 = vld [vmem:[%s13073_s3 + $0xa58] ss:$12 sps:$4 sm:$0xff]   ;;  %v9746_v39 = vld [vmem:[%s13073_s3 + $0xa70] ss:$12 sps:$4 sm:$0xff]  }
 0x46b   :  { %8631 = vmatprep.subr.bf16.mxu0 %v9706_v56  ;;  %v9740_v34 = vld [vmem:[%s13073_s3 + $0x2d4] ss:$12 sps:$4 sm:$0xff]   ;;  %v9742_v37 = vld [vmem:[%s13073_s3 + $0x998] ss:$12 sps:$4 sm:$0xff]   ;;  %v9747_v31 = vld [vmem:[%s13073_s3 + $0x9b0] ss:$12 sps:$4 sm:$0xff]  }
 0x46c   :  { %6709 = vmatpush1.bf16.msra.mxu1 %v9703_v57  ;;  %v9745_v38 = vld [vmem:[%s13073_s3 + $0x2ec] ss:$12 sps:$4 sm:$0xff]   ;;  %v9743_v40 = vld [vmem:[%s13073_s3 + $0x2e8] ss:$12 sps:$4 sm:$0xff]   ;;  %v9750_v41 = vld [vmem:[%s13073_s3 + $0x304] ss:$12 sps:$4 sm:$0xff]  }
 0x46d   :  { %6710 = vmatprep.subr.bf16.mxu1 %v9710_v59  ;;  %v3722_v42 = vld [vmem:[#allocation5 + $0x10] sm:$0xff]  ;;  %v9751_v43 = vld [vmem:[%s13073_s3 + $0xcc8] ss:$12 sps:$4 sm:$0xff]   ;;  %v3737_v48 = vld [vmem:[#allocation5 + $0x88] sm:$0xff] }
 0x46e   :  { %8632 = vmatpush3.bf16.msra.mxu0 %v9707_v58  ;;  %v3732_v44 = vld [vmem:[#allocation5 + $0x60] sm:$0xff]  ;;  %v9748_v45 = vld [vmem:[%s13073_s3 + $0x300] ss:$12 sps:$4 sm:$0xff]   ;;  %v9755_v49 = vld [vmem:[%s13073_s3 + $0x31c] ss:$12 sps:$4 sm:$0xff]   ;;  %v11970_v50 = vpack.c.bf16 %v3722_v42, %v3722_v42  ;;  %v11985_v54 = vpack.c.bf16 %v3737_v48, %v3737_v48 }
 0x46f   :  { %8661 = vmatprep.subr.bf16.mxu0 %v9711_v60  ;;  %v9752_v47 = vld [vmem:[%s13073_s3 + $0xc08] ss:$12 sps:$4 sm:$0xff]   ;;  %v11972_v9 = vpack.c.bf16 %v3732_v44, %v3732_v44  ;;  %v9753_v51 = vld [vmem:[%s13073_s3 + $0x318] ss:$12 sps:$4 sm:$0xff]   ;;  %v9756_v52 = vld [vmem:[%s13073_s3 + $0xce0] ss:$12 sps:$4 sm:$0xff]  }
 0x470   :  { %6711 = vmatpush1.bf16.msra.mxu1 %v9708_v63  ;;  %v9757_v53 = vld [vmem:[%s13073_s3 + $0xc20] ss:$12 sps:$4 sm:$0xff]   ;;  %v9761_v56 = vld [vmem:[%s13073_s3 + $0xcf8] ss:$12 sps:$4 sm:$0xff]   ;;  %v9758_v57 = vld [vmem:[%s13073_s3 + $0x330] ss:$12 sps:$4 sm:$0xff]  }
 0x471   :  { %7215 = vmatmul.mubr.bf16.vlgmr.msra.gmra.mrb[24].mxu0 %v11871_v6  ;;  %6712 = vmatprep.subr.bf16.mxu1 %v9715_v25  ;;  %v9760_v55 = vld [vmem:[%s13073_s3 + $0x334] ss:$12 sps:$4 sm:$0xff]   ;;  %v9762_v58 = vld [vmem:[%s13073_s3 + $0xc38] ss:$12 sps:$4 sm:$0xff]   ;;  %v9767_v61 = vld [vmem:[%s13073_s3 + $0xc50] ss:$12 sps:$4 sm:$0xff]  }
 0x472   :  { %8662 = vmatpush3.bf16.msra.mxu0 %v9712_v0  ;;  %7294 = vmatprep.mubr.bf16.mxu0 %v11876_v11  ;;  %v9765_v59 = vld [vmem:[%s13073_s3 + $0x34c] ss:$12 sps:$4 sm:$0xff]   ;;  %v9763_v60 = vld [vmem:[%s13073_s3 + $0x348] ss:$12 sps:$4 sm:$0xff]   ;;  %v9770_v63 = vld [vmem:[%s13073_s3 + $0x364] ss:$12 sps:$4 sm:$0xff]  }
 0x473   :  { %8663 = vmatprep.subr.bf16.mxu0 %v9716_v4  ;;  %v9771_v0 = vld [vmem:[%s13073_s3 + $0xd28] ss:$12 sps:$4 sm:$0xff]   ;;  %v9768_v1 = vld [vmem:[%s13073_s3 + $0x360] ss:$12 sps:$4 sm:$0xff]   ;;  %v9814_v44 = vld [vmem:[%s13073_s3 + $0x484] ss:$12 sps:$4 sm:$0xff]  }
 0x474   :  { %6713 = vmatpush1.bf16.msra.mxu1 %v9713_v7  ;;  %v9772_v25 = vld [vmem:[%s13073_s3 + $0xc68] ss:$12 sps:$4 sm:$0xff]   ;;  %v9776_v7 = vld [vmem:[%s13073_s3 + $0xd40] ss:$12 sps:$4 sm:$0xff]  }
 0x475   :  { %6714 = vmatprep.subr.bf16.mxu1 %v9720_v13  ;;  %v9775_v4 = vld [vmem:[%s13073_s3 + $0x37c] ss:$12 sps:$4 sm:$0xff]   ;;  %v9777_v13 = vld [vmem:[%s13073_s3 + $0xc80] ss:$12 sps:$4 sm:$0xff]  }
 0x476   :  { %8664 = vmatpush3.bf16.msra.mxu0 %v9717_v12  ;;  %v9773_v12 = vld [vmem:[%s13073_s3 + $0x378] ss:$12 sps:$4 sm:$0xff]   ;;  %v9817_v48 = vld [vmem:[%s13073_s3 + $0x49c] ss:$12 sps:$4 sm:$0xff]  }
 0x477   :  { %8665 = vmatprep.subr.bf16.mxu0 %v9721_v14  ;;  %v9780_v14 = vld [vmem:[%s13073_s3 + $0x394] ss:$12 sps:$4 sm:$0xff]   ;;  %v9811_v42 = vld [vmem:[%s13073_s3 + $0x46c] ss:$12 sps:$4 sm:$0xff]  }
 0x478   :  { %6715 = vmatpush1.bf16.msra.mxu1 %v9718_v15  ;;  %v9781_v15 = vld [vmem:[%s13073_s3 + $0xd58] ss:$12 sps:$4 sm:$0xff]  }
 0x479   :  { %6716 = vmatprep.subr.bf16.mxu1 %v9725_v17  ;;  %v9782_v17 = vld [vmem:[%s13073_s3 + $0xc98] ss:$12 sps:$4 sm:$0xff]  }
 0x47a   :  { %8666 = vmatpush3.bf16.msra.mxu0 %v9722_v16  ;;  %v9778_v16 = vld [vmem:[%s13073_s3 + $0x390] ss:$12 sps:$4 sm:$0xff]  }
 0x47b   :  { %8667 = vmatprep.subr.bf16.mxu0 %v9726_v62  ;;  %v9785_v62 = vld [vmem:[%s13073_s3 + $0x3ac] ss:$12 sps:$4 sm:$0xff]  }
 0x47c   :  { %6717 = vmatpush1.bf16.msra.mxu1 %v9723_v18  ;;  %v9783_v18 = vld [vmem:[%s13073_s3 + $0x3a8] ss:$12 sps:$4 sm:$0xff]  }
 0x47d   :  { %6718 = vmatprep.subr.bf16.mxu1 %v9730_v20  ;;  %v9787_v20 = vld [vmem:[%s13073_s3 + $0xcb0] ss:$12 sps:$4 sm:$0xff]  }
 0x47e   :  { %8668 = vmatpush3.bf16.msra.mxu0 %v9727_v19  ;;  %v9786_v19 = vld [vmem:[%s13073_s3 + $0xd70] ss:$12 sps:$4 sm:$0xff]  }
 0x47f   :  { %8669 = vmatprep.subr.bf16.mxu0 %v9731_v21  ;;  %v9790_v21 = vld [vmem:[%s13073_s3 + $0x3c4] ss:$12 sps:$4 sm:$0xff]  }
 0x480   :  { %6719 = vmatpush1.bf16.msra.mxu1 %v9728_v22  ;;  %v3736_v22 = vld [vmem:[#allocation5 + $0x80] sm:$0xff] }
 0x481   :  { %6720 = vmatprep.subr.bf16.mxu1 %v9735_v28  ;;  %v9793_v28 = vld [vmem:[%s13073_s3 + $0x3dc] ss:$12 sps:$4 sm:$0xff]  }
 0x482   :  { %8670 = vmatpush3.bf16.msra.mxu0 %v9732_v24  ;;  %v9788_v24 = vld [vmem:[%s13073_s3 + $0x3c0] ss:$12 sps:$4 sm:$0xff]  }
 0x483   :  { %8671 = vmatprep.subr.bf16.mxu0 %v9736_v32  ;;  %v12070_v32 = vpack.c.bf16 %v3736_v22, %v3736_v22  ;;  %v9862_v22 = vld [vmem:[%s13073_s3 + $0x604] ss:$12 sps:$4 sm:$0xff]  }
 0x484   :  { %6721 = vmatpush1.bf16.msra.mxu1 %v9733_v33  ;;  %v9791_v33 = vld [vmem:[%s13073_s3 + $0x3d8] ss:$12 sps:$4 sm:$0xff]  }
 0x485   :  { %6722 = vmatprep.subr.bf16.mxu1 %v9740_v34  ;;  %v9794_v34 = vld [vmem:[%s13073_s3 + $0x3f0] ss:$12 sps:$4 sm:$0xff]  }
 0x486   :  { %8672 = vmatpush3.bf16.msra.mxu0 %v9737_v30  ;;  %v9796_v30 = vld [vmem:[%s13073_s3 + $0x3f4] ss:$12 sps:$4 sm:$0xff]  }
 0x487   :  { %8673 = vmatprep.subr.bf16.mxu0 %v9741_v35  ;;  %v9799_v35 = vld [vmem:[%s13073_s3 + $0x40c] ss:$12 sps:$4 sm:$0xff]  }
 0x488   :  { %6723 = vmatpush1.bf16.msra.mxu1 %v9738_v36  ;;  %v9797_v36 = vld [vmem:[%s13073_s3 + $0x408] ss:$12 sps:$4 sm:$0xff]  }
 0x489   :  { %6724 = vmatprep.subr.bf16.mxu1 %v9745_v38  ;;  %v9800_v38 = vld [vmem:[%s13073_s3 + $0x420] ss:$12 sps:$4 sm:$0xff]  }
 0x48a   :  { %8674 = vmatpush3.bf16.msra.mxu0 %v9742_v37  ;;  %v9802_v37 = vld [vmem:[%s13073_s3 + $0x424] ss:$12 sps:$4 sm:$0xff]  }
 0x48b   :  { %8675 = vmatprep.subr.bf16.mxu0 %v9746_v39  ;;  %v9805_v39 = vld [vmem:[%s13073_s3 + $0x43c] ss:$12 sps:$4 sm:$0xff]  }
 0x48c   :  { %6725 = vmatpush1.bf16.msra.mxu1 %v9743_v40  ;;  %v9803_v40 = vld [vmem:[%s13073_s3 + $0x438] ss:$12 sps:$4 sm:$0xff]  }
 0x48d   :  { %6735 = vmatprep.subr.bf16.mxu1 %v9750_v41  ;;  %v9806_v41 = vld [vmem:[%s13073_s3 + $0x450] ss:$12 sps:$4 sm:$0xff]  }
 0x48e   :  { %8676 = vmatpush3.bf16.msra.mxu0 %v9747_v31  ;;  %v9808_v31 = vld [vmem:[%s13073_s3 + $0x454] ss:$12 sps:$4 sm:$0xff]  }
 0x48f   :  { %8705 = vmatprep.subr.bf16.mxu0 %v9751_v43  ;;  %6727 = vmatmul.mubr.bf16.vlgmr.msra.gmra.mrb[0].mxu1 %v11970_v50  ;;  %v9809_v43 = vld [vmem:[%s13073_s3 + $0x468] ss:$12 sps:$4 sm:$0xff]  }
 0x490   :  { %6736 = vmatpush1.bf16.msra.mxu1 %v9748_v45  ;;  %6767 = vmatprep.mubr.bf16.mxu1 %v11725_v8  ;;  %v9766_v8 = vld [vmem:[%s13073_s3 + $0xd10] ss:$12 sps:$4 sm:$0xff]   ;;  %v3727_v45 = vld [vmem:[#allocation5 + $0x38] sm:$0xff] }
 0x491   :  { %7295 = vmatmul.mubr.bf16.vlgmr.msra.gmra.mrb[28].mxu0 %v11972_v9  ;;  %6737 = vmatprep.subr.bf16.mxu1 %v9755_v49  ;;  %v12122_v49 = vpack.c.bf16 %v3727_v45, %v3727_v45 }
 0x492   :  { %8706 = vmatpush3.bf16.msra.mxu0 %v9752_v47  ;;  %7374 = vmatprep.mubr.bf16.mxu0 %v11985_v54  ;;  %v9812_v47 = vld [vmem:[%s13073_s3 + $0x480] ss:$12 sps:$4 sm:$0xff]  }
 0x493   :  { %8707 = vmatprep.subr.bf16.mxu0 %v9756_v52  ;;  %v9820_v52 = vld [vmem:[%s13073_s3 + $0x4b4] ss:$12 sps:$4 sm:$0xff]  }
 0x494   :  { %6738 = vmatpush1.bf16.msra.mxu1 %v9753_v51  ;;  %v9815_v51 = vld [vmem:[%s13073_s3 + $0x498] ss:$12 sps:$4 sm:$0xff]  }
 0x495   :  { %6739 = vmatprep.subr.bf16.mxu1 %v9760_v55  ;;  %v9821_v55 = vld [vmem:[%s13073_s3 + $0x4c8] ss:$12 sps:$4 sm:$0xff]  }
 0x496   :  { %8708 = vmatpush3.bf16.msra.mxu0 %v9757_v53  ;;  %v9818_v53 = vld [vmem:[%s13073_s3 + $0x4b0] ss:$12 sps:$4 sm:$0xff]  }
 0x497   :  { %8709 = vmatprep.subr.bf16.mxu0 %v9761_v56  ;;  %v9826_v56 = vld [vmem:[%s13073_s3 + $0x4e4] ss:$12 sps:$4 sm:$0xff]  }
 0x498   :  { %6740 = vmatpush1.bf16.msra.mxu1 %v9758_v57  ;;  %v9824_v57 = vld [vmem:[%s13073_s3 + $0x4e0] ss:$12 sps:$4 sm:$0xff]  }
 0x499   :  { %6741 = vmatprep.subr.bf16.mxu1 %v9765_v59  ;;  %v9827_v59 = vld [vmem:[%s13073_s3 + $0x4f8] ss:$12 sps:$4 sm:$0xff]  }
 0x49a   :  { %8710 = vmatpush3.bf16.msra.mxu0 %v9762_v58  ;;  %v9829_v58 = vld [vmem:[%s13073_s3 + $0x4fc] ss:$12 sps:$4 sm:$0xff]  }
 0x49b   :  { %8711 = vmatprep.subr.bf16.mxu0 %v9766_v8  ;;  %v9832_v8 = vld [vmem:[%s13073_s3 + $0x514] ss:$12 sps:$4 sm:$0xff]  }
 0x49c   :  { %6742 = vmatpush1.bf16.msra.mxu1 %v9763_v60  ;;  %v9830_v60 = vld [vmem:[%s13073_s3 + $0x510] ss:$12 sps:$4 sm:$0xff]  }
 0x49d   :  { %6743 = vmatprep.subr.bf16.mxu1 %v9770_v63  ;;  %v9833_v63 = vld [vmem:[%s13073_s3 + $0x528] ss:$12 sps:$4 sm:$0xff]  }
 0x49e   :  { %8712 = vmatpush3.bf16.msra.mxu0 %v9767_v61  ;;  %v9835_v61 = vld [vmem:[%s13073_s3 + $0x52c] ss:$12 sps:$4 sm:$0xff]  }
 0x49f   :  { %8713 = vmatprep.subr.bf16.mxu0 %v9771_v0  ;;  %v9838_v0 = vld [vmem:[%s13073_s3 + $0x544] ss:$12 sps:$4 sm:$0xff]  }
 0x4a0   :  { %6744 = vmatpush1.bf16.msra.mxu1 %v9768_v1  ;;  %v9836_v1 = vld [vmem:[%s13073_s3 + $0x540] ss:$12 sps:$4 sm:$0xff]  }
 0x4a1   :  { %6745 = vmatprep.subr.bf16.mxu1 %v9775_v4  ;;  %v9839_v4 = vld [vmem:[%s13073_s3 + $0x558] ss:$12 sps:$4 sm:$0xff]  }
 0x4a2   :  { %8714 = vmatpush3.bf16.msra.mxu0 %v9772_v25  ;;  %v9841_v25 = vld [vmem:[%s13073_s3 + $0x55c] ss:$12 sps:$4 sm:$0xff]  }
 0x4a3   :  { %8715 = vmatprep.subr.bf16.mxu0 %v9776_v7  ;;  %v9844_v7 = vld [vmem:[%s13073_s3 + $0x574] ss:$12 sps:$4 sm:$0xff]  }
 0x4a4   :  { %6746 = vmatpush1.bf16.msra.mxu1 %v9773_v12  ;;  %v9842_v12 = vld [vmem:[%s13073_s3 + $0x570] ss:$12 sps:$4 sm:$0xff]  }
 0x4a5   :  { %6747 = vmatprep.subr.bf16.mxu1 %v9780_v14  ;;  %v9845_v14 = vld [vmem:[%s13073_s3 + $0x588] ss:$12 sps:$4 sm:$0xff]  }
 0x4a6   :  { %8716 = vmatpush3.bf16.msra.mxu0 %v9777_v13  ;;  %v9847_v13 = vld [vmem:[%s13073_s3 + $0x58c] ss:$12 sps:$4 sm:$0xff]  }
 0x4a7   :  { %8717 = vmatprep.subr.bf16.mxu0 %v9781_v15  ;;  %v9850_v15 = vld [vmem:[%s13073_s3 + $0x5a4] ss:$12 sps:$4 sm:$0xff]  }
 0x4a8   :  { %6748 = vmatpush1.bf16.msra.mxu1 %v9778_v16  ;;  %v9848_v16 = vld [vmem:[%s13073_s3 + $0x5a0] ss:$12 sps:$4 sm:$0xff]  }
 0x4a9   :  { %6749 = vmatprep.subr.bf16.mxu1 %v9785_v62  ;;  %v9851_v62 = vld [vmem:[%s13073_s3 + $0x5b8] ss:$12 sps:$4 sm:$0xff]  }
 0x4aa   :  { %8718 = vmatpush3.bf16.msra.mxu0 %v9782_v17  ;;  %v9853_v17 = vld [vmem:[%s13073_s3 + $0x5bc] ss:$12 sps:$4 sm:$0xff]  }
 0x4ab   :  { %8719 = vmatprep.subr.bf16.mxu0 %v9786_v19  ;;  %v9854_v19 = vld [vmem:[%s13073_s3 + $0x5d0] ss:$12 sps:$4 sm:$0xff]  }
 0x4ac   :  { %6750 = vmatpush1.bf16.msra.mxu1 %v9783_v18  ;;  %v9856_v18 = vld [vmem:[%s13073_s3 + $0x5d4] ss:$12 sps:$4 sm:$0xff]  }
 0x4ad   :  { %6751 = vmatprep.subr.bf16.mxu1 %v9790_v21  ;;  %v9857_v21 = vld [vmem:[%s13073_s3 + $0x5e8] ss:$12 sps:$4 sm:$0xff]  }
 0x4ae   :  { %8720 = vmatpush3.bf16.msra.mxu0 %v9787_v20  ;;  %v9859_v20 = vld [vmem:[%s13073_s3 + $0x5ec] ss:$12 sps:$4 sm:$0xff]  }
 0x4af   :  { %8758 = vmatprep.subr.bf16.mxu0 %v10219_v46 }
 0x4b0   :  { %6752 = vmatpush1.bf16.msra.mxu1 %v9788_v24  ;;  %v3726_v24 = vld [vmem:[#allocation5 + $0x30] sm:$0xff] }
 0x4b1   :  { %7375 = vmatmul.mubr.bf16.vlgmr.msra.gmra.mrb[32].mxu0 %v12070_v32  ;;  %6753 = vmatprep.subr.bf16.mxu1 %v9793_v28  ;;  %v9860_v28 = vld [vmem:[%s13073_s3 + $0x600] ss:$12 sps:$4 sm:$0xff]  }
 0x4b2   :  { %8774 = vmatprep.mubr.msk.bf16.mxu0 %vm10220_vm15, %v10219_v46 }
 0x4b4   :  { %6754 = vmatpush1.bf16.msra.mxu1 %v9791_v33  ;;  %v12219_v33 = vpack.c.bf16 %v3726_v24, %v3726_v24  ;;  %v9914_v24 = vld [vmem:[%s13073_s3 + $0x7b0] ss:$12 sps:$4 sm:$0xff]  }
 0x4b5   :  { %6755 = vmatprep.subr.bf16.mxu1 %v9796_v30  ;;  %v9865_v30 = vld [vmem:[%s13073_s3 + $0x61c] ss:$12 sps:$4 sm:$0xff]  }
 0x4b8   :  { %6756 = vmatpush1.bf16.msra.mxu1 %v9794_v34  ;;  %v9863_v34 = vld [vmem:[%s13073_s3 + $0x618] ss:$12 sps:$4 sm:$0xff]  }
 0x4b9   :  { %6757 = vmatprep.subr.bf16.mxu1 %v9799_v35  ;;  %v9868_v35 = vld [vmem:[%s13073_s3 + $0x634] ss:$12 sps:$4 sm:$0xff]  }
 0x4bc   :  { %6758 = vmatpush1.bf16.msra.mxu1 %v9797_v36  ;;  %v9866_v36 = vld [vmem:[%s13073_s3 + $0x630] ss:$12 sps:$4 sm:$0xff]  }
 0x4bd   :  { %6759 = vmatprep.subr.bf16.mxu1 %v9802_v37  ;;  %v9871_v37 = vld [vmem:[%s13073_s3 + $0x64c] ss:$12 sps:$4 sm:$0xff]  }
 0x4c0   :  { %6760 = vmatpush1.bf16.msra.mxu1 %v9800_v38  ;;  %v9874_v38 = vld [vmem:[%s13073_s3 + $0x664] ss:$12 sps:$4 sm:$0xff]  }
 0x4c1   :  { %6761 = vmatprep.subr.bf16.mxu1 %v9805_v39  ;;  %v9872_v39 = vld [vmem:[%s13073_s3 + $0x660] ss:$12 sps:$4 sm:$0xff]  }
 0x4c4   :  { %6762 = vmatpush1.bf16.msra.mxu1 %v9803_v40  ;;  %v9877_v40 = vld [vmem:[%s13073_s3 + $0x67c] ss:$12 sps:$4 sm:$0xff]  }
 0x4c5   :  { %6763 = vmatprep.subr.bf16.mxu1 %v9808_v31  ;;  %v9875_v31 = vld [vmem:[%s13073_s3 + $0x678] ss:$12 sps:$4 sm:$0xff]  }
 0x4c8   :  { %6764 = vmatpush1.bf16.msra.mxu1 %v9806_v41  ;;  %v9880_v41 = vld [vmem:[%s13073_s3 + $0x694] ss:$12 sps:$4 sm:$0xff]  }
 0x4c9   :  { %6765 = vmatprep.subr.bf16.mxu1 %v9811_v42 }
 0x4cc   :  { %6766 = vmatpush1.bf16.msra.mxu1 %v9809_v43 }
 0x4cd   :  { %6776 = vmatprep.subr.bf16.mxu1 %v9814_v44  ;;  %v9878_v44 = vld [vmem:[%s13073_s3 + $0x690] ss:$12 sps:$4 sm:$0xff]  }
 0x4cf   :  { %6768 = vmatmul.mubr.bf16.vlgmr.msra.gmra.mrb[0].mxu1 %v11727_v10  ;;  %v9823_v10 = vld [vmem:[%s13073_s3 + $0x4cc] ss:$12 sps:$4 sm:$0xff]  }
 0x4d0   :  { %6777 = vmatpush1.bf16.msra.mxu1 %v9812_v47  ;;  %6808 = vmatprep.mubr.bf16.mxu1 %v12122_v49 }
 0x4d1   :  { %6778 = vmatprep.subr.bf16.mxu1 %v9817_v48  ;;  %v9883_v48 = vld [vmem:[%s13073_s3 + $0x6ac] ss:$12 sps:$4 sm:$0xff]  }
 0x4d4   :  { %6779 = vmatpush1.bf16.msra.mxu1 %v9815_v51 }
 0x4d5   :  { %6780 = vmatprep.subr.bf16.mxu1 %v9820_v52  ;;  %v9881_v52 = vld [vmem:[%s13073_s3 + $0x6a8] ss:$12 sps:$4 sm:$0xff]  }
 0x4d8   :  { %6781 = vmatpush1.bf16.msra.mxu1 %v9818_v53  ;;  %v9886_v53 = vld [vmem:[%s13073_s3 + $0x6c4] ss:$12 sps:$4 sm:$0xff]  }
 0x4d9   :  { %6782 = vmatprep.subr.bf16.mxu1 %v9823_v10  ;;  %v9884_v10 = vld [vmem:[%s13073_s3 + $0x6c0] ss:$12 sps:$4 sm:$0xff]  }
 0x4dc   :  { %6783 = vmatpush1.bf16.msra.mxu1 %v9821_v55  ;;  %v9889_v55 = vld [vmem:[%s13073_s3 + $0x6dc] ss:$12 sps:$4 sm:$0xff]  }
 0x4dd   :  { %6784 = vmatprep.subr.bf16.mxu1 %v9826_v56  ;;  %v9887_v56 = vld [vmem:[%s13073_s3 + $0x6d8] ss:$12 sps:$4 sm:$0xff]  }
 0x4e0   :  { %6785 = vmatpush1.bf16.msra.mxu1 %v9824_v57  ;;  %v9892_v57 = vld [vmem:[%s13073_s3 + $0x6f4] ss:$12 sps:$4 sm:$0xff]  }
 0x4e1   :  { %6786 = vmatprep.subr.bf16.mxu1 %v9829_v58  ;;  %v9890_v58 = vld [vmem:[%s13073_s3 + $0x6f0] ss:$12 sps:$4 sm:$0xff]  }
 0x4e4   :  { %6787 = vmatpush1.bf16.msra.mxu1 %v9827_v59  ;;  %v9895_v59 = vld [vmem:[%s13073_s3 + $0x70c] ss:$12 sps:$4 sm:$0xff]  }
 0x4e5   :  { %6788 = vmatprep.subr.bf16.mxu1 %v9832_v8  ;;  %v9893_v8 = vld [vmem:[%s13073_s3 + $0x708] ss:$12 sps:$4 sm:$0xff]  }
 0x4e8   :  { %6789 = vmatpush1.bf16.msra.mxu1 %v9830_v60  ;;  %v9898_v60 = vld [vmem:[%s13073_s3 + $0x724] ss:$12 sps:$4 sm:$0xff]  }
 0x4e9   :  { %6790 = vmatprep.subr.bf16.mxu1 %v9835_v61  ;;  %v9896_v61 = vld [vmem:[%s13073_s3 + $0x720] ss:$12 sps:$4 sm:$0xff]  }
 0x4ec   :  { %6791 = vmatpush1.bf16.msra.mxu1 %v9833_v63  ;;  %v9901_v63 = vld [vmem:[%s13073_s3 + $0x73c] ss:$12 sps:$4 sm:$0xff]  }
 0x4ed   :  { %6792 = vmatprep.subr.bf16.mxu1 %v9838_v0  ;;  %v9899_v0 = vld [vmem:[%s13073_s3 + $0x738] ss:$12 sps:$4 sm:$0xff]  }
 0x4f0   :  { %6793 = vmatpush1.bf16.msra.mxu1 %v9836_v1  ;;  %v9904_v1 = vld [vmem:[%s13073_s3 + $0x754] ss:$12 sps:$4 sm:$0xff]  }
 0x4f1   :  { %6794 = vmatprep.subr.bf16.mxu1 %v9841_v25 }
 0x4f4   :  { %6795 = vmatpush1.bf16.msra.mxu1 %v9839_v4 }
 0x4f5   :  { %6796 = vmatprep.subr.bf16.mxu1 %v9844_v7  ;;  %v9902_v7 = vld [vmem:[%s13073_s3 + $0x750] ss:$12 sps:$4 sm:$0xff]  }
 0x4f8   :  { %6797 = vmatpush1.bf16.msra.mxu1 %v9842_v12 }
 0x4f9   :  { %6798 = vmatprep.subr.bf16.mxu1 %v9847_v13 }
 0x4fc   :  { %6799 = vmatpush1.bf16.msra.mxu1 %v9845_v14  ;;  %v9907_v14 = vld [vmem:[%s13073_s3 + $0x76c] ss:$12 sps:$4 sm:$0xff]  }
 0x4fd   :  { %6800 = vmatprep.subr.bf16.mxu1 %v9850_v15 }
 0x500   :  { %6801 = vmatpush1.bf16.msra.mxu1 %v9848_v16  ;;  %v9905_v16 = vld [vmem:[%s13073_s3 + $0x768] ss:$12 sps:$4 sm:$0xff]  }
 0x501   :  { %6802 = vmatprep.subr.bf16.mxu1 %v9853_v17  ;;  %v9910_v17 = vld [vmem:[%s13073_s3 + $0x784] ss:$12 sps:$4 sm:$0xff]  }
 0x504   :  { %6803 = vmatpush1.bf16.msra.mxu1 %v9851_v62  ;;  %v3731_v62 = vld [vmem:[#allocation5 + $0x58] sm:$0xff] }
 0x505   :  { %6804 = vmatprep.subr.bf16.mxu1 %v9856_v18  ;;  %v9908_v18 = vld [vmem:[%s13073_s3 + $0x780] ss:$12 sps:$4 sm:$0xff]  }
 0x508   :  { %6805 = vmatpush1.bf16.msra.mxu1 %v9854_v19  ;;  %v9913_v19 = vld [vmem:[%s13073_s3 + $0x79c] ss:$12 sps:$4 sm:$0xff]  }
 0x509   :  { %6806 = vmatprep.subr.bf16.mxu1 %v9859_v20  ;;  %v12326_v20 = vpack.c.bf16 %v3731_v62, %v3731_v62  ;;  %v9959_v62 = vld [vmem:[%s13073_s3 + $0x918] ss:$12 sps:$4 sm:$0xff]  }
 0x50c   :  { %6807 = vmatpush1.bf16.msra.mxu1 %v9857_v21  ;;  %v9911_v21 = vld [vmem:[%s13073_s3 + $0x798] ss:$12 sps:$4 sm:$0xff]  }
 0x50d   :  { %6817 = vmatprep.subr.bf16.mxu1 %v9862_v22  ;;  %v9916_v22 = vld [vmem:[%s13073_s3 + $0x7b4] ss:$12 sps:$4 sm:$0xff]  }
 0x50f   :  { %6809 = vmatmul.mubr.bf16.vlgmr.msra.gmra.mrb[0].mxu1 %v12219_v33 }
 0x510   :  { %6818 = vmatpush1.bf16.msra.mxu1 %v9860_v28  ;;  %6849 = vmatprep.mubr.bf16.mxu1 %v11764_v23  ;;  %v9869_v23 = vld [vmem:[%s13073_s3 + $0x648] ss:$12 sps:$4 sm:$0xff]  }
 0x511   :  { %6819 = vmatprep.subr.bf16.mxu1 %v9865_v30  ;;  %v9917_v28 = vld [vmem:[%s13073_s3 + $0x7c8] ss:$12 sps:$4 sm:$0xff]   ;;  %v9922_v30 = vld [vmem:[%s13073_s3 + $0x7e4] ss:$12 sps:$4 sm:$0xff]  }
 0x514   :  { %6820 = vmatpush1.bf16.msra.mxu1 %v9863_v34  ;;  %v9920_v34 = vld [vmem:[%s13073_s3 + $0x7e0] ss:$12 sps:$4 sm:$0xff]  }
 0x515   :  { %6821 = vmatprep.subr.bf16.mxu1 %v9868_v35  ;;  %v9925_v35 = vld [vmem:[%s13073_s3 + $0x7fc] ss:$12 sps:$4 sm:$0xff]  }
 0x518   :  { %6822 = vmatpush1.bf16.msra.mxu1 %v9866_v36  ;;  %v9923_v36 = vld [vmem:[%s13073_s3 + $0x7f8] ss:$12 sps:$4 sm:$0xff]  }
 0x519   :  { %6823 = vmatprep.subr.bf16.mxu1 %v9871_v37  ;;  %v9928_v37 = vld [vmem:[%s13073_s3 + $0x814] ss:$12 sps:$4 sm:$0xff]  }
 0x51c   :  { %6824 = vmatpush1.bf16.msra.mxu1 %v9869_v23 }
 0x51d   :  { %6825 = vmatprep.subr.bf16.mxu1 %v9874_v38 }
 0x520   :  { %6826 = vmatpush1.bf16.msra.mxu1 %v9872_v39  ;;  %v9926_v39 = vld [vmem:[%s13073_s3 + $0x810] ss:$12 sps:$4 sm:$0xff]  }
 0x521   :  { %6827 = vmatprep.subr.bf16.mxu1 %v9877_v40 }
 0x524   :  { %v8589_v42 = vpop.f32.mrb[20].mxu0  ;;  %6828 = vmatpush1.bf16.msra.mxu1 %v9875_v31 }
 0x525   :  { %v8590_v43 = vpop.f32.mrb[21].mxu0  ;;  %6829 = vmatprep.subr.bf16.mxu1 %v9880_v41  ;;  %v9931_v41 = vld [vmem:[%s13073_s3 + $0x82c] ss:$12 sps:$4 sm:$0xff]  }
 0x526   :  { %v12259_v45 = vadd.f32 %v8590_v43, %v8589_v42  ;;  %v8592_v47 = vpop.f32.mrb[22].mxu0  ;;  %v9929_v43 = vld [vmem:[%s13073_s3 + $0x828] ss:$12 sps:$4 sm:$0xff]  }
 0x527   :  { %v8593_v51 = vpop.f32.mrb[23].mxu0  ;;  %v9932_v47 = vld [vmem:[%s13073_s3 + $0x840] ss:$12 sps:$4 sm:$0xff]  }
 0x528   :  { %6830 = vmatpush1.bf16.msra.mxu1 %v9878_v44  ;;  %v9934_v44 = vld [vmem:[%s13073_s3 + $0x844] ss:$12 sps:$4 sm:$0xff]  }
 0x529   :  { %6831 = vmatprep.subr.bf16.mxu1 %v9883_v48  ;;  %v9937_v48 = vld [vmem:[%s13073_s3 + $0x85c] ss:$12 sps:$4 sm:$0xff]   ;;  %v9935_v51 = vld [vmem:[%s13073_s3 + $0x858] ss:$12 sps:$4 sm:$0xff]  }
 0x52c   :  { %6832 = vmatpush1.bf16.msra.mxu1 %v9881_v52  ;;  %v9940_v52 = vld [vmem:[%s13073_s3 + $0x874] ss:$12 sps:$4 sm:$0xff]  }
 0x52d   :  { %6833 = vmatprep.subr.bf16.mxu1 %v9886_v53  ;;  %v9938_v53 = vld [vmem:[%s13073_s3 + $0x870] ss:$12 sps:$4 sm:$0xff]  }
 0x530   :  { %6834 = vmatpush1.bf16.msra.mxu1 %v9884_v10  ;;  %v9943_v10 = vld [vmem:[%s13073_s3 + $0x88c] ss:$12 sps:$4 sm:$0xff]  }
 0x531   :  { %6835 = vmatprep.subr.bf16.mxu1 %v9889_v55  ;;  %v9941_v55 = vld [vmem:[%s13073_s3 + $0x888] ss:$12 sps:$4 sm:$0xff]  }
 0x534   :  { %6836 = vmatpush1.bf16.msra.mxu1 %v9887_v56  ;;  %v9946_v56 = vld [vmem:[%s13073_s3 + $0x8a4] ss:$12 sps:$4 sm:$0xff]  }
 0x535   :  { %6837 = vmatprep.subr.bf16.mxu1 %v9892_v57  ;;  %v9944_v57 = vld [vmem:[%s13073_s3 + $0x8a0] ss:$12 sps:$4 sm:$0xff]  }
 0x538   :  { %6838 = vmatpush1.bf16.msra.mxu1 %v9890_v58  ;;  %v9949_v58 = vld [vmem:[%s13073_s3 + $0x8bc] ss:$12 sps:$4 sm:$0xff]  }
 0x539   :  { %6839 = vmatprep.subr.bf16.mxu1 %v9895_v59  ;;  %v9947_v59 = vld [vmem:[%s13073_s3 + $0x8b8] ss:$12 sps:$4 sm:$0xff]  }
 0x53c   :  { %6840 = vmatpush1.bf16.msra.mxu1 %v9893_v8  ;;  %v9952_v8 = vld [vmem:[%s13073_s3 + $0x8d4] ss:$12 sps:$4 sm:$0xff]  }
 0x53d   :  { %6841 = vmatprep.subr.bf16.mxu1 %v9898_v60 }
 0x540   :  { %6842 = vmatpush1.bf16.msra.mxu1 %v9896_v61 }
 0x541   :  { %6843 = vmatprep.subr.bf16.mxu1 %v9901_v63  ;;  %v9950_v63 = vld [vmem:[%s13073_s3 + $0x8d0] ss:$12 sps:$4 sm:$0xff]  }
 0x544   :  { %v8633_v25 = vpop.f32.mrb[24].mxu0  ;;  %6844 = vmatpush1.bf16.msra.mxu1 %v9899_v0 }
 0x545   :  { %v8634_v4 = vpop.f32.mrb[25].mxu0  ;;  %6845 = vmatprep.subr.bf16.mxu1 %v9904_v1 }
 0x546   :  { %v12309_v12 = vadd.f32 %v8634_v4, %v8633_v25  ;;  %v8636_v13 = vpop.f32.mrb[26].mxu0  ;;  %v9955_v25 = vld [vmem:[%s13073_s3 + $0x8ec] ss:$12 sps:$4 sm:$0xff]  }
 0x547   :  { %v8637_v15 = vpop.f32.mrb[27].mxu0  ;;  %v9958_v13 = vld [vmem:[%s13073_s3 + $0x904] ss:$12 sps:$4 sm:$0xff]  }
 0x548   :  { %6846 = vmatpush1.bf16.msra.mxu1 %v9902_v7  ;;  %v9953_v7 = vld [vmem:[%s13073_s3 + $0x8e8] ss:$12 sps:$4 sm:$0xff]   ;;  %v9956_v15 = vld [vmem:[%s13073_s3 + $0x900] ss:$12 sps:$4 sm:$0xff]  }
 0x549   :  { %6847 = vmatprep.subr.bf16.mxu1 %v9907_v14  ;;  %v3730_v14 = vld [vmem:[#allocation5 + $0x50] sm:$0xff] }
 0x54c   :  { %6848 = vmatpush1.bf16.msra.mxu1 %v9905_v16  ;;  %v12427_v16 = vpack.c.bf16 %v3730_v14, %v3730_v14  ;;  %v10024_v14 = vld [vmem:[%s13073_s3 + $0xb14] ss:$12 sps:$4 sm:$0xff]  }
 0x54d   :  { %6858 = vmatprep.subr.bf16.mxu1 %v9910_v17  ;;  %v9961_v17 = vld [vmem:[%s13073_s3 + $0x91c] ss:$12 sps:$4 sm:$0xff]  }
 0x54f   :  { %6850 = vmatmul.mubr.bf16.vlgmr.msra.gmra.mrb[0].mxu1 %v11871_v6  ;;  %v9919_v6 = vld [vmem:[%s13073_s3 + $0x7cc] ss:$12 sps:$4 sm:$0xff]  }
 0x550   :  { %6859 = vmatpush1.bf16.msra.mxu1 %v9908_v18  ;;  %6890 = vmatprep.mubr.bf16.mxu1 %v12326_v20  ;;  %v9964_v18 = vld [vmem:[%s13073_s3 + $0x934] ss:$12 sps:$4 sm:$0xff]  }
 0x551   :  { %6860 = vmatprep.subr.bf16.mxu1 %v9913_v19  ;;  %v9962_v19 = vld [vmem:[%s13073_s3 + $0x930] ss:$12 sps:$4 sm:$0xff]  }
 0x554   :  { %6861 = vmatpush1.bf16.msra.mxu1 %v9911_v21  ;;  %v9967_v21 = vld [vmem:[%s13073_s3 + $0x94c] ss:$12 sps:$4 sm:$0xff]  }
 0x555   :  { %6862 = vmatprep.subr.bf16.mxu1 %v9916_v22  ;;  %v9970_v22 = vld [vmem:[%s13073_s3 + $0x964] ss:$12 sps:$4 sm:$0xff]  }
 0x558   :  { %6863 = vmatpush1.bf16.msra.mxu1 %v9914_v24  ;;  %v9968_v24 = vld [vmem:[%s13073_s3 + $0x960] ss:$12 sps:$4 sm:$0xff]  }
 0x559   :  { %6864 = vmatprep.subr.bf16.mxu1 %v9919_v6  ;;  %v9973_v6 = vld [vmem:[%s13073_s3 + $0x97c] ss:$12 sps:$4 sm:$0xff]  }
 0x55c   :  { %6865 = vmatpush1.bf16.msra.mxu1 %v9917_v28  ;;  %v9971_v28 = vld [vmem:[%s13073_s3 + $0x978] ss:$12 sps:$4 sm:$0xff]  }
 0x55d   :  { %6866 = vmatprep.subr.bf16.mxu1 %v9922_v30  ;;  %v9976_v30 = vld [vmem:[%s13073_s3 + $0x994] ss:$12 sps:$4 sm:$0xff]  }
 0x560   :  { %6867 = vmatpush1.bf16.msra.mxu1 %v9920_v34  ;;  %v9974_v34 = vld [vmem:[%s13073_s3 + $0x990] ss:$12 sps:$4 sm:$0xff]  }
 0x561   :  { %6868 = vmatprep.subr.bf16.mxu1 %v9925_v35  ;;  %v9979_v35 = vld [vmem:[%s13073_s3 + $0x9ac] ss:$12 sps:$4 sm:$0xff]  }
 0x564   :  { %v8677_v23 = vpop.f32.mrb[28].mxu0  ;;  %6869 = vmatpush1.bf16.msra.mxu1 %v9923_v36  ;;  %v9977_v36 = vld [vmem:[%s13073_s3 + $0x9a8] ss:$12 sps:$4 sm:$0xff]  }
 0x565   :  { %v8678_v38 = vpop.f32.mrb[29].mxu0  ;;  %6870 = vmatprep.subr.bf16.mxu1 %v9928_v37  ;;  %v9982_v37 = vld [vmem:[%s13073_s3 + $0x9c4] ss:$12 sps:$4 sm:$0xff]  }
 0x566   :  { %v12363_v40 = vadd.f32 %v8678_v38, %v8677_v23  ;;  %v8680_v31 = vpop.f32.mrb[30].mxu0  ;;  %v9980_v23 = vld [vmem:[%s13073_s3 + $0x9c0] ss:$12 sps:$4 sm:$0xff]   ;;  %v9985_v38 = vld [vmem:[%s13073_s3 + $0x9dc] ss:$12 sps:$4 sm:$0xff]  }
 0x567   :  { %v8681_v42 = vpop.f32.mrb[31].mxu0  ;;  %v9988_v31 = vld [vmem:[%s13073_s3 + $0x9f4] ss:$12 sps:$4 sm:$0xff]  }
 0x568   :  { %6871 = vmatpush1.bf16.msra.mxu1 %v9926_v39  ;;  %v9983_v39 = vld [vmem:[%s13073_s3 + $0x9d8] ss:$12 sps:$4 sm:$0xff]  }
 0x569   :  { %6872 = vmatprep.subr.bf16.mxu1 %v9931_v41  ;;  %v9986_v41 = vld [vmem:[%s13073_s3 + $0x9f0] ss:$12 sps:$4 sm:$0xff]   ;;  %v9991_v42 = vld [vmem:[%s13073_s3 + $0xa0c] ss:$12 sps:$4 sm:$0xff]  }
 0x56c   :  { %6873 = vmatpush1.bf16.msra.mxu1 %v9929_v43  ;;  %v9989_v43 = vld [vmem:[%s13073_s3 + $0xa08] ss:$12 sps:$4 sm:$0xff]  }
 0x56d   :  { %6874 = vmatprep.subr.bf16.mxu1 %v9934_v44  ;;  %v9994_v44 = vld [vmem:[%s13073_s3 + $0xa24] ss:$12 sps:$4 sm:$0xff]  }
 0x570   :  { %6875 = vmatpush1.bf16.msra.mxu1 %v9932_v47  ;;  %v9992_v47 = vld [vmem:[%s13073_s3 + $0xa20] ss:$12 sps:$4 sm:$0xff]  }
 0x571   :  { %6876 = vmatprep.subr.bf16.mxu1 %v9937_v48  ;;  %v9997_v48 = vld [vmem:[%s13073_s3 + $0xa3c] ss:$12 sps:$4 sm:$0xff]  }
 0x574   :  { %6877 = vmatpush1.bf16.msra.mxu1 %v9935_v51  ;;  %v9995_v51 = vld [vmem:[%s13073_s3 + $0xa38] ss:$12 sps:$4 sm:$0xff]  }
 0x575   :  { %6878 = vmatprep.subr.bf16.mxu1 %v9940_v52  ;;  %v10000_v52 = vld [vmem:[%s13073_s3 + $0xa54] ss:$12 sps:$4 sm:$0xff]  }
 0x578   :  { %6879 = vmatpush1.bf16.msra.mxu1 %v9938_v53  ;;  %v9998_v53 = vld [vmem:[%s13073_s3 + $0xa50] ss:$12 sps:$4 sm:$0xff]  }
 0x579   :  { %6880 = vmatprep.subr.bf16.mxu1 %v9943_v10  ;;  %v10003_v10 = vld [vmem:[%s13073_s3 + $0xa6c] ss:$12 sps:$4 sm:$0xff]  }
 0x57c   :  { %6881 = vmatpush1.bf16.msra.mxu1 %v9941_v55  ;;  %v10001_v55 = vld [vmem:[%s13073_s3 + $0xa68] ss:$12 sps:$4 sm:$0xff]  }
 0x57d   :  { %6882 = vmatprep.subr.bf16.mxu1 %v9946_v56  ;;  %v10006_v56 = vld [vmem:[%s13073_s3 + $0xa84] ss:$12 sps:$4 sm:$0xff]  }
 0x580   :  { %6883 = vmatpush1.bf16.msra.mxu1 %v9944_v57  ;;  %v3735_v57 = vld [vmem:[#allocation5 + $0x78] sm:$0xff] }
 0x581   :  { %6884 = vmatprep.subr.bf16.mxu1 %v9949_v58  ;;  %v10004_v58 = vld [vmem:[%s13073_s3 + $0xa80] ss:$12 sps:$4 sm:$0xff]  }
 0x584   :  { %v8721_v60 = vpop.f32.mrb[32].mxu0  ;;  %6885 = vmatpush1.bf16.msra.mxu1 %v9947_v59  ;;  %v10009_v59 = vld [vmem:[%s13073_s3 + $0xa9c] ss:$12 sps:$4 sm:$0xff]  }
 0x585   :  { %v8722_v61 = vpop.f32.mrb[33].mxu0  ;;  %6886 = vmatprep.subr.bf16.mxu1 %v9952_v8  ;;  %v12530_v8 = vpack.c.bf16 %v3735_v57, %v3735_v57  ;;  %v10072_v57 = vld [vmem:[%s13073_s3 + $0xc94] ss:$12 sps:$4 sm:$0xff]  }
 0x586   :  { %v12413_v0 = vadd.f32 %v8722_v61, %v8721_v60  ;;  %v8724_v1 = vpop.f32.mrb[34].mxu0  ;;  %v10007_v60 = vld [vmem:[%s13073_s3 + $0xa98] ss:$12 sps:$4 sm:$0xff]   ;;  %v10012_v61 = vld [vmem:[%s13073_s3 + $0xab4] ss:$12 sps:$4 sm:$0xff]  }
 0x587   :  { %v8725_v4 = vpop.f32.mrb[35].mxu0  ;;  %v10013_v1 = vld [vmem:[%s13073_s3 + $0xac8] ss:$12 sps:$4 sm:$0xff]  }
 0x588   :  { %6887 = vmatpush1.bf16.msra.mxu1 %v9950_v63  ;;  %v10010_v63 = vld [vmem:[%s13073_s3 + $0xab0] ss:$12 sps:$4 sm:$0xff]   ;;  %v10016_v4 = vld [vmem:[%s13073_s3 + $0xae0] ss:$12 sps:$4 sm:$0xff]  }
 0x589   :  { %6888 = vmatprep.subr.bf16.mxu1 %v9955_v25  ;;  %v10018_v25 = vld [vmem:[%s13073_s3 + $0xae4] ss:$12 sps:$4 sm:$0xff]  }
 0x58c   :  { %6889 = vmatpush1.bf16.msra.mxu1 %v9953_v7  ;;  %v10021_v7 = vld [vmem:[%s13073_s3 + $0xafc] ss:$12 sps:$4 sm:$0xff]  }
 0x58d   :  { %6899 = vmatprep.subr.bf16.mxu1 %v9958_v13  ;;  %v10019_v13 = vld [vmem:[%s13073_s3 + $0xaf8] ss:$12 sps:$4 sm:$0xff]  }
 0x58f   :  { %6891 = vmatmul.mubr.bf16.vlgmr.msra.gmra.mrb[0].mxu1 %v12427_v16 }
 0x590   :  { %6900 = vmatpush1.bf16.msra.mxu1 %v9956_v15  ;;  %6931 = vmatprep.mubr.bf16.mxu1 %v11876_v11  ;;  %v9965_v11 = vld [vmem:[%s13073_s3 + $0x948] ss:$12 sps:$4 sm:$0xff]   ;;  %v10022_v15 = vld [vmem:[%s13073_s3 + $0xb10] ss:$12 sps:$4 sm:$0xff]  }
 0x591   :  { %6901 = vmatprep.subr.bf16.mxu1 %v9961_v17  ;;  %v10027_v17 = vld [vmem:[%s13073_s3 + $0xb2c] ss:$12 sps:$4 sm:$0xff]  }
 0x594   :  { %6902 = vmatpush1.bf16.msra.mxu1 %v9959_v62  ;;  %v10025_v62 = vld [vmem:[%s13073_s3 + $0xb28] ss:$12 sps:$4 sm:$0xff]  }
 0x595   :  { %6903 = vmatprep.subr.bf16.mxu1 %v9964_v18  ;;  %v10030_v18 = vld [vmem:[%s13073_s3 + $0xb44] ss:$12 sps:$4 sm:$0xff]  }
 0x598   :  { %6904 = vmatpush1.bf16.msra.mxu1 %v9962_v19  ;;  %v10028_v19 = vld [vmem:[%s13073_s3 + $0xb40] ss:$12 sps:$4 sm:$0xff]  }
 0x599   :  { %6905 = vmatprep.subr.bf16.mxu1 %v9967_v21  ;;  %v10033_v21 = vld [vmem:[%s13073_s3 + $0xb5c] ss:$12 sps:$4 sm:$0xff]  }
 0x59c   :  { %6906 = vmatpush1.bf16.msra.mxu1 %v9965_v11  ;;  %v10031_v11 = vld [vmem:[%s13073_s3 + $0xb58] ss:$12 sps:$4 sm:$0xff]  }
 0x59d   :  { %6907 = vmatprep.subr.bf16.mxu1 %v9970_v22  ;;  %v10036_v22 = vld [vmem:[%s13073_s3 + $0xb74] ss:$12 sps:$4 sm:$0xff]  }
 0x5a0   :  { %6908 = vmatpush1.bf16.msra.mxu1 %v9968_v24  ;;  %v10034_v24 = vld [vmem:[%s13073_s3 + $0xb70] ss:$12 sps:$4 sm:$0xff]  }
 0x5a1   :  { %6909 = vmatprep.subr.bf16.mxu1 %v9973_v6  ;;  %v10039_v6 = vld [vmem:[%s13073_s3 + $0xb8c] ss:$12 sps:$4 sm:$0xff]  }
 0x5a4   :  { %6910 = vmatpush1.bf16.msra.mxu1 %v9971_v28  ;;  %v10037_v28 = vld [vmem:[%s13073_s3 + $0xb88] ss:$12 sps:$4 sm:$0xff]  }
 0x5a5   :  { %6911 = vmatprep.subr.bf16.mxu1 %v9976_v30  ;;  %v10042_v30 = vld [vmem:[%s13073_s3 + $0xba4] ss:$12 sps:$4 sm:$0xff]  }
 0x5a8   :  { %6912 = vmatpush1.bf16.msra.mxu1 %v9974_v34  ;;  %v10040_v34 = vld [vmem:[%s13073_s3 + $0xba0] ss:$12 sps:$4 sm:$0xff]  }
 0x5a9   :  { %6913 = vmatprep.subr.bf16.mxu1 %v9979_v35  ;;  %v10045_v35 = vld [vmem:[%s13073_s3 + $0xbbc] ss:$12 sps:$4 sm:$0xff]  }
 0x5ac   :  { %6914 = vmatpush1.bf16.msra.mxu1 %v9977_v36  ;;  %v10043_v36 = vld [vmem:[%s13073_s3 + $0xbb8] ss:$12 sps:$4 sm:$0xff]  }
 0x5ad   :  { %6915 = vmatprep.subr.bf16.mxu1 %v9982_v37  ;;  %v10048_v37 = vld [vmem:[%s13073_s3 + $0xbd4] ss:$12 sps:$4 sm:$0xff]  }
 0x5b0   :  { %6916 = vmatpush1.bf16.msra.mxu1 %v9980_v23  ;;  %v10046_v23 = vld [vmem:[%s13073_s3 + $0xbd0] ss:$12 sps:$4 sm:$0xff]  }
 0x5b1   :  { %6917 = vmatprep.subr.bf16.mxu1 %v9985_v38  ;;  %v10051_v38 = vld [vmem:[%s13073_s3 + $0xbec] ss:$12 sps:$4 sm:$0xff]  }
 0x5b4   :  { %6918 = vmatpush1.bf16.msra.mxu1 %v9983_v39  ;;  %v10049_v39 = vld [vmem:[%s13073_s3 + $0xbe8] ss:$12 sps:$4 sm:$0xff]  }
 0x5b5   :  { %6919 = vmatprep.subr.bf16.mxu1 %v9988_v31  ;;  %v10054_v31 = vld [vmem:[%s13073_s3 + $0xc04] ss:$12 sps:$4 sm:$0xff]  }
 0x5b8   :  { %6920 = vmatpush1.bf16.msra.mxu1 %v9986_v41  ;;  %v3734_v41 = vld [vmem:[#allocation5 + $0x70] sm:$0xff] }
 0x5b9   :  { %6921 = vmatprep.subr.bf16.mxu1 %v9991_v42  ;;  %v10052_v42 = vld [vmem:[%s13073_s3 + $0xc00] ss:$12 sps:$4 sm:$0xff]  }
 0x5bc   :  { %6922 = vmatpush1.bf16.msra.mxu1 %v9989_v43  ;;  %v12627_v43 = vpack.c.bf16 %v3734_v41, %v3734_v41  ;;  %v10115_v41 = vld [vmem:[%s13073_s3 + $0xb0] ss:$12 sps:$4 sm:$0xff]  }
 0x5bd   :  { %6923 = vmatprep.subr.bf16.mxu1 %v9994_v44  ;;  %v10057_v44 = vld [vmem:[%s13073_s3 + $0xc1c] ss:$12 sps:$4 sm:$0xff]  }
 0x5c0   :  { %6924 = vmatpush1.bf16.msra.mxu1 %v9992_v47  ;;  %v10055_v47 = vld [vmem:[%s13073_s3 + $0xc18] ss:$12 sps:$4 sm:$0xff]  }
 0x5c1   :  { %6925 = vmatprep.subr.bf16.mxu1 %v9997_v48  ;;  %v10060_v48 = vld [vmem:[%s13073_s3 + $0xc34] ss:$12 sps:$4 sm:$0xff]  }
 0x5c4   :  { %6926 = vmatpush1.bf16.msra.mxu1 %v9995_v51  ;;  %v10058_v51 = vld [vmem:[%s13073_s3 + $0xc30] ss:$12 sps:$4 sm:$0xff]  }
 0x5c5   :  { %6927 = vmatprep.subr.bf16.mxu1 %v10000_v52  ;;  %v10063_v52 = vld [vmem:[%s13073_s3 + $0xc4c] ss:$12 sps:$4 sm:$0xff]  }
 0x5c8   :  { %6928 = vmatpush1.bf16.msra.mxu1 %v9998_v53  ;;  %v10066_v53 = vld [vmem:[%s13073_s3 + $0xc64] ss:$12 sps:$4 sm:$0xff]  }
 0x5c9   :  { %6929 = vmatprep.subr.bf16.mxu1 %v10003_v10  ;;  %v10064_v10 = vld [vmem:[%s13073_s3 + $0xc60] ss:$12 sps:$4 sm:$0xff]  }
 0x5cc   :  { %6930 = vmatpush1.bf16.msra.mxu1 %v10001_v55  ;;  %v10069_v55 = vld [vmem:[%s13073_s3 + $0xc7c] ss:$12 sps:$4 sm:$0xff]  }
 0x5cd   :  { %6940 = vmatprep.subr.bf16.mxu1 %v10006_v56  ;;  %v10067_v56 = vld [vmem:[%s13073_s3 + $0xc78] ss:$12 sps:$4 sm:$0xff]  }
 0x5cf   :  { %6932 = vmatmul.mubr.bf16.vlgmr.msra.gmra.mrb[0].mxu1 %v11972_v9  ;;  %v10015_v9 = vld [vmem:[%s13073_s3 + $0xacc] ss:$12 sps:$4 sm:$0xff]  }
 0x5d0   :  { %6941 = vmatpush1.bf16.msra.mxu1 %v10004_v58  ;;  %6972 = vmatprep.mubr.bf16.mxu1 %v12530_v8  ;;  %v10070_v58 = vld [vmem:[%s13073_s3 + $0xc90] ss:$12 sps:$4 sm:$0xff]  }
 0x5d1   :  { %6942 = vmatprep.subr.bf16.mxu1 %v10009_v59  ;;  %v10075_v59 = vld [vmem:[%s13073_s3 + $0xcac] ss:$12 sps:$4 sm:$0xff]  }
 0x5d4   :  { %6943 = vmatpush1.bf16.msra.mxu1 %v10007_v60  ;;  %v10073_v60 = vld [vmem:[%s13073_s3 + $0xca8] ss:$12 sps:$4 sm:$0xff]  }
 0x5d5   :  { %6944 = vmatprep.subr.bf16.mxu1 %v10012_v61  ;;  %v10078_v61 = vld [vmem:[%s13073_s3 + $0xcc4] ss:$12 sps:$4 sm:$0xff]  }
 0x5d8   :  { %6945 = vmatpush1.bf16.msra.mxu1 %v10010_v63  ;;  %v10076_v63 = vld [vmem:[%s13073_s3 + $0xcc0] ss:$12 sps:$4 sm:$0xff]  }
 0x5d9   :  { %6946 = vmatprep.subr.bf16.mxu1 %v10015_v9  ;;  %v10081_v9 = vld [vmem:[%s13073_s3 + $0xcdc] ss:$12 sps:$4 sm:$0xff]  }
 0x5dc   :  { %6947 = vmatpush1.bf16.msra.mxu1 %v10013_v1  ;;  %v10079_v1 = vld [vmem:[%s13073_s3 + $0xcd8] ss:$12 sps:$4 sm:$0xff]  }
 0x5dd   :  { %6948 = vmatprep.subr.bf16.mxu1 %v10018_v25  ;;  %v10084_v25 = vld [vmem:[%s13073_s3 + $0xcf4] ss:$12 sps:$4 sm:$0xff]  }
 0x5e0   :  { %6949 = vmatpush1.bf16.msra.mxu1 %v10016_v4  ;;  %v10082_v4 = vld [vmem:[%s13073_s3 + $0xcf0] ss:$12 sps:$4 sm:$0xff]  }
 0x5e1   :  { %6950 = vmatprep.subr.bf16.mxu1 %v10021_v7  ;;  %v10087_v7 = vld [vmem:[%s13073_s3 + $0xd0c] ss:$12 sps:$4 sm:$0xff]  }
 0x5e4   :  { %6951 = vmatpush1.bf16.msra.mxu1 %v10019_v13  ;;  %v10085_v13 = vld [vmem:[%s13073_s3 + $0xd08] ss:$12 sps:$4 sm:$0xff]  }
 0x5e5   :  { %6952 = vmatprep.subr.bf16.mxu1 %v10024_v14  ;;  %v10090_v14 = vld [vmem:[%s13073_s3 + $0xd24] ss:$12 sps:$4 sm:$0xff]  }
 0x5e8   :  { %6953 = vmatpush1.bf16.msra.mxu1 %v10022_v15  ;;  %v10088_v15 = vld [vmem:[%s13073_s3 + $0xd20] ss:$12 sps:$4 sm:$0xff]  }
 0x5e9   :  { %6954 = vmatprep.subr.bf16.mxu1 %v10027_v17  ;;  %v10093_v17 = vld [vmem:[%s13073_s3 + $0xd3c] ss:$12 sps:$4 sm:$0xff]  }
 0x5ec   :  { %6955 = vmatpush1.bf16.msra.mxu1 %v10025_v62  ;;  %v10091_v62 = vld [vmem:[%s13073_s3 + $0xd38] ss:$12 sps:$4 sm:$0xff]  }
 0x5ed   :  { %6956 = vmatprep.subr.bf16.mxu1 %v10030_v18  ;;  %v10096_v18 = vld [vmem:[%s13073_s3 + $0xd54] ss:$12 sps:$4 sm:$0xff]  }
 0x5f0   :  { %6957 = vmatpush1.bf16.msra.mxu1 %v10028_v19  ;;  %v10094_v19 = vld [vmem:[%s13073_s3 + $0xd50] ss:$12 sps:$4 sm:$0xff]  }
 0x5f1   :  { %6958 = vmatprep.subr.bf16.mxu1 %v10033_v21  ;;  %v10099_v21 = vld [vmem:[%s13073_s3 + $0xd6c] ss:$12 sps:$4 sm:$0xff]  }
 0x5f4   :  { %6959 = vmatpush1.bf16.msra.mxu1 %v10031_v11  ;;  %v10097_v11 = vld [vmem:[%s13073_s3 + $0xd68] ss:$12 sps:$4 sm:$0xff]  }
 0x5f5   :  { %6960 = vmatprep.subr.bf16.mxu1 %v10036_v22  ;;  %v10100_v22 = vld [vmem:[%s13073_s3 + $0xc8] ss:$12 sps:$4 sm:$0xff]  }
 0x5f8   :  { %6961 = vmatpush1.bf16.msra.mxu1 %v10034_v24  ;;  %v10101_v24 = vld [vmem:[%s13073_s3 + $0x8] ss:$12 sps:$4 sm:$0xff]  }
 0x5f9   :  { %6962 = vmatprep.subr.bf16.mxu1 %v10039_v6  ;;  %v10102_v6 = vld [vmem:[%s13073_s3 + $0xe0] ss:$12 sps:$4 sm:$0xff]  }
 0x5fc   :  { %6963 = vmatpush1.bf16.msra.mxu1 %v10037_v28  ;;  %v10103_v28 = vld [vmem:[%s13073_s3 + $0x20] ss:$12 sps:$4 sm:$0xff]  }
 0x5fd   :  { %6964 = vmatprep.subr.bf16.mxu1 %v10042_v30  ;;  %v10104_v30 = vld [vmem:[%s13073_s3 + $0xf8] ss:$12 sps:$4 sm:$0xff]  }
 0x600   :  { %6965 = vmatpush1.bf16.msra.mxu1 %v10040_v34  ;;  %v10105_v34 = vld [vmem:[%s13073_s3 + $0x38] ss:$12 sps:$4 sm:$0xff]  }
 0x601   :  { %6966 = vmatprep.subr.bf16.mxu1 %v10045_v35  ;;  %v10108_v35 = vld [vmem:[%s13073_s3 + $0x128] ss:$12 sps:$4 sm:$0xff]  }
 0x604   :  { %6967 = vmatpush1.bf16.msra.mxu1 %v10043_v36  ;;  %v10109_v36 = vld [vmem:[%s13073_s3 + $0x68] ss:$12 sps:$4 sm:$0xff]  }
 0x605   :  { %6968 = vmatprep.subr.bf16.mxu1 %v10048_v37  ;;  %v10110_v37 = vld [vmem:[%s13073_s3 + $0x140] ss:$12 sps:$4 sm:$0xff]  }
 0x608   :  { %6969 = vmatpush1.bf16.msra.mxu1 %v10046_v23  ;;  %v10111_v23 = vld [vmem:[%s13073_s3 + $0x80] ss:$12 sps:$4 sm:$0xff]  }
 0x609   :  { %6970 = vmatprep.subr.bf16.mxu1 %v10051_v38  ;;  %v10112_v38 = vld [vmem:[%s13073_s3 + $0x158] ss:$12 sps:$4 sm:$0xff]  }
 0x60c   :  { %6971 = vmatpush1.bf16.msra.mxu1 %v10049_v39  ;;  %v10113_v39 = vld [vmem:[%s13073_s3 + $0x98] ss:$12 sps:$4 sm:$0xff]  }
 0x60d   :  { %6981 = vmatprep.subr.bf16.mxu1 %v10054_v31  ;;  %v10114_v31 = vld [vmem:[%s13073_s3 + $0x170] ss:$12 sps:$4 sm:$0xff]  }
 0x60f   :  { %6973 = vmatmul.mubr.bf16.vlgmr.msra.gmra.mrb[0].mxu1 %v12627_v43 }
 0x610   :  { %6982 = vmatpush1.bf16.msra.mxu1 %v10052_v42  ;;  %7013 = vmatprep.mubr.bf16.mxu1 %v11985_v54  ;;  %v10061_v54 = vld [vmem:[%s13073_s3 + $0xc48] ss:$12 sps:$4 sm:$0xff]  }
 0x611   :  { %6983 = vmatprep.subr.bf16.mxu1 %v10057_v44  ;;  %v10116_v42 = vld [vmem:[%s13073_s3 + $0x248] ss:$12 sps:$4 sm:$0xff]  }
 0x612   :  { %v10117_v44 = vld [vmem:[%s13073_s3 + $0x188] ss:$12 sps:$4 sm:$0xff]  }
 0x614   :  { %6984 = vmatpush1.bf16.msra.mxu1 %v10055_v47  ;;  %v10118_v47 = vld [vmem:[%s13073_s3 + $0x260] ss:$12 sps:$4 sm:$0xff]  }
 0x615   :  { %6985 = vmatprep.subr.bf16.mxu1 %v10060_v48  ;;  %v10119_v48 = vld [vmem:[%s13073_s3 + $0x1a0] ss:$12 sps:$4 sm:$0xff]  }
 0x618   :  { %6986 = vmatpush1.bf16.msra.mxu1 %v10058_v51  ;;  %v10120_v51 = vld [vmem:[%s13073_s3 + $0x278] ss:$12 sps:$4 sm:$0xff]  }
 0x619   :  { %6987 = vmatprep.subr.bf16.mxu1 %v10063_v52  ;;  %v10121_v52 = vld [vmem:[%s13073_s3 + $0x1b8] ss:$12 sps:$4 sm:$0xff]  }
 0x61c   :  { %6988 = vmatpush1.bf16.msra.mxu1 %v10061_v54  ;;  %v10124_v54 = vld [vmem:[%s13073_s3 + $0x2a8] ss:$12 sps:$4 sm:$0xff]  }
 0x61d   :  { %6989 = vmatprep.subr.bf16.mxu1 %v10066_v53  ;;  %v10125_v53 = vld [vmem:[%s13073_s3 + $0x1e8] ss:$12 sps:$4 sm:$0xff]  }
 0x620   :  { %6990 = vmatpush1.bf16.msra.mxu1 %v10064_v10  ;;  %v10126_v10 = vld [vmem:[%s13073_s3 + $0x2c0] ss:$12 sps:$4 sm:$0xff]  }
 0x621   :  { %6991 = vmatprep.subr.bf16.mxu1 %v10069_v55  ;;  %v10127_v55 = vld [vmem:[%s13073_s3 + $0x200] ss:$12 sps:$4 sm:$0xff]  }
 0x624   :  { %6992 = vmatpush1.bf16.msra.mxu1 %v10067_v56  ;;  %v10128_v56 = vld [vmem:[%s13073_s3 + $0x2d8] ss:$12 sps:$4 sm:$0xff]  }
 0x625   :  { %6993 = vmatprep.subr.bf16.mxu1 %v10072_v57  ;;  %v10129_v57 = vld [vmem:[%s13073_s3 + $0x218] ss:$12 sps:$4 sm:$0xff]  }
 0x628   :  { %6994 = vmatpush1.bf16.msra.mxu1 %v10070_v58  ;;  %v10130_v58 = vld [vmem:[%s13073_s3 + $0x2f0] ss:$12 sps:$4 sm:$0xff]  }
 0x629   :  { %6995 = vmatprep.subr.bf16.mxu1 %v10075_v59  ;;  %v10131_v59 = vld [vmem:[%s13073_s3 + $0x230] ss:$12 sps:$4 sm:$0xff]  }
 0x62c   :  { %6996 = vmatpush1.bf16.msra.mxu1 %v10073_v60  ;;  %v10132_v60 = vld [vmem:[%s13073_s3 + $0x548] ss:$12 sps:$4 sm:$0xff]  }
 0x62d   :  { %6997 = vmatprep.subr.bf16.mxu1 %v10078_v61  ;;  %v10133_v61 = vld [vmem:[%s13073_s3 + $0x488] ss:$12 sps:$4 sm:$0xff]  }
 0x630   :  { %6998 = vmatpush1.bf16.msra.mxu1 %v10076_v63  ;;  %v10134_v63 = vld [vmem:[%s13073_s3 + $0x560] ss:$12 sps:$4 sm:$0xff]  }
 0x631   :  { %6999 = vmatprep.subr.bf16.mxu1 %v10081_v9  ;;  %v10135_v9 = vld [vmem:[%s13073_s3 + $0x4a0] ss:$12 sps:$4 sm:$0xff]  }
 0x634   :  { %7000 = vmatpush1.bf16.msra.mxu1 %v10079_v1  ;;  %v10136_v1 = vld [vmem:[%s13073_s3 + $0x578] ss:$12 sps:$4 sm:$0xff]  }
 0x635   :  { %7001 = vmatprep.subr.bf16.mxu1 %v10084_v25  ;;  %v10137_v25 = vld [vmem:[%s13073_s3 + $0x4b8] ss:$12 sps:$4 sm:$0xff]  }
 0x638   :  { %7002 = vmatpush1.bf16.msra.mxu1 %v10082_v4  ;;  %v10140_v4 = vld [vmem:[%s13073_s3 + $0x5a8] ss:$12 sps:$4 sm:$0xff]  }
 0x639   :  { %7003 = vmatprep.subr.bf16.mxu1 %v10087_v7  ;;  %v10141_v7 = vld [vmem:[%s13073_s3 + $0x4e8] ss:$12 sps:$4 sm:$0xff]  }
 0x63c   :  { %7004 = vmatpush1.bf16.msra.mxu1 %v10085_v13  ;;  %v10142_v13 = vld [vmem:[%s13073_s3 + $0x5c0] ss:$12 sps:$4 sm:$0xff]  }
 0x63d   :  { %7005 = vmatprep.subr.bf16.mxu1 %v10090_v14  ;;  %v10143_v14 = vld [vmem:[%s13073_s3 + $0x500] ss:$12 sps:$4 sm:$0xff]  }
 0x640   :  { %7006 = vmatpush1.bf16.msra.mxu1 %v10088_v15  ;;  %v10144_v15 = vld [vmem:[%s13073_s3 + $0x5d8] ss:$12 sps:$4 sm:$0xff]  }
 0x641   :  { %7007 = vmatprep.subr.bf16.mxu1 %v10093_v17  ;;  %v10145_v17 = vld [vmem:[%s13073_s3 + $0x518] ss:$12 sps:$4 sm:$0xff]  }
 0x644   :  { %7008 = vmatpush1.bf16.msra.mxu1 %v10091_v62  ;;  %v10146_v62 = vld [vmem:[%s13073_s3 + $0x5f0] ss:$12 sps:$4 sm:$0xff]  }
 0x645   :  { %7009 = vmatprep.subr.bf16.mxu1 %v10096_v18  ;;  %v10147_v18 = vld [vmem:[%s13073_s3 + $0x530] ss:$12 sps:$4 sm:$0xff]  }
 0x648   :  { %7010 = vmatpush1.bf16.msra.mxu1 %v10094_v19  ;;  %v10148_v19 = vld [vmem:[%s13073_s3 + $0x848] ss:$12 sps:$4 sm:$0xff]  }
 0x649   :  { %7011 = vmatprep.subr.bf16.mxu1 %v10099_v21  ;;  %v10149_v21 = vld [vmem:[%s13073_s3 + $0x788] ss:$12 sps:$4 sm:$0xff]  }
 0x64c   :  { %7012 = vmatpush1.bf16.msra.mxu1 %v10097_v11  ;;  %v10150_v11 = vld [vmem:[%s13073_s3 + $0x860] ss:$12 sps:$4 sm:$0xff]  }
 0x64d   :  { %8529 = vmatprep.subr.bf16.mxu1 %v10100_v22  ;;  %v10151_v22 = vld [vmem:[%s13073_s3 + $0x7a0] ss:$12 sps:$4 sm:$0xff]  }
 0x64f   :  { %7014 = vmatmul.mubr.bf16.vlgmr.msra.gmra.mrb[0].mxu1 %v12070_v32  ;;  %v10106_v32 = vld [vmem:[%s13073_s3 + $0x110] ss:$12 sps:$4 sm:$0xff]  }
 0x650   :  { %8530 = vmatpush3.bf16.msra.mxu1 %v10101_v24  ;;  %7054 = vmatprep.mubr.bf16.mxu1 %v11719_v3  ;;  %v10107_v3 = vld [vmem:[%s13073_s3 + $0x50] ss:$12 sps:$4 sm:$0xff]   ;;  %v10152_v24 = vld [vmem:[%s13073_s3 + $0x878] ss:$12 sps:$4 sm:$0xff]  }
 0x651   :  { %8531 = vmatprep.subr.bf16.mxu1 %v10102_v6  ;;  %v10153_v6 = vld [vmem:[%s13073_s3 + $0x7b8] ss:$12 sps:$4 sm:$0xff]  }
 0x654   :  { %8532 = vmatpush3.bf16.msra.mxu1 %v10103_v28  ;;  %v10156_v28 = vld [vmem:[%s13073_s3 + $0x8a8] ss:$12 sps:$4 sm:$0xff]  }
 0x655   :  { %8533 = vmatprep.subr.bf16.mxu1 %v10104_v30  ;;  %v10157_v30 = vld [vmem:[%s13073_s3 + $0x7e8] ss:$12 sps:$4 sm:$0xff]  }
 0x658   :  { %8534 = vmatpush3.bf16.msra.mxu1 %v10105_v34  ;;  %v10158_v34 = vld [vmem:[%s13073_s3 + $0x8c0] ss:$12 sps:$4 sm:$0xff]  }
 0x659   :  { %8535 = vmatprep.subr.bf16.mxu1 %v10106_v32  ;;  %v10159_v32 = vld [vmem:[%s13073_s3 + $0x800] ss:$12 sps:$4 sm:$0xff]  }
 0x65c   :  { %8536 = vmatpush3.bf16.msra.mxu1 %v10107_v3  ;;  %v10160_v3 = vld [vmem:[%s13073_s3 + $0x8d8] ss:$12 sps:$4 sm:$0xff]  }
 0x65d   :  { %8537 = vmatprep.subr.bf16.mxu1 %v10108_v35  ;;  %v10161_v35 = vld [vmem:[%s13073_s3 + $0x818] ss:$12 sps:$4 sm:$0xff]  }
 0x660   :  { %8538 = vmatpush3.bf16.msra.mxu1 %v10109_v36  ;;  %v10162_v36 = vld [vmem:[%s13073_s3 + $0x8f0] ss:$12 sps:$4 sm:$0xff]  }
 0x661   :  { %8539 = vmatprep.subr.bf16.mxu1 %v10110_v37  ;;  %v10163_v37 = vld [vmem:[%s13073_s3 + $0x830] ss:$12 sps:$4 sm:$0xff]  }
 0x664   :  { %8540 = vmatpush3.bf16.msra.mxu1 %v10111_v23  ;;  %v10164_v23 = vld [vmem:[%s13073_s3 + $0xb48] ss:$12 sps:$4 sm:$0xff]  }
 0x665   :  { %8541 = vmatprep.subr.bf16.mxu1 %v10112_v38  ;;  %v10165_v38 = vld [vmem:[%s13073_s3 + $0xa88] ss:$12 sps:$4 sm:$0xff]  }
 0x668   :  { %8542 = vmatpush3.bf16.msra.mxu1 %v10113_v39  ;;  %v10166_v39 = vld [vmem:[%s13073_s3 + $0xb60] ss:$12 sps:$4 sm:$0xff]  }
 0x669   :  { %8543 = vmatprep.subr.bf16.mxu1 %v10114_v31  ;;  %v10167_v31 = vld [vmem:[%s13073_s3 + $0xaa0] ss:$12 sps:$4 sm:$0xff]  }
 0x66c   :  { %8544 = vmatpush3.bf16.msra.mxu1 %v10115_v41  ;;  %v10168_v41 = vld [vmem:[%s13073_s3 + $0xb78] ss:$12 sps:$4 sm:$0xff]  }
 0x66d   :  { %8551 = vmatprep.subr.bf16.mxu1 %v10116_v42  ;;  %v10169_v42 = vld [vmem:[%s13073_s3 + $0xab8] ss:$12 sps:$4 sm:$0xff]  }
 0x66f   :  { %7055 = vmatmul.mubr.bf16.vlgmr.msra.gmra.mrb[4].mxu1 %v11721_v5  ;;  %v10122_v5 = vld [vmem:[%s13073_s3 + $0x290] ss:$12 sps:$4 sm:$0xff]  }
 0x670   :  { %8552 = vmatpush3.bf16.msra.mxu1 %v10117_v44  ;;  %7094 = vmatprep.mubr.bf16.mxu1 %v11744_v2  ;;  %v10123_v2 = vld [vmem:[%s13073_s3 + $0x1d0] ss:$12 sps:$4 sm:$0xff]   ;;  %v10172_v44 = vld [vmem:[%s13073_s3 + $0xba8] ss:$12 sps:$4 sm:$0xff]  }
 0x671   :  { %8553 = vmatprep.subr.bf16.mxu1 %v10118_v47  ;;  %v10173_v47 = vld [vmem:[%s13073_s3 + $0xae8] ss:$12 sps:$4 sm:$0xff]  }
 0x674   :  { %8554 = vmatpush3.bf16.msra.mxu1 %v10119_v48  ;;  %v10174_v48 = vld [vmem:[%s13073_s3 + $0xbc0] ss:$12 sps:$4 sm:$0xff]  }
 0x675   :  { %8555 = vmatprep.subr.bf16.mxu1 %v10120_v51  ;;  %v10175_v51 = vld [vmem:[%s13073_s3 + $0xb00] ss:$12 sps:$4 sm:$0xff]  }
 0x678   :  { %8556 = vmatpush3.bf16.msra.mxu1 %v10121_v52  ;;  %v10176_v52 = vld [vmem:[%s13073_s3 + $0xbd8] ss:$12 sps:$4 sm:$0xff]  }
 0x679   :  { %8557 = vmatprep.subr.bf16.mxu1 %v10122_v5  ;;  %v10177_v5 = vld [vmem:[%s13073_s3 + $0xb18] ss:$12 sps:$4 sm:$0xff]  }
 0x67c   :  { %8558 = vmatpush3.bf16.msra.mxu1 %v10123_v2  ;;  %v10178_v2 = vld [vmem:[%s13073_s3 + $0xbf0] ss:$12 sps:$4 sm:$0xff]  }
 0x67d   :  { %8559 = vmatprep.subr.bf16.mxu1 %v10124_v54  ;;  %v10179_v54 = vld [vmem:[%s13073_s3 + $0xb30] ss:$12 sps:$4 sm:$0xff]  }
 0x680   :  { %8560 = vmatpush3.bf16.msra.mxu1 %v10125_v53  ;;  %v10180_v53 = vld [vmem:[%s13074_s5 + $0x40] sm:$0xff]  }
 0x681   :  { %8561 = vmatprep.subr.bf16.mxu1 %v10126_v10  ;;  %v10181_v10 = vld [vmem:[%s13074_s5] sm:$0xff]  }
 0x684   :  { %8562 = vmatpush3.bf16.msra.mxu1 %v10127_v55  ;;  %v10182_v55 = vld [vmem:[%s13074_s5 + $0x48] sm:$0xff]  }
 0x685   :  { %8563 = vmatprep.subr.bf16.mxu1 %v10128_v56  ;;  %v10183_v56 = vld [vmem:[%s13074_s5 + $0x8] sm:$0xff]  }
 0x688   :  { %8564 = vmatpush3.bf16.msra.mxu1 %v10129_v57  ;;  %v10184_v57 = vld [vmem:[%s13074_s5 + $0x50] sm:$0xff]  }
 0x689   :  { %8565 = vmatprep.subr.bf16.mxu1 %v10130_v58  ;;  %v10185_v58 = vld [vmem:[%s13074_s5 + $0x10] sm:$0xff]  }
 0x68c   :  { %8566 = vmatpush3.bf16.msra.mxu1 %v10131_v59  ;;  %v10187_v59 = vld [vmem:[%s13074_s5 + $0x18] sm:$0xff]  }
 0x68d   :  { %8595 = vmatprep.subr.bf16.mxu1 %v10132_v60  ;;  %v10188_v60 = vld [vmem:[%s13074_s5 + $0x60] sm:$0xff]  }
 0x68f   :  { %7095 = vmatmul.mubr.bf16.vlgmr.msra.gmra.mrb[8].mxu1 %v11970_v50  ;;  %v10138_v50 = vld [vmem:[%s13073_s3 + $0x590] ss:$12 sps:$4 sm:$0xff]  }
 0x690   :  { %8596 = vmatpush3.bf16.msra.mxu1 %v10133_v61  ;;  %7174 = vmatprep.mubr.bf16.mxu1 %v12122_v49  ;;  %v10139_v49 = vld [vmem:[%s13073_s3 + $0x4d0] ss:$12 sps:$4 sm:$0xff]   ;;  %v10189_v61 = vld [vmem:[%s13074_s5 + $0x20] sm:$0xff]  }
 0x691   :  { %8597 = vmatprep.subr.bf16.mxu1 %v10134_v63  ;;  %v10190_v63 = vld [vmem:[%s13074_s5 + $0x68] sm:$0xff]  }
 0x694   :  { %8598 = vmatpush3.bf16.msra.mxu1 %v10135_v9  ;;  %v10191_v9 = vld [vmem:[%s13074_s5 + $0x28] sm:$0xff]  }
 0x695   :  { %8599 = vmatprep.subr.bf16.mxu1 %v10136_v1  ;;  %v10192_v1 = vld [vmem:[%s13074_s5 + $0x70] sm:$0xff]  }
 0x698   :  { %8600 = vmatpush3.bf16.msra.mxu1 %v10137_v25  ;;  %v10193_v25 = vld [vmem:[%s13074_s5 + $0x30] sm:$0xff]  }
 0x699   :  { %8601 = vmatprep.subr.bf16.mxu1 %v10138_v50  ;;  %v10194_v50 = vld [vmem:[%s13074_s5 + $0x78] sm:$0xff]  }
 0x69c   :  { %8602 = vmatpush3.bf16.msra.mxu1 %v10139_v49  ;;  %v10195_v49 = vld [vmem:[%s13074_s5 + $0x38] sm:$0xff]  }
 0x69d   :  { %8603 = vmatprep.subr.bf16.mxu1 %v10140_v4  ;;  %v4332_v4 = vld [vmem:[%s13075_s4] sm:$0x7] }
 0x6a0   :  { %8604 = vmatpush3.bf16.msra.mxu1 %v10141_v7  ;;  %v4337_v7 = vrot.slane %v4332_v4, %v425_v27  ;;  %v10197_v27 = vld [vmem:[%s13074_s5 + $0x88] sm:$0xff]  }
 0x6a1   :  { %8605 = vmatprep.subr.bf16.mxu1 %v10142_v13  ;;  %v4341_v13 = vrot.slane %v4332_v4, %v429_v29  ;;  %v10198_v29 = vld [vmem:[%s13074_s5 + $0x90] sm:$0xff]  }
 0x6a4   :  { %8606 = vmatpush3.bf16.msra.mxu1 %v10143_v14 }
 0x6a5   :  { %8607 = vmatprep.subr.bf16.mxu1 %v10144_v15 }
 0x6a8   :  { %8608 = vmatpush3.bf16.msra.mxu1 %v10145_v17 }
 0x6a9   :  { %8609 = vmatprep.subr.bf16.mxu1 %v10146_v62 }
 0x6ac   :  { %8610 = vmatpush3.bf16.msra.mxu1 %v10147_v18 }
 0x6ad   :  { %8639 = vmatprep.subr.bf16.mxu1 %v10148_v19 }
 0x6af   :  { %7175 = vmatmul.mubr.bf16.vlgmr.msra.gmra.mrb[12].mxu1 %v12219_v33  ;;  %v10154_v33 = vld [vmem:[%s13073_s3 + $0x890] ss:$12 sps:$4 sm:$0xff]  }
 0x6b0   :  { %8640 = vmatpush3.bf16.msra.mxu1 %v10149_v21  ;;  %7254 = vmatprep.mubr.bf16.mxu1 %v12326_v20  ;;  %v10155_v20 = vld [vmem:[%s13073_s3 + $0x7d0] ss:$12 sps:$4 sm:$0xff]  }
 0x6b1   :  { %8641 = vmatprep.subr.bf16.mxu1 %v10150_v11 }
 0x6b4   :  { %8642 = vmatpush3.bf16.msra.mxu1 %v10151_v22  ;;  %v10196_v22 = vld [vmem:[%s13074_s5 + $0x80] sm:$0xff]  }
 0x6b5   :  { %8643 = vmatprep.subr.bf16.mxu1 %v10152_v24  ;;  %8759 = vmatpush3.bf16.msra.mxu0 %v10196_v22 }
 0x6b6   :  { %8760 = vmatprep.subr.bf16.mxu0 %v10219_v46 }
 0x6b8   :  { %8644 = vmatpush3.bf16.msra.mxu1 %v10153_v6 }
 0x6b9   :  { %8645 = vmatprep.subr.bf16.mxu1 %v10154_v33  ;;  %8761 = vmatpush3.bf16.msra.mxu0 %v10197_v27  ;;  %v10199_v33 = vld [vmem:[%s13074_s5 + $0x98] sm:$0xff]  }
 0x6ba   :  { %8762 = vmatprep.subr.bf16.mxu0 %v10219_v46 }
 0x6bc   :  { %8646 = vmatpush3.bf16.msra.mxu1 %v10155_v20  ;;  %v10200_v20 = vld [vmem:[%s13074_s5 + $0xa0] sm:$0xff]  }
 0x6bd   :  { %8647 = vmatprep.subr.bf16.mxu1 %v10156_v28  ;;  %8763 = vmatpush3.bf16.msra.mxu0 %v10198_v29  ;;  %v4344_v28 = vsub.s32 2, %v11432_v26  ;;  %v10203_v26 = vld [vmem:[%s13074_s5 + $0xb8] sm:$0xff]  }
 0x6be   :  { %8764 = vmatprep.subr.bf16.mxu0 %v10219_v46 }
 0x6c0   :  { %8648 = vmatpush3.bf16.msra.mxu1 %v10157_v30 }
 0x6c1   :  { %8649 = vmatprep.subr.bf16.mxu1 %v10158_v34  ;;  %8765 = vmatpush3.bf16.msra.mxu0 %v10199_v33  ;;  %v4345_v34 = vrot.slane %v4332_v4, %v4344_v28 }
 0x6c2   :  { %8766 = vmatprep.subr.bf16.mxu0 %v10219_v46 }
 0x6c4   :  { %8650 = vmatpush3.bf16.msra.mxu1 %v10159_v32 }
 0x6c5   :  { %8651 = vmatprep.subr.bf16.mxu1 %v10160_v3  ;;  %8767 = vmatpush3.bf16.msra.mxu0 %v10200_v20 }
 0x6c6   :  { %8768 = vmatprep.subr.bf16.mxu0 %v10219_v46 }
 0x6c8   :  { %8652 = vmatpush3.bf16.msra.mxu1 %v10161_v35 }
 0x6c9   :  { %8653 = vmatprep.subr.bf16.mxu1 %v10162_v36 }
 0x6cc   :  { %8654 = vmatpush3.bf16.msra.mxu1 %v10163_v37 }
 0x6cd   :  { %8683 = vmatprep.subr.bf16.mxu1 %v10164_v23  ;;  %v10201_v23 = vld [vmem:[%s13074_s5 + $0xa8] sm:$0xff]  }
 0x6ce   :  { %8769 = vmatpush3.bf16.msra.mxu0 %v10201_v23 }
 0x6cf   :  { %7255 = vmatmul.mubr.bf16.vlgmr.msra.gmra.mrb[16].mxu1 %v12427_v16  ;;  %v10170_v16 = vld [vmem:[%s13073_s3 + $0xb90] ss:$12 sps:$4 sm:$0xff]   ;;  %8770 = vmatprep.subr.bf16.mxu0 %v10219_v46 }
 0x6d0   :  { %8684 = vmatpush3.bf16.msra.mxu1 %v10165_v38  ;;  %7334 = vmatprep.mubr.bf16.mxu1 %v12530_v8  ;;  %v10171_v8 = vld [vmem:[%s13073_s3 + $0xad0] ss:$12 sps:$4 sm:$0xff]  }
 0x6d1   :  { %8685 = vmatprep.subr.bf16.mxu1 %v10166_v39  ;;  %v10202_v38 = vld [vmem:[%s13074_s5 + $0xb0] sm:$0xff]  }
 0x6d2   :  { %8771 = vmatpush3.bf16.msra.mxu0 %v10202_v38 }
 0x6d3   :  { %8772 = vmatprep.subr.bf16.mxu0 %v10219_v46 }
 0x6d4   :  { %8686 = vmatpush3.bf16.msra.mxu1 %v10167_v31 }
 0x6d5   :  { %8687 = vmatprep.subr.bf16.mxu1 %v10168_v41 }
 0x6d6   :  { %8773 = vmatpush3.bf16.msra.mxu0 %v10203_v26 }
 0x6d8   :  { %8688 = vmatpush3.bf16.msra.mxu1 %v10169_v42 }
 0x6d9   :  { %8689 = vmatprep.subr.bf16.mxu1 %v10170_v16 }
 0x6dc   :  { %8690 = vmatpush3.bf16.msra.mxu1 %v10171_v8 }
 0x6dd   :  { %8691 = vmatprep.subr.bf16.mxu1 %v10172_v44 }
 0x6e0   :  { %8692 = vmatpush3.bf16.msra.mxu1 %v10173_v47 }
 0x6e1   :  { %8693 = vmatprep.subr.bf16.mxu1 %v10174_v48 }
 0x6e4   :  { %8694 = vmatpush3.bf16.msra.mxu1 %v10175_v51 }
 0x6e5   :  { %8695 = vmatprep.subr.bf16.mxu1 %v10176_v52 }
 0x6e8   :  { %8696 = vmatpush3.bf16.msra.mxu1 %v10177_v5 }
 0x6e9   :  { %8697 = vmatprep.subr.bf16.mxu1 %v10178_v2 }
 0x6ec   :  { %8698 = vmatpush3.bf16.msra.mxu1 %v10179_v54 }
 0x6ed   :  { %8727 = vmatprep.subr.bf16.mxu1 %v10180_v53 }
 0x6ef   :  { %7335 = vmatmul.mubr.bf16.vlgmr.msra.gmra.mrb[20].mxu1 %v12627_v43  ;;  %v10186_v43 = vld [vmem:[%s13074_s5 + $0x58] sm:$0xff]  }
 0x6f0   :  { %8728 = vmatpush3.bf16.msra.mxu1 %v10181_v10 }
 0x6f1   :  { %8729 = vmatprep.subr.bf16.mxu1 %v10182_v55 }
 0x6f4   :  { %8730 = vmatpush3.bf16.msra.mxu1 %v10183_v56 }
 0x6f5   :  { %8731 = vmatprep.subr.bf16.mxu1 %v10184_v57 }
 0x6f8   :  { %8732 = vmatpush3.bf16.msra.mxu1 %v10185_v58 }
 0x6f9   :  { %8733 = vmatprep.subr.bf16.mxu1 %v10186_v43 }
 0x6fc   :  { %8734 = vmatpush3.bf16.msra.mxu1 %v10187_v59 }
 0x6fd   :  { %8735 = vmatprep.subr.bf16.mxu1 %v10188_v60 }
 0x700   :  { %8736 = vmatpush3.bf16.msra.mxu1 %v10189_v61 }
 0x701   :  { %8737 = vmatprep.subr.bf16.mxu1 %v10190_v63 }
 0x704   :  { %8738 = vmatpush3.bf16.msra.mxu1 %v10191_v9 }
 0x705   :  { %8739 = vmatprep.subr.bf16.mxu1 %v10192_v1 }
 0x708   :  { %8740 = vmatpush3.bf16.msra.mxu1 %v10193_v25 }
 0x709   :  { %8741 = vmatprep.subr.bf16.mxu1 %v10194_v50 }
 0x70c   :  { %8742 = vmatpush3.bf16.msra.mxu1 %v10195_v49 }
 0x722   :  { %v7015_v14 = vpop.f32.mrb[0].mxu1 }
 0x723   :  { %v8796_v15 = vadd.f32 %v7015_v14, %v4337_v7  ;;  %v7017_v17 = vpop.f32.mrb[1].mxu1 }
 0x724   :  { %v8797_v62 = vadd.f32 %v7017_v17, %v4341_v13  ;;  %v7019_v18 = vpop.f32.mrb[2].mxu1 }
 0x725   :  { %v7382_v19 = vmax.f32 %v8796_v15, 0.0  ;;  %v7020_v21 = vpop.f32.mrb[3].mxu1 }
 0x726   :  { %v7383_v11 = vmax.f32 %v8797_v62, 0.0 }
 0x727   :  { %v7385_v6 = vpack.c.bf16 %v7382_v19, %v7382_v19 }
 0x728   :  { %v7386_v24 = vpack.c.bf16 %v7383_v11, %v7383_v11 }
 0x72a   :  { %7619 = vmatprep.mubr.bf16.mxu1 %v7386_v24 }
 0x72b   :  { %7620 = vmatmul.mubr.bf16.vlgmr.msra.gmra.mrb[24].mxu1 %v7385_v6 }
 0x742   :  { %v8545_v30 = vpop.f32.mrb[4].mxu1 }
 0x743   :  { %v8546_v32 = vpop.f32.mrb[5].mxu1 }
 0x744   :  { %v8547_v3 = vadd.f32 %v8546_v32, %v8545_v30  ;;  %v8548_v35 = vpop.f32.mrb[6].mxu1 }
 0x745   :  { %v8549_v36 = vpop.f32.mrb[7].mxu1 }
 0x746   :  { %v7057_v37 = vadd.f32 %v8547_v3, %v4345_v34 }
 0x762   :  { %v8567_v39 = vpop.f32.mrb[8].mxu1 }
 0x763   :  { %v8568_v31 = vpop.f32.mrb[9].mxu1 }
 0x764   :  { %v8569_v41 = vadd.f32 %v8568_v31, %v8567_v39  ;;  %v8570_v42 = vpop.f32.mrb[10].mxu1 }
 0x765   :  { %v8571_v16 = vpop.f32.mrb[11].mxu1 }
 0x766   :  { %v7097_v8 = vadd.f32 %v8569_v41, %v7057_v37 }
 0x768   :  { %v7137_v44 = vadd.f32 %v12259_v45, %v7097_v8 }
 0x782   :  { %v8611_v47 = vpop.f32.mrb[12].mxu1 }
 0x783   :  { %v8612_v48 = vpop.f32.mrb[13].mxu1 }
 0x784   :  { %v8613_v51 = vadd.f32 %v8612_v48, %v8611_v47  ;;  %v8614_v52 = vpop.f32.mrb[14].mxu1 }
 0x785   :  { %v8615_v5 = vpop.f32.mrb[15].mxu1 }
 0x786   :  { %v7177_v2 = vadd.f32 %v8613_v51, %v7137_v44 }
 0x788   :  { %v7217_v54 = vadd.f32 %v12309_v12, %v7177_v2 }
 0x7a2   :  { %v8655_v53 = vpop.f32.mrb[16].mxu1 }
 0x7a3   :  { %v8656_v10 = vpop.f32.mrb[17].mxu1 }
 0x7a4   :  { %v8657_v46 = vadd.f32 %v8656_v10, %v8655_v53  ;;  %v8658_v55 = vpop.f32.mrb[18].mxu1 }
 0x7a5   :  { %v8659_v56 = vpop.f32.mrb[19].mxu1 }
 0x7a6   :  { %v7257_v57 = vadd.f32 %v8657_v46, %v7217_v54 }
 0x7a8   :  { %v7297_v58 = vadd.f32 %v12363_v40, %v7257_v57  ;;  %v8504_v40 = vld [vmem:[%s13076_s6] ss:$0 sm:$0xff] }
 0x7c2   :  { %v8699_v43 = vpop.f32.mrb[20].mxu1 }
 0x7c3   :  { %v8700_v59 = vpop.f32.mrb[21].mxu1 }
 0x7c4   :  { %v8701_v60 = vadd.f32 %v8700_v59, %v8699_v43  ;;  %v8702_v45 = vpop.f32.mrb[22].mxu1 }
 0x7c5   :  { %v8703_v61 = vpop.f32.mrb[23].mxu1 }
 0x7c6   :  { %v7337_v63 = vadd.f32 %v8701_v60, %v7297_v58 }
 0x7c8   :  { %v7377_v9 = vadd.f32 %v12413_v0, %v7337_v63 }
 0x7ca   :  { %v7384_v1 = vmax.f32 %v7377_v9, 0.0 }
 0x7cc   :  { %v7387_v25 = vpack.c.bf16 %v7384_v1, %v7384_v1 }
 0x7ce   :  { %8775 = vmatmul.mubr.bf16.vlgmr.msra.gmra.mrb[36].mxu0 %v7387_v25 }
 0x7fe   :  { %v8743_v12 = vpop.f32.mrb[24].mxu1 }
 0x7ff   :  { %v8744_v50 = vpop.f32.mrb[25].mxu1 }
 0x800   :  { %v8745_v49 = vadd.f32 %v8744_v50, %v8743_v12  ;;  %v8746_v4 = vpop.f32.mrb[26].mxu1 }
 0x801   :  { %v8747_v7 = vpop.f32.mrb[27].mxu1 }
 0x802   :  { %v7622_v13 = vadd.f32 %v8745_v49, %v8504_v40 }
 0x8a1   :  { %v7661_v14 = vpop.f32.mrb[36].mxu0 }
 0x8a2   :  { %v7662_v15 = vadd.f32 %v7661_v14, %v7622_v13  ;;  %v8776_v17 = vpop.f32.mrb[37].mxu0 }
 0x8a3   :  { %v7664_v62 = vpop.f32.mrb[38].mxu0 }
 0x8a4   :  { %v7667_v18 = vmax.f32 %v7662_v15, 0.0  ;;  %v8777_v19 = vpop.f32.mrb[39].mxu0 }
 0x8a6   :  { %7668 = vst [vmem:[%s13077_s7] sm:$0xff] %v7667_v18 }

</bundles_post_ra>
